<compile_context>
chip_gen: v7x
topology: tpu7x:2x2x1
jax: 0.10.0
libtpu: 0.0.40
codegen_flags: <defaults>
</compile_context>

<pallas_src>
import jax
import jax.numpy as jnp
from jax import lax
from jax.experimental import pallas as pl
from jax.experimental.pallas import tpu as pltpu

# ---------------- problem sizes implied by the module ----------------
IN_H = IN_W = 28          # 28 - 5 + 1 = 24 -> pool 2 -> 12, matches 32*12*12
KH = KW = 5
POOL_OUT = 12
C_OUT = 32
N_SPATIAL = POOL_OUT * POOL_OUT        # 144
N_TAPS = KH * KW                       # 25
TAPS_PAD = 32                          # taps zero-padded 25 -> 32
FC1_IN = C_OUT * N_SPATIAL             # 4608 = 36 * 128 (lane dense)
FC1_OUT = 64
FC1_PAD = 128                          # fc1 features zero-padded 64 -> 128
FC2_OUT = 10

CONV_TILE = 16                         # samples per conv grid step
MXU_DTYPE = jnp.bfloat16               # matmul operand dtype (f32 accumulation)


# ---------------- Pallas kernels ----------------
def conv_relu_pool_kernel(p_ref, w_ref, b_ref, o_ref):
    """Conv (as matmul) + 2x2 maxpool + bias + ReLU for one batch tile.

    p_ref: (T, 4*144, 32) bf16 im2col patches; rows ordered (pool_offset, i, j),
           tap axis zero-padded 25 -> 32.
    w_ref: (32, 32) bf16 conv weight, (tap, out_channel); rows 25..31 are zero.
    b_ref: (1, 32)  f32 conv bias.
    o_ref: (T, 32, 144) bf16 pooled features, per sample channel-major
           (c, i*12 + j): the row-major flatten equals PyTorch view(-1, 4608).
    """
    tile = o_ref.shape[0]
    w = w_ref[...]

    # One matmul per 2x2 pool offset; the max-pool is an elementwise max of the
    # four slabs.  Bias + ReLU commute with max, so apply them once afterwards.
    def slab(pp):
        p = p_ref[:, pl.ds(pp * N_SPATIAL, N_SPATIAL), :]          # (T, 144, 32)
        p = p.reshape(tile * N_SPATIAL, TAPS_PAD)
        return jnp.dot(p, w, preferred_element_type=jnp.float32)   # (T*144, 32)

    m = jnp.maximum(jnp.maximum(slab(0), slab(1)),
                    jnp.maximum(slab(2), slab(3)))                  # f32
    pooled = jnp.maximum(m + b_ref[...], 0.0)                       # bias + ReLU
    pooled = pooled.reshape(tile, N_SPATIAL, C_OUT)

    # Per-sample (144, 32) -> (32, 144) transpose on the XLU so the HBM store
    # is channel-major and the wrapper-side flatten to (N, 4608) is free.
    for i in range(tile):
        o_ref[i] = pooled[i].T.astype(o_ref.dtype)


def mlp_kernel(x_ref, w1_ref, b1_ref, w2_ref, b2_ref, o_ref):
    """fc1 (bf16 x bf16 -> f32) -> ReLU -> fc2 (f32) for one batch tile."""
    h = jnp.dot(x_ref[...], w1_ref[...], preferred_element_type=jnp.float32)
    h = jnp.maximum(h + b1_ref[...], 0.0)                           # (T, 128) f32
    o = jnp.dot(h, w2_ref[...], preferred_element_type=jnp.float32)
    o_ref[...] = o + b2_ref[...]                                    # (T, 10)


# ---------------- JAX glue ----------------
def im2col_pooled_order(x):
    """x: (N, 1, 28, 28) -> patches (N, 4*144, 25).

    patches[n, pp*144 + i*12 + j, di*5 + dj] = x[n, 0, 2i + pi + di, 2j + pj + dj]
    with pp = pi*2 + pj the 2x2 pool-window offset.
    """
    n = x.shape[0]
    blocks = []
    for pp in range(4):
        pi, pj = pp // 2, pp % 2
        taps = []
        for di in range(KH):
            for dj in range(KW):
                sl = x[:, 0,
                       pi + di: pi + di + 2 * POOL_OUT: 2,
                       pj + dj: pj + dj + 2 * POOL_OUT: 2]          # (N, 12, 12)
                taps.append(sl.reshape(n, N_SPATIAL))
        blocks.append(jnp.stack(taps, axis=-1))                     # (N, 144, 25)
    return jnp.concatenate(blocks, axis=1)                          # (N, 576, 25)


def _round_up(x, m):
    return (x + m - 1) // m * m


def _pick_batch_tile(n_padded, cap):
    """Largest multiple-of-16 tile <= cap dividing n_padded with >= 2 grid steps
    (keeps both v7x TensorCores busy); single step only for tiny batches."""
    t = min(cap, n_padded)
    while t >= 16:
        if n_padded % t == 0 and n_padded // t >= 2:
            return t
        t -= 16
    return min(cap, n_padded)


def net_forward(x, params):
    """x: (N, 1, 28, 28) float32 -> logits (N, 10) float32."""
    w_conv, b_conv, w1, b1, w2, b2 = params
    n = x.shape[0]
    n_pad = _round_up(n, CONV_TILE)
    if n_pad != n:
        x = jnp.pad(x, ((0, n_pad - n), (0, 0), (0, 0), (0, 0)))

    # ---- operand prep: bf16 matmul operands, zero-padded to friendly shapes ----
    # conv weight (32,1,5,5) -> tap-major (25,32) -> zero-pad taps to 32
    w_mat = jnp.pad(w_conv.reshape(C_OUT, N_TAPS).T,
                    ((0, TAPS_PAD - N_TAPS), (0, 0))).astype(MXU_DTYPE)
    # TODO(synk): im2col still runs in XLA; building patches in-kernel from the
    # raw (T,1,28,28) block would cut conv input HBM traffic a further ~12x.
    patches = jnp.pad(im2col_pooled_order(x),
                      ((0, 0), (0, 0), (0, TAPS_PAD - N_TAPS))).astype(MXU_DTYPE)
    # fc1 padded 64 -> 128 output features (exact: ReLU(0)=0 and the matching
    # zero rows of w2 contribute nothing); fc2 stays f32 (tiny).
    w1_p = jnp.pad(w1, ((0, 0), (0, FC1_PAD - FC1_OUT))).astype(MXU_DTYPE)
    b1_p = jnp.pad(b1, (0, FC1_PAD - FC1_OUT)).reshape(1, FC1_PAD)
    w2_p = jnp.pad(w2, ((0, FC1_PAD - FC1_OUT), (0, 0)))
    b2_p = b2.reshape(1, FC2_OUT)
    b_conv_p = b_conv.reshape(1, C_OUT)

    # ---- kernel 1: conv + bias + ReLU + 2x2 maxpool, channel-major bf16 out ----
    feats = pl.pallas_call(
        conv_relu_pool_kernel,
        out_shape=jax.ShapeDtypeStruct((n_pad, C_OUT, N_SPATIAL), MXU_DTYPE),
        grid=(n_pad // CONV_TILE,),
        in_specs=[
            pl.BlockSpec((CONV_TILE, 4 * N_SPATIAL, TAPS_PAD), lambda i: (i, 0, 0)),
            pl.BlockSpec((TAPS_PAD, C_OUT), lambda i: (0, 0)),   # resident weight
            pl.BlockSpec((1, C_OUT), lambda i: (0, 0)),          # resident bias
        ],
        out_specs=pl.BlockSpec((CONV_TILE, C_OUT, N_SPATIAL), lambda i: (i, 0, 0)),
        compiler_params=pltpu.CompilerParams(
            dimension_semantics=("parallel",)),
    )(patches, w_mat, b_conv_p)

    # (N, 32, 144) -> (N, 4608) is a pure row-major collapse (no data movement)
    # and reproduces PyTorch's view(-1, 32*12*12) channel-major order exactly.
    x_flat = feats.reshape(n_pad, FC1_IN)

    # ---- kernel 2: fc1 -> ReLU -> fc2, batch-tiled, weights resident ----
    mlp_tile = _pick_batch_tile(n_pad, cap=128)
    logits = pl.pallas_call(
        mlp_kernel,
        out_shape=jax.ShapeDtypeStruct((n_pad, FC2_OUT), jnp.float32),
        grid=(n_pad // mlp_tile,),
        in_specs=[
            pl.BlockSpec((mlp_tile, FC1_IN), lambda i: (i, 0)),  # 4608 = 36*128
            pl.BlockSpec((FC1_IN, FC1_PAD), lambda i: (0, 0)),   # resident w1
            pl.BlockSpec((1, FC1_PAD), lambda i: (0, 0)),
            pl.BlockSpec((FC1_PAD, FC2_OUT), lambda i: (0, 0)),
            pl.BlockSpec((1, FC2_OUT), lambda i: (0, 0)),
        ],
        out_specs=pl.BlockSpec((mlp_tile, FC2_OUT), lambda i: (i, 0)),
        compiler_params=pltpu.CompilerParams(
            dimension_semantics=("parallel",)),
    )(x_flat, w1_p, b1_p, w2_p, b2_p)

    return logits[:n]


# ---------------- deterministic parameter init (PyTorch-style bounds) ----------------
def init_params(key):
    ks = jax.random.split(key, 6)
    bc = 1.0 / jnp.sqrt(1.0 * KH * KW)          # conv fan_in = 25
    b1 = 1.0 / jnp.sqrt(float(FC1_IN))
    b2 = 1.0 / jnp.sqrt(float(FC1_OUT))
    w_conv = jax.random.uniform(ks[0], (C_OUT, 1, KH, KW), jnp.float32, -bc, bc)
    b_conv = jax.random.uniform(ks[1], (C_OUT,), jnp.float32, -bc, bc)
    w1 = jax.random.uniform(ks[2], (FC1_IN, FC1_OUT), jnp.float32, -b1, b1)
    b1v = jax.random.uniform(ks[3], (FC1_OUT,), jnp.float32, -b1, b1)
    w2 = jax.random.uniform(ks[4], (FC1_OUT, FC2_OUT), jnp.float32, -b2, b2)
    b2v = jax.random.uniform(ks[5], (FC2_OUT,), jnp.float32, -b2, b2)
    return (w_conv, b_conv, w1, b1v, w2, b2v)


# ---------------- pure-JAX f32 reference (for correctness check) ----------------
def reference_forward(x, params):
    w_conv, b_conv, w1, b1, w2, b2 = params
    y = lax.conv_general_dilated(
        x, w_conv, window_strides=(1, 1), padding="VALID",
        dimension_numbers=("NCHW", "OIHW", "NCHW"))
    y = jnp.maximum(y + b_conv.reshape(1, C_OUT, 1, 1), 0.0)
    y = lax.reduce_window(y, -jnp.inf, lax.max,
                          (1, 1, 2, 2), (1, 1, 2, 2), "VALID")
    y = y.reshape(x.shape[0], -1)
    h = jnp.maximum(y @ w1 + b1, 0.0)
    return h @ w2 + b2


if __name__ == "__main__":
    key = jax.random.PRNGKey(0)
    k_param, k_x = jax.random.split(key)
    params = init_params(k_param)

    batch = 32   # 2 conv grid steps (tile 16) and 2 MLP grid steps (tile 16)
    x = jax.random.normal(k_x, (batch, 1, IN_H, IN_W), jnp.float32)

    out = jax.jit(net_forward)(x, params)
    out = jax.block_until_ready(out)

    ref = reference_forward(x, params)
    assert out.shape == (batch, FC2_OUT)
    # bf16 MXU operands with f32 accumulation (per perf guidance): expected
    # logit error is a few 1e-3; tolerance still catches any layout bug.
    assert jnp.allclose(out, ref, rtol=2e-2, atol=2e-2), "mismatch vs JAX reference"

    print("KERNEL_OK")
</pallas_src>

<mosaic_0001>
module attributes {stable_mosaic.version = 11 : i64} {
  func.func @conv_relu_pool_kernel(%arg0: i32, %arg1: memref<16x576x32xbf16, #tpu.memory_space<vmem>>, %arg2: memref<32x32xbf16, #tpu.memory_space<vmem>>, %arg3: memref<1x32xf32, #tpu.memory_space<vmem>>, %arg4: memref<16x32x144xbf16, #tpu.memory_space<vmem>>) attributes {dimension_semantics = [#tpu.dimension_semantics<parallel>], iteration_bounds = array<i64: 2>, scalar_prefetch = 0 : i64, scratch_operands = 0 : i64, tpu.core_type = #tpu.core_type<tc>, window_params = [{transform_indices = @transform_0, window_bounds = array<i64: 16, 576, 32>}, {pipeline_mode = #tpu.pipeline_mode<synchronous>, transform_indices = @transform_1, window_bounds = array<i64: 32, 32>}, {pipeline_mode = #tpu.pipeline_mode<synchronous>, transform_indices = @transform_2, window_bounds = array<i64: 1, 32>}, {transform_indices = @transform_3, window_bounds = array<i64: 16, 32, 144>}]} {
    %c0 = arith.constant 0 : index
    %c0_0 = arith.constant 0 : index
    %0 = vector.load %arg2[%c0, %c0_0] : memref<32x32xbf16, #tpu.memory_space<vmem>>, vector<32x32xbf16>
    %c0_1 = arith.constant 0 : index
    %c0_2 = arith.constant 0 : index
    %c0_3 = arith.constant 0 : index
    %1 = vector.load %arg1[%c0_1, %c0_2, %c0_3] : memref<16x576x32xbf16, #tpu.memory_space<vmem>>, vector<16x144x32xbf16>
    %2 = vector.shape_cast %1 : vector<16x144x32xbf16> to vector<2304x32xbf16>
    %cst = arith.constant dense<0.000000e+00> : vector<2304x32xf32>
    %3 = tpu.matmul %2, %0, %cst {dimension_numbers = #tpu.dot_dimension_numbers<[1], [0], [0], [1], [0, 0, 1, 1], [], []>} : vector<2304x32xbf16>, vector<32x32xbf16>, vector<2304x32xf32> -> vector<2304x32xf32>
    %c0_4 = arith.constant 0 : index
    %c144 = arith.constant 144 : index
    %c0_5 = arith.constant 0 : index
    %4 = vector.load %arg1[%c0_4, %c144, %c0_5] : memref<16x576x32xbf16, #tpu.memory_space<vmem>>, vector<16x144x32xbf16>
    %5 = vector.shape_cast %4 : vector<16x144x32xbf16> to vector<2304x32xbf16>
    %cst_6 = arith.constant dense<0.000000e+00> : vector<2304x32xf32>
    %6 = tpu.matmul %5, %0, %cst_6 {dimension_numbers = #tpu.dot_dimension_numbers<[1], [0], [0], [1], [0, 0, 1, 1], [], []>} : vector<2304x32xbf16>, vector<32x32xbf16>, vector<2304x32xf32> -> vector<2304x32xf32>
    %7 = arith.maximumf %3, %6 : vector<2304x32xf32>
    %c0_7 = arith.constant 0 : index
    %c288 = arith.constant 288 : index
    %c0_8 = arith.constant 0 : index
    %8 = vector.load %arg1[%c0_7, %c288, %c0_8] : memref<16x576x32xbf16, #tpu.memory_space<vmem>>, vector<16x144x32xbf16>
    %9 = vector.shape_cast %8 : vector<16x144x32xbf16> to vector<2304x32xbf16>
    %cst_9 = arith.constant dense<0.000000e+00> : vector<2304x32xf32>
    %10 = tpu.matmul %9, %0, %cst_9 {dimension_numbers = #tpu.dot_dimension_numbers<[1], [0], [0], [1], [0, 0, 1, 1], [], []>} : vector<2304x32xbf16>, vector<32x32xbf16>, vector<2304x32xf32> -> vector<2304x32xf32>
    %c0_10 = arith.constant 0 : index
    %c432 = arith.constant 432 : index
    %c0_11 = arith.constant 0 : index
    %11 = vector.load %arg1[%c0_10, %c432, %c0_11] : memref<16x576x32xbf16, #tpu.memory_space<vmem>>, vector<16x144x32xbf16>
    %12 = vector.shape_cast %11 : vector<16x144x32xbf16> to vector<2304x32xbf16>
    %cst_12 = arith.constant dense<0.000000e+00> : vector<2304x32xf32>
    %13 = tpu.matmul %12, %0, %cst_12 {dimension_numbers = #tpu.dot_dimension_numbers<[1], [0], [0], [1], [0, 0, 1, 1], [], []>} : vector<2304x32xbf16>, vector<32x32xbf16>, vector<2304x32xf32> -> vector<2304x32xf32>
    %14 = arith.maximumf %10, %13 : vector<2304x32xf32>
    %15 = arith.maximumf %7, %14 : vector<2304x32xf32>
    %c0_13 = arith.constant 0 : index
    %c0_14 = arith.constant 0 : index
    %16 = vector.load %arg3[%c0_13, %c0_14] : memref<1x32xf32, #tpu.memory_space<vmem>>, vector<1x32xf32>
    %17 = vector.broadcast %16 : vector<1x32xf32> to vector<2304x32xf32>
    %18 = arith.addf %15, %17 : vector<2304x32xf32>
    %cst_15 = arith.constant 0.000000e+00 : f32
    %19 = vector.broadcast %cst_15 : f32 to vector<2304x32xf32>
    %20 = arith.maximumf %18, %19 : vector<2304x32xf32>
    %21 = vector.shape_cast %20 : vector<2304x32xf32> to vector<16x144x32xf32>
    %22 = vector.extract_strided_slice %21 {offsets = [0, 0, 0], sizes = [1, 144, 32], strides = [1, 1, 1]} : vector<16x144x32xf32> to vector<1x144x32xf32>
    %23 = vector.shape_cast %22 : vector<1x144x32xf32> to vector<144x32xf32>
    %24 = tpu.transpose %23, [1, 0] : vector<144x32xf32> -> vector<32x144xf32>
    %25 = arith.truncf %24 : vector<32x144xf32> to vector<32x144xbf16>
    %c0_16 = arith.constant 0 : index
    %c0_17 = arith.constant 0 : index
    %c0_18 = arith.constant 0 : index
    %26 = vector.load %arg4[%c0_16, %c0_17, %c0_18] : memref<16x32x144xbf16, #tpu.memory_space<vmem>>, vector<1x32x144xbf16>
    %27 = vector.shape_cast %26 : vector<1x32x144xbf16> to vector<32x144xbf16>
    %28 = vector.shape_cast %25 : vector<32x144xbf16> to vector<1x32x144xbf16>
    tpu.vector_store %arg4[%c0_16, %c0_17, %c0_18], %28 {strides = array<i32>} : memref<16x32x144xbf16, #tpu.memory_space<vmem>>, vector<1x32x144xbf16>,
    %29 = vector.extract_strided_slice %21 {offsets = [1, 0, 0], sizes = [1, 144, 32], strides = [1, 1, 1]} : vector<16x144x32xf32> to vector<1x144x32xf32>
    %30 = vector.shape_cast %29 : vector<1x144x32xf32> to vector<144x32xf32>
    %31 = tpu.transpose %30, [1, 0] : vector<144x32xf32> -> vector<32x144xf32>
    %32 = arith.truncf %31 : vector<32x144xf32> to vector<32x144xbf16>
    %c1 = arith.constant 1 : index
    %c0_19 = arith.constant 0 : index
    %c0_20 = arith.constant 0 : index
    %33 = vector.load %arg4[%c1, %c0_19, %c0_20] : memref<16x32x144xbf16, #tpu.memory_space<vmem>>, vector<1x32x144xbf16>
    %34 = vector.shape_cast %33 : vector<1x32x144xbf16> to vector<32x144xbf16>
    %35 = vector.shape_cast %32 : vector<32x144xbf16> to vector<1x32x144xbf16>
    tpu.vector_store %arg4[%c1, %c0_19, %c0_20], %35 {strides = array<i32>} : memref<16x32x144xbf16, #tpu.memory_space<vmem>>, vector<1x32x144xbf16>,
    %36 = vector.extract_strided_slice %21 {offsets = [2, 0, 0], sizes = [1, 144, 32], strides = [1, 1, 1]} : vector<16x144x32xf32> to vector<1x144x32xf32>
    %37 = vector.shape_cast %36 : vector<1x144x32xf32> to vector<144x32xf32>
    %38 = tpu.transpose %37, [1, 0] : vector<144x32xf32> -> vector<32x144xf32>
    %39 = arith.truncf %38 : vector<32x144xf32> to vector<32x144xbf16>
    %c2 = arith.constant 2 : index
    %c0_21 = arith.constant 0 : index
    %c0_22 = arith.constant 0 : index
    %40 = vector.load %arg4[%c2, %c0_21, %c0_22] : memref<16x32x144xbf16, #tpu.memory_space<vmem>>, vector<1x32x144xbf16>
    %41 = vector.shape_cast %40 : vector<1x32x144xbf16> to vector<32x144xbf16>
    %42 = vector.shape_cast %39 : vector<32x144xbf16> to vector<1x32x144xbf16>
    tpu.vector_store %arg4[%c2, %c0_21, %c0_22], %42 {strides = array<i32>} : memref<16x32x144xbf16, #tpu.memory_space<vmem>>, vector<1x32x144xbf16>,
    %43 = vector.extract_strided_slice %21 {offsets = [3, 0, 0], sizes = [1, 144, 32], strides = [1, 1, 1]} : vector<16x144x32xf32> to vector<1x144x32xf32>
    %44 = vector.shape_cast %43 : vector<1x144x32xf32> to vector<144x32xf32>
    %45 = tpu.transpose %44, [1, 0] : vector<144x32xf32> -> vector<32x144xf32>
    %46 = arith.truncf %45 : vector<32x144xf32> to vector<32x144xbf16>
    %c3 = arith.constant 3 : index
    %c0_23 = arith.constant 0 : index
    %c0_24 = arith.constant 0 : index
    %47 = vector.load %arg4[%c3, %c0_23, %c0_24] : memref<16x32x144xbf16, #tpu.memory_space<vmem>>, vector<1x32x144xbf16>
    %48 = vector.shape_cast %47 : vector<1x32x144xbf16> to vector<32x144xbf16>
    %49 = vector.shape_cast %46 : vector<32x144xbf16> to vector<1x32x144xbf16>
    tpu.vector_store %arg4[%c3, %c0_23, %c0_24], %49 {strides = array<i32>} : memref<16x32x144xbf16, #tpu.memory_space<vmem>>, vector<1x32x144xbf16>,
    %50 = vector.extract_strided_slice %21 {offsets = [4, 0, 0], sizes = [1, 144, 32], strides = [1, 1, 1]} : vector<16x144x32xf32> to vector<1x144x32xf32>
    %51 = vector.shape_cast %50 : vector<1x144x32xf32> to vector<144x32xf32>
    %52 = tpu.transpose %51, [1, 0] : vector<144x32xf32> -> vector<32x144xf32>
    %53 = arith.truncf %52 : vector<32x144xf32> to vector<32x144xbf16>
    %c4 = arith.constant 4 : index
    %c0_25 = arith.constant 0 : index
    %c0_26 = arith.constant 0 : index
    %54 = vector.load %arg4[%c4, %c0_25, %c0_26] : memref<16x32x144xbf16, #tpu.memory_space<vmem>>, vector<1x32x144xbf16>
    %55 = vector.shape_cast %54 : vector<1x32x144xbf16> to vector<32x144xbf16>
    %56 = vector.shape_cast %53 : vector<32x144xbf16> to vector<1x32x144xbf16>
    tpu.vector_store %arg4[%c4, %c0_25, %c0_26], %56 {strides = array<i32>} : memref<16x32x144xbf16, #tpu.memory_space<vmem>>, vector<1x32x144xbf16>,
    %57 = vector.extract_strided_slice %21 {offsets = [5, 0, 0], sizes = [1, 144, 32], strides = [1, 1, 1]} : vector<16x144x32xf32> to vector<1x144x32xf32>
    %58 = vector.shape_cast %57 : vector<1x144x32xf32> to vector<144x32xf32>
    %59 = tpu.transpose %58, [1, 0] : vector<144x32xf32> -> vector<32x144xf32>
    %60 = arith.truncf %59 : vector<32x144xf32> to vector<32x144xbf16>
    %c5 = arith.constant 5 : index
    %c0_27 = arith.constant 0 : index
    %c0_28 = arith.constant 0 : index
    %61 = vector.load %arg4[%c5, %c0_27, %c0_28] : memref<16x32x144xbf16, #tpu.memory_space<vmem>>, vector<1x32x144xbf16>
    %62 = vector.shape_cast %61 : vector<1x32x144xbf16> to vector<32x144xbf16>
    %63 = vector.shape_cast %60 : vector<32x144xbf16> to vector<1x32x144xbf16>
    tpu.vector_store %arg4[%c5, %c0_27, %c0_28], %63 {strides = array<i32>} : memref<16x32x144xbf16, #tpu.memory_space<vmem>>, vector<1x32x144xbf16>,
    %64 = vector.extract_strided_slice %21 {offsets = [6, 0, 0], sizes = [1, 144, 32], strides = [1, 1, 1]} : vector<16x144x32xf32> to vector<1x144x32xf32>
    %65 = vector.shape_cast %64 : vector<1x144x32xf32> to vector<144x32xf32>
    %66 = tpu.transpose %65, [1, 0] : vector<144x32xf32> -> vector<32x144xf32>
    %67 = arith.truncf %66 : vector<32x144xf32> to vector<32x144xbf16>
    %c6 = arith.constant 6 : index
    %c0_29 = arith.constant 0 : index
    %c0_30 = arith.constant 0 : index
    %68 = vector.load %arg4[%c6, %c0_29, %c0_30] : memref<16x32x144xbf16, #tpu.memory_space<vmem>>, vector<1x32x144xbf16>
    %69 = vector.shape_cast %68 : vector<1x32x144xbf16> to vector<32x144xbf16>
    %70 = vector.shape_cast %67 : vector<32x144xbf16> to vector<1x32x144xbf16>
    tpu.vector_store %arg4[%c6, %c0_29, %c0_30], %70 {strides = array<i32>} : memref<16x32x144xbf16, #tpu.memory_space<vmem>>, vector<1x32x144xbf16>,
    %71 = vector.extract_strided_slice %21 {offsets = [7, 0, 0], sizes = [1, 144, 32], strides = [1, 1, 1]} : vector<16x144x32xf32> to vector<1x144x32xf32>
    %72 = vector.shape_cast %71 : vector<1x144x32xf32> to vector<144x32xf32>
    %73 = tpu.transpose %72, [1, 0] : vector<144x32xf32> -> vector<32x144xf32>
    %74 = arith.truncf %73 : vector<32x144xf32> to vector<32x144xbf16>
    %c7 = arith.constant 7 : index
    %c0_31 = arith.constant 0 : index
    %c0_32 = arith.constant 0 : index
    %75 = vector.load %arg4[%c7, %c0_31, %c0_32] : memref<16x32x144xbf16, #tpu.memory_space<vmem>>, vector<1x32x144xbf16>
    %76 = vector.shape_cast %75 : vector<1x32x144xbf16> to vector<32x144xbf16>
    %77 = vector.shape_cast %74 : vector<32x144xbf16> to vector<1x32x144xbf16>
    tpu.vector_store %arg4[%c7, %c0_31, %c0_32], %77 {strides = array<i32>} : memref<16x32x144xbf16, #tpu.memory_space<vmem>>, vector<1x32x144xbf16>,
    %78 = vector.extract_strided_slice %21 {offsets = [8, 0, 0], sizes = [1, 144, 32], strides = [1, 1, 1]} : vector<16x144x32xf32> to vector<1x144x32xf32>
    %79 = vector.shape_cast %78 : vector<1x144x32xf32> to vector<144x32xf32>
    %80 = tpu.transpose %79, [1, 0] : vector<144x32xf32> -> vector<32x144xf32>
    %81 = arith.truncf %80 : vector<32x144xf32> to vector<32x144xbf16>
    %c8 = arith.constant 8 : index
    %c0_33 = arith.constant 0 : index
    %c0_34 = arith.constant 0 : index
    %82 = vector.load %arg4[%c8, %c0_33, %c0_34] : memref<16x32x144xbf16, #tpu.memory_space<vmem>>, vector<1x32x144xbf16>
    %83 = vector.shape_cast %82 : vector<1x32x144xbf16> to vector<32x144xbf16>
    %84 = vector.shape_cast %81 : vector<32x144xbf16> to vector<1x32x144xbf16>
    tpu.vector_store %arg4[%c8, %c0_33, %c0_34], %84 {strides = array<i32>} : memref<16x32x144xbf16, #tpu.memory_space<vmem>>, vector<1x32x144xbf16>,
    %85 = vector.extract_strided_slice %21 {offsets = [9, 0, 0], sizes = [1, 144, 32], strides = [1, 1, 1]} : vector<16x144x32xf32> to vector<1x144x32xf32>
    %86 = vector.shape_cast %85 : vector<1x144x32xf32> to vector<144x32xf32>
    %87 = tpu.transpose %86, [1, 0] : vector<144x32xf32> -> vector<32x144xf32>
    %88 = arith.truncf %87 : vector<32x144xf32> to vector<32x144xbf16>
    %c9 = arith.constant 9 : index
    %c0_35 = arith.constant 0 : index
    %c0_36 = arith.constant 0 : index
    %89 = vector.load %arg4[%c9, %c0_35, %c0_36] : memref<16x32x144xbf16, #tpu.memory_space<vmem>>, vector<1x32x144xbf16>
    %90 = vector.shape_cast %89 : vector<1x32x144xbf16> to vector<32x144xbf16>
    %91 = vector.shape_cast %88 : vector<32x144xbf16> to vector<1x32x144xbf16>
    tpu.vector_store %arg4[%c9, %c0_35, %c0_36], %91 {strides = array<i32>} : memref<16x32x144xbf16, #tpu.memory_space<vmem>>, vector<1x32x144xbf16>,
    %92 = vector.extract_strided_slice %21 {offsets = [10, 0, 0], sizes = [1, 144, 32], strides = [1, 1, 1]} : vector<16x144x32xf32> to vector<1x144x32xf32>
    %93 = vector.shape_cast %92 : vector<1x144x32xf32> to vector<144x32xf32>
    %94 = tpu.transpose %93, [1, 0] : vector<144x32xf32> -> vector<32x144xf32>
    %95 = arith.truncf %94 : vector<32x144xf32> to vector<32x144xbf16>
    %c10 = arith.constant 10 : index
    %c0_37 = arith.constant 0 : index
    %c0_38 = arith.constant 0 : index
    %96 = vector.load %arg4[%c10, %c0_37, %c0_38] : memref<16x32x144xbf16, #tpu.memory_space<vmem>>, vector<1x32x144xbf16>
    %97 = vector.shape_cast %96 : vector<1x32x144xbf16> to vector<32x144xbf16>
    %98 = vector.shape_cast %95 : vector<32x144xbf16> to vector<1x32x144xbf16>
    tpu.vector_store %arg4[%c10, %c0_37, %c0_38], %98 {strides = array<i32>} : memref<16x32x144xbf16, #tpu.memory_space<vmem>>, vector<1x32x144xbf16>,
    %99 = vector.extract_strided_slice %21 {offsets = [11, 0, 0], sizes = [1, 144, 32], strides = [1, 1, 1]} : vector<16x144x32xf32> to vector<1x144x32xf32>
    %100 = vector.shape_cast %99 : vector<1x144x32xf32> to vector<144x32xf32>
    %101 = tpu.transpose %100, [1, 0] : vector<144x32xf32> -> vector<32x144xf32>
    %102 = arith.truncf %101 : vector<32x144xf32> to vector<32x144xbf16>
    %c11 = arith.constant 11 : index
    %c0_39 = arith.constant 0 : index
    %c0_40 = arith.constant 0 : index
    %103 = vector.load %arg4[%c11, %c0_39, %c0_40] : memref<16x32x144xbf16, #tpu.memory_space<vmem>>, vector<1x32x144xbf16>
    %104 = vector.shape_cast %103 : vector<1x32x144xbf16> to vector<32x144xbf16>
    %105 = vector.shape_cast %102 : vector<32x144xbf16> to vector<1x32x144xbf16>
    tpu.vector_store %arg4[%c11, %c0_39, %c0_40], %105 {strides = array<i32>} : memref<16x32x144xbf16, #tpu.memory_space<vmem>>, vector<1x32x144xbf16>,
    %106 = vector.extract_strided_slice %21 {offsets = [12, 0, 0], sizes = [1, 144, 32], strides = [1, 1, 1]} : vector<16x144x32xf32> to vector<1x144x32xf32>
    %107 = vector.shape_cast %106 : vector<1x144x32xf32> to vector<144x32xf32>
    %108 = tpu.transpose %107, [1, 0] : vector<144x32xf32> -> vector<32x144xf32>
    %109 = arith.truncf %108 : vector<32x144xf32> to vector<32x144xbf16>
    %c12 = arith.constant 12 : index
    %c0_41 = arith.constant 0 : index
    %c0_42 = arith.constant 0 : index
    %110 = vector.load %arg4[%c12, %c0_41, %c0_42] : memref<16x32x144xbf16, #tpu.memory_space<vmem>>, vector<1x32x144xbf16>
    %111 = vector.shape_cast %110 : vector<1x32x144xbf16> to vector<32x144xbf16>
    %112 = vector.shape_cast %109 : vector<32x144xbf16> to vector<1x32x144xbf16>
    tpu.vector_store %arg4[%c12, %c0_41, %c0_42], %112 {strides = array<i32>} : memref<16x32x144xbf16, #tpu.memory_space<vmem>>, vector<1x32x144xbf16>,
    %113 = vector.extract_strided_slice %21 {offsets = [13, 0, 0], sizes = [1, 144, 32], strides = [1, 1, 1]} : vector<16x144x32xf32> to vector<1x144x32xf32>
    %114 = vector.shape_cast %113 : vector<1x144x32xf32> to vector<144x32xf32>
    %115 = tpu.transpose %114, [1, 0] : vector<144x32xf32> -> vector<32x144xf32>
    %116 = arith.truncf %115 : vector<32x144xf32> to vector<32x144xbf16>
    %c13 = arith.constant 13 : index
    %c0_43 = arith.constant 0 : index
    %c0_44 = arith.constant 0 : index
    %117 = vector.load %arg4[%c13, %c0_43, %c0_44] : memref<16x32x144xbf16, #tpu.memory_space<vmem>>, vector<1x32x144xbf16>
    %118 = vector.shape_cast %117 : vector<1x32x144xbf16> to vector<32x144xbf16>
    %119 = vector.shape_cast %116 : vector<32x144xbf16> to vector<1x32x144xbf16>
    tpu.vector_store %arg4[%c13, %c0_43, %c0_44], %119 {strides = array<i32>} : memref<16x32x144xbf16, #tpu.memory_space<vmem>>, vector<1x32x144xbf16>,
    %120 = vector.extract_strided_slice %21 {offsets = [14, 0, 0], sizes = [1, 144, 32], strides = [1, 1, 1]} : vector<16x144x32xf32> to vector<1x144x32xf32>
    %121 = vector.shape_cast %120 : vector<1x144x32xf32> to vector<144x32xf32>
    %122 = tpu.transpose %121, [1, 0] : vector<144x32xf32> -> vector<32x144xf32>
    %123 = arith.truncf %122 : vector<32x144xf32> to vector<32x144xbf16>
    %c14 = arith.constant 14 : index
    %c0_45 = arith.constant 0 : index
    %c0_46 = arith.constant 0 : index
    %124 = vector.load %arg4[%c14, %c0_45, %c0_46] : memref<16x32x144xbf16, #tpu.memory_space<vmem>>, vector<1x32x144xbf16>
    %125 = vector.shape_cast %124 : vector<1x32x144xbf16> to vector<32x144xbf16>
    %126 = vector.shape_cast %123 : vector<32x144xbf16> to vector<1x32x144xbf16>
    tpu.vector_store %arg4[%c14, %c0_45, %c0_46], %126 {strides = array<i32>} : memref<16x32x144xbf16, #tpu.memory_space<vmem>>, vector<1x32x144xbf16>,
    %127 = vector.extract_strided_slice %21 {offsets = [15, 0, 0], sizes = [1, 144, 32], strides = [1, 1, 1]} : vector<16x144x32xf32> to vector<1x144x32xf32>
    %128 = vector.shape_cast %127 : vector<1x144x32xf32> to vector<144x32xf32>
    %129 = tpu.transpose %128, [1, 0] : vector<144x32xf32> -> vector<32x144xf32>
    %130 = arith.truncf %129 : vector<32x144xf32> to vector<32x144xbf16>
    %c15 = arith.constant 15 : index
    %c0_47 = arith.constant 0 : index
    %c0_48 = arith.constant 0 : index
    %131 = vector.load %arg4[%c15, %c0_47, %c0_48] : memref<16x32x144xbf16, #tpu.memory_space<vmem>>, vector<1x32x144xbf16>
    %132 = vector.shape_cast %131 : vector<1x32x144xbf16> to vector<32x144xbf16>
    %133 = vector.shape_cast %130 : vector<32x144xbf16> to vector<1x32x144xbf16>
    tpu.vector_store %arg4[%c15, %c0_47, %c0_48], %133 {strides = array<i32>} : memref<16x32x144xbf16, #tpu.memory_space<vmem>>, vector<1x32x144xbf16>,
    return
  }
  func.func @transform_0(%arg0: i32) -> (i32, i32, i32) {
    %c0_i32 = arith.constant 0 : i32
    %c0_i32_0 = arith.constant 0 : i32
    %c0_i32_1 = arith.constant 0 : i32
    return %arg0, %c0_i32, %c0_i32_0 : i32, i32, i32
  }
  func.func @transform_1(%arg0: i32) -> (i32, i32) {
    %c0_i32 = arith.constant 0 : i32
    %c0_i32_0 = arith.constant 0 : i32
    %c0_i32_1 = arith.constant 0 : i32
    return %c0_i32, %c0_i32_0 : i32, i32
  }
  func.func @transform_2(%arg0: i32) -> (i32, i32) {
    %c0_i32 = arith.constant 0 : i32
    %c0_i32_0 = arith.constant 0 : i32
    %c0_i32_1 = arith.constant 0 : i32
    return %c0_i32, %c0_i32_0 : i32, i32
  }
  func.func @transform_3(%arg0: i32) -> (i32, i32, i32) {
    %c0_i32 = arith.constant 0 : i32
    %c0_i32_0 = arith.constant 0 : i32
    %c0_i32_1 = arith.constant 0 : i32
    return %arg0, %c0_i32, %c0_i32_0 : i32, i32, i32
  }
}

module attributes {stable_mosaic.version = 11 : i64} {
  func.func @mlp_kernel(%arg0: i32, %arg1: memref<16x4608xbf16, #tpu.memory_space<vmem>>, %arg2: memref<4608x128xbf16, #tpu.memory_space<vmem>>, %arg3: memref<1x128xf32, #tpu.memory_space<vmem>>, %arg4: memref<128x10xf32, #tpu.memory_space<vmem>>, %arg5: memref<1x10xf32, #tpu.memory_space<vmem>>, %arg6: memref<16x10xf32, #tpu.memory_space<vmem>>) attributes {dimension_semantics = [#tpu.dimension_semantics<parallel>], iteration_bounds = array<i64: 2>, scalar_prefetch = 0 : i64, scratch_operands = 0 : i64, tpu.core_type = #tpu.core_type<tc>, window_params = [{transform_indices = @transform_0, window_bounds = array<i64: 16, 4608>}, {pipeline_mode = #tpu.pipeline_mode<synchronous>, transform_indices = @transform_1, window_bounds = array<i64: 4608, 128>}, {pipeline_mode = #tpu.pipeline_mode<synchronous>, transform_indices = @transform_2, window_bounds = array<i64: 1, 128>}, {pipeline_mode = #tpu.pipeline_mode<synchronous>, transform_indices = @transform_3, window_bounds = array<i64: 128, 10>}, {pipeline_mode = #tpu.pipeline_mode<synchronous>, transform_indices = @transform_4, window_bounds = array<i64: 1, 10>}, {transform_indices = @transform_5, window_bounds = array<i64: 16, 10>}]} {
    %c0 = arith.constant 0 : index
    %c0_0 = arith.constant 0 : index
    %0 = vector.load %arg1[%c0, %c0_0] : memref<16x4608xbf16, #tpu.memory_space<vmem>>, vector<16x4608xbf16>
    %c0_1 = arith.constant 0 : index
    %c0_2 = arith.constant 0 : index
    %1 = vector.load %arg2[%c0_1, %c0_2] : memref<4608x128xbf16, #tpu.memory_space<vmem>>, vector<4608x128xbf16>
    %cst = arith.constant dense<0.000000e+00> : vector<16x128xf32>
    %2 = tpu.matmul %0, %1, %cst {dimension_numbers = #tpu.dot_dimension_numbers<[1], [0], [0], [1], [0, 0, 1, 1], [], []>} : vector<16x4608xbf16>, vector<4608x128xbf16>, vector<16x128xf32> -> vector<16x128xf32>
    %c0_3 = arith.constant 0 : index
    %c0_4 = arith.constant 0 : index
    %3 = vector.load %arg3[%c0_3, %c0_4] : memref<1x128xf32, #tpu.memory_space<vmem>>, vector<1x128xf32>
    %4 = vector.broadcast %3 : vector<1x128xf32> to vector<16x128xf32>
    %5 = arith.addf %2, %4 : vector<16x128xf32>
    %cst_5 = arith.constant 0.000000e+00 : f32
    %6 = vector.broadcast %cst_5 : f32 to vector<16x128xf32>
    %7 = arith.maximumf %5, %6 : vector<16x128xf32>
    %c0_6 = arith.constant 0 : index
    %c0_7 = arith.constant 0 : index
    %8 = vector.load %arg4[%c0_6, %c0_7] : memref<128x10xf32, #tpu.memory_space<vmem>>, vector<128x10xf32>
    %cst_8 = arith.constant dense<0.000000e+00> : vector<16x10xf32>
    %9 = tpu.matmul %7, %8, %cst_8 {dimension_numbers = #tpu.dot_dimension_numbers<[1], [0], [0], [1], [0, 0, 1, 1], [], []>} : vector<16x128xf32>, vector<128x10xf32>, vector<16x10xf32> -> vector<16x10xf32>
    %c0_9 = arith.constant 0 : index
    %c0_10 = arith.constant 0 : index
    %10 = vector.load %arg5[%c0_9, %c0_10] : memref<1x10xf32, #tpu.memory_space<vmem>>, vector<1x10xf32>
    %11 = vector.broadcast %10 : vector<1x10xf32> to vector<16x10xf32>
    %12 = arith.addf %9, %11 : vector<16x10xf32>
    %c0_11 = arith.constant 0 : index
    %c0_12 = arith.constant 0 : index
    %13 = vector.load %arg6[%c0_11, %c0_12] : memref<16x10xf32, #tpu.memory_space<vmem>>, vector<16x10xf32>
    tpu.vector_store %arg6[%c0_11, %c0_12], %12 {strides = array<i32>} : memref<16x10xf32, #tpu.memory_space<vmem>>, vector<16x10xf32>,
    return
  }
  func.func @transform_0(%arg0: i32) -> (i32, i32) {
    %c0_i32 = arith.constant 0 : i32
    %c0_i32_0 = arith.constant 0 : i32
    return %arg0, %c0_i32 : i32, i32
  }
  func.func @transform_1(%arg0: i32) -> (i32, i32) {
    %c0_i32 = arith.constant 0 : i32
    %c0_i32_0 = arith.constant 0 : i32
    %c0_i32_1 = arith.constant 0 : i32
    return %c0_i32, %c0_i32_0 : i32, i32
  }
  func.func @transform_2(%arg0: i32) -> (i32, i32) {
    %c0_i32 = arith.constant 0 : i32
    %c0_i32_0 = arith.constant 0 : i32
    %c0_i32_1 = arith.constant 0 : i32
    return %c0_i32, %c0_i32_0 : i32, i32
  }
  func.func @transform_3(%arg0: i32) -> (i32, i32) {
    %c0_i32 = arith.constant 0 : i32
    %c0_i32_0 = arith.constant 0 : i32
    %c0_i32_1 = arith.constant 0 : i32
    return %c0_i32, %c0_i32_0 : i32, i32
  }
  func.func @transform_4(%arg0: i32) -> (i32, i32) {
    %c0_i32 = arith.constant 0 : i32
    %c0_i32_0 = arith.constant 0 : i32
    %c0_i32_1 = arith.constant 0 : i32
    return %c0_i32, %c0_i32_0 : i32, i32
  }
  func.func @transform_5(%arg0: i32) -> (i32, i32) {
    %c0_i32 = arith.constant 0 : i32
    %c0_i32_0 = arith.constant 0 : i32
    return %arg0, %c0_i32 : i32, i32
  }
}

</mosaic_0001>

<bundles_post_ra>
// kernel: net_forward.2
= control target key start
LH: loop header
LB: loop body
LE: loop exit
PB: predicated region body
PF: predicated region fallthrough
CT: control target
= control target key end

     0   :  { %s18028_s12 = smov 0   ;;  %s23114_s0 = inlined_call_operand.vmem [shape: bf16[32,576,32], index: 0, kind: input, shape index: {}]   ;;  %s23115_s1 = inlined_call_operand.vmem [shape: bf16[32,32], index: 1, kind: input, shape index: {}]   ;;  %s23116_s2 = inlined_call_operand.vmem [shape: f32[1,32], index: 2, kind: input, shape index: {}]   ;;  %s23117_s3 = inlined_call_operand.vmem [shape: bf16[32,32,144], index: 3, kind: output, shape index: {}]  }
   0x1 LB: > { %s13692_s13 = sadd.s32 4294967295, %s18006_s12   ;;  %p13696_p0 = scmp.ge.s32.totalorder %s18006_s12, 1  ;;  %s18006_s12 = sphi %s18028_s12, %s13_s12  }
   0x2   : > { %p139_p1 = scmp.lt.s32.totalorder %s18006_s12, 3 }
   0x4   : > { %p140_p2 = pnand %p13696_p0, %p139_p1 }
   0x6   : > { %143 = sbr.rel (%p140_p2) target bundleno = 1536 (0x600), region = 32 }
   0xd   : > { %v17418_v0 = vld [vmem:[%s23115_s1] sm:$0xff]   ;;  %s13697_s16 = sshll.u32 %s13692_s13, 4  ;;  %v17419_v1 = vld [vmem:[%s23115_s1 + $0x8] sm:$0xff]   ;;  %vm1204_vm0 = vcmask 261120   ;;  %vm12232_vm1 = vcmask 1043456   ;;  %vm12233_vm2 = vcmask 130052  }
   0xe   : > { %p166_p3 = scmp.lt.s32.totalorder %s13697_s16, 31  ;;  %15632 = vmatprep.subr.bf16.mxu0 %v17418_v0  ;;  %15924 = vmatprep.subr.bf16.mxu1 %v17418_v0  ;;  %vm22467_vm3 = vmor %vm12233_vm2, %vm12232_vm1 }
   0xf   : > { %15633 = vmatpush3.bf16.msra.mxu0 %v17418_v0  ;;  %15925 = vmatpush3.bf16.msra.mxu1 %v17418_v0 }
  0x10   : > { %s24999_s16 = smov (!%p166_p3, %s13697_s16), 31  ;;  %15634 = vmatprep.subr.bf16.mxu0 %v17419_v1  ;;  %15926 = vmatprep.subr.bf16.mxu1 %v17419_v1 }
  0x11   : > { %s16800_s19 = smul.u32 288, %s24999_s16  ;;  %s14983_s4 = sshll.u32 %s24999_s16, 5 }
  0x12   : > { %s22463_s7 = scalar_lea.vmem %s23117_s3, %s14983_s4 }
  0x13   : > { %15635 = vmatpush3.bf16.msra.mxu0 %v17419_v1  ;;  %15927 = vmatpush3.bf16.msra.mxu1 %v17419_v1  ;;  %s18048_s22 = scalar_lea.vmem %s23114_s0, %s16800_s19 }
  0x14   : > { %v17420_v2 = vld [vmem:[%s18048_s22] sm:$0xff]   ;;  %16216 = vmatprep.subr.bf16.mxu0 %v17418_v0  ;;  %16508 = vmatprep.subr.bf16.mxu1 %v17418_v0  ;;  %v17421_v3 = vld [vmem:[%s18048_s22 + $0x48] sm:$0xff]   ;;  %v17423_v5 = vld [vmem:[%s18048_s22 + $0x50] sm:$0xff]  }
  0x15   : > { %15636 = vmatprep.mubr.msk.bf16.mxu0 %vm1204_vm0, %v17420_v2  ;;  %v17422_v4 = vld [vmem:[%s18048_s22 + $0x8] sm:$0xff]   ;;  %15928 = vmatprep.mubr.msk.bf16.mxu1 %vm1204_vm0, %v17421_v3  ;;  %v17424_v6 = vld [vmem:[%s18048_s22 + $0x10] sm:$0xff]   ;;  %v17425_v7 = vld [vmem:[%s18048_s22 + $0x58] sm:$0xff]  }
  0x16   : > { %15637 = vmatmul.mubr.msk.bf16.vlgmr.msra.gmra.mrb[0].mxu0 %vm1204_vm0, %v17422_v4  ;;  %15929 = vmatmul.mubr.msk.bf16.vlgmr.msra.gmra.mrb[0].mxu1 %vm1204_vm0, %v17423_v5  ;;  %v17426_v8 = vld [vmem:[%s18048_s22 + $0x18] sm:$0xff]   ;;  %v17427_v9 = vld [vmem:[%s18048_s22 + $0x60] sm:$0xff]   ;;  %v17429_v11 = vld [vmem:[%s18048_s22 + $0x68] sm:$0xff]  }
  0x17   : > { %16217 = vmatpush3.bf16.msra.mxu0 %v17418_v0  ;;  %16509 = vmatpush3.bf16.msra.mxu1 %v17418_v0  ;;  %v17428_v10 = vld [vmem:[%s18048_s22 + $0x20] sm:$0xff]   ;;  %v17430_v12 = vld [vmem:[%s18048_s22 + $0x28] sm:$0xff]   ;;  %v17431_v13 = vld [vmem:[%s18048_s22 + $0x70] sm:$0xff]  }
  0x18   : > { %15640 = vmatprep.mubr.msk.bf16.mxu0 %vm1204_vm0, %v17424_v6  ;;  %15932 = vmatprep.mubr.msk.bf16.mxu1 %vm1204_vm0, %v17425_v7  ;;  %v17432_v14 = vld [vmem:[%s18048_s22 + $0x30] sm:$0xff]   ;;  %v17433_v15 = vld [vmem:[%s18048_s22 + $0x78] sm:$0xff]   ;;  %v17435_v17 = vld [vmem:[%s18048_s22 + $0x80] sm:$0xff]  }
  0x19   : > { %16218 = vmatprep.subr.bf16.mxu0 %v17419_v1  ;;  %16510 = vmatprep.subr.bf16.mxu1 %v17419_v1  ;;  %v17434_v16 = vld [vmem:[%s18048_s22 + $0x38] sm:$0xff]   ;;  %v17436_v18 = vld [vmem:[%s18048_s22 + $0x40] sm:$0xff]   ;;  %v17437_v19 = vld [vmem:[%s18048_s22 + $0x88] sm:$0xff]  }
  0x1a   : > { %v17438_v20 = vld [vmem:[%s18048_s22 + $0x120] sm:$0xff]   ;;  %v17439_v21 = vld [vmem:[%s18048_s22 + $0x168] sm:$0xff]   ;;  %v17441_v23 = vld [vmem:[%s18048_s22 + $0x170] sm:$0xff]  }
  0x1b   : > { %16219 = vmatpush3.bf16.msra.mxu0 %v17419_v1  ;;  %16511 = vmatpush3.bf16.msra.mxu1 %v17419_v1  ;;  %v17440_v22 = vld [vmem:[%s18048_s22 + $0x128] sm:$0xff]   ;;  %v17442_v24 = vld [vmem:[%s18048_s22 + $0x130] sm:$0xff]   ;;  %v17443_v25 = vld [vmem:[%s18048_s22 + $0x178] sm:$0xff]  }
  0x1c   : > { %v17444_v26 = vld [vmem:[%s18048_s22 + $0x138] sm:$0xff]   ;;  %v17445_v27 = vld [vmem:[%s18048_s22 + $0x180] sm:$0xff]   ;;  %v17447_v29 = vld [vmem:[%s18048_s22 + $0x188] sm:$0xff]  }
  0x1d   : > { %v17446_v28 = vld [vmem:[%s18048_s22 + $0x140] sm:$0xff]   ;;  %v17448_v30 = vld [vmem:[%s18048_s22 + $0x148] sm:$0xff]   ;;  %v17449_v31 = vld [vmem:[%s18048_s22 + $0x190] sm:$0xff]  }
  0x1e   : > { %15641 = vmatmul.mubr.msk.bf16.gmra.mrb[4].mxu0 %vm1204_vm0, %v17426_v8  ;;  %15933 = vmatmul.mubr.msk.bf16.gmra.mrb[4].mxu1 %vm1204_vm0, %v17427_v9  ;;  %v17450_v32 = vld [vmem:[%s18048_s22 + $0x150] sm:$0xff]   ;;  %v17451_v33 = vld [vmem:[%s18048_s22 + $0x198] sm:$0xff]   ;;  %v17453_v35 = vld [vmem:[%s18048_s22 + $0x1a0] sm:$0xff]  }
  0x1f   : > { %15644 = vmatprep.mubr.msk.bf16.mxu0 %vm1204_vm0, %v17428_v10  ;;  %15936 = vmatprep.mubr.msk.bf16.mxu1 %vm1204_vm0, %v17429_v11  ;;  %v17452_v34 = vld [vmem:[%s18048_s22 + $0x158] sm:$0xff]   ;;  %v17454_v36 = vld [vmem:[%s18048_s22 + $0x160] sm:$0xff]   ;;  %v17455_v37 = vld [vmem:[%s18048_s22 + $0x1a8] sm:$0xff]  }
  0x20   : > { %v17456_v38 = vld [vmem:[%s18048_s22 + $0x240] sm:$0xff]   ;;  %v17457_v39 = vld [vmem:[%s18048_s22 + $0x288] sm:$0xff]   ;;  %v17459_v41 = vld [vmem:[%s18048_s22 + $0x290] sm:$0xff]  }
  0x21   : > { %v17458_v40 = vld [vmem:[%s18048_s22 + $0x248] sm:$0xff]   ;;  %v17460_v42 = vld [vmem:[%s18048_s22 + $0x250] sm:$0xff]   ;;  %v17461_v43 = vld [vmem:[%s18048_s22 + $0x298] sm:$0xff]  }
  0x22   : > { %v17462_v44 = vld [vmem:[%s18048_s22 + $0x258] sm:$0xff]   ;;  %v17463_v45 = vld [vmem:[%s18048_s22 + $0x2a0] sm:$0xff]   ;;  %v17465_v47 = vld [vmem:[%s18048_s22 + $0x2a8] sm:$0xff]  }
  0x23   : > { %v17464_v46 = vld [vmem:[%s18048_s22 + $0x260] sm:$0xff]   ;;  %v17466_v48 = vld [vmem:[%s18048_s22 + $0x268] sm:$0xff]   ;;  %v17467_v49 = vld [vmem:[%s18048_s22 + $0x2b0] sm:$0xff]  }
  0x24   : > { %v17468_v50 = vld [vmem:[%s18048_s22 + $0x270] sm:$0xff]   ;;  %v17469_v51 = vld [vmem:[%s18048_s22 + $0x2b8] sm:$0xff]   ;;  %v17471_v53 = vld [vmem:[%s18048_s22 + $0x2c0] sm:$0xff]  }
  0x25   : > { %v17470_v52 = vld [vmem:[%s18048_s22 + $0x278] sm:$0xff]   ;;  %v17472_v54 = vld [vmem:[%s18048_s22 + $0x280] sm:$0xff]   ;;  %v17473_v55 = vld [vmem:[%s18048_s22 + $0x2c8] sm:$0xff]  }
  0x26   : > { %15645 = vmatmul.mubr.msk.bf16.gmra.mrb[8].mxu0 %vm1204_vm0, %v17430_v12  ;;  %15937 = vmatmul.mubr.msk.bf16.gmra.mrb[8].mxu1 %vm1204_vm0, %v17431_v13  ;;  %v17474_v56 = vld [vmem:[%s18048_s22 + $0x360] sm:$0xff]   ;;  %v17475_v57 = vld [vmem:[%s18048_s22 + $0x3a8] sm:$0xff]   ;;  %v17477_v59 = vld [vmem:[%s18048_s22 + $0x3b0] sm:$0xff]  }
  0x27   : > { %15648 = vmatprep.mubr.msk.bf16.mxu0 %vm1204_vm0, %v17432_v14  ;;  %15940 = vmatprep.mubr.msk.bf16.mxu1 %vm1204_vm0, %v17433_v15  ;;  %v17476_v58 = vld [vmem:[%s18048_s22 + $0x368] sm:$0xff]   ;;  %v17478_v60 = vld [vmem:[%s18048_s22 + $0x370] sm:$0xff]   ;;  %v17479_v61 = vld [vmem:[%s18048_s22 + $0x3b8] sm:$0xff]  }
  0x28   : > { %v17480_v62 = vld [vmem:[%s18048_s22 + $0x378] sm:$0xff]   ;;  %v17481_v63 = vld [vmem:[%s18048_s22 + $0x3c0] sm:$0xff]   ;;  %v17483_v1 = vld [vmem:[%s18048_s22 + $0x3c8] sm:$0xff]  }
  0x29   : > { %v17482_v0 = vld [vmem:[%s18048_s22 + $0x380] sm:$0xff]   ;;  %v17484_v2 = vld [vmem:[%s18048_s22 + $0x388] sm:$0xff]   ;;  %v17485_v3 = vld [vmem:[%s18048_s22 + $0x3d0] sm:$0xff]  }
  0x2a   : > { %v17486_v4 = vld [vmem:[%s18048_s22 + $0x390] sm:$0xff]   ;;  %v17487_v5 = vld [vmem:[%s18048_s22 + $0x3d8] sm:$0xff]   ;;  %v17489_v7 = vld [vmem:[%s18048_s22 + $0x3e0] sm:$0xff]  }
  0x2b   : > { %v17488_v6 = vld [vmem:[%s18048_s22 + $0x398] sm:$0xff]   ;;  %v17490_v8 = vld [vmem:[%s18048_s22 + $0x3a0] sm:$0xff]   ;;  %v17491_v9 = vld [vmem:[%s18048_s22 + $0x3e8] sm:$0xff]  }
  0x2c   : > { %v17492_v10 = vld [vmem:[%s18048_s22 + $0x480] sm:$0xff]   ;;  %v17493_v11 = vld [vmem:[%s18048_s22 + $0x4c8] sm:$0xff]   ;;  %v17495_v13 = vld [vmem:[%s18048_s22 + $0x4d0] sm:$0xff]  }
  0x2d   : > { %v17494_v12 = vld [vmem:[%s18048_s22 + $0x488] sm:$0xff]   ;;  %v17496_v14 = vld [vmem:[%s18048_s22 + $0x490] sm:$0xff]   ;;  %v17497_v15 = vld [vmem:[%s18048_s22 + $0x4d8] sm:$0xff]  }
  0x2e   : > { %15649 = vmatmul.mubr.msk.bf16.gmra.mrb[12].mxu0 %vm1204_vm0, %v17434_v16  ;;  %15941 = vmatmul.mubr.msk.bf16.gmra.mrb[12].mxu1 %vm1204_vm0, %v17435_v17  ;;  %v17498_v16 = vld [vmem:[%s18048_s22 + $0x498] sm:$0xff]   ;;  %v17499_v17 = vld [vmem:[%s18048_s22 + $0x4e0] sm:$0xff]  }
  0x2f   : > { %15652 = vmatprep.mubr.msk.bf16.mxu0 %vm1204_vm0, %v17436_v18  ;;  %15944 = vmatprep.mubr.msk.bf16.mxu1 %vm1204_vm0, %v17437_v19  ;;  %v17500_v18 = vld [vmem:[%s18048_s22 + $0x4a0] sm:$0xff]   ;;  %v17501_v19 = vld [vmem:[%s18048_s22 + $0x4e8] sm:$0xff]  }
  0x36   : > { %15653 = vmatmul.mubr.msk.bf16.gmra.mrb[16].mxu0 %vm1204_vm0, %v17438_v20  ;;  %15945 = vmatmul.mubr.msk.bf16.gmra.mrb[16].mxu1 %vm1204_vm0, %v17439_v21  ;;  %v17502_v20 = vld [vmem:[%s18048_s22 + $0x4a8] sm:$0xff]   ;;  %v17503_v21 = vld [vmem:[%s18048_s22 + $0x4f0] sm:$0xff]  }
  0x37   : > { %15656 = vmatprep.mubr.msk.bf16.mxu0 %vm1204_vm0, %v17440_v22  ;;  %15948 = vmatprep.mubr.msk.bf16.mxu1 %vm1204_vm0, %v17441_v23  ;;  %v17504_v22 = vld [vmem:[%s18048_s22 + $0x4b0] sm:$0xff]   ;;  %v17505_v23 = vld [vmem:[%s18048_s22 + $0x4f8] sm:$0xff]  }
  0x3e   : > { %15657 = vmatmul.mubr.msk.bf16.gmra.mrb[20].mxu0 %vm1204_vm0, %v17442_v24  ;;  %15949 = vmatmul.mubr.msk.bf16.gmra.mrb[20].mxu1 %vm1204_vm0, %v17443_v25  ;;  %v17506_v24 = vld [vmem:[%s18048_s22 + $0x4b8] sm:$0xff]   ;;  %v17507_v25 = vld [vmem:[%s18048_s22 + $0x500] sm:$0xff]  }
  0x3f   : > { %15660 = vmatprep.mubr.msk.bf16.mxu0 %vm1204_vm0, %v17444_v26  ;;  %15952 = vmatprep.mubr.msk.bf16.mxu1 %vm1204_vm0, %v17445_v27  ;;  %v17508_v26 = vld [vmem:[%s18048_s22 + $0x4c0] sm:$0xff]   ;;  %v17509_v27 = vld [vmem:[%s18048_s22 + $0x508] sm:$0xff]  }
  0x46   : > { %15661 = vmatmul.mubr.msk.bf16.gmra.mrb[24].mxu0 %vm1204_vm0, %v17446_v28  ;;  %15953 = vmatmul.mubr.msk.bf16.gmra.mrb[24].mxu1 %vm1204_vm0, %v17447_v29  ;;  %v17510_v28 = vld [vmem:[%s18048_s22 + $0x5a0] sm:$0xff]   ;;  %v17511_v29 = vld [vmem:[%s18048_s22 + $0x5e8] sm:$0xff]  }
  0x47   : > { %15664 = vmatprep.mubr.msk.bf16.mxu0 %vm1204_vm0, %v17448_v30  ;;  %15956 = vmatprep.mubr.msk.bf16.mxu1 %vm1204_vm0, %v17449_v31  ;;  %v17512_v30 = vld [vmem:[%s18048_s22 + $0x5a8] sm:$0xff]   ;;  %v17513_v31 = vld [vmem:[%s18048_s22 + $0x5f0] sm:$0xff]  }
  0x4e   : > { %15665 = vmatmul.mubr.msk.bf16.gmra.mrb[28].mxu0 %vm1204_vm0, %v17450_v32  ;;  %15957 = vmatmul.mubr.msk.bf16.gmra.mrb[28].mxu1 %vm1204_vm0, %v17451_v33  ;;  %v17514_v32 = vld [vmem:[%s18048_s22 + $0x5b0] sm:$0xff]   ;;  %v17515_v33 = vld [vmem:[%s18048_s22 + $0x5f8] sm:$0xff]  }
  0x4f   : > { %15668 = vmatprep.mubr.msk.bf16.mxu0 %vm1204_vm0, %v17452_v34  ;;  %15960 = vmatprep.mubr.msk.bf16.mxu1 %vm1204_vm0, %v17453_v35  ;;  %v17516_v34 = vld [vmem:[%s18048_s22 + $0x5b8] sm:$0xff]   ;;  %v17517_v35 = vld [vmem:[%s18048_s22 + $0x600] sm:$0xff]  }
  0x56   : > { %15669 = vmatmul.mubr.msk.bf16.gmra.mrb[32].mxu0 %vm1204_vm0, %v17454_v36  ;;  %15961 = vmatmul.mubr.msk.bf16.gmra.mrb[32].mxu1 %vm1204_vm0, %v17455_v37  ;;  %v17518_v36 = vld [vmem:[%s18048_s22 + $0x5c0] sm:$0xff]   ;;  %v17519_v37 = vld [vmem:[%s18048_s22 + $0x608] sm:$0xff]  }
  0x57   : > { %15672 = vmatprep.mubr.msk.bf16.mxu0 %vm1204_vm0, %v17456_v38  ;;  %15964 = vmatprep.mubr.msk.bf16.mxu1 %vm1204_vm0, %v17457_v39  ;;  %v17520_v38 = vld [vmem:[%s18048_s22 + $0x5c8] sm:$0xff]   ;;  %v17521_v39 = vld [vmem:[%s18048_s22 + $0x610] sm:$0xff]  }
  0x5e   : > { %15673 = vmatmul.mubr.msk.bf16.gmra.mrb[36].mxu0 %vm1204_vm0, %v17458_v40  ;;  %15965 = vmatmul.mubr.msk.bf16.gmra.mrb[36].mxu1 %vm1204_vm0, %v17459_v41  ;;  %v17522_v40 = vld [vmem:[%s18048_s22 + $0x5d0] sm:$0xff]   ;;  %v17523_v41 = vld [vmem:[%s18048_s22 + $0x618] sm:$0xff]  }
  0x5f   : > { %15676 = vmatprep.mubr.msk.bf16.mxu0 %vm1204_vm0, %v17460_v42  ;;  %15968 = vmatprep.mubr.msk.bf16.mxu1 %vm1204_vm0, %v17461_v43  ;;  %v17524_v42 = vld [vmem:[%s18048_s22 + $0x5d8] sm:$0xff]   ;;  %v17525_v43 = vld [vmem:[%s18048_s22 + $0x620] sm:$0xff]  }
  0x66   : > { %15677 = vmatmul.mubr.msk.bf16.gmra.mrb[40].mxu0 %vm1204_vm0, %v17462_v44  ;;  %15969 = vmatmul.mubr.msk.bf16.gmra.mrb[40].mxu1 %vm1204_vm0, %v17463_v45  ;;  %v17526_v44 = vld [vmem:[%s18048_s22 + $0x5e0] sm:$0xff]   ;;  %v17527_v45 = vld [vmem:[%s18048_s22 + $0x628] sm:$0xff]  }
  0x67   : > { %15680 = vmatprep.mubr.msk.bf16.mxu0 %vm1204_vm0, %v17464_v46  ;;  %15972 = vmatprep.mubr.msk.bf16.mxu1 %vm1204_vm0, %v17465_v47  ;;  %v17528_v46 = vld [vmem:[%s18048_s22 + $0x6c0] sm:$0xff]   ;;  %v17529_v47 = vld [vmem:[%s18048_s22 + $0x708] sm:$0xff]  }
  0x6e   : > { %15681 = vmatmul.mubr.msk.bf16.gmra.mrb[44].mxu0 %vm1204_vm0, %v17466_v48  ;;  %15973 = vmatmul.mubr.msk.bf16.gmra.mrb[44].mxu1 %vm1204_vm0, %v17467_v49  ;;  %v17530_v48 = vld [vmem:[%s18048_s22 + $0x6c8] sm:$0xff]  }
  0x6f   : > { %15684 = vmatprep.mubr.msk.bf16.mxu0 %vm1204_vm0, %v17468_v50  ;;  %15976 = vmatprep.mubr.msk.bf16.mxu1 %vm1204_vm0, %v17469_v51  ;;  %v17531_v50 = vld [vmem:[%s18048_s22 + $0x710] sm:$0xff]  }
  0x70   : > { %v17532_v51 = vld [vmem:[%s18048_s22 + $0x6d0] sm:$0xff]  }
  0x76   : > { %15685 = vmatmul.mubr.msk.bf16.gmra.mrb[48].mxu0 %vm1204_vm0, %v17470_v52  ;;  %15977 = vmatmul.mubr.msk.bf16.gmra.mrb[48].mxu1 %vm1204_vm0, %v17471_v53 }
  0x77   : > { %15688 = vmatprep.mubr.msk.bf16.mxu0 %vm1204_vm0, %v17472_v54  ;;  %15980 = vmatprep.mubr.msk.bf16.mxu1 %vm1204_vm0, %v17473_v55 }
  0x7e   : > { %15689 = vmatmul.mubr.msk.bf16.gmra.mrb[52].mxu0 %vm1204_vm0, %v17474_v56  ;;  %15981 = vmatmul.mubr.msk.bf16.gmra.mrb[52].mxu1 %vm1204_vm0, %v17475_v57 }
  0x7f   : > { %15692 = vmatprep.mubr.msk.bf16.mxu0 %vm1204_vm0, %v17476_v58  ;;  %15984 = vmatprep.mubr.msk.bf16.mxu1 %vm1204_vm0, %v17477_v59 }
  0x86   : > { %15693 = vmatmul.mubr.msk.bf16.gmra.mrb[56].mxu0 %vm1204_vm0, %v17478_v60  ;;  %15985 = vmatmul.mubr.msk.bf16.gmra.mrb[56].mxu1 %vm1204_vm0, %v17479_v61  ;;  %v17533_v60 = vld [vmem:[%s18048_s22 + $0x718] sm:$0xff]  }
  0x87   : > { %15696 = vmatprep.mubr.msk.bf16.mxu0 %vm1204_vm0, %v17480_v62  ;;  %15988 = vmatprep.mubr.msk.bf16.mxu1 %vm1204_vm0, %v17481_v63  ;;  %v17557_v63 = vld [vmem:[%s18048_s22 + $0x850] sm:$0xff]  }
  0x8e   : > { %15697 = vmatmul.mubr.msk.bf16.gmra.mrb[60].mxu0 %vm1204_vm0, %v17482_v0  ;;  %15989 = vmatmul.mubr.msk.bf16.gmra.mrb[60].mxu1 %vm1204_vm0, %v17483_v1  ;;  %v17534_v0 = vld [vmem:[%s18048_s22 + $0x6d8] sm:$0xff]  }
  0x8f   : > { %15700 = vmatprep.mubr.msk.bf16.mxu0 %vm1204_vm0, %v17484_v2  ;;  %15992 = vmatprep.mubr.msk.bf16.mxu1 %vm1204_vm0, %v17485_v3  ;;  %v17535_v2 = vld [vmem:[%s18048_s22 + $0x720] sm:$0xff]  }
  0x90   : > { %v17536_v3 = vld [vmem:[%s18048_s22 + $0x6e0] sm:$0xff]  }
  0x96   : > { %15701 = vmatmul.mubr.msk.bf16.gmra.mrb[64].mxu0 %vm1204_vm0, %v17486_v4  ;;  %15993 = vmatmul.mubr.msk.bf16.gmra.mrb[64].mxu1 %vm1204_vm0, %v17487_v5 }
  0x97   : > { %15704 = vmatprep.mubr.msk.bf16.mxu0 %vm1204_vm0, %v17488_v6  ;;  %15996 = vmatprep.mubr.msk.bf16.mxu1 %vm1204_vm0, %v17489_v7 }
  0x9e   : > { %15705 = vmatmul.mubr.msk.bf16.gmra.mrb[68].mxu0 %vm1204_vm0, %v17490_v8  ;;  %15997 = vmatmul.mubr.msk.bf16.gmra.mrb[68].mxu1 %vm1204_vm0, %v17491_v9 }
  0x9f   : > { %15708 = vmatprep.mubr.msk.bf16.mxu0 %vm1204_vm0, %v17492_v10  ;;  %16000 = vmatprep.mubr.msk.bf16.mxu1 %vm1204_vm0, %v17493_v11 }
  0xa6   : > { %15709 = vmatmul.mubr.msk.bf16.gmra.mrb[72].mxu0 %vm1204_vm0, %v17494_v12  ;;  %16001 = vmatmul.mubr.msk.bf16.gmra.mrb[72].mxu1 %vm1204_vm0, %v17495_v13  ;;  %v17537_v12 = vld [vmem:[%s18048_s22 + $0x728] sm:$0xff]  }
  0xa7   : > { %15712 = vmatprep.mubr.msk.bf16.mxu0 %vm1204_vm0, %v17496_v14  ;;  %16004 = vmatprep.mubr.msk.bf16.mxu1 %vm1204_vm0, %v17497_v15  ;;  %v17555_v15 = vld [vmem:[%s18048_s22 + $0x848] sm:$0xff]  }
  0xa8   : > { %v17556_v13 = vld [vmem:[%s18048_s22 + $0x808] sm:$0xff]  }
  0xae   : > { %15713 = vmatmul.mubr.msk.bf16.gmra.mrb[76].mxu0 %vm1204_vm0, %v17498_v16  ;;  %16005 = vmatmul.mubr.msk.bf16.gmra.mrb[76].mxu1 %vm1204_vm0, %v17499_v17  ;;  %v17538_v16 = vld [vmem:[%s18048_s22 + $0x6e8] sm:$0xff]  }
  0xaf   : > { %15716 = vmatprep.mubr.msk.bf16.mxu0 %vm1204_vm0, %v17500_v18  ;;  %16008 = vmatprep.mubr.msk.bf16.mxu1 %vm1204_vm0, %v17501_v19  ;;  %v17539_v18 = vld [vmem:[%s18048_s22 + $0x730] sm:$0xff]  }
  0xb0   : > { %v17540_v19 = vld [vmem:[%s18048_s22 + $0x6f0] sm:$0xff]  }
  0xb6   : > { %15717 = vmatmul.mubr.msk.bf16.gmra.mrb[80].mxu0 %vm1204_vm0, %v17502_v20  ;;  %16009 = vmatmul.mubr.msk.bf16.gmra.mrb[80].mxu1 %vm1204_vm0, %v17503_v21 }
  0xb7   : > { %15720 = vmatprep.mubr.msk.bf16.mxu0 %vm1204_vm0, %v17504_v22  ;;  %16012 = vmatprep.mubr.msk.bf16.mxu1 %vm1204_vm0, %v17505_v23 }
  0xbe   : > { %15721 = vmatmul.mubr.msk.bf16.gmra.mrb[84].mxu0 %vm1204_vm0, %v17506_v24  ;;  %16013 = vmatmul.mubr.msk.bf16.gmra.mrb[84].mxu1 %vm1204_vm0, %v17507_v25 }
  0xbf   : > { %15724 = vmatprep.mubr.msk.bf16.mxu0 %vm1204_vm0, %v17508_v26  ;;  %16016 = vmatprep.mubr.msk.bf16.mxu1 %vm1204_vm0, %v17509_v27 }
  0xc6   : > { %15725 = vmatmul.mubr.msk.bf16.gmra.mrb[88].mxu0 %vm1204_vm0, %v17510_v28  ;;  %16017 = vmatmul.mubr.msk.bf16.gmra.mrb[88].mxu1 %vm1204_vm0, %v17511_v29  ;;  %v17541_v28 = vld [vmem:[%s18048_s22 + $0x738] sm:$0xff]  }
  0xc7   : > { %15728 = vmatprep.mubr.msk.bf16.mxu0 %vm1204_vm0, %v17512_v30  ;;  %16020 = vmatprep.mubr.msk.bf16.mxu1 %vm1204_vm0, %v17513_v31  ;;  %v17553_v31 = vld [vmem:[%s18048_s22 + $0x840] sm:$0xff]  }
  0xce   : > { %15729 = vmatmul.mubr.msk.bf16.gmra.mrb[92].mxu0 %vm1204_vm0, %v17514_v32  ;;  %16021 = vmatmul.mubr.msk.bf16.gmra.mrb[92].mxu1 %vm1204_vm0, %v17515_v33  ;;  %v17542_v32 = vld [vmem:[%s18048_s22 + $0x6f8] sm:$0xff]  }
  0xcf   : > { %15732 = vmatprep.mubr.msk.bf16.mxu0 %vm1204_vm0, %v17516_v34  ;;  %16024 = vmatprep.mubr.msk.bf16.mxu1 %vm1204_vm0, %v17517_v35  ;;  %v17543_v34 = vld [vmem:[%s18048_s22 + $0x740] sm:$0xff]  }
  0xd0   : > { %v17544_v35 = vld [vmem:[%s18048_s22 + $0x700] sm:$0xff]  }
  0xd6   : > { %15733 = vmatmul.mubr.msk.bf16.gmra.mrb[96].mxu0 %vm1204_vm0, %v17518_v36  ;;  %16025 = vmatmul.mubr.msk.bf16.gmra.mrb[96].mxu1 %vm1204_vm0, %v17519_v37 }
  0xd7   : > { %15736 = vmatprep.mubr.msk.bf16.mxu0 %vm1204_vm0, %v17520_v38  ;;  %16028 = vmatprep.mubr.msk.bf16.mxu1 %vm1204_vm0, %v17521_v39 }
  0xde   : > { %15737 = vmatmul.mubr.msk.bf16.gmra.mrb[100].mxu0 %vm1204_vm0, %v17522_v40  ;;  %16029 = vmatmul.mubr.msk.bf16.gmra.mrb[100].mxu1 %vm1204_vm0, %v17523_v41 }
  0xdf   : > { %15740 = vmatprep.mubr.msk.bf16.mxu0 %vm1204_vm0, %v17524_v42  ;;  %16032 = vmatprep.mubr.msk.bf16.mxu1 %vm1204_vm0, %v17525_v43 }
  0xe6   : > { %15741 = vmatmul.mubr.msk.bf16.gmra.mrb[104].mxu0 %vm1204_vm0, %v17526_v44  ;;  %16033 = vmatmul.mubr.msk.bf16.gmra.mrb[104].mxu1 %vm1204_vm0, %v17527_v45  ;;  %v17545_v44 = vld [vmem:[%s18048_s22 + $0x748] sm:$0xff]   ;;  %v17552_v45 = vld [vmem:[%s18048_s22 + $0x7f8] sm:$0xff]  }
  0xe7   : > { %15744 = vmatprep.mubr.msk.bf16.mxu0 %vm1204_vm0, %v17528_v46  ;;  %16036 = vmatprep.mubr.msk.bf16.mxu1 %vm1204_vm0, %v17529_v47  ;;  %v17551_v47 = vld [vmem:[%s18048_s22 + $0x838] sm:$0xff]  }
  0xe9   : > { %v18271_v49 = vpop.f32.mrb[0].mxu0  ;;  %v18275_v52 = vpop.f32.mrb[0].mxu1 }
  0xea   : > { %v18277_v53 = vpop.f32.mrb[1].mxu0  ;;  %v18281_v55 = vpop.f32.mrb[1].mxu1 }
  0xeb   : > { %v18283_v56 = vpop.f32.mrb[2].mxu0  ;;  %v18287_v58 = vpop.f32.mrb[2].mxu1 }
  0xec   : > { %v18289_v59 = vpop.f32.mrb[3].mxu0  ;;  %v18294_v62 = vpop.f32.mrb[3].mxu1 }
  0xee   : > { %15745 = vmatmul.mubr.msk.bf16.gmra.mrb[108].mxu0 %vm1204_vm0, %v17530_v48  ;;  %16037 = vmatmul.mubr.msk.bf16.gmra.mrb[108].mxu1 %vm1204_vm0, %v17531_v50  ;;  %v17546_v48 = vld [vmem:[%s18048_s22 + $0x7e0] sm:$0xff]  }
  0xef   : > { %15748 = vmatprep.mubr.msk.bf16.mxu0 %vm1204_vm0, %v17532_v51  ;;  %16040 = vmatprep.mubr.msk.bf16.mxu1 %vm1204_vm0, %v17533_v60  ;;  %v17547_v51 = vld [vmem:[%s18048_s22 + $0x828] sm:$0xff]  }
  0xf0   : > { %v17548_v60 = vld [vmem:[%s18048_s22 + $0x7e8] sm:$0xff]  }
  0xf1   : > { %v18303_v1 = vpop.f32.mrb[4].mxu0  ;;  %v18307_v4 = vpop.f32.mrb[4].mxu1 }
  0xf2   : > { %v18309_v5 = vpop.f32.mrb[5].mxu0  ;;  %v18313_v7 = vpop.f32.mrb[5].mxu1 }
  0xf3   : > { %v18315_v8 = vpop.f32.mrb[6].mxu0  ;;  %v18319_v10 = vpop.f32.mrb[6].mxu1 }
  0xf4   : > { %v18321_v11 = vpop.f32.mrb[7].mxu0  ;;  %v18326_v14 = vpop.f32.mrb[7].mxu1 }
  0xf6   : > { %15749 = vmatmul.mubr.msk.bf16.gmra.mrb[112].mxu0 %vm1204_vm0, %v17534_v0  ;;  %16041 = vmatmul.mubr.msk.bf16.gmra.mrb[112].mxu1 %vm1204_vm0, %v17535_v2 }
  0xf7   : > { %15752 = vmatprep.mubr.msk.bf16.mxu0 %vm1204_vm0, %v17536_v3  ;;  %16044 = vmatprep.mubr.msk.bf16.mxu1 %vm1204_vm0, %v17537_v12 }
  0xf9   : > { %v18335_v17 = vpop.f32.mrb[8].mxu0  ;;  %v18339_v20 = vpop.f32.mrb[8].mxu1 }
  0xfa   : > { %v18341_v21 = vpop.f32.mrb[9].mxu0  ;;  %v18345_v23 = vpop.f32.mrb[9].mxu1 }
  0xfb   : > { %v18347_v24 = vpop.f32.mrb[10].mxu0  ;;  %v18351_v26 = vpop.f32.mrb[10].mxu1 }
  0xfc   : > { %v18353_v27 = vpop.f32.mrb[11].mxu0  ;;  %v18358_v30 = vpop.f32.mrb[11].mxu1 }
  0xfe   : > { %15753 = vmatmul.mubr.msk.bf16.gmra.mrb[116].mxu0 %vm1204_vm0, %v17538_v16  ;;  %16045 = vmatmul.mubr.msk.bf16.gmra.mrb[116].mxu1 %vm1204_vm0, %v17539_v18  ;;  %v17550_v18 = vld [vmem:[%s18048_s22 + $0x7f0] sm:$0xff]  }
  0xff   : > { %15756 = vmatprep.mubr.msk.bf16.mxu0 %vm1204_vm0, %v17540_v19  ;;  %16048 = vmatprep.mubr.msk.bf16.mxu1 %vm1204_vm0, %v17541_v28 }
 0x101   : > { %v18367_v33 = vpop.f32.mrb[12].mxu0  ;;  %v18371_v36 = vpop.f32.mrb[12].mxu1 }
 0x102   : > { %v18373_v37 = vpop.f32.mrb[13].mxu0  ;;  %v18377_v39 = vpop.f32.mrb[13].mxu1 }
 0x103   : > { %v18379_v40 = vpop.f32.mrb[14].mxu0  ;;  %v18383_v42 = vpop.f32.mrb[14].mxu1 }
 0x104   : > { %v18385_v43 = vpop.f32.mrb[15].mxu0  ;;  %v18390_v46 = vpop.f32.mrb[15].mxu1 }
 0x106   : > { %15757 = vmatmul.mubr.msk.bf16.gmra.mrb[120].mxu0 %vm1204_vm0, %v17542_v32  ;;  %16049 = vmatmul.mubr.msk.bf16.gmra.mrb[120].mxu1 %vm1204_vm0, %v17543_v34  ;;  %v17549_v32 = vld [vmem:[%s18048_s22 + $0x830] sm:$0xff]  }
 0x107   : > { %15760 = vmatprep.mubr.msk.bf16.mxu0 %vm1204_vm0, %v17544_v35  ;;  %16052 = vmatprep.mubr.msk.bf16.mxu1 %vm1204_vm0, %v17545_v44 }
 0x109   : > { %v18399_v50 = vpop.f32.mrb[16].mxu0  ;;  %v18403_v0 = vpop.f32.mrb[16].mxu1 }
 0x10a   : > { %v18405_v2 = vpop.f32.mrb[17].mxu0  ;;  %v18409_v12 = vpop.f32.mrb[17].mxu1 }
 0x10b   : > { %v18411_v16 = vpop.f32.mrb[18].mxu0  ;;  %v18415_v19 = vpop.f32.mrb[18].mxu1 }
 0x10c   : > { %v18417_v28 = vpop.f32.mrb[19].mxu0  ;;  %v18422_v35 = vpop.f32.mrb[19].mxu1 }
 0x10e   : > { %15761 = vmatmul.mubr.msk.bf16.gmra.mrb[124].mxu0 %vm1204_vm0, %v17546_v48  ;;  %16053 = vmatmul.mubr.msk.bf16.gmra.mrb[124].mxu1 %vm1204_vm0, %v17547_v51 }
 0x10f   : > { %15764 = vmatprep.mubr.msk.bf16.mxu0 %vm1204_vm0, %v17548_v60  ;;  %16056 = vmatprep.mubr.msk.bf16.mxu1 %vm1204_vm0, %v17549_v32  ;;  %v17554_v60 = vld [vmem:[%s18048_s22 + $0x800] sm:$0xff]  }
 0x111   : > { %v18431_v3 = vpop.f32.mrb[20].mxu0  ;;  %v18435_v34 = vpop.f32.mrb[20].mxu1 }
 0x112   : > { %v18437_v41 = vpop.f32.mrb[21].mxu0  ;;  %v18441_v44 = vpop.f32.mrb[21].mxu1 }
 0x113   : > { %v18443_v51 = vpop.f32.mrb[22].mxu0  ;;  %v18447_v32 = vpop.f32.mrb[22].mxu1 }
 0x114   : > { %v18449_v38 = vpop.f32.mrb[23].mxu0  ;;  %v18454_v25 = vpop.f32.mrb[23].mxu1 }
 0x115   : > { %23648 = vst [vmem:[#allocation2_spill] sm:$0xff] %v18449_v38  ;;  %23649 = vst [vmem:[#allocation3_spill] sm:$0xff] %v18454_v25 }
 0x116   : > { %15765 = vmatmul.mubr.msk.bf16.gmra.mrb[128].mxu0 %vm1204_vm0, %v17550_v18  ;;  %16057 = vmatmul.mubr.msk.bf16.gmra.mrb[128].mxu1 %vm1204_vm0, %v17551_v47 }
 0x117   : > { %15768 = vmatprep.mubr.msk.bf16.mxu0 %vm1204_vm0, %v17552_v45  ;;  %16060 = vmatprep.mubr.msk.bf16.mxu1 %vm1204_vm0, %v17553_v31  ;;  %v17558_v31 = vld [vmem:[%s18048_s22 + $0x810] sm:$0xff]  }
 0x119   : > { %v18463_v22 = vpop.f32.mrb[24].mxu0  ;;  %v18467_v29 = vpop.f32.mrb[24].mxu1 }
 0x11a   : > { %23650 = vst [vmem:[#allocation4_spill] sm:$0xff] %v18463_v22  ;;  %23651 = vst [vmem:[#allocation5_spill] sm:$0xff] %v18467_v29  ;;  %v18469_v9 = vpop.f32.mrb[25].mxu0  ;;  %v18473_v48 = vpop.f32.mrb[25].mxu1  ;;  %v17820_v22 = vld [vmem:[%s18048_s22 + $0x760] sm:$0xff]  }
 0x11b   : > { %23652 = vst [vmem:[#allocation6_spill] sm:$0xff] %v18469_v9  ;;  %23653 = vst [vmem:[#allocation7_spill] sm:$0xff] %v18473_v48  ;;  %v18475_v45 = vpop.f32.mrb[26].mxu0  ;;  %v18479_v47 = vpop.f32.mrb[26].mxu1  ;;  %v17559_v48 = vld [vmem:[%s18048_s22 + $0x858] sm:$0xff]  }
 0x11c   : > { %23654 = vst [vmem:[#allocation8_spill] sm:$0xff] %v18475_v45  ;;  %23655 = vst [vmem:[#allocation9_spill] sm:$0xff] %v18479_v47  ;;  %v18481_v6 = vpop.f32.mrb[27].mxu0  ;;  %v18486_v57 = vpop.f32.mrb[27].mxu1  ;;  %v17560_v9 = vld [vmem:[%s18048_s22 + $0x818] sm:$0xff]  }
 0x11d   : > { %23656 = vst [vmem:[#allocation10_spill] sm:$0xff] %v18481_v6  ;;  %23657 = vst [vmem:[#allocation11_spill] sm:$0xff] %v18486_v57  ;;  %v17561_v6 = vld [vmem:[%s18048_s22 + $0x860] sm:$0xff]  }
 0x11e   : > { %15769 = vmatmul.mubr.msk.bf16.gmra.mrb[132].mxu0 %vm1204_vm0, %v17554_v60  ;;  %16061 = vmatmul.mubr.msk.bf16.gmra.mrb[132].mxu1 %vm1204_vm0, %v17555_v15 }
 0x11f   : > { %15772 = vmatprep.mubr.msk.bf16.mxu0 %vm1204_vm0, %v17556_v13  ;;  %16064 = vmatprep.mubr.msk.bf16.mxu1 %vm1204_vm0, %v17557_v63  ;;  %v17562_v63 = vld [vmem:[%s18048_s22 + $0x820] sm:$0xff]  }
 0x121   : > { %v18495_v54 = vpop.f32.mrb[28].mxu0  ;;  %v18499_v61 = vpop.f32.mrb[28].mxu1 }
 0x122   : > { %23658 = vst [vmem:[#allocation12_spill] sm:$0xff] %v18495_v54  ;;  %23659 = vst [vmem:[#allocation13_spill] sm:$0xff] %v18499_v61  ;;  %v18501_v47 = vpop.f32.mrb[29].mxu0  ;;  %v18505_v18 = vpop.f32.mrb[29].mxu1  ;;  %v17564_v61 = vld [vmem:[%s18048_s22 + $0x900] sm:$0xff]  }
 0x123   : > { %23660 = vst [vmem:[#allocation14_spill] sm:$0xff] %v18501_v47  ;;  %23661 = vst [vmem:[#allocation15_spill] sm:$0xff] %v18505_v18  ;;  %v18507_v13 = vpop.f32.mrb[30].mxu0  ;;  %v18511_v15 = vpop.f32.mrb[30].mxu1  ;;  %v17563_v47 = vld [vmem:[%s18048_s22 + $0x868] sm:$0xff]  }
 0x124   : > { %23662 = vst [vmem:[#allocation16_spill] sm:$0xff] %v18507_v13  ;;  %23663 = vst [vmem:[#allocation17_spill] sm:$0xff] %v18511_v15  ;;  %v18513_v57 = vpop.f32.mrb[31].mxu0  ;;  %v18518_v29 = vpop.f32.mrb[31].mxu1 }
 0x125   : > { %23664 = vst [vmem:[#allocation18_spill] sm:$0xff] %v18513_v57  ;;  %23665 = vst [vmem:[#allocation19_spill] sm:$0xff] %v18518_v29  ;;  %v17565_v57 = vld [vmem:[%s18048_s22 + $0x948] sm:$0xff]  }
 0x126   : > { %15773 = vmatmul.mubr.msk.bf16.gmra.mrb[136].mxu0 %vm1204_vm0, %v17558_v31  ;;  %16065 = vmatmul.mubr.msk.bf16.gmra.mrb[136].mxu1 %vm1204_vm0, %v17559_v48 }
 0x127   : > { %15776 = vmatprep.mubr.msk.bf16.mxu0 %vm1204_vm0, %v17560_v9  ;;  %16068 = vmatprep.mubr.msk.bf16.mxu1 %vm1204_vm0, %v17561_v6  ;;  %v17566_v6 = vld [vmem:[%s18048_s22 + $0x908] sm:$0xff]  }
 0x129   : > { %v18527_v18 = vpop.f32.mrb[32].mxu0  ;;  %v18531_v45 = vpop.f32.mrb[32].mxu1 }
 0x12a   : > { %23666 = vst [vmem:[#allocation20_spill] sm:$0xff] %v18527_v18  ;;  %23667 = vst [vmem:[#allocation21_spill] sm:$0xff] %v18531_v45  ;;  %v18533_v15 = vpop.f32.mrb[33].mxu0  ;;  %v18537_v60 = vpop.f32.mrb[33].mxu1  ;;  %v17568_v45 = vld [vmem:[%s18048_s22 + $0x910] sm:$0xff]  }
 0x12b   : > { %23668 = vst [vmem:[#allocation22_spill] sm:$0xff] %v18533_v15  ;;  %23669 = vst [vmem:[#allocation23_spill] sm:$0xff] %v18537_v60  ;;  %v18539_v9 = vpop.f32.mrb[34].mxu0  ;;  %v18543_v48 = vpop.f32.mrb[34].mxu1  ;;  %v17567_v15 = vld [vmem:[%s18048_s22 + $0x950] sm:$0xff]  }
 0x12c   : > { %23670 = vst [vmem:[#allocation24_spill] sm:$0xff] %v18539_v9  ;;  %23671 = vst [vmem:[#allocation25_spill] sm:$0xff] %v18543_v48  ;;  %v18545_v29 = vpop.f32.mrb[35].mxu0  ;;  %v18550_v54 = vpop.f32.mrb[35].mxu1 }
 0x12d   : > { %23672 = vst [vmem:[#allocation26_spill] sm:$0xff] %v18545_v29  ;;  %23673 = vst [vmem:[#allocation27_spill] sm:$0xff] %v18550_v54  ;;  %v17569_v29 = vld [vmem:[%s18048_s22 + $0x958] sm:$0xff]  }
 0x12e   : > { %15777 = vmatmul.mubr.msk.bf16.gmra.mrb[140].mxu0 %vm1204_vm0, %v17562_v63  ;;  %16069 = vmatmul.mubr.msk.bf16.gmra.mrb[140].mxu1 %vm1204_vm0, %v17563_v47 }
 0x12f   : > { %15780 = vmatprep.mubr.msk.bf16.mxu0 %vm1204_vm0, %v17564_v61  ;;  %16072 = vmatprep.mubr.msk.bf16.mxu1 %vm1204_vm0, %v17565_v57  ;;  %v17570_v57 = vld [vmem:[%s18048_s22 + $0x918] sm:$0xff]  }
 0x131   : > { %v18559_v60 = vpop.f32.mrb[36].mxu0  ;;  %v18563_v13 = vpop.f32.mrb[36].mxu1 }
 0x132   : > { %23674 = vst [vmem:[#allocation28_spill] sm:$0xff] %v18559_v60  ;;  %23675 = vst [vmem:[#allocation29_spill] sm:$0xff] %v18563_v13  ;;  %v18565_v48 = vpop.f32.mrb[37].mxu0  ;;  %v18569_v31 = vpop.f32.mrb[37].mxu1  ;;  %v17572_v13 = vld [vmem:[%s18048_s22 + $0x920] sm:$0xff]  }
 0x133   : > { %23676 = vst [vmem:[#allocation30_spill] sm:$0xff] %v18565_v48  ;;  %23677 = vst [vmem:[#allocation31_spill] sm:$0xff] %v18569_v31  ;;  %v18571_v61 = vpop.f32.mrb[38].mxu0  ;;  %v18575_v47 = vpop.f32.mrb[38].mxu1  ;;  %v17571_v48 = vld [vmem:[%s18048_s22 + $0x960] sm:$0xff]  }
 0x134   : > { %23678 = vst [vmem:[#allocation32_spill] sm:$0xff] %v18571_v61  ;;  %23679 = vst [vmem:[#allocation33_spill] sm:$0xff] %v18575_v47  ;;  %v18577_v54 = vpop.f32.mrb[39].mxu0  ;;  %v18582_v18 = vpop.f32.mrb[39].mxu1 }
 0x135   : > { %23680 = vst [vmem:[#allocation34_spill] sm:$0xff] %v18577_v54  ;;  %23681 = vst [vmem:[#allocation35_spill] sm:$0xff] %v18582_v18  ;;  %v17573_v54 = vld [vmem:[%s18048_s22 + $0x968] sm:$0xff]  }
 0x136   : > { %15781 = vmatmul.mubr.msk.bf16.gmra.mrb[144].mxu0 %vm1204_vm0, %v17566_v6  ;;  %16073 = vmatmul.mubr.msk.bf16.gmra.mrb[144].mxu1 %vm1204_vm0, %v17567_v15 }
 0x137   : > { %15784 = vmatprep.mubr.msk.bf16.mxu0 %vm1204_vm0, %v17568_v45  ;;  %16076 = vmatprep.mubr.msk.bf16.mxu1 %vm1204_vm0, %v17569_v29  ;;  %v17574_v29 = vld [vmem:[%s18048_s22 + $0x928] sm:$0xff]  }
 0x139   : > { %v18591_v31 = vpop.f32.mrb[40].mxu0  ;;  %v18595_v9 = vpop.f32.mrb[40].mxu1 }
 0x13a   : > { %23682 = vst [vmem:[#allocation36_spill] sm:$0xff] %v18591_v31  ;;  %23683 = vst [vmem:[#allocation37_spill] sm:$0xff] %v18595_v9  ;;  %v18597_v47 = vpop.f32.mrb[41].mxu0  ;;  %v18601_v63 = vpop.f32.mrb[41].mxu1  ;;  %v17576_v9 = vld [vmem:[%s18048_s22 + $0x930] sm:$0xff]  }
 0x13b   : > { %23684 = vst [vmem:[#allocation38_spill] sm:$0xff] %v18597_v47  ;;  %23685 = vst [vmem:[#allocation39_spill] sm:$0xff] %v18601_v63  ;;  %v18603_v45 = vpop.f32.mrb[42].mxu0  ;;  %v18607_v15 = vpop.f32.mrb[42].mxu1  ;;  %v17575_v47 = vld [vmem:[%s18048_s22 + $0x970] sm:$0xff]  }
 0x13c   : > { %23686 = vst [vmem:[#allocation40_spill] sm:$0xff] %v18603_v45  ;;  %23687 = vst [vmem:[#allocation41_spill] sm:$0xff] %v18607_v15  ;;  %v18609_v18 = vpop.f32.mrb[43].mxu0  ;;  %v18614_v60 = vpop.f32.mrb[43].mxu1 }
 0x13d   : > { %23688 = vst [vmem:[#allocation42_spill] sm:$0xff] %v18609_v18  ;;  %23689 = vst [vmem:[#allocation43_spill] sm:$0xff] %v18614_v60  ;;  %v17577_v18 = vld [vmem:[%s18048_s22 + $0x978] sm:$0xff]  }
 0x13e   : > { %15785 = vmatmul.mubr.msk.bf16.gmra.mrb[148].mxu0 %vm1204_vm0, %v17570_v57  ;;  %16077 = vmatmul.mubr.msk.bf16.gmra.mrb[148].mxu1 %vm1204_vm0, %v17571_v48 }
 0x13f   : > { %15788 = vmatprep.mubr.msk.bf16.mxu0 %vm1204_vm0, %v17572_v13  ;;  %16080 = vmatprep.mubr.msk.bf16.mxu1 %vm1204_vm0, %v17573_v54  ;;  %v17578_v54 = vld [vmem:[%s18048_s22 + $0x938] sm:$0xff]  }
 0x141   : > { %v18623_v63 = vpop.f32.mrb[44].mxu0  ;;  %v18627_v61 = vpop.f32.mrb[44].mxu1 }
 0x142   : > { %23690 = vst [vmem:[#allocation44_spill] sm:$0xff] %v18623_v63  ;;  %23691 = vst [vmem:[#allocation45_spill] sm:$0xff] %v18627_v61  ;;  %v18629_v15 = vpop.f32.mrb[45].mxu0  ;;  %v18633_v6 = vpop.f32.mrb[45].mxu1  ;;  %v17580_v61 = vld [vmem:[%s18048_s22 + $0x940] sm:$0xff]  }
 0x143   : > { %23692 = vst [vmem:[#allocation46_spill] sm:$0xff] %v18629_v15  ;;  %23693 = vst [vmem:[#allocation47_spill] sm:$0xff] %v18633_v6  ;;  %v18635_v13 = vpop.f32.mrb[46].mxu0  ;;  %v18639_v48 = vpop.f32.mrb[46].mxu1  ;;  %v17579_v15 = vld [vmem:[%s18048_s22 + $0x980] sm:$0xff]  }
 0x144   : > { %23694 = vst [vmem:[#allocation48_spill] sm:$0xff] %v18635_v13  ;;  %23695 = vst [vmem:[#allocation49_spill] sm:$0xff] %v18639_v48  ;;  %v18641_v60 = vpop.f32.mrb[47].mxu0  ;;  %v18646_v31 = vpop.f32.mrb[47].mxu1 }
 0x145   : > { %23696 = vst [vmem:[#allocation50_spill] sm:$0xff] %v18641_v60  ;;  %23697 = vst [vmem:[#allocation51_spill] sm:$0xff] %v18646_v31  ;;  %v17581_v60 = vld [vmem:[%s18048_s22 + $0x988] sm:$0xff]  }
 0x146   : > { %15789 = vmatmul.mubr.msk.bf16.gmra.mrb[152].mxu0 %vm1204_vm0, %v17574_v29  ;;  %16081 = vmatmul.mubr.msk.bf16.gmra.mrb[152].mxu1 %vm1204_vm0, %v17575_v47 }
 0x147   : > { %15792 = vmatprep.mubr.msk.bf16.mxu0 %vm1204_vm0, %v17576_v9  ;;  %16084 = vmatprep.mubr.msk.bf16.mxu1 %vm1204_vm0, %v17577_v18  ;;  %v17582_v18 = vld [vmem:[%s18048_s22 + $0xa20] sm:$0xff]  }
 0x149   : > { %v18655_v6 = vpop.f32.mrb[48].mxu0  ;;  %v18659_v45 = vpop.f32.mrb[48].mxu1 }
 0x14a   : > { %23698 = vst [vmem:[#allocation52_spill] sm:$0xff] %v18655_v6  ;;  %23699 = vst [vmem:[#allocation53_spill] sm:$0xff] %v18659_v45  ;;  %v18661_v48 = vpop.f32.mrb[49].mxu0  ;;  %v18665_v57 = vpop.f32.mrb[49].mxu1  ;;  %v17584_v45 = vld [vmem:[%s18048_s22 + $0xa28] sm:$0xff]  }
 0x14b   : > { %23700 = vst [vmem:[#allocation54_spill] sm:$0xff] %v18661_v48  ;;  %23701 = vst [vmem:[#allocation55_spill] sm:$0xff] %v18665_v57  ;;  %v18667_v9 = vpop.f32.mrb[50].mxu0  ;;  %v18671_v47 = vpop.f32.mrb[50].mxu1  ;;  %v17583_v48 = vld [vmem:[%s18048_s22 + $0xa68] sm:$0xff]  }
 0x14c   : > { %23702 = vst [vmem:[#allocation56_spill] sm:$0xff] %v18667_v9  ;;  %23703 = vst [vmem:[#allocation57_spill] sm:$0xff] %v18671_v47  ;;  %v18673_v31 = vpop.f32.mrb[51].mxu0  ;;  %v18678_v63 = vpop.f32.mrb[51].mxu1 }
 0x14d   : > { %23704 = vst [vmem:[#allocation58_spill] sm:$0xff] %v18673_v31  ;;  %23705 = vst [vmem:[#allocation59_spill] sm:$0xff] %v18678_v63  ;;  %v17585_v31 = vld [vmem:[%s18048_s22 + $0xa70] sm:$0xff]  }
 0x14e   : > { %15793 = vmatmul.mubr.msk.bf16.gmra.mrb[156].mxu0 %vm1204_vm0, %v17578_v54  ;;  %16085 = vmatmul.mubr.msk.bf16.gmra.mrb[156].mxu1 %vm1204_vm0, %v17579_v15 }
 0x14f   : > { %15796 = vmatprep.mubr.msk.bf16.mxu0 %vm1204_vm0, %v17580_v61  ;;  %16088 = vmatprep.mubr.msk.bf16.mxu1 %vm1204_vm0, %v17581_v60  ;;  %v17586_v60 = vld [vmem:[%s18048_s22 + $0xa30] sm:$0xff]  }
 0x151   : > { %v18687_v57 = vpop.f32.mrb[52].mxu0  ;;  %v18691_v13 = vpop.f32.mrb[52].mxu1 }
 0x152   : > { %23706 = vst [vmem:[#allocation60_spill] sm:$0xff] %v18687_v57  ;;  %23707 = vst [vmem:[#allocation61_spill] sm:$0xff] %v18691_v13  ;;  %v18693_v47 = vpop.f32.mrb[53].mxu0  ;;  %v18697_v29 = vpop.f32.mrb[53].mxu1  ;;  %v17588_v13 = vld [vmem:[%s18048_s22 + $0xa38] sm:$0xff]  }
 0x153   : > { %23708 = vst [vmem:[#allocation62_spill] sm:$0xff] %v18693_v47  ;;  %23709 = vst [vmem:[#allocation63_spill] sm:$0xff] %v18697_v29  ;;  %v18699_v61 = vpop.f32.mrb[54].mxu0  ;;  %v18703_v15 = vpop.f32.mrb[54].mxu1  ;;  %v17587_v47 = vld [vmem:[%s18048_s22 + $0xa78] sm:$0xff]  }
 0x154   : > { %23710 = vst [vmem:[#allocation64_spill] sm:$0xff] %v18699_v61  ;;  %23711 = vst [vmem:[#allocation65_spill] sm:$0xff] %v18703_v15  ;;  %v18705_v63 = vpop.f32.mrb[55].mxu0  ;;  %v18710_v6 = vpop.f32.mrb[55].mxu1 }
 0x155   : > { %23712 = vst [vmem:[#allocation66_spill] sm:$0xff] %v18705_v63  ;;  %23713 = vst [vmem:[#allocation67_spill] sm:$0xff] %v18710_v6  ;;  %v17589_v63 = vld [vmem:[%s18048_s22 + $0xa80] sm:$0xff]  }
 0x156   : > { %15797 = vmatmul.mubr.msk.bf16.gmra.mrb[160].mxu0 %vm1204_vm0, %v17582_v18  ;;  %16089 = vmatmul.mubr.msk.bf16.gmra.mrb[160].mxu1 %vm1204_vm0, %v17583_v48 }
 0x157   : > { %15800 = vmatprep.mubr.msk.bf16.mxu0 %vm1204_vm0, %v17584_v45  ;;  %16092 = vmatprep.mubr.msk.bf16.mxu1 %vm1204_vm0, %v17585_v31  ;;  %v17590_v31 = vld [vmem:[%s18048_s22 + $0xa40] sm:$0xff]  }
 0x159   : > { %v18719_v29 = vpop.f32.mrb[56].mxu0  ;;  %v18723_v9 = vpop.f32.mrb[56].mxu1 }
 0x15a   : > { %23714 = vst [vmem:[#allocation68_spill] sm:$0xff] %v18719_v29  ;;  %23715 = vst [vmem:[#allocation69_spill] sm:$0xff] %v18723_v9  ;;  %v18725_v15 = vpop.f32.mrb[57].mxu0  ;;  %v18729_v54 = vpop.f32.mrb[57].mxu1  ;;  %v17592_v9 = vld [vmem:[%s18048_s22 + $0xa48] sm:$0xff]  }
 0x15b   : > { %23716 = vst [vmem:[#allocation70_spill] sm:$0xff] %v18725_v15  ;;  %23717 = vst [vmem:[#allocation71_spill] sm:$0xff] %v18729_v54  ;;  %v18731_v45 = vpop.f32.mrb[58].mxu0  ;;  %v18735_v48 = vpop.f32.mrb[58].mxu1  ;;  %v17591_v15 = vld [vmem:[%s18048_s22 + $0xa88] sm:$0xff]  }
 0x15c   : > { %23718 = vst [vmem:[#allocation72_spill] sm:$0xff] %v18731_v45  ;;  %23719 = vst [vmem:[#allocation73_spill] sm:$0xff] %v18735_v48  ;;  %v18737_v6 = vpop.f32.mrb[59].mxu0  ;;  %v18742_v57 = vpop.f32.mrb[59].mxu1 }
 0x15d   : > { %23720 = vst [vmem:[#allocation74_spill] sm:$0xff] %v18737_v6  ;;  %23721 = vst [vmem:[#allocation75_spill] sm:$0xff] %v18742_v57  ;;  %v17593_v6 = vld [vmem:[%s18048_s22 + $0xa90] sm:$0xff]  }
 0x15e   : > { %15801 = vmatmul.mubr.msk.bf16.gmra.mrb[164].mxu0 %vm1204_vm0, %v17586_v60  ;;  %16093 = vmatmul.mubr.msk.bf16.gmra.mrb[164].mxu1 %vm1204_vm0, %v17587_v47 }
 0x15f   : > { %15804 = vmatprep.mubr.msk.bf16.mxu0 %vm1204_vm0, %v17588_v13  ;;  %16096 = vmatprep.mubr.msk.bf16.mxu1 %vm1204_vm0, %v17589_v63  ;;  %v17594_v63 = vld [vmem:[%s18048_s22 + $0xa50] sm:$0xff]  }
 0x161   : > { %v18751_v54 = vpop.f32.mrb[60].mxu0  ;;  %v18755_v61 = vpop.f32.mrb[60].mxu1 }
 0x162   : > { %23722 = vst [vmem:[#allocation76_spill] sm:$0xff] %v18751_v54  ;;  %23723 = vst [vmem:[#allocation77_spill] sm:$0xff] %v18755_v61  ;;  %v18757_v48 = vpop.f32.mrb[61].mxu0  ;;  %v18761_v18 = vpop.f32.mrb[61].mxu1  ;;  %v17596_v61 = vld [vmem:[%s18048_s22 + $0xa58] sm:$0xff]  }
 0x163   : > { %23724 = vst [vmem:[#allocation78_spill] sm:$0xff] %v18757_v48  ;;  %23725 = vst [vmem:[#allocation79_spill] sm:$0xff] %v18761_v18  ;;  %v18763_v13 = vpop.f32.mrb[62].mxu0  ;;  %v18767_v47 = vpop.f32.mrb[62].mxu1  ;;  %v17595_v48 = vld [vmem:[%s18048_s22 + $0xa98] sm:$0xff]  }
 0x164   : > { %23726 = vst [vmem:[#allocation80_spill] sm:$0xff] %v18763_v13  ;;  %23727 = vst [vmem:[#allocation81_spill] sm:$0xff] %v18767_v47  ;;  %v18769_v57 = vpop.f32.mrb[63].mxu0  ;;  %v18774_v29 = vpop.f32.mrb[63].mxu1 }
 0x165   : > { %23728 = vst [vmem:[#allocation82_spill] sm:$0xff] %v18769_v57  ;;  %23729 = vst [vmem:[#allocation83_spill] sm:$0xff] %v18774_v29  ;;  %v17597_v57 = vld [vmem:[%s18048_s22 + $0xaa0] sm:$0xff]  }
 0x166   : > { %15805 = vmatmul.mubr.msk.bf16.gmra.mrb[168].mxu0 %vm1204_vm0, %v17590_v31  ;;  %16097 = vmatmul.mubr.msk.bf16.gmra.mrb[168].mxu1 %vm1204_vm0, %v17591_v15 }
 0x167   : > { %15808 = vmatprep.mubr.msk.bf16.mxu0 %vm1204_vm0, %v17592_v9  ;;  %16100 = vmatprep.mubr.msk.bf16.mxu1 %vm1204_vm0, %v17593_v6  ;;  %v17598_v6 = vld [vmem:[%s18048_s22 + $0xa60] sm:$0xff]  }
 0x169   : > { %v18783_v18 = vpop.f32.mrb[64].mxu0  ;;  %v18787_v45 = vpop.f32.mrb[64].mxu1 }
 0x16a   : > { %23730 = vst [vmem:[#allocation84_spill] sm:$0xff] %v18783_v18  ;;  %23731 = vst [vmem:[#allocation85_spill] sm:$0xff] %v18787_v45  ;;  %v18789_v47 = vpop.f32.mrb[65].mxu0  ;;  %v18793_v60 = vpop.f32.mrb[65].mxu1  ;;  %v17600_v45 = vld [vmem:[%s18048_s22 + $0xb40] sm:$0xff]  }
 0x16b   : > { %23732 = vst [vmem:[#allocation86_spill] sm:$0xff] %v18789_v47  ;;  %23733 = vst [vmem:[#allocation87_spill] sm:$0xff] %v18793_v60  ;;  %v18795_v9 = vpop.f32.mrb[66].mxu0  ;;  %v18799_v15 = vpop.f32.mrb[66].mxu1  ;;  %v17599_v47 = vld [vmem:[%s18048_s22 + $0xaa8] sm:$0xff]  }
 0x16c   : > { %23734 = vst [vmem:[#allocation88_spill] sm:$0xff] %v18795_v9  ;;  %23735 = vst [vmem:[#allocation89_spill] sm:$0xff] %v18799_v15  ;;  %v18801_v29 = vpop.f32.mrb[67].mxu0  ;;  %v18806_v54 = vpop.f32.mrb[67].mxu1 }
 0x16d   : > { %23736 = vst [vmem:[#allocation90_spill] sm:$0xff] %v18801_v29  ;;  %23737 = vst [vmem:[#allocation91_spill] sm:$0xff] %v18806_v54  ;;  %v17601_v29 = vld [vmem:[%s18048_s22 + $0xb88] sm:$0xff]  }
 0x16e   : > { %15809 = vmatmul.mubr.msk.bf16.gmra.mrb[172].mxu0 %vm1204_vm0, %v17594_v63  ;;  %16101 = vmatmul.mubr.msk.bf16.gmra.mrb[172].mxu1 %vm1204_vm0, %v17595_v48 }
 0x16f   : > { %15812 = vmatprep.mubr.msk.bf16.mxu0 %vm1204_vm0, %v17596_v61  ;;  %16104 = vmatprep.mubr.msk.bf16.mxu1 %vm1204_vm0, %v17597_v57  ;;  %v17602_v57 = vld [vmem:[%s18048_s22 + $0xb48] sm:$0xff]  }
 0x171   : > { %v18815_v60 = vpop.f32.mrb[68].mxu0  ;;  %v18819_v13 = vpop.f32.mrb[68].mxu1 }
 0x172   : > { %23738 = vst [vmem:[#allocation92_spill] sm:$0xff] %v18815_v60  ;;  %23739 = vst [vmem:[#allocation93_spill] sm:$0xff] %v18819_v13  ;;  %v18821_v15 = vpop.f32.mrb[69].mxu0  ;;  %v18825_v31 = vpop.f32.mrb[69].mxu1  ;;  %v17604_v13 = vld [vmem:[%s18048_s22 + $0xb50] sm:$0xff]  }
 0x173   : > { %23740 = vst [vmem:[#allocation94_spill] sm:$0xff] %v18821_v15  ;;  %23741 = vst [vmem:[#allocation95_spill] sm:$0xff] %v18825_v31  ;;  %v18827_v61 = vpop.f32.mrb[70].mxu0  ;;  %v18831_v48 = vpop.f32.mrb[70].mxu1  ;;  %v17603_v15 = vld [vmem:[%s18048_s22 + $0xb90] sm:$0xff]  }
 0x174   : > { %23742 = vst [vmem:[#allocation96_spill] sm:$0xff] %v18827_v61  ;;  %23743 = vst [vmem:[#allocation97_spill] sm:$0xff] %v18831_v48  ;;  %v18833_v54 = vpop.f32.mrb[71].mxu0  ;;  %v18838_v18 = vpop.f32.mrb[71].mxu1 }
 0x175   : > { %23744 = vst [vmem:[#allocation98_spill] sm:$0xff] %v18833_v54  ;;  %23745 = vst [vmem:[#allocation99_spill] sm:$0xff] %v18838_v18  ;;  %v17605_v54 = vld [vmem:[%s18048_s22 + $0xb98] sm:$0xff]  }
 0x176   : > { %15813 = vmatmul.mubr.msk.bf16.gmra.mrb[176].mxu0 %vm1204_vm0, %v17598_v6  ;;  %16105 = vmatmul.mubr.msk.bf16.gmra.mrb[176].mxu1 %vm1204_vm0, %v17599_v47 }
 0x177   : > { %15816 = vmatprep.mubr.msk.bf16.mxu0 %vm1204_vm0, %v17600_v45  ;;  %16108 = vmatprep.mubr.msk.bf16.mxu1 %vm1204_vm0, %v17601_v29  ;;  %v17606_v29 = vld [vmem:[%s18048_s22 + $0xb58] sm:$0xff]  }
 0x179   : > { %v18847_v31 = vpop.f32.mrb[72].mxu0  ;;  %v18851_v9 = vpop.f32.mrb[72].mxu1 }
 0x17a   : > { %23746 = vst [vmem:[#allocation100_spill] sm:$0xff] %v18847_v31  ;;  %23747 = vst [vmem:[#allocation101_spill] sm:$0xff] %v18851_v9  ;;  %v18853_v48 = vpop.f32.mrb[73].mxu0  ;;  %v18857_v63 = vpop.f32.mrb[73].mxu1  ;;  %v17608_v9 = vld [vmem:[%s18048_s22 + $0xb60] sm:$0xff]  }
 0x17b   : > { %23748 = vst [vmem:[#allocation102_spill] sm:$0xff] %v18853_v48  ;;  %23749 = vst [vmem:[#allocation103_spill] sm:$0xff] %v18857_v63  ;;  %v18859_v45 = vpop.f32.mrb[74].mxu0  ;;  %v18863_v47 = vpop.f32.mrb[74].mxu1  ;;  %v17607_v48 = vld [vmem:[%s18048_s22 + $0xba0] sm:$0xff]  }
 0x17c   : > { %23750 = vst [vmem:[#allocation104_spill] sm:$0xff] %v18859_v45  ;;  %23751 = vst [vmem:[#allocation105_spill] sm:$0xff] %v18863_v47  ;;  %v18865_v18 = vpop.f32.mrb[75].mxu0  ;;  %v18870_v60 = vpop.f32.mrb[75].mxu1 }
 0x17d   : > { %23752 = vst [vmem:[#allocation106_spill] sm:$0xff] %v18865_v18  ;;  %23753 = vst [vmem:[#allocation107_spill] sm:$0xff] %v18870_v60  ;;  %v17609_v18 = vld [vmem:[%s18048_s22 + $0xba8] sm:$0xff]  }
 0x17e   : > { %15817 = vmatmul.mubr.msk.bf16.gmra.mrb[180].mxu0 %vm1204_vm0, %v17602_v57  ;;  %16109 = vmatmul.mubr.msk.bf16.gmra.mrb[180].mxu1 %vm1204_vm0, %v17603_v15 }
 0x17f   : > { %15820 = vmatprep.mubr.msk.bf16.mxu0 %vm1204_vm0, %v17604_v13  ;;  %16112 = vmatprep.mubr.msk.bf16.mxu1 %vm1204_vm0, %v17605_v54  ;;  %v17610_v54 = vld [vmem:[%s18048_s22 + $0xb68] sm:$0xff]  }
 0x181   : > { %v18879_v63 = vpop.f32.mrb[76].mxu0  ;;  %v18883_v61 = vpop.f32.mrb[76].mxu1 }
 0x182   : > { %23754 = vst [vmem:[#allocation108_spill] sm:$0xff] %v18879_v63  ;;  %23755 = vst [vmem:[#allocation109_spill] sm:$0xff] %v18883_v61  ;;  %v18885_v47 = vpop.f32.mrb[77].mxu0  ;;  %v18889_v6 = vpop.f32.mrb[77].mxu1  ;;  %v17612_v61 = vld [vmem:[%s18048_s22 + $0xb70] sm:$0xff]  }
 0x183   : > { %23756 = vst [vmem:[#allocation110_spill] sm:$0xff] %v18885_v47  ;;  %23757 = vst [vmem:[#allocation111_spill] sm:$0xff] %v18889_v6  ;;  %v18891_v13 = vpop.f32.mrb[78].mxu0  ;;  %v18895_v15 = vpop.f32.mrb[78].mxu1  ;;  %v17611_v47 = vld [vmem:[%s18048_s22 + $0xbb0] sm:$0xff]  }
 0x184   : > { %23758 = vst [vmem:[#allocation112_spill] sm:$0xff] %v18891_v13  ;;  %23759 = vst [vmem:[#allocation113_spill] sm:$0xff] %v18895_v15  ;;  %v18897_v60 = vpop.f32.mrb[79].mxu0  ;;  %v18902_v31 = vpop.f32.mrb[79].mxu1 }
 0x185   : > { %23760 = vst [vmem:[#allocation114_spill] sm:$0xff] %v18897_v60  ;;  %23761 = vst [vmem:[#allocation115_spill] sm:$0xff] %v18902_v31  ;;  %v17613_v60 = vld [vmem:[%s18048_s22 + $0xbb8] sm:$0xff]  }
 0x186   : > { %15821 = vmatmul.mubr.msk.bf16.gmra.mrb[184].mxu0 %vm1204_vm0, %v17606_v29  ;;  %16113 = vmatmul.mubr.msk.bf16.gmra.mrb[184].mxu1 %vm1204_vm0, %v17607_v48 }
 0x187   : > { %15824 = vmatprep.mubr.msk.bf16.mxu0 %vm1204_vm0, %v17608_v9  ;;  %16116 = vmatprep.mubr.msk.bf16.mxu1 %vm1204_vm0, %v17609_v18  ;;  %v17614_v18 = vld [vmem:[%s18048_s22 + $0xb78] sm:$0xff]  }
 0x189   : > { %v18911_v6 = vpop.f32.mrb[80].mxu0  ;;  %v18915_v45 = vpop.f32.mrb[80].mxu1 }
 0x18a   : > { %23762 = vst [vmem:[#allocation116_spill] sm:$0xff] %v18911_v6  ;;  %23763 = vst [vmem:[#allocation117_spill] sm:$0xff] %v18915_v45  ;;  %v18917_v15 = vpop.f32.mrb[81].mxu0  ;;  %v18921_v57 = vpop.f32.mrb[81].mxu1  ;;  %v17616_v45 = vld [vmem:[%s18048_s22 + $0xb80] sm:$0xff]  }
 0x18b   : > { %23764 = vst [vmem:[#allocation118_spill] sm:$0xff] %v18917_v15  ;;  %23765 = vst [vmem:[#allocation119_spill] sm:$0xff] %v18921_v57  ;;  %v18923_v9 = vpop.f32.mrb[82].mxu0  ;;  %v18927_v48 = vpop.f32.mrb[82].mxu1  ;;  %v17615_v15 = vld [vmem:[%s18048_s22 + $0xbc0] sm:$0xff]  }
 0x18c   : > { %23766 = vst [vmem:[#allocation120_spill] sm:$0xff] %v18923_v9  ;;  %23767 = vst [vmem:[#allocation121_spill] sm:$0xff] %v18927_v48  ;;  %v18929_v31 = vpop.f32.mrb[83].mxu0  ;;  %v18934_v63 = vpop.f32.mrb[83].mxu1 }
 0x18d   : > { %23768 = vst [vmem:[#allocation122_spill] sm:$0xff] %v18929_v31  ;;  %23769 = vst [vmem:[#allocation123_spill] sm:$0xff] %v18934_v63  ;;  %v17617_v31 = vld [vmem:[%s18048_s22 + $0xbc8] sm:$0xff]  }
 0x18e   : > { %15825 = vmatmul.mubr.msk.bf16.gmra.mrb[188].mxu0 %vm1204_vm0, %v17610_v54  ;;  %16117 = vmatmul.mubr.msk.bf16.gmra.mrb[188].mxu1 %vm1204_vm0, %v17611_v47 }
 0x18f   : > { %15828 = vmatprep.mubr.msk.bf16.mxu0 %vm1204_vm0, %v17612_v61  ;;  %16120 = vmatprep.mubr.msk.bf16.mxu1 %vm1204_vm0, %v17613_v60  ;;  %v17618_v60 = vld [vmem:[%s18048_s22 + $0xc60] sm:$0xff]  }
 0x191   : > { %v18943_v57 = vpop.f32.mrb[84].mxu0  ;;  %v18947_v13 = vpop.f32.mrb[84].mxu1 }
 0x192   : > { %23770 = vst [vmem:[#allocation124_spill] sm:$0xff] %v18943_v57  ;;  %23771 = vst [vmem:[#allocation125_spill] sm:$0xff] %v18947_v13  ;;  %v18949_v48 = vpop.f32.mrb[85].mxu0  ;;  %v18953_v29 = vpop.f32.mrb[85].mxu1  ;;  %v17620_v13 = vld [vmem:[%s18048_s22 + $0xc68] sm:$0xff]  }
 0x193   : > { %23772 = vst [vmem:[#allocation126_spill] sm:$0xff] %v18949_v48  ;;  %23773 = vst [vmem:[#allocation127_spill] sm:$0xff] %v18953_v29  ;;  %v18955_v61 = vpop.f32.mrb[86].mxu0  ;;  %v18959_v47 = vpop.f32.mrb[86].mxu1  ;;  %v17619_v48 = vld [vmem:[%s18048_s22 + $0xca8] sm:$0xff]  }
 0x194   : > { %23774 = vst [vmem:[#allocation128_spill] sm:$0xff] %v18955_v61  ;;  %23775 = vst [vmem:[#allocation129_spill] sm:$0xff] %v18959_v47  ;;  %v18961_v63 = vpop.f32.mrb[87].mxu0  ;;  %v18966_v6 = vpop.f32.mrb[87].mxu1 }
 0x195   : > { %23776 = vst [vmem:[#allocation130_spill] sm:$0xff] %v18961_v63  ;;  %23777 = vst [vmem:[#allocation131_spill] sm:$0xff] %v18966_v6  ;;  %v17621_v63 = vld [vmem:[%s18048_s22 + $0xcb0] sm:$0xff]  }
 0x196   : > { %15829 = vmatmul.mubr.msk.bf16.gmra.mrb[192].mxu0 %vm1204_vm0, %v17614_v18  ;;  %16121 = vmatmul.mubr.msk.bf16.gmra.mrb[192].mxu1 %vm1204_vm0, %v17615_v15 }
 0x197   : > { %15832 = vmatprep.mubr.msk.bf16.mxu0 %vm1204_vm0, %v17616_v45  ;;  %16124 = vmatprep.mubr.msk.bf16.mxu1 %vm1204_vm0, %v17617_v31  ;;  %v17622_v31 = vld [vmem:[%s18048_s22 + $0xc70] sm:$0xff]  }
 0x199   : > { %v18975_v29 = vpop.f32.mrb[88].mxu0  ;;  %v18979_v9 = vpop.f32.mrb[88].mxu1 }
 0x19a   : > { %23778 = vst [vmem:[#allocation132_spill] sm:$0xff] %v18975_v29  ;;  %23779 = vst [vmem:[#allocation133_spill] sm:$0xff] %v18979_v9  ;;  %v18981_v47 = vpop.f32.mrb[89].mxu0  ;;  %v18985_v54 = vpop.f32.mrb[89].mxu1  ;;  %v17624_v9 = vld [vmem:[%s18048_s22 + $0xc78] sm:$0xff]  }
 0x19b   : > { %23780 = vst [vmem:[#allocation134_spill] sm:$0xff] %v18981_v47  ;;  %23781 = vst [vmem:[#allocation135_spill] sm:$0xff] %v18985_v54  ;;  %v18987_v45 = vpop.f32.mrb[90].mxu0  ;;  %v18991_v15 = vpop.f32.mrb[90].mxu1  ;;  %v17623_v47 = vld [vmem:[%s18048_s22 + $0xcb8] sm:$0xff]  }
 0x19c   : > { %23782 = vst [vmem:[#allocation136_spill] sm:$0xff] %v18987_v45  ;;  %23783 = vst [vmem:[#allocation137_spill] sm:$0xff] %v18991_v15  ;;  %v18993_v6 = vpop.f32.mrb[91].mxu0  ;;  %v18998_v57 = vpop.f32.mrb[91].mxu1 }
 0x19d   : > { %23784 = vst [vmem:[#allocation138_spill] sm:$0xff] %v18993_v6  ;;  %23785 = vst [vmem:[#allocation139_spill] sm:$0xff] %v18998_v57  ;;  %v17625_v6 = vld [vmem:[%s18048_s22 + $0xcc0] sm:$0xff]  }
 0x19e   : > { %15833 = vmatmul.mubr.msk.bf16.gmra.mrb[196].mxu0 %vm1204_vm0, %v17618_v60  ;;  %16125 = vmatmul.mubr.msk.bf16.gmra.mrb[196].mxu1 %vm1204_vm0, %v17619_v48 }
 0x19f   : > { %15836 = vmatprep.mubr.msk.bf16.mxu0 %vm1204_vm0, %v17620_v13  ;;  %16128 = vmatprep.mubr.msk.bf16.mxu1 %vm1204_vm0, %v17621_v63  ;;  %v17626_v63 = vld [vmem:[%s18048_s22 + $0xc80] sm:$0xff]  }
 0x1a1   : > { %v19007_v54 = vpop.f32.mrb[92].mxu0  ;;  %v19011_v61 = vpop.f32.mrb[92].mxu1 }
 0x1a2   : > { %23786 = vst [vmem:[#allocation140_spill] sm:$0xff] %v19007_v54  ;;  %23787 = vst [vmem:[#allocation141_spill] sm:$0xff] %v19011_v61  ;;  %v19013_v15 = vpop.f32.mrb[93].mxu0  ;;  %v19017_v18 = vpop.f32.mrb[93].mxu1  ;;  %v17628_v61 = vld [vmem:[%s18048_s22 + $0xc88] sm:$0xff]  }
 0x1a3   : > { %23788 = vst [vmem:[#allocation142_spill] sm:$0xff] %v19013_v15  ;;  %23789 = vst [vmem:[#allocation143_spill] sm:$0xff] %v19017_v18  ;;  %v19019_v13 = vpop.f32.mrb[94].mxu0  ;;  %v19023_v48 = vpop.f32.mrb[94].mxu1  ;;  %v17627_v15 = vld [vmem:[%s18048_s22 + $0xcc8] sm:$0xff]  }
 0x1a4   : > { %23790 = vst [vmem:[#allocation144_spill] sm:$0xff] %v19019_v13  ;;  %23791 = vst [vmem:[#allocation145_spill] sm:$0xff] %v19023_v48  ;;  %v19025_v57 = vpop.f32.mrb[95].mxu0  ;;  %v19030_v29 = vpop.f32.mrb[95].mxu1 }
 0x1a5   : > { %23792 = vst [vmem:[#allocation146_spill] sm:$0xff] %v19025_v57  ;;  %23793 = vst [vmem:[#allocation147_spill] sm:$0xff] %v19030_v29  ;;  %v17629_v57 = vld [vmem:[%s18048_s22 + $0xcd0] sm:$0xff]  }
 0x1a6   : > { %15837 = vmatmul.mubr.msk.bf16.gmra.mrb[200].mxu0 %vm1204_vm0, %v17622_v31  ;;  %16129 = vmatmul.mubr.msk.bf16.gmra.mrb[200].mxu1 %vm1204_vm0, %v17623_v47 }
 0x1a7   : > { %15840 = vmatprep.mubr.msk.bf16.mxu0 %vm1204_vm0, %v17624_v9  ;;  %16132 = vmatprep.mubr.msk.bf16.mxu1 %vm1204_vm0, %v17625_v6  ;;  %v17630_v6 = vld [vmem:[%s18048_s22 + $0xc90] sm:$0xff]  }
 0x1a9   : > { %v19039_v18 = vpop.f32.mrb[96].mxu0  ;;  %v19043_v45 = vpop.f32.mrb[96].mxu1 }
 0x1aa   : > { %23794 = vst [vmem:[#allocation148_spill] sm:$0xff] %v19039_v18  ;;  %23795 = vst [vmem:[#allocation149_spill] sm:$0xff] %v19043_v45  ;;  %v19045_v48 = vpop.f32.mrb[97].mxu0  ;;  %v19049_v60 = vpop.f32.mrb[97].mxu1  ;;  %v17632_v45 = vld [vmem:[%s18048_s22 + $0xc98] sm:$0xff]  }
 0x1ab   : > { %23796 = vst [vmem:[#allocation150_spill] sm:$0xff] %v19045_v48  ;;  %23797 = vst [vmem:[#allocation151_spill] sm:$0xff] %v19049_v60  ;;  %v19051_v9 = vpop.f32.mrb[98].mxu0  ;;  %v19055_v47 = vpop.f32.mrb[98].mxu1  ;;  %v17631_v48 = vld [vmem:[%s18048_s22 + $0xcd8] sm:$0xff]  }
 0x1ac   : > { %23798 = vst [vmem:[#allocation152_spill] sm:$0xff] %v19051_v9  ;;  %23799 = vst [vmem:[#allocation153_spill] sm:$0xff] %v19055_v47  ;;  %v19057_v29 = vpop.f32.mrb[99].mxu0  ;;  %v19062_v54 = vpop.f32.mrb[99].mxu1 }
 0x1ad   : > { %23800 = vst [vmem:[#allocation154_spill] sm:$0xff] %v19057_v29  ;;  %23801 = vst [vmem:[#allocation155_spill] sm:$0xff] %v19062_v54  ;;  %v17633_v29 = vld [vmem:[%s18048_s22 + $0xce0] sm:$0xff]  }
 0x1ae   : > { %15841 = vmatmul.mubr.msk.bf16.gmra.mrb[204].mxu0 %vm1204_vm0, %v17626_v63  ;;  %16133 = vmatmul.mubr.msk.bf16.gmra.mrb[204].mxu1 %vm1204_vm0, %v17627_v15 }
 0x1af   : > { %15844 = vmatprep.mubr.msk.bf16.mxu0 %vm1204_vm0, %v17628_v61  ;;  %16136 = vmatprep.mubr.msk.bf16.mxu1 %vm1204_vm0, %v17629_v57  ;;  %v17634_v57 = vld [vmem:[%s18048_s22 + $0xca0] sm:$0xff]  }
 0x1b1   : > { %v19071_v60 = vpop.f32.mrb[100].mxu0  ;;  %v19075_v13 = vpop.f32.mrb[100].mxu1 }
 0x1b2   : > { %23802 = vst [vmem:[#allocation156_spill] sm:$0xff] %v19071_v60  ;;  %23803 = vst [vmem:[#allocation157_spill] sm:$0xff] %v19075_v13  ;;  %v19077_v47 = vpop.f32.mrb[101].mxu0  ;;  %v19081_v31 = vpop.f32.mrb[101].mxu1  ;;  %v17636_v13 = vld [vmem:[%s18048_s22 + $0xd80] sm:$0xff]  }
 0x1b3   : > { %23804 = vst [vmem:[#allocation158_spill] sm:$0xff] %v19077_v47  ;;  %23805 = vst [vmem:[#allocation159_spill] sm:$0xff] %v19081_v31  ;;  %v19083_v61 = vpop.f32.mrb[102].mxu0  ;;  %v19087_v15 = vpop.f32.mrb[102].mxu1  ;;  %v17635_v47 = vld [vmem:[%s18048_s22 + $0xce8] sm:$0xff]  }
 0x1b4   : > { %23806 = vst [vmem:[#allocation160_spill] sm:$0xff] %v19083_v61  ;;  %23807 = vst [vmem:[#allocation161_spill] sm:$0xff] %v19087_v15  ;;  %v19089_v54 = vpop.f32.mrb[103].mxu0  ;;  %v19094_v18 = vpop.f32.mrb[103].mxu1 }
 0x1b5   : > { %23808 = vst [vmem:[#allocation162_spill] sm:$0xff] %v19089_v54  ;;  %23809 = vst [vmem:[#allocation163_spill] sm:$0xff] %v19094_v18  ;;  %v17637_v54 = vld [vmem:[%s18048_s22 + $0xdc8] sm:$0xff]  }
 0x1b6   : > { %15845 = vmatmul.mubr.msk.bf16.gmra.mrb[208].mxu0 %vm1204_vm0, %v17630_v6  ;;  %16137 = vmatmul.mubr.msk.bf16.gmra.mrb[208].mxu1 %vm1204_vm0, %v17631_v48 }
 0x1b7   : > { %15848 = vmatprep.mubr.msk.bf16.mxu0 %vm1204_vm0, %v17632_v45  ;;  %16140 = vmatprep.mubr.msk.bf16.mxu1 %vm1204_vm0, %v17633_v29  ;;  %v17638_v29 = vld [vmem:[%s18048_s22 + $0xd88] sm:$0xff]  }
 0x1b9   : > { %v19103_v31 = vpop.f32.mrb[104].mxu0  ;;  %v19107_v9 = vpop.f32.mrb[104].mxu1 }
 0x1ba   : > { %23810 = vst [vmem:[#allocation164_spill] sm:$0xff] %v19103_v31  ;;  %23811 = vst [vmem:[#allocation165_spill] sm:$0xff] %v19107_v9  ;;  %v19109_v15 = vpop.f32.mrb[105].mxu0  ;;  %v19113_v63 = vpop.f32.mrb[105].mxu1  ;;  %v17640_v9 = vld [vmem:[%s18048_s22 + $0xd90] sm:$0xff]  }
 0x1bb   : > { %23812 = vst [vmem:[#allocation166_spill] sm:$0xff] %v19109_v15  ;;  %23813 = vst [vmem:[#allocation167_spill] sm:$0xff] %v19113_v63  ;;  %v19115_v45 = vpop.f32.mrb[106].mxu0  ;;  %v19119_v48 = vpop.f32.mrb[106].mxu1  ;;  %v17639_v15 = vld [vmem:[%s18048_s22 + $0xdd0] sm:$0xff]  }
 0x1bc   : > { %23814 = vst [vmem:[#allocation168_spill] sm:$0xff] %v19115_v45  ;;  %23815 = vst [vmem:[#allocation169_spill] sm:$0xff] %v19119_v48  ;;  %v19121_v18 = vpop.f32.mrb[107].mxu0  ;;  %v19126_v60 = vpop.f32.mrb[107].mxu1 }
 0x1bd   : > { %23816 = vst [vmem:[#allocation170_spill] sm:$0xff] %v19121_v18  ;;  %23817 = vst [vmem:[#allocation171_spill] sm:$0xff] %v19126_v60  ;;  %v17641_v18 = vld [vmem:[%s18048_s22 + $0xdd8] sm:$0xff]  }
 0x1be   : > { %15849 = vmatmul.mubr.msk.bf16.gmra.mrb[212].mxu0 %vm1204_vm0, %v17634_v57  ;;  %16141 = vmatmul.mubr.msk.bf16.gmra.mrb[212].mxu1 %vm1204_vm0, %v17635_v47 }
 0x1bf   : > { %15852 = vmatprep.mubr.msk.bf16.mxu0 %vm1204_vm0, %v17636_v13  ;;  %16144 = vmatprep.mubr.msk.bf16.mxu1 %vm1204_vm0, %v17637_v54  ;;  %v17642_v54 = vld [vmem:[%s18048_s22 + $0xd98] sm:$0xff]  }
 0x1c1   : > { %v19135_v63 = vpop.f32.mrb[108].mxu0  ;;  %v19139_v61 = vpop.f32.mrb[108].mxu1 }
 0x1c2   : > { %23818 = vst [vmem:[#allocation172_spill] sm:$0xff] %v19135_v63  ;;  %23819 = vst [vmem:[#allocation173_spill] sm:$0xff] %v19139_v61  ;;  %v19141_v48 = vpop.f32.mrb[109].mxu0  ;;  %v19145_v6 = vpop.f32.mrb[109].mxu1  ;;  %v17644_v61 = vld [vmem:[%s18048_s22 + $0xda0] sm:$0xff]  }
 0x1c3   : > { %23820 = vst [vmem:[#allocation174_spill] sm:$0xff] %v19141_v48  ;;  %23821 = vst [vmem:[#allocation175_spill] sm:$0xff] %v19145_v6  ;;  %v19147_v13 = vpop.f32.mrb[110].mxu0  ;;  %v19151_v47 = vpop.f32.mrb[110].mxu1  ;;  %v17643_v48 = vld [vmem:[%s18048_s22 + $0xde0] sm:$0xff]  }
 0x1c4   : > { %23822 = vst [vmem:[#allocation176_spill] sm:$0xff] %v19147_v13  ;;  %23823 = vst [vmem:[#allocation177_spill] sm:$0xff] %v19151_v47  ;;  %v19153_v60 = vpop.f32.mrb[111].mxu0  ;;  %v19158_v31 = vpop.f32.mrb[111].mxu1 }
 0x1c5   : > { %23824 = vst [vmem:[#allocation178_spill] sm:$0xff] %v19153_v60  ;;  %23825 = vst [vmem:[#allocation179_spill] sm:$0xff] %v19158_v31  ;;  %v17645_v60 = vld [vmem:[%s18048_s22 + $0xde8] sm:$0xff]  }
 0x1c6   : > { %15853 = vmatmul.mubr.msk.bf16.gmra.mrb[216].mxu0 %vm1204_vm0, %v17638_v29  ;;  %16145 = vmatmul.mubr.msk.bf16.gmra.mrb[216].mxu1 %vm1204_vm0, %v17639_v15 }
 0x1c7   : > { %15856 = vmatprep.mubr.msk.bf16.mxu0 %vm1204_vm0, %v17640_v9  ;;  %16148 = vmatprep.mubr.msk.bf16.mxu1 %vm1204_vm0, %v17641_v18  ;;  %v17646_v18 = vld [vmem:[%s18048_s22 + $0xda8] sm:$0xff]  }
 0x1c9   : > { %v19167_v6 = vpop.f32.mrb[112].mxu0  ;;  %v19171_v45 = vpop.f32.mrb[112].mxu1 }
 0x1ca   : > { %23826 = vst [vmem:[#allocation180_spill] sm:$0xff] %v19167_v6  ;;  %23827 = vst [vmem:[#allocation181_spill] sm:$0xff] %v19171_v45  ;;  %v19173_v47 = vpop.f32.mrb[113].mxu0  ;;  %v19177_v57 = vpop.f32.mrb[113].mxu1  ;;  %v17648_v45 = vld [vmem:[%s18048_s22 + $0xdb0] sm:$0xff]  }
 0x1cb   : > { %23828 = vst [vmem:[#allocation182_spill] sm:$0xff] %v19173_v47  ;;  %23829 = vst [vmem:[#allocation183_spill] sm:$0xff] %v19177_v57  ;;  %v19179_v9 = vpop.f32.mrb[114].mxu0  ;;  %v19183_v15 = vpop.f32.mrb[114].mxu1  ;;  %v17647_v47 = vld [vmem:[%s18048_s22 + $0xdf0] sm:$0xff]  }
 0x1cc   : > { %23830 = vst [vmem:[#allocation184_spill] sm:$0xff] %v19179_v9  ;;  %23831 = vst [vmem:[#allocation185_spill] sm:$0xff] %v19183_v15  ;;  %v19185_v31 = vpop.f32.mrb[115].mxu0  ;;  %v19190_v63 = vpop.f32.mrb[115].mxu1 }
 0x1cd   : > { %23832 = vst [vmem:[#allocation186_spill] sm:$0xff] %v19185_v31  ;;  %23833 = vst [vmem:[#allocation187_spill] sm:$0xff] %v19190_v63  ;;  %v17649_v31 = vld [vmem:[%s18048_s22 + $0xdf8] sm:$0xff]  }
 0x1ce   : > { %15857 = vmatmul.mubr.msk.bf16.gmra.mrb[220].mxu0 %vm1204_vm0, %v17642_v54  ;;  %16149 = vmatmul.mubr.msk.bf16.gmra.mrb[220].mxu1 %vm1204_vm0, %v17643_v48 }
 0x1cf   : > { %15860 = vmatprep.mubr.msk.bf16.mxu0 %vm1204_vm0, %v17644_v61  ;;  %16152 = vmatprep.mubr.msk.bf16.mxu1 %vm1204_vm0, %v17645_v60  ;;  %v17650_v60 = vld [vmem:[%s18048_s22 + $0xdb8] sm:$0xff]  }
 0x1d1   : > { %v19199_v57 = vpop.f32.mrb[116].mxu0  ;;  %v19203_v13 = vpop.f32.mrb[116].mxu1 }
 0x1d2   : > { %23834 = vst [vmem:[#allocation188_spill] sm:$0xff] %v19199_v57  ;;  %23835 = vst [vmem:[#allocation189_spill] sm:$0xff] %v19203_v13  ;;  %v19205_v15 = vpop.f32.mrb[117].mxu0  ;;  %v19209_v29 = vpop.f32.mrb[117].mxu1  ;;  %v17652_v13 = vld [vmem:[%s18048_s22 + $0xdc0] sm:$0xff]  }
 0x1d3   : > { %23836 = vst [vmem:[#allocation190_spill] sm:$0xff] %v19205_v15  ;;  %23837 = vst [vmem:[#allocation191_spill] sm:$0xff] %v19209_v29  ;;  %v19211_v61 = vpop.f32.mrb[118].mxu0  ;;  %v19215_v48 = vpop.f32.mrb[118].mxu1  ;;  %v17651_v15 = vld [vmem:[%s18048_s22 + $0xe00] sm:$0xff]  }
 0x1d4   : > { %23838 = vst [vmem:[#allocation192_spill] sm:$0xff] %v19211_v61  ;;  %23839 = vst [vmem:[#allocation193_spill] sm:$0xff] %v19215_v48  ;;  %v19217_v63 = vpop.f32.mrb[119].mxu0  ;;  %v19222_v6 = vpop.f32.mrb[119].mxu1 }
 0x1d5   : > { %23840 = vst [vmem:[#allocation194_spill] sm:$0xff] %v19217_v63  ;;  %23841 = vst [vmem:[#allocation195_spill] sm:$0xff] %v19222_v6  ;;  %v17653_v63 = vld [vmem:[%s18048_s22 + $0xe08] sm:$0xff]  }
 0x1d6   : > { %15861 = vmatmul.mubr.msk.bf16.gmra.mrb[224].mxu0 %vm1204_vm0, %v17646_v18  ;;  %16153 = vmatmul.mubr.msk.bf16.gmra.mrb[224].mxu1 %vm1204_vm0, %v17647_v47 }
 0x1d7   : > { %15864 = vmatprep.mubr.msk.bf16.mxu0 %vm1204_vm0, %v17648_v45  ;;  %16156 = vmatprep.mubr.msk.bf16.mxu1 %vm1204_vm0, %v17649_v31  ;;  %v17654_v31 = vld [vmem:[%s18048_s22 + $0xea0] sm:$0xff]  }
 0x1d9   : > { %v19231_v29 = vpop.f32.mrb[120].mxu0  ;;  %v19235_v9 = vpop.f32.mrb[120].mxu1 }
 0x1da   : > { %23842 = vst [vmem:[#allocation196_spill] sm:$0xff] %v19231_v29  ;;  %23843 = vst [vmem:[#allocation197_spill] sm:$0xff] %v19235_v9  ;;  %v19237_v48 = vpop.f32.mrb[121].mxu0  ;;  %v19241_v54 = vpop.f32.mrb[121].mxu1  ;;  %v17656_v9 = vld [vmem:[%s18048_s22 + $0xea8] sm:$0xff]  }
 0x1db   : > { %23844 = vst [vmem:[#allocation198_spill] sm:$0xff] %v19237_v48  ;;  %23845 = vst [vmem:[#allocation199_spill] sm:$0xff] %v19241_v54  ;;  %v19243_v45 = vpop.f32.mrb[122].mxu0  ;;  %v19247_v47 = vpop.f32.mrb[122].mxu1  ;;  %v17655_v48 = vld [vmem:[%s18048_s22 + $0xee8] sm:$0xff]  }
 0x1dc   : > { %23846 = vst [vmem:[#allocation200_spill] sm:$0xff] %v19243_v45  ;;  %23847 = vst [vmem:[#allocation201_spill] sm:$0xff] %v19247_v47  ;;  %v19249_v6 = vpop.f32.mrb[123].mxu0  ;;  %v19254_v57 = vpop.f32.mrb[123].mxu1 }
 0x1dd   : > { %23848 = vst [vmem:[#allocation202_spill] sm:$0xff] %v19249_v6  ;;  %23849 = vst [vmem:[#allocation203_spill] sm:$0xff] %v19254_v57  ;;  %v17657_v6 = vld [vmem:[%s18048_s22 + $0xef0] sm:$0xff]  }
 0x1de   : > { %15865 = vmatmul.mubr.msk.bf16.gmra.mrb[228].mxu0 %vm1204_vm0, %v17650_v60  ;;  %16157 = vmatmul.mubr.msk.bf16.gmra.mrb[228].mxu1 %vm1204_vm0, %v17651_v15 }
 0x1df   : > { %15868 = vmatprep.mubr.msk.bf16.mxu0 %vm1204_vm0, %v17652_v13  ;;  %16160 = vmatprep.mubr.msk.bf16.mxu1 %vm1204_vm0, %v17653_v63  ;;  %v17658_v63 = vld [vmem:[%s18048_s22 + $0xeb0] sm:$0xff]  }
 0x1e1   : > { %v19263_v54 = vpop.f32.mrb[124].mxu0  ;;  %v19267_v61 = vpop.f32.mrb[124].mxu1 }
 0x1e2   : > { %23850 = vst [vmem:[#allocation204_spill] sm:$0xff] %v19263_v54  ;;  %23851 = vst [vmem:[#allocation205_spill] sm:$0xff] %v19267_v61  ;;  %v19269_v47 = vpop.f32.mrb[125].mxu0  ;;  %v19273_v18 = vpop.f32.mrb[125].mxu1  ;;  %v17660_v61 = vld [vmem:[%s18048_s22 + $0xeb8] sm:$0xff]  }
 0x1e3   : > { %23852 = vst [vmem:[#allocation206_spill] sm:$0xff] %v19269_v47  ;;  %23853 = vst [vmem:[#allocation207_spill] sm:$0xff] %v19273_v18  ;;  %v19275_v13 = vpop.f32.mrb[126].mxu0  ;;  %v19279_v15 = vpop.f32.mrb[126].mxu1  ;;  %v17659_v47 = vld [vmem:[%s18048_s22 + $0xef8] sm:$0xff]  }
 0x1e4   : > { %23854 = vst [vmem:[#allocation208_spill] sm:$0xff] %v19275_v13  ;;  %23855 = vst [vmem:[#allocation209_spill] sm:$0xff] %v19279_v15  ;;  %v19281_v57 = vpop.f32.mrb[127].mxu0  ;;  %v19286_v29 = vpop.f32.mrb[127].mxu1 }
 0x1e5   : > { %23856 = vst [vmem:[#allocation210_spill] sm:$0xff] %v19281_v57  ;;  %23857 = vst [vmem:[#allocation211_spill] sm:$0xff] %v19286_v29  ;;  %v17661_v57 = vld [vmem:[%s18048_s22 + $0xf00] sm:$0xff]  }
 0x1e6   : > { %15869 = vmatmul.mubr.msk.bf16.gmra.mrb[232].mxu0 %vm1204_vm0, %v17654_v31  ;;  %16161 = vmatmul.mubr.msk.bf16.gmra.mrb[232].mxu1 %vm1204_vm0, %v17655_v48 }
 0x1e7   : > { %15872 = vmatprep.mubr.msk.bf16.mxu0 %vm1204_vm0, %v17656_v9  ;;  %16164 = vmatprep.mubr.msk.bf16.mxu1 %vm1204_vm0, %v17657_v6  ;;  %v17662_v6 = vld [vmem:[%s18048_s22 + $0xec0] sm:$0xff]  }
 0x1e9   : > { %v19295_v18 = vpop.f32.mrb[128].mxu0  ;;  %v19299_v45 = vpop.f32.mrb[128].mxu1 }
 0x1ea   : > { %23858 = vst [vmem:[#allocation212_spill] sm:$0xff] %v19295_v18  ;;  %23859 = vst [vmem:[#allocation213_spill] sm:$0xff] %v19299_v45  ;;  %v19301_v15 = vpop.f32.mrb[129].mxu0  ;;  %v19305_v60 = vpop.f32.mrb[129].mxu1  ;;  %v17664_v45 = vld [vmem:[%s18048_s22 + $0xec8] sm:$0xff]  }
 0x1eb   : > { %23860 = vst [vmem:[#allocation214_spill] sm:$0xff] %v19301_v15  ;;  %23861 = vst [vmem:[#allocation215_spill] sm:$0xff] %v19305_v60  ;;  %v19307_v9 = vpop.f32.mrb[130].mxu0  ;;  %v19311_v48 = vpop.f32.mrb[130].mxu1  ;;  %v17663_v15 = vld [vmem:[%s18048_s22 + $0xf08] sm:$0xff]  }
 0x1ec   : > { %23862 = vst [vmem:[#allocation216_spill] sm:$0xff] %v19307_v9  ;;  %23863 = vst [vmem:[#allocation217_spill] sm:$0xff] %v19311_v48  ;;  %v19313_v29 = vpop.f32.mrb[131].mxu0  ;;  %v19318_v54 = vpop.f32.mrb[131].mxu1 }
 0x1ed   : > { %23864 = vst [vmem:[#allocation218_spill] sm:$0xff] %v19313_v29  ;;  %23865 = vst [vmem:[#allocation219_spill] sm:$0xff] %v19318_v54  ;;  %v17665_v29 = vld [vmem:[%s18048_s22 + $0xf10] sm:$0xff]  }
 0x1ee   : > { %15873 = vmatmul.mubr.msk.bf16.gmra.mrb[236].mxu0 %vm1204_vm0, %v17658_v63  ;;  %16165 = vmatmul.mubr.msk.bf16.gmra.mrb[236].mxu1 %vm1204_vm0, %v17659_v47 }
 0x1ef   : > { %15876 = vmatprep.mubr.msk.bf16.mxu0 %vm1204_vm0, %v17660_v61  ;;  %16168 = vmatprep.mubr.msk.bf16.mxu1 %vm1204_vm0, %v17661_v57  ;;  %v17666_v57 = vld [vmem:[%s18048_s22 + $0xed0] sm:$0xff]  }
 0x1f1   : > { %v19327_v60 = vpop.f32.mrb[132].mxu0  ;;  %v19331_v13 = vpop.f32.mrb[132].mxu1 }
 0x1f2   : > { %23866 = vst [vmem:[#allocation220_spill] sm:$0xff] %v19327_v60  ;;  %23867 = vst [vmem:[#allocation221_spill] sm:$0xff] %v19331_v13  ;;  %v19333_v48 = vpop.f32.mrb[133].mxu0  ;;  %v19337_v31 = vpop.f32.mrb[133].mxu1  ;;  %v17668_v13 = vld [vmem:[%s18048_s22 + $0xed8] sm:$0xff]  }
 0x1f3   : > { %23868 = vst [vmem:[#allocation222_spill] sm:$0xff] %v19333_v48  ;;  %23869 = vst [vmem:[#allocation223_spill] sm:$0xff] %v19337_v31  ;;  %v19339_v61 = vpop.f32.mrb[134].mxu0  ;;  %v19343_v47 = vpop.f32.mrb[134].mxu1  ;;  %v17667_v48 = vld [vmem:[%s18048_s22 + $0xf18] sm:$0xff]  }
 0x1f4   : > { %23870 = vst [vmem:[#allocation224_spill] sm:$0xff] %v19339_v61  ;;  %23871 = vst [vmem:[#allocation225_spill] sm:$0xff] %v19343_v47  ;;  %v19345_v54 = vpop.f32.mrb[135].mxu0  ;;  %v19350_v18 = vpop.f32.mrb[135].mxu1 }
 0x1f5   : > { %23872 = vst [vmem:[#allocation226_spill] sm:$0xff] %v19345_v54  ;;  %23873 = vst [vmem:[#allocation227_spill] sm:$0xff] %v19350_v18  ;;  %v17669_v54 = vld [vmem:[%s18048_s22 + $0xf20] sm:$0xff]  }
 0x1f6   : > { %15877 = vmatmul.mubr.msk.bf16.gmra.mrb[240].mxu0 %vm1204_vm0, %v17662_v6  ;;  %16169 = vmatmul.mubr.msk.bf16.gmra.mrb[240].mxu1 %vm1204_vm0, %v17663_v15 }
 0x1f7   : > { %15880 = vmatprep.mubr.msk.bf16.mxu0 %vm1204_vm0, %v17664_v45  ;;  %16172 = vmatprep.mubr.msk.bf16.mxu1 %vm1204_vm0, %v17665_v29  ;;  %v17670_v29 = vld [vmem:[%s18048_s22 + $0xee0] sm:$0xff]  }
 0x1f9   : > { %v19359_v31 = vpop.f32.mrb[136].mxu0  ;;  %v19363_v9 = vpop.f32.mrb[136].mxu1 }
 0x1fa   : > { %23874 = vst [vmem:[#allocation228_spill] sm:$0xff] %v19359_v31  ;;  %23875 = vst [vmem:[#allocation229_spill] sm:$0xff] %v19363_v9  ;;  %v19365_v47 = vpop.f32.mrb[137].mxu0  ;;  %v19369_v63 = vpop.f32.mrb[137].mxu1  ;;  %v17672_v9 = vld [vmem:[%s18048_s22 + $0xfc0] sm:$0xff]  }
 0x1fb   : > { %23876 = vst [vmem:[#allocation230_spill] sm:$0xff] %v19365_v47  ;;  %23877 = vst [vmem:[#allocation231_spill] sm:$0xff] %v19369_v63  ;;  %v19371_v45 = vpop.f32.mrb[138].mxu0  ;;  %v19375_v15 = vpop.f32.mrb[138].mxu1  ;;  %v17671_v47 = vld [vmem:[%s18048_s22 + $0xf28] sm:$0xff]  }
 0x1fc   : > { %23878 = vst [vmem:[#allocation232_spill] sm:$0xff] %v19371_v45  ;;  %23879 = vst [vmem:[#allocation233_spill] sm:$0xff] %v19375_v15  ;;  %v19377_v18 = vpop.f32.mrb[139].mxu0  ;;  %v19382_v60 = vpop.f32.mrb[139].mxu1 }
 0x1fd   : > { %23880 = vst [vmem:[#allocation234_spill] sm:$0xff] %v19377_v18  ;;  %23881 = vst [vmem:[#allocation235_spill] sm:$0xff] %v19382_v60  ;;  %v17673_v18 = vld [vmem:[%s18048_s22 + $0x1008] sm:$0xff]  }
 0x1fe   : > { %15881 = vmatmul.mubr.msk.bf16.gmra.mrb[244].mxu0 %vm1204_vm0, %v17666_v57  ;;  %16173 = vmatmul.mubr.msk.bf16.gmra.mrb[244].mxu1 %vm1204_vm0, %v17667_v48 }
 0x1ff   : > { %15884 = vmatprep.mubr.msk.bf16.mxu0 %vm1204_vm0, %v17668_v13  ;;  %16176 = vmatprep.mubr.msk.bf16.mxu1 %vm1204_vm0, %v17669_v54  ;;  %v17674_v54 = vld [vmem:[%s18048_s22 + $0xfc8] sm:$0xff]  }
 0x201   : > { %v19391_v63 = vpop.f32.mrb[140].mxu0  ;;  %v19395_v61 = vpop.f32.mrb[140].mxu1 }
 0x202   : > { %23882 = vst [vmem:[#allocation236_spill] sm:$0xff] %v19391_v63  ;;  %23883 = vst [vmem:[#allocation237_spill] sm:$0xff] %v19395_v61  ;;  %v19397_v15 = vpop.f32.mrb[141].mxu0  ;;  %v19401_v6 = vpop.f32.mrb[141].mxu1  ;;  %v17676_v61 = vld [vmem:[%s18048_s22 + $0xfd0] sm:$0xff]  }
 0x203   : > { %23884 = vst [vmem:[#allocation238_spill] sm:$0xff] %v19397_v15  ;;  %23885 = vst [vmem:[#allocation239_spill] sm:$0xff] %v19401_v6  ;;  %v19403_v13 = vpop.f32.mrb[142].mxu0  ;;  %v19407_v48 = vpop.f32.mrb[142].mxu1  ;;  %v17675_v15 = vld [vmem:[%s18048_s22 + $0x1010] sm:$0xff]  }
 0x204   : > { %23886 = vst [vmem:[#allocation240_spill] sm:$0xff] %v19403_v13  ;;  %23887 = vst [vmem:[#allocation241_spill] sm:$0xff] %v19407_v48  ;;  %v19409_v60 = vpop.f32.mrb[143].mxu0  ;;  %v19414_v31 = vpop.f32.mrb[143].mxu1 }
 0x205   : > { %23888 = vst [vmem:[#allocation242_spill] sm:$0xff] %v19409_v60  ;;  %23889 = vst [vmem:[#allocation243_spill] sm:$0xff] %v19414_v31  ;;  %v17677_v60 = vld [vmem:[%s18048_s22 + $0x1018] sm:$0xff]  }
 0x206   : > { %15885 = vmatmul.mubr.msk.bf16.gmra.mrb[248].mxu0 %vm1204_vm0, %v17670_v29  ;;  %16177 = vmatmul.mubr.msk.bf16.gmra.mrb[248].mxu1 %vm1204_vm0, %v17671_v47 }
 0x207   : > { %15888 = vmatprep.mubr.msk.bf16.mxu0 %vm1204_vm0, %v17672_v9  ;;  %16180 = vmatprep.mubr.msk.bf16.mxu1 %vm1204_vm0, %v17673_v18  ;;  %v17678_v18 = vld [vmem:[%s18048_s22 + $0xfd8] sm:$0xff]  }
 0x209   : > { %v19423_v6 = vpop.f32.mrb[144].mxu0  ;;  %v19427_v45 = vpop.f32.mrb[144].mxu1 }
 0x20a   : > { %23890 = vst [vmem:[#allocation244_spill] sm:$0xff] %v19423_v6  ;;  %23891 = vst [vmem:[#allocation245_spill] sm:$0xff] %v19427_v45  ;;  %v19429_v48 = vpop.f32.mrb[145].mxu0  ;;  %v19433_v57 = vpop.f32.mrb[145].mxu1  ;;  %v17680_v45 = vld [vmem:[%s18048_s22 + $0xfe0] sm:$0xff]  }
 0x20b   : > { %23892 = vst [vmem:[#allocation246_spill] sm:$0xff] %v19429_v48  ;;  %23893 = vst [vmem:[#allocation247_spill] sm:$0xff] %v19433_v57  ;;  %v19435_v9 = vpop.f32.mrb[146].mxu0  ;;  %v19439_v47 = vpop.f32.mrb[146].mxu1  ;;  %v17679_v48 = vld [vmem:[%s18048_s22 + $0x1020] sm:$0xff]  }
 0x20c   : > { %23894 = vst [vmem:[#allocation248_spill] sm:$0xff] %v19435_v9  ;;  %23895 = vst [vmem:[#allocation249_spill] sm:$0xff] %v19439_v47  ;;  %v19441_v31 = vpop.f32.mrb[147].mxu0  ;;  %v19446_v63 = vpop.f32.mrb[147].mxu1 }
 0x20d   : > { %23896 = vst [vmem:[#allocation250_spill] sm:$0xff] %v19441_v31  ;;  %23897 = vst [vmem:[#allocation251_spill] sm:$0xff] %v19446_v63  ;;  %v17681_v31 = vld [vmem:[%s18048_s22 + $0x1028] sm:$0xff]  }
 0x20e   : > { %15889 = vmatmul.mubr.msk.bf16.gmra.mrb[252].mxu0 %vm1204_vm0, %v17674_v54  ;;  %16181 = vmatmul.mubr.msk.bf16.gmra.mrb[252].mxu1 %vm1204_vm0, %v17675_v15 }
 0x20f   : > { %15892 = vmatprep.mubr.msk.bf16.mxu0 %vm1204_vm0, %v17676_v61  ;;  %16184 = vmatprep.mubr.msk.bf16.mxu1 %vm1204_vm0, %v17677_v60  ;;  %v17682_v60 = vld [vmem:[%s18048_s22 + $0xfe8] sm:$0xff]  }
 0x211   : > { %v19455_v57 = vpop.f32.mrb[148].mxu0  ;;  %v19459_v13 = vpop.f32.mrb[148].mxu1 }
 0x212   : > { %23898 = vst [vmem:[#allocation252_spill] sm:$0xff] %v19455_v57  ;;  %23899 = vst [vmem:[#allocation253_spill] sm:$0xff] %v19459_v13  ;;  %v19461_v47 = vpop.f32.mrb[149].mxu0  ;;  %v19465_v29 = vpop.f32.mrb[149].mxu1  ;;  %v17684_v13 = vld [vmem:[%s18048_s22 + $0xff0] sm:$0xff]  }
 0x213   : > { %23900 = vst [vmem:[#allocation254_spill] sm:$0xff] %v19461_v47  ;;  %23901 = vst [vmem:[#allocation255_spill] sm:$0xff] %v19465_v29  ;;  %v19467_v61 = vpop.f32.mrb[150].mxu0  ;;  %v19471_v15 = vpop.f32.mrb[150].mxu1  ;;  %v17683_v47 = vld [vmem:[%s18048_s22 + $0x1030] sm:$0xff]  }
 0x214   : > { %23902 = vst [vmem:[#allocation256_spill] sm:$0xff] %v19467_v61  ;;  %23903 = vst [vmem:[#allocation257_spill] sm:$0xff] %v19471_v15  ;;  %v19473_v63 = vpop.f32.mrb[151].mxu0  ;;  %v19478_v6 = vpop.f32.mrb[151].mxu1 }
 0x215   : > { %23904 = vst [vmem:[#allocation258_spill] sm:$0xff] %v19473_v63  ;;  %23905 = vst [vmem:[#allocation259_spill] sm:$0xff] %v19478_v6  ;;  %v17685_v63 = vld [vmem:[%s18048_s22 + $0x1038] sm:$0xff]  }
 0x216   : > { %15893 = vmatmul.mubr.msk.bf16.gmra.mrb[0].mxu0 %vm1204_vm0, %v17678_v18  ;;  %16185 = vmatmul.mubr.msk.bf16.gmra.mrb[0].mxu1 %vm1204_vm0, %v17679_v48 }
 0x217   : > { %15896 = vmatprep.mubr.msk.bf16.mxu0 %vm1204_vm0, %v17680_v45  ;;  %16188 = vmatprep.mubr.msk.bf16.mxu1 %vm1204_vm0, %v17681_v31  ;;  %v17686_v31 = vld [vmem:[%s18048_s22 + $0xff8] sm:$0xff]  }
 0x219   : > { %v19487_v29 = vpop.f32.mrb[152].mxu0  ;;  %v19491_v9 = vpop.f32.mrb[152].mxu1 }
 0x21a   : > { %23906 = vst [vmem:[#allocation260_spill] sm:$0xff] %v19487_v29  ;;  %23907 = vst [vmem:[#allocation261_spill] sm:$0xff] %v19491_v9  ;;  %v19493_v15 = vpop.f32.mrb[153].mxu0  ;;  %v19497_v54 = vpop.f32.mrb[153].mxu1  ;;  %v17688_v9 = vld [vmem:[%s18048_s22 + $0x1000] sm:$0xff]  }
 0x21b   : > { %23908 = vst [vmem:[#allocation262_spill] sm:$0xff] %v19493_v15  ;;  %23909 = vst [vmem:[#allocation263_spill] sm:$0xff] %v19497_v54  ;;  %v19499_v45 = vpop.f32.mrb[154].mxu0  ;;  %v19503_v48 = vpop.f32.mrb[154].mxu1  ;;  %v17687_v15 = vld [vmem:[%s18048_s22 + $0x1040] sm:$0xff]  }
 0x21c   : > { %23910 = vst [vmem:[#allocation264_spill] sm:$0xff] %v19499_v45  ;;  %23911 = vst [vmem:[#allocation265_spill] sm:$0xff] %v19503_v48  ;;  %v19505_v6 = vpop.f32.mrb[155].mxu0  ;;  %v19510_v57 = vpop.f32.mrb[155].mxu1  ;;  %v17690_v45 = vld [vmem:[%s18048_s22 + $0x10e0] sm:$0xff]  }
 0x21d   : > { %23912 = vst [vmem:[#allocation266_spill] sm:$0xff] %v19505_v6  ;;  %23913 = vst [vmem:[#allocation267_spill] sm:$0xff] %v19510_v57  ;;  %v17689_v6 = vld [vmem:[%s18048_s22 + $0x1048] sm:$0xff]  }
 0x21e   : > { %15897 = vmatmul.mubr.msk.bf16.gmra.mrb[4].mxu0 %vm1204_vm0, %v17682_v60  ;;  %16189 = vmatmul.mubr.msk.bf16.gmra.mrb[4].mxu1 %vm1204_vm0, %v17683_v47 }
 0x21f   : > { %15900 = vmatprep.mubr.msk.bf16.mxu0 %vm1204_vm0, %v17684_v13  ;;  %16192 = vmatprep.mubr.msk.bf16.mxu1 %vm1204_vm0, %v17685_v63 }
 0x221   : > { %v19519_v54 = vpop.f32.mrb[156].mxu0  ;;  %v19523_v61 = vpop.f32.mrb[156].mxu1 }
 0x222   : > { %23914 = vst [vmem:[#allocation268_spill] sm:$0xff] %v19519_v54  ;;  %23915 = vst [vmem:[#allocation269_spill] sm:$0xff] %v19523_v61  ;;  %v19525_v48 = vpop.f32.mrb[157].mxu0  ;;  %v19529_v60 = vpop.f32.mrb[157].mxu1  ;;  %v17818_v61 = vld [vmem:[%s18048_s22 + $0x758] sm:$0xff]  }
 0x223   : > { %23916 = vst [vmem:[#allocation270_spill] sm:$0xff] %v19525_v48  ;;  %23917 = vst [vmem:[#allocation271_spill] sm:$0xff] %v19529_v60  ;;  %v19531_v47 = vpop.f32.mrb[158].mxu0  ;;  %v19535_v13 = vpop.f32.mrb[158].mxu1 }
 0x224   : > { %23918 = vst [vmem:[#allocation272_spill] sm:$0xff] %v19531_v47  ;;  %23919 = vst [vmem:[#allocation273_spill] sm:$0xff] %v19535_v13  ;;  %v19537_v57 = vpop.f32.mrb[159].mxu0  ;;  %v19542_v29 = vpop.f32.mrb[159].mxu1  ;;  %v17693_v47 = vld [vmem:[%s18048_s22 + $0x1130] sm:$0xff]  }
 0x225   : > { %23920 = vst [vmem:[#allocation274_spill] sm:$0xff] %v19537_v57  ;;  %23921 = vst [vmem:[#allocation275_spill] sm:$0xff] %v19542_v29  ;;  %v17691_v29 = vld [vmem:[%s18048_s22 + $0x1128] sm:$0xff]   ;;  %v17694_v13 = vld [vmem:[%s18048_s22 + $0x10f0] sm:$0xff]  }
 0x226   : > { %15901 = vmatmul.mubr.msk.bf16.gmra.mrb[8].mxu0 %vm1204_vm0, %v17686_v31  ;;  %16193 = vmatmul.mubr.msk.bf16.gmra.mrb[8].mxu1 %vm1204_vm0, %v17687_v15  ;;  %v17692_v15 = vld [vmem:[%s18048_s22 + $0x10e8] sm:$0xff]  }
 0x227   : > { %15904 = vmatprep.mubr.msk.bf16.mxu0 %vm1204_vm0, %v17688_v9  ;;  %16196 = vmatprep.mubr.msk.bf16.mxu1 %vm1204_vm0, %v17689_v6 }
 0x229   : > { %v19550_v63 = vpop.f32.mrb[160].mxu0  ;;  %v19552_v60 = vpop.f32.mrb[160].mxu1 }
 0x22a   : > { %23922 = vst [vmem:[#allocation276_spill] sm:$0xff] %v19550_v63  ;;  %23923 = vst [vmem:[#allocation277_spill] sm:$0xff] %v19552_v60  ;;  %v19554_v48 = vpop.f32.mrb[161].mxu0  ;;  %v19559_v18 = vpop.f32.mrb[161].mxu1 }
 0x22b   : > { %23924 = vst [vmem:[#allocation278_spill] sm:$0xff] %v19554_v48  ;;  %23925 = vst [vmem:[#allocation279_spill] sm:$0xff] %v19559_v18  ;;  %v19561_v31 = vpop.f32.mrb[162].mxu0  ;;  %v19567_v9 = vpop.f32.mrb[162].mxu1 }
 0x22c   : > { %23926 = vst [vmem:[#allocation280_spill] sm:$0xff] %v19561_v31  ;;  %23927 = vst [vmem:[#allocation281_spill] sm:$0xff] %v19567_v9  ;;  %v19569_v57 = vpop.f32.mrb[163].mxu0  ;;  %v19574_v60 = vpop.f32.mrb[163].mxu1  ;;  %v17697_v31 = vld [vmem:[%s18048_s22 + $0x1140] sm:$0xff]  }
 0x22d   : > { %23928 = vst [vmem:[#allocation282_spill] sm:$0xff] %v19569_v57  ;;  %23929 = vst [vmem:[#allocation283_spill] sm:$0xff] %v19574_v60  ;;  %v17695_v60 = vld [vmem:[%s18048_s22 + $0x1138] sm:$0xff]   ;;  %v17698_v9 = vld [vmem:[%s18048_s22 + $0x1100] sm:$0xff]  }
 0x22e   : > { %15905 = vmatmul.mubr.msk.bf16.gmra.mrb[12].mxu0 %vm1204_vm0, %v17690_v45  ;;  %16197 = vmatmul.mubr.msk.bf16.gmra.mrb[12].mxu1 %vm1204_vm0, %v17691_v29  ;;  %v17696_v29 = vld [vmem:[%s18048_s22 + $0x10f8] sm:$0xff]  }
 0x22f   : > { %15908 = vmatprep.mubr.msk.bf16.mxu0 %vm1204_vm0, %v17692_v15  ;;  %16200 = vmatprep.mubr.msk.bf16.mxu1 %vm1204_vm0, %v17693_v47 }
 0x231   : > { %v19582_v6 = vpop.f32.mrb[164].mxu0  ;;  %v19584_v18 = vpop.f32.mrb[164].mxu1 }
 0x232   : > { %23930 = vst [vmem:[#allocation284_spill] sm:$0xff] %v19582_v6  ;;  %23931 = vst [vmem:[#allocation285_spill] sm:$0xff] %v19584_v18  ;;  %v19586_v48 = vpop.f32.mrb[165].mxu0  ;;  %v19591_v63 = vpop.f32.mrb[165].mxu1 }
 0x233   : > { %23932 = vst [vmem:[#allocation286_spill] sm:$0xff] %v19586_v48  ;;  %23933 = vst [vmem:[#allocation287_spill] sm:$0xff] %v19591_v63  ;;  %v19593_v45 = vpop.f32.mrb[166].mxu0  ;;  %v19599_v15 = vpop.f32.mrb[166].mxu1 }
 0x234   : > { %23934 = vst [vmem:[#allocation288_spill] sm:$0xff] %v19593_v45  ;;  %23935 = vst [vmem:[#allocation289_spill] sm:$0xff] %v19599_v15  ;;  %v19601_v57 = vpop.f32.mrb[167].mxu0  ;;  %v19606_v18 = vpop.f32.mrb[167].mxu1  ;;  %v17701_v45 = vld [vmem:[%s18048_s22 + $0x1150] sm:$0xff]  }
 0x235   : > { %23936 = vst [vmem:[#allocation290_spill] sm:$0xff] %v19601_v57  ;;  %23937 = vst [vmem:[#allocation291_spill] sm:$0xff] %v19606_v18  ;;  %v17699_v18 = vld [vmem:[%s18048_s22 + $0x1148] sm:$0xff]   ;;  %v17702_v15 = vld [vmem:[%s18048_s22 + $0x1110] sm:$0xff]  }
 0x236   : > { %15909 = vmatmul.mubr.msk.bf16.gmra.mrb[16].mxu0 %vm1204_vm0, %v17694_v13  ;;  %16201 = vmatmul.mubr.msk.bf16.gmra.mrb[16].mxu1 %vm1204_vm0, %v17695_v60  ;;  %v17700_v60 = vld [vmem:[%s18048_s22 + $0x1108] sm:$0xff]  }
 0x237   : > { %15912 = vmatprep.mubr.msk.bf16.mxu0 %vm1204_vm0, %v17696_v29  ;;  %16204 = vmatprep.mubr.msk.bf16.mxu1 %vm1204_vm0, %v17697_v31 }
 0x239   : > { %v19614_v47 = vpop.f32.mrb[168].mxu0  ;;  %v19616_v63 = vpop.f32.mrb[168].mxu1 }
 0x23a   : > { %23938 = vst [vmem:[#allocation292_spill] sm:$0xff] %v19614_v47  ;;  %23939 = vst [vmem:[#allocation293_spill] sm:$0xff] %v19616_v63  ;;  %v19618_v48 = vpop.f32.mrb[169].mxu0  ;;  %v19623_v6 = vpop.f32.mrb[169].mxu1 }
 0x23b   : > { %23940 = vst [vmem:[#allocation294_spill] sm:$0xff] %v19618_v48  ;;  %23941 = vst [vmem:[#allocation295_spill] sm:$0xff] %v19623_v6  ;;  %v19625_v13 = vpop.f32.mrb[170].mxu0  ;;  %v19631_v29 = vpop.f32.mrb[170].mxu1 }
 0x23c   : > { %23942 = vst [vmem:[#allocation296_spill] sm:$0xff] %v19625_v13  ;;  %23943 = vst [vmem:[#allocation297_spill] sm:$0xff] %v19631_v29  ;;  %v19633_v57 = vpop.f32.mrb[171].mxu0  ;;  %v19638_v63 = vpop.f32.mrb[171].mxu1  ;;  %v17705_v13 = vld [vmem:[%s18048_s22 + $0x1160] sm:$0xff]  }
 0x23d   : > { %23944 = vst [vmem:[#allocation298_spill] sm:$0xff] %v19633_v57  ;;  %23945 = vst [vmem:[#allocation299_spill] sm:$0xff] %v19638_v63  ;;  %v17703_v63 = vld [vmem:[%s18048_s22 + $0x1158] sm:$0xff]   ;;  %v17706_v29 = vld [vmem:[%s18048_s22 + $0x1120] sm:$0xff]  }
 0x23e   : > { %15913 = vmatmul.mubr.msk.bf16.gmra.mrb[20].mxu0 %vm1204_vm0, %v17698_v9  ;;  %16205 = vmatmul.mubr.msk.bf16.gmra.mrb[20].mxu1 %vm1204_vm0, %v17699_v18  ;;  %v17704_v18 = vld [vmem:[%s18048_s22 + $0x1118] sm:$0xff]  }
 0x23f   : > { %15916 = vmatprep.mubr.msk.bf16.mxu0 %vm1204_vm0, %v17700_v60  ;;  %16208 = vmatprep.mubr.msk.bf16.mxu1 %vm1204_vm0, %v17701_v45 }
 0x241   : > { %v19646_v31 = vpop.f32.mrb[172].mxu0  ;;  %v19648_v6 = vpop.f32.mrb[172].mxu1 }
 0x242   : > { %23946 = vst [vmem:[#allocation300_spill] sm:$0xff] %v19646_v31  ;;  %23947 = vst [vmem:[#allocation301_spill] sm:$0xff] %v19648_v6  ;;  %v19650_v48 = vpop.f32.mrb[173].mxu0  ;;  %v19655_v47 = vpop.f32.mrb[173].mxu1 }
 0x243   : > { %23948 = vst [vmem:[#allocation302_spill] sm:$0xff] %v19650_v48  ;;  %23949 = vst [vmem:[#allocation303_spill] sm:$0xff] %v19655_v47  ;;  %v19657_v9 = vpop.f32.mrb[174].mxu0  ;;  %v19663_v60 = vpop.f32.mrb[174].mxu1 }
 0x244   : > { %23950 = vst [vmem:[#allocation304_spill] sm:$0xff] %v19657_v9  ;;  %23951 = vst [vmem:[#allocation305_spill] sm:$0xff] %v19663_v60  ;;  %v19665_v57 = vpop.f32.mrb[175].mxu0  ;;  %v19670_v6 = vpop.f32.mrb[175].mxu1  ;;  %v17709_v9 = vld [vmem:[%s18048_s22 + $0xd8] sm:$0xff]  }
 0x245   : > { %23952 = vst [vmem:[#allocation306_spill] sm:$0xff] %v19665_v57  ;;  %23953 = vst [vmem:[#allocation307_spill] sm:$0xff] %v19670_v6  ;;  %v17707_v6 = vld [vmem:[%s18048_s22 + $0x1168] sm:$0xff]   ;;  %v17710_v60 = vld [vmem:[%s18048_s22 + $0x98] sm:$0xff]  }
 0x246   : > { %15917 = vmatmul.mubr.msk.bf16.gmra.mrb[24].mxu0 %vm1204_vm0, %v17702_v15  ;;  %16209 = vmatmul.mubr.msk.bf16.gmra.mrb[24].mxu1 %vm1204_vm0, %v17703_v63  ;;  %v17708_v63 = vld [vmem:[%s18048_s22 + $0x90] sm:$0xff]  }
 0x247   : > { %15920 = vmatprep.mubr.msk.bf16.mxu0 %vm1204_vm0, %v17704_v18  ;;  %16212 = vmatprep.mubr.msk.bf16.mxu1 %vm1204_vm0, %v17705_v13 }
 0x249   : > { %v19678_v45 = vpop.f32.mrb[176].mxu0  ;;  %v19680_v47 = vpop.f32.mrb[176].mxu1 }
 0x24a   : > { %23954 = vst [vmem:[#allocation308_spill] sm:$0xff] %v19678_v45  ;;  %23955 = vst [vmem:[#allocation309_spill] sm:$0xff] %v19680_v47  ;;  %v19682_v48 = vpop.f32.mrb[177].mxu0  ;;  %v19687_v31 = vpop.f32.mrb[177].mxu1 }
 0x24b   : > { %23956 = vst [vmem:[#allocation310_spill] sm:$0xff] %v19682_v48  ;;  %23957 = vst [vmem:[#allocation311_spill] sm:$0xff] %v19687_v31  ;;  %v19689_v15 = vpop.f32.mrb[178].mxu0  ;;  %v19695_v18 = vpop.f32.mrb[178].mxu1 }
 0x24c   : > { %23958 = vst [vmem:[#allocation312_spill] sm:$0xff] %v19689_v15  ;;  %23959 = vst [vmem:[#allocation313_spill] sm:$0xff] %v19695_v18  ;;  %v19697_v57 = vpop.f32.mrb[179].mxu0  ;;  %v19702_v47 = vpop.f32.mrb[179].mxu1  ;;  %v17713_v15 = vld [vmem:[%s18048_s22 + $0xe8] sm:$0xff]  }
 0x24d   : > { %23960 = vst [vmem:[#allocation314_spill] sm:$0xff] %v19697_v57  ;;  %23961 = vst [vmem:[#allocation315_spill] sm:$0xff] %v19702_v47  ;;  %v17711_v47 = vld [vmem:[%s18048_s22 + $0xe0] sm:$0xff]   ;;  %v17714_v18 = vld [vmem:[%s18048_s22 + $0xa8] sm:$0xff]  }
 0x24e   : > { %15921 = vmatmul.mubr.msk.bf16.gmra.mrb[28].mxu0 %vm1204_vm0, %v17706_v29  ;;  %16213 = vmatmul.mubr.msk.bf16.gmra.mrb[28].mxu1 %vm1204_vm0, %v17707_v6  ;;  %v17712_v6 = vld [vmem:[%s18048_s22 + $0xa0] sm:$0xff]  }
 0x24f   : > { %16220 = vmatprep.mubr.msk.bf16.mxu0 %vm1204_vm0, %v17708_v63  ;;  %16512 = vmatprep.mubr.msk.bf16.mxu1 %vm1204_vm0, %v17709_v9 }
 0x251   : > { %v19710_v13 = vpop.f32.mrb[180].mxu0  ;;  %v19712_v31 = vpop.f32.mrb[180].mxu1 }
 0x252   : > { %23962 = vst [vmem:[#allocation316_spill] sm:$0xff] %v19710_v13  ;;  %23963 = vst [vmem:[#allocation317_spill] sm:$0xff] %v19712_v31  ;;  %v19714_v48 = vpop.f32.mrb[181].mxu0  ;;  %v19719_v45 = vpop.f32.mrb[181].mxu1 }
 0x253   : > { %23964 = vst [vmem:[#allocation318_spill] sm:$0xff] %v19714_v48  ;;  %23965 = vst [vmem:[#allocation319_spill] sm:$0xff] %v19719_v45  ;;  %v19721_v29 = vpop.f32.mrb[182].mxu0  ;;  %v19727_v63 = vpop.f32.mrb[182].mxu1 }
 0x254   : > { %23966 = vst [vmem:[#allocation320_spill] sm:$0xff] %v19721_v29  ;;  %23967 = vst [vmem:[#allocation321_spill] sm:$0xff] %v19727_v63  ;;  %v19729_v57 = vpop.f32.mrb[183].mxu0  ;;  %v19734_v31 = vpop.f32.mrb[183].mxu1  ;;  %v17717_v29 = vld [vmem:[%s18048_s22 + $0xf8] sm:$0xff]  }
 0x255   : > { %23968 = vst [vmem:[#allocation322_spill] sm:$0xff] %v19729_v57  ;;  %23969 = vst [vmem:[#allocation323_spill] sm:$0xff] %v19734_v31  ;;  %v17715_v31 = vld [vmem:[%s18048_s22 + $0xf0] sm:$0xff]   ;;  %v17718_v63 = vld [vmem:[%s18048_s22 + $0xb8] sm:$0xff]  }
 0x256   : > { %16221 = vmatmul.mubr.msk.bf16.vlgmr.msra.gmra.mrb[32].mxu0 %vm1204_vm0, %v17710_v60  ;;  %16513 = vmatmul.mubr.msk.bf16.vlgmr.msra.gmra.mrb[32].mxu1 %vm1204_vm0, %v17711_v47  ;;  %v17716_v47 = vld [vmem:[%s18048_s22 + $0xb0] sm:$0xff]  }
 0x257   : > { %16224 = vmatprep.mubr.msk.bf16.mxu0 %vm1204_vm0, %v17712_v6  ;;  %16516 = vmatprep.mubr.msk.bf16.mxu1 %vm1204_vm0, %v17713_v15 }
 0x259   : > { %v19742_v9 = vpop.f32.mrb[184].mxu0  ;;  %v19744_v45 = vpop.f32.mrb[184].mxu1 }
 0x25a   : > { %23970 = vst [vmem:[#allocation324_spill] sm:$0xff] %v19742_v9  ;;  %23971 = vst [vmem:[#allocation325_spill] sm:$0xff] %v19744_v45  ;;  %v19746_v48 = vpop.f32.mrb[185].mxu0  ;;  %v19751_v13 = vpop.f32.mrb[185].mxu1 }
 0x25b   : > { %23972 = vst [vmem:[#allocation326_spill] sm:$0xff] %v19746_v48  ;;  %23973 = vst [vmem:[#allocation327_spill] sm:$0xff] %v19751_v13  ;;  %v19753_v60 = vpop.f32.mrb[186].mxu0  ;;  %v19759_v6 = vpop.f32.mrb[186].mxu1 }
 0x25c   : > { %23974 = vst [vmem:[#allocation328_spill] sm:$0xff] %v19753_v60  ;;  %23975 = vst [vmem:[#allocation329_spill] sm:$0xff] %v19759_v6  ;;  %v19761_v57 = vpop.f32.mrb[187].mxu0  ;;  %v19766_v45 = vpop.f32.mrb[187].mxu1  ;;  %v17721_v60 = vld [vmem:[%s18048_s22 + $0x108] sm:$0xff]  }
 0x25d   : > { %23976 = vst [vmem:[#allocation330_spill] sm:$0xff] %v19761_v57  ;;  %23977 = vst [vmem:[#allocation331_spill] sm:$0xff] %v19766_v45  ;;  %v17719_v45 = vld [vmem:[%s18048_s22 + $0x100] sm:$0xff]   ;;  %v17722_v6 = vld [vmem:[%s18048_s22 + $0xc8] sm:$0xff]  }
 0x25e   : > { %16225 = vmatmul.mubr.msk.bf16.gmra.mrb[36].mxu0 %vm1204_vm0, %v17714_v18  ;;  %16517 = vmatmul.mubr.msk.bf16.gmra.mrb[36].mxu1 %vm1204_vm0, %v17715_v31  ;;  %v17720_v31 = vld [vmem:[%s18048_s22 + $0xc0] sm:$0xff]  }
 0x25f   : > { %16228 = vmatprep.mubr.msk.bf16.mxu0 %vm1204_vm0, %v17716_v47  ;;  %16520 = vmatprep.mubr.msk.bf16.mxu1 %vm1204_vm0, %v17717_v29 }
 0x261   : > { %v19774_v15 = vpop.f32.mrb[188].mxu0  ;;  %v19776_v13 = vpop.f32.mrb[188].mxu1 }
 0x262   : > { %23978 = vst [vmem:[#allocation332_spill] sm:$0xff] %v19774_v15  ;;  %23979 = vst [vmem:[#allocation333_spill] sm:$0xff] %v19776_v13  ;;  %v19778_v48 = vpop.f32.mrb[189].mxu0  ;;  %v19783_v9 = vpop.f32.mrb[189].mxu1 }
 0x263   : > { %23980 = vst [vmem:[#allocation334_spill] sm:$0xff] %v19778_v48  ;;  %23981 = vst [vmem:[#allocation335_spill] sm:$0xff] %v19783_v9  ;;  %v19785_v18 = vpop.f32.mrb[190].mxu0  ;;  %v19791_v47 = vpop.f32.mrb[190].mxu1 }
 0x264   : > { %23982 = vst [vmem:[#allocation336_spill] sm:$0xff] %v19785_v18  ;;  %23983 = vst [vmem:[#allocation337_spill] sm:$0xff] %v19791_v47  ;;  %v19793_v57 = vpop.f32.mrb[191].mxu0  ;;  %v19798_v13 = vpop.f32.mrb[191].mxu1  ;;  %v17725_v18 = vld [vmem:[%s18048_s22 + $0x118] sm:$0xff]   ;;  %v17726_v47 = vld [vmem:[%s18048_s22 + $0x1b0] sm:$0xff]  }
 0x265   : > { %23984 = vst [vmem:[#allocation338_spill] sm:$0xff] %v19793_v57  ;;  %23985 = vst [vmem:[#allocation339_spill] sm:$0xff] %v19798_v13  ;;  %v17723_v13 = vld [vmem:[%s18048_s22 + $0x110] sm:$0xff]  }
 0x266   : > { %16229 = vmatmul.mubr.msk.bf16.gmra.mrb[40].mxu0 %vm1204_vm0, %v17718_v63  ;;  %16521 = vmatmul.mubr.msk.bf16.gmra.mrb[40].mxu1 %vm1204_vm0, %v17719_v45  ;;  %v17724_v45 = vld [vmem:[%s18048_s22 + $0xd0] sm:$0xff]  }
 0x267   : > { %16232 = vmatprep.mubr.msk.bf16.mxu0 %vm1204_vm0, %v17720_v31  ;;  %16524 = vmatprep.mubr.msk.bf16.mxu1 %vm1204_vm0, %v17721_v60 }
 0x269   : > { %v19806_v29 = vpop.f32.mrb[192].mxu0  ;;  %v19808_v9 = vpop.f32.mrb[192].mxu1 }
 0x26a   : > { %23986 = vst [vmem:[#allocation340_spill] sm:$0xff] %v19806_v29  ;;  %23987 = vst [vmem:[#allocation341_spill] sm:$0xff] %v19808_v9  ;;  %v19810_v48 = vpop.f32.mrb[193].mxu0  ;;  %v19815_v15 = vpop.f32.mrb[193].mxu1 }
 0x26b   : > { %23988 = vst [vmem:[#allocation342_spill] sm:$0xff] %v19810_v48  ;;  %23989 = vst [vmem:[#allocation343_spill] sm:$0xff] %v19815_v15  ;;  %v19817_v63 = vpop.f32.mrb[194].mxu0  ;;  %v19823_v31 = vpop.f32.mrb[194].mxu1 }
 0x26c   : > { %23990 = vst [vmem:[#allocation344_spill] sm:$0xff] %v19817_v63  ;;  %23991 = vst [vmem:[#allocation345_spill] sm:$0xff] %v19823_v31  ;;  %v19825_v57 = vpop.f32.mrb[195].mxu0  ;;  %v19830_v9 = vpop.f32.mrb[195].mxu1  ;;  %v17729_v63 = vld [vmem:[%s18048_s22 + $0x200] sm:$0xff]  }
 0x26d   : > { %23992 = vst [vmem:[#allocation346_spill] sm:$0xff] %v19825_v57  ;;  %23993 = vst [vmem:[#allocation347_spill] sm:$0xff] %v19830_v9  ;;  %v17727_v9 = vld [vmem:[%s18048_s22 + $0x1f8] sm:$0xff]   ;;  %v17730_v31 = vld [vmem:[%s18048_s22 + $0x1c0] sm:$0xff]  }
 0x26e   : > { %16233 = vmatmul.mubr.msk.bf16.gmra.mrb[44].mxu0 %vm1204_vm0, %v17722_v6  ;;  %16525 = vmatmul.mubr.msk.bf16.gmra.mrb[44].mxu1 %vm1204_vm0, %v17723_v13  ;;  %v17728_v13 = vld [vmem:[%s18048_s22 + $0x1b8] sm:$0xff]  }
 0x26f   : > { %16236 = vmatprep.mubr.msk.bf16.mxu0 %vm1204_vm0, %v17724_v45  ;;  %16528 = vmatprep.mubr.msk.bf16.mxu1 %vm1204_vm0, %v17725_v18 }
 0x271   : > { %v19838_v60 = vpop.f32.mrb[196].mxu0  ;;  %v19840_v15 = vpop.f32.mrb[196].mxu1 }
 0x272   : > { %23994 = vst [vmem:[#allocation348_spill] sm:$0xff] %v19838_v60  ;;  %23995 = vst [vmem:[#allocation349_spill] sm:$0xff] %v19840_v15  ;;  %v19842_v48 = vpop.f32.mrb[197].mxu0  ;;  %v19847_v29 = vpop.f32.mrb[197].mxu1 }
 0x273   : > { %23996 = vst [vmem:[#allocation350_spill] sm:$0xff] %v19842_v48  ;;  %23997 = vst [vmem:[#allocation351_spill] sm:$0xff] %v19847_v29  ;;  %v19849_v6 = vpop.f32.mrb[198].mxu0  ;;  %v19855_v45 = vpop.f32.mrb[198].mxu1 }
 0x274   : > { %23998 = vst [vmem:[#allocation352_spill] sm:$0xff] %v19849_v6  ;;  %23999 = vst [vmem:[#allocation353_spill] sm:$0xff] %v19855_v45  ;;  %v19857_v57 = vpop.f32.mrb[199].mxu0  ;;  %v19862_v15 = vpop.f32.mrb[199].mxu1  ;;  %v17733_v6 = vld [vmem:[%s18048_s22 + $0x210] sm:$0xff]  }
 0x275   : > { %24000 = vst [vmem:[#allocation354_spill] sm:$0xff] %v19857_v57  ;;  %24001 = vst [vmem:[#allocation355_spill] sm:$0xff] %v19862_v15  ;;  %v17731_v15 = vld [vmem:[%s18048_s22 + $0x208] sm:$0xff]   ;;  %v17734_v45 = vld [vmem:[%s18048_s22 + $0x1d0] sm:$0xff]  }
 0x276   : > { %16237 = vmatmul.mubr.msk.bf16.gmra.mrb[48].mxu0 %vm1204_vm0, %v17726_v47  ;;  %16529 = vmatmul.mubr.msk.bf16.gmra.mrb[48].mxu1 %vm1204_vm0, %v17727_v9  ;;  %v17732_v9 = vld [vmem:[%s18048_s22 + $0x1c8] sm:$0xff]  }
 0x277   : > { %16240 = vmatprep.mubr.msk.bf16.mxu0 %vm1204_vm0, %v17728_v13  ;;  %16532 = vmatprep.mubr.msk.bf16.mxu1 %vm1204_vm0, %v17729_v63 }
 0x279   : > { %v19870_v18 = vpop.f32.mrb[200].mxu0  ;;  %v19872_v29 = vpop.f32.mrb[200].mxu1 }
 0x27a   : > { %24002 = vst [vmem:[#allocation356_spill] sm:$0xff] %v19870_v18  ;;  %24003 = vst [vmem:[#allocation357_spill] sm:$0xff] %v19872_v29  ;;  %v19874_v48 = vpop.f32.mrb[201].mxu0  ;;  %v19879_v60 = vpop.f32.mrb[201].mxu1 }
 0x27b   : > { %24004 = vst [vmem:[#allocation358_spill] sm:$0xff] %v19874_v48  ;;  %24005 = vst [vmem:[#allocation359_spill] sm:$0xff] %v19879_v60  ;;  %v19881_v47 = vpop.f32.mrb[202].mxu0  ;;  %v19887_v13 = vpop.f32.mrb[202].mxu1 }
 0x27c   : > { %24006 = vst [vmem:[#allocation360_spill] sm:$0xff] %v19881_v47  ;;  %24007 = vst [vmem:[#allocation361_spill] sm:$0xff] %v19887_v13  ;;  %v19889_v57 = vpop.f32.mrb[203].mxu0  ;;  %v19894_v29 = vpop.f32.mrb[203].mxu1  ;;  %v17737_v47 = vld [vmem:[%s18048_s22 + $0x220] sm:$0xff]  }
 0x27d   : > { %24008 = vst [vmem:[#allocation362_spill] sm:$0xff] %v19889_v57  ;;  %24009 = vst [vmem:[#allocation363_spill] sm:$0xff] %v19894_v29  ;;  %v17735_v29 = vld [vmem:[%s18048_s22 + $0x218] sm:$0xff]   ;;  %v17738_v13 = vld [vmem:[%s18048_s22 + $0x1e0] sm:$0xff]  }
 0x27e   : > { %16241 = vmatmul.mubr.msk.bf16.gmra.mrb[52].mxu0 %vm1204_vm0, %v17730_v31  ;;  %16533 = vmatmul.mubr.msk.bf16.gmra.mrb[52].mxu1 %vm1204_vm0, %v17731_v15  ;;  %v17736_v15 = vld [vmem:[%s18048_s22 + $0x1d8] sm:$0xff]  }
 0x27f   : > { %16244 = vmatprep.mubr.msk.bf16.mxu0 %vm1204_vm0, %v17732_v9  ;;  %16536 = vmatprep.mubr.msk.bf16.mxu1 %vm1204_vm0, %v17733_v6 }
 0x281   : > { %v19902_v63 = vpop.f32.mrb[204].mxu0  ;;  %v19904_v60 = vpop.f32.mrb[204].mxu1 }
 0x282   : > { %24010 = vst [vmem:[#allocation364_spill] sm:$0xff] %v19902_v63  ;;  %24011 = vst [vmem:[#allocation365_spill] sm:$0xff] %v19904_v60  ;;  %v19906_v48 = vpop.f32.mrb[205].mxu0  ;;  %v19911_v18 = vpop.f32.mrb[205].mxu1 }
 0x283   : > { %24012 = vst [vmem:[#allocation366_spill] sm:$0xff] %v19906_v48  ;;  %24013 = vst [vmem:[#allocation367_spill] sm:$0xff] %v19911_v18  ;;  %v19913_v31 = vpop.f32.mrb[206].mxu0  ;;  %v19919_v9 = vpop.f32.mrb[206].mxu1 }
 0x284   : > { %24014 = vst [vmem:[#allocation368_spill] sm:$0xff] %v19913_v31  ;;  %24015 = vst [vmem:[#allocation369_spill] sm:$0xff] %v19919_v9  ;;  %v19921_v57 = vpop.f32.mrb[207].mxu0  ;;  %v19926_v60 = vpop.f32.mrb[207].mxu1  ;;  %v17741_v31 = vld [vmem:[%s18048_s22 + $0x230] sm:$0xff]  }
 0x285   : > { %24016 = vst [vmem:[#allocation370_spill] sm:$0xff] %v19921_v57  ;;  %24017 = vst [vmem:[#allocation371_spill] sm:$0xff] %v19926_v60  ;;  %v17739_v60 = vld [vmem:[%s18048_s22 + $0x228] sm:$0xff]   ;;  %v17742_v9 = vld [vmem:[%s18048_s22 + $0x1f0] sm:$0xff]  }
 0x286   : > { %16245 = vmatmul.mubr.msk.bf16.gmra.mrb[56].mxu0 %vm1204_vm0, %v17734_v45  ;;  %16537 = vmatmul.mubr.msk.bf16.gmra.mrb[56].mxu1 %vm1204_vm0, %v17735_v29  ;;  %v17740_v29 = vld [vmem:[%s18048_s22 + $0x1e8] sm:$0xff]  }
 0x287   : > { %16248 = vmatprep.mubr.msk.bf16.mxu0 %vm1204_vm0, %v17736_v15  ;;  %16540 = vmatprep.mubr.msk.bf16.mxu1 %vm1204_vm0, %v17737_v47 }
 0x289   : > { %v19934_v6 = vpop.f32.mrb[208].mxu0  ;;  %v19936_v18 = vpop.f32.mrb[208].mxu1 }
 0x28a   : > { %24018 = vst [vmem:[#allocation372_spill] sm:$0xff] %v19934_v6  ;;  %24019 = vst [vmem:[#allocation373_spill] sm:$0xff] %v19936_v18  ;;  %v19938_v48 = vpop.f32.mrb[209].mxu0  ;;  %v19943_v63 = vpop.f32.mrb[209].mxu1 }
 0x28b   : > { %24020 = vst [vmem:[#allocation374_spill] sm:$0xff] %v19938_v48  ;;  %24021 = vst [vmem:[#allocation375_spill] sm:$0xff] %v19943_v63  ;;  %v19945_v45 = vpop.f32.mrb[210].mxu0  ;;  %v19951_v15 = vpop.f32.mrb[210].mxu1 }
 0x28c   : > { %24022 = vst [vmem:[#allocation376_spill] sm:$0xff] %v19945_v45  ;;  %24023 = vst [vmem:[#allocation377_spill] sm:$0xff] %v19951_v15  ;;  %v19953_v57 = vpop.f32.mrb[211].mxu0  ;;  %v19958_v18 = vpop.f32.mrb[211].mxu1  ;;  %v17745_v45 = vld [vmem:[%s18048_s22 + $0x318] sm:$0xff]  }
 0x28d   : > { %24024 = vst [vmem:[#allocation378_spill] sm:$0xff] %v19953_v57  ;;  %24025 = vst [vmem:[#allocation379_spill] sm:$0xff] %v19958_v18  ;;  %v17743_v18 = vld [vmem:[%s18048_s22 + $0x238] sm:$0xff]  }
 0x28e   : > { %16249 = vmatmul.mubr.msk.bf16.gmra.mrb[60].mxu0 %vm1204_vm0, %v17738_v13  ;;  %16541 = vmatmul.mubr.msk.bf16.gmra.mrb[60].mxu1 %vm1204_vm0, %v17739_v60  ;;  %v17744_v60 = vld [vmem:[%s18048_s22 + $0x2d0] sm:$0xff]   ;;  %v17746_v15 = vld [vmem:[%s18048_s22 + $0x2d8] sm:$0xff]  }
 0x28f   : > { %16252 = vmatprep.mubr.msk.bf16.mxu0 %vm1204_vm0, %v17740_v29  ;;  %16544 = vmatprep.mubr.msk.bf16.mxu1 %vm1204_vm0, %v17741_v31 }
 0x291   : > { %v19966_v47 = vpop.f32.mrb[212].mxu0  ;;  %v19968_v63 = vpop.f32.mrb[212].mxu1 }
 0x292   : > { %24026 = vst [vmem:[#allocation380_spill] sm:$0xff] %v19966_v47  ;;  %24027 = vst [vmem:[#allocation381_spill] sm:$0xff] %v19968_v63  ;;  %v19970_v48 = vpop.f32.mrb[213].mxu0  ;;  %v19975_v6 = vpop.f32.mrb[213].mxu1 }
 0x293   : > { %24028 = vst [vmem:[#allocation382_spill] sm:$0xff] %v19970_v48  ;;  %24029 = vst [vmem:[#allocation383_spill] sm:$0xff] %v19975_v6  ;;  %v19977_v13 = vpop.f32.mrb[214].mxu0  ;;  %v19983_v29 = vpop.f32.mrb[214].mxu1 }
 0x294   : > { %24030 = vst [vmem:[#allocation384_spill] sm:$0xff] %v19977_v13  ;;  %24031 = vst [vmem:[#allocation385_spill] sm:$0xff] %v19983_v29  ;;  %v19985_v57 = vpop.f32.mrb[215].mxu0  ;;  %v19990_v63 = vpop.f32.mrb[215].mxu1  ;;  %v17749_v13 = vld [vmem:[%s18048_s22 + $0x328] sm:$0xff]  }
 0x295   : > { %24032 = vst [vmem:[#allocation386_spill] sm:$0xff] %v19985_v57  ;;  %24033 = vst [vmem:[#allocation387_spill] sm:$0xff] %v19990_v63  ;;  %v17747_v63 = vld [vmem:[%s18048_s22 + $0x320] sm:$0xff]   ;;  %v17750_v29 = vld [vmem:[%s18048_s22 + $0x2e8] sm:$0xff]  }
 0x296   : > { %16253 = vmatmul.mubr.msk.bf16.gmra.mrb[64].mxu0 %vm1204_vm0, %v17742_v9  ;;  %16545 = vmatmul.mubr.msk.bf16.gmra.mrb[64].mxu1 %vm1204_vm0, %v17743_v18  ;;  %v17748_v18 = vld [vmem:[%s18048_s22 + $0x2e0] sm:$0xff]  }
 0x297   : > { %16256 = vmatprep.mubr.msk.bf16.mxu0 %vm1204_vm0, %v17744_v60  ;;  %16548 = vmatprep.mubr.msk.bf16.mxu1 %vm1204_vm0, %v17745_v45 }
 0x299   : > { %v19998_v31 = vpop.f32.mrb[216].mxu0  ;;  %v20000_v6 = vpop.f32.mrb[216].mxu1 }
 0x29a   : > { %24034 = vst [vmem:[#allocation388_spill] sm:$0xff] %v19998_v31  ;;  %24035 = vst [vmem:[#allocation389_spill] sm:$0xff] %v20000_v6  ;;  %v20002_v48 = vpop.f32.mrb[217].mxu0  ;;  %v20007_v47 = vpop.f32.mrb[217].mxu1 }
 0x29b   : > { %24036 = vst [vmem:[#allocation390_spill] sm:$0xff] %v20002_v48  ;;  %24037 = vst [vmem:[#allocation391_spill] sm:$0xff] %v20007_v47  ;;  %v20009_v9 = vpop.f32.mrb[218].mxu0  ;;  %v20015_v60 = vpop.f32.mrb[218].mxu1 }
 0x29c   : > { %24038 = vst [vmem:[#allocation392_spill] sm:$0xff] %v20009_v9  ;;  %24039 = vst [vmem:[#allocation393_spill] sm:$0xff] %v20015_v60  ;;  %v20017_v57 = vpop.f32.mrb[219].mxu0  ;;  %v20022_v6 = vpop.f32.mrb[219].mxu1  ;;  %v17753_v9 = vld [vmem:[%s18048_s22 + $0x338] sm:$0xff]  }
 0x29d   : > { %24040 = vst [vmem:[#allocation394_spill] sm:$0xff] %v20017_v57  ;;  %24041 = vst [vmem:[#allocation395_spill] sm:$0xff] %v20022_v6  ;;  %v17751_v6 = vld [vmem:[%s18048_s22 + $0x330] sm:$0xff]   ;;  %v17754_v60 = vld [vmem:[%s18048_s22 + $0x2f8] sm:$0xff]  }
 0x29e   : > { %16257 = vmatmul.mubr.msk.bf16.gmra.mrb[68].mxu0 %vm1204_vm0, %v17746_v15  ;;  %16549 = vmatmul.mubr.msk.bf16.gmra.mrb[68].mxu1 %vm1204_vm0, %v17747_v63  ;;  %v17752_v63 = vld [vmem:[%s18048_s22 + $0x2f0] sm:$0xff]  }
 0x29f   : > { %16260 = vmatprep.mubr.msk.bf16.mxu0 %vm1204_vm0, %v17748_v18  ;;  %16552 = vmatprep.mubr.msk.bf16.mxu1 %vm1204_vm0, %v17749_v13 }
 0x2a1   : > { %v20030_v45 = vpop.f32.mrb[220].mxu0  ;;  %v20032_v47 = vpop.f32.mrb[220].mxu1 }
 0x2a2   : > { %24042 = vst [vmem:[#allocation396_spill] sm:$0xff] %v20030_v45  ;;  %24043 = vst [vmem:[#allocation397_spill] sm:$0xff] %v20032_v47  ;;  %v20034_v48 = vpop.f32.mrb[221].mxu0  ;;  %v20039_v31 = vpop.f32.mrb[221].mxu1 }
 0x2a3   : > { %24044 = vst [vmem:[#allocation398_spill] sm:$0xff] %v20034_v48  ;;  %24045 = vst [vmem:[#allocation399_spill] sm:$0xff] %v20039_v31  ;;  %v20041_v15 = vpop.f32.mrb[222].mxu0  ;;  %v20047_v18 = vpop.f32.mrb[222].mxu1 }
 0x2a4   : > { %24046 = vst [vmem:[#allocation400_spill] sm:$0xff] %v20041_v15  ;;  %24047 = vst [vmem:[#allocation401_spill] sm:$0xff] %v20047_v18  ;;  %v20049_v57 = vpop.f32.mrb[223].mxu0  ;;  %v20054_v47 = vpop.f32.mrb[223].mxu1  ;;  %v17757_v15 = vld [vmem:[%s18048_s22 + $0x348] sm:$0xff]  }
 0x2a5   : > { %24048 = vst [vmem:[#allocation402_spill] sm:$0xff] %v20049_v57  ;;  %24049 = vst [vmem:[#allocation403_spill] sm:$0xff] %v20054_v47  ;;  %v17755_v47 = vld [vmem:[%s18048_s22 + $0x340] sm:$0xff]   ;;  %v17758_v18 = vld [vmem:[%s18048_s22 + $0x308] sm:$0xff]  }
 0x2a6   : > { %16261 = vmatmul.mubr.msk.bf16.gmra.mrb[72].mxu0 %vm1204_vm0, %v17750_v29  ;;  %16553 = vmatmul.mubr.msk.bf16.gmra.mrb[72].mxu1 %vm1204_vm0, %v17751_v6  ;;  %v17756_v6 = vld [vmem:[%s18048_s22 + $0x300] sm:$0xff]  }
 0x2a7   : > { %16264 = vmatprep.mubr.msk.bf16.mxu0 %vm1204_vm0, %v17752_v63  ;;  %16556 = vmatprep.mubr.msk.bf16.mxu1 %vm1204_vm0, %v17753_v9 }
 0x2a9   : > { %v20062_v13 = vpop.f32.mrb[224].mxu0  ;;  %v20064_v31 = vpop.f32.mrb[224].mxu1 }
 0x2aa   : > { %24050 = vst [vmem:[#allocation404_spill] sm:$0xff] %v20062_v13  ;;  %24051 = vst [vmem:[#allocation405_spill] sm:$0xff] %v20064_v31  ;;  %v20066_v48 = vpop.f32.mrb[225].mxu0  ;;  %v20071_v45 = vpop.f32.mrb[225].mxu1 }
 0x2ab   : > { %24052 = vst [vmem:[#allocation406_spill] sm:$0xff] %v20066_v48  ;;  %24053 = vst [vmem:[#allocation407_spill] sm:$0xff] %v20071_v45  ;;  %v20073_v29 = vpop.f32.mrb[226].mxu0  ;;  %v20079_v63 = vpop.f32.mrb[226].mxu1 }
 0x2ac   : > { %24054 = vst [vmem:[#allocation408_spill] sm:$0xff] %v20073_v29  ;;  %24055 = vst [vmem:[#allocation409_spill] sm:$0xff] %v20079_v63  ;;  %v20081_v57 = vpop.f32.mrb[227].mxu0  ;;  %v20086_v31 = vpop.f32.mrb[227].mxu1  ;;  %v17761_v29 = vld [vmem:[%s18048_s22 + $0x358] sm:$0xff]   ;;  %v17762_v63 = vld [vmem:[%s18048_s22 + $0x3f0] sm:$0xff]  }
 0x2ad   : > { %24056 = vst [vmem:[#allocation410_spill] sm:$0xff] %v20081_v57  ;;  %24057 = vst [vmem:[#allocation411_spill] sm:$0xff] %v20086_v31  ;;  %v17759_v31 = vld [vmem:[%s18048_s22 + $0x350] sm:$0xff]  }
 0x2ae   : > { %16265 = vmatmul.mubr.msk.bf16.gmra.mrb[76].mxu0 %vm1204_vm0, %v17754_v60  ;;  %16557 = vmatmul.mubr.msk.bf16.gmra.mrb[76].mxu1 %vm1204_vm0, %v17755_v47  ;;  %v17760_v47 = vld [vmem:[%s18048_s22 + $0x310] sm:$0xff]  }
 0x2af   : > { %16268 = vmatprep.mubr.msk.bf16.mxu0 %vm1204_vm0, %v17756_v6  ;;  %16560 = vmatprep.mubr.msk.bf16.mxu1 %vm1204_vm0, %v17757_v15 }
 0x2b1   : > { %v20094_v9 = vpop.f32.mrb[228].mxu0  ;;  %v20096_v45 = vpop.f32.mrb[228].mxu1 }
 0x2b2   : > { %24058 = vst [vmem:[#allocation412_spill] sm:$0xff] %v20094_v9  ;;  %24059 = vst [vmem:[#allocation413_spill] sm:$0xff] %v20096_v45  ;;  %v20098_v48 = vpop.f32.mrb[229].mxu0  ;;  %v20103_v13 = vpop.f32.mrb[229].mxu1 }
 0x2b3   : > { %24060 = vst [vmem:[#allocation414_spill] sm:$0xff] %v20098_v48  ;;  %24061 = vst [vmem:[#allocation415_spill] sm:$0xff] %v20103_v13  ;;  %v20105_v60 = vpop.f32.mrb[230].mxu0  ;;  %v20111_v6 = vpop.f32.mrb[230].mxu1 }
 0x2b4   : > { %24062 = vst [vmem:[#allocation416_spill] sm:$0xff] %v20105_v60  ;;  %24063 = vst [vmem:[#allocation417_spill] sm:$0xff] %v20111_v6  ;;  %v20113_v57 = vpop.f32.mrb[231].mxu0  ;;  %v20118_v45 = vpop.f32.mrb[231].mxu1  ;;  %v17765_v60 = vld [vmem:[%s18048_s22 + $0x440] sm:$0xff]  }
 0x2b5   : > { %24064 = vst [vmem:[#allocation418_spill] sm:$0xff] %v20113_v57  ;;  %24065 = vst [vmem:[#allocation419_spill] sm:$0xff] %v20118_v45  ;;  %v17763_v45 = vld [vmem:[%s18048_s22 + $0x438] sm:$0xff]   ;;  %v17766_v6 = vld [vmem:[%s18048_s22 + $0x400] sm:$0xff]  }
 0x2b6   : > { %16269 = vmatmul.mubr.msk.bf16.gmra.mrb[80].mxu0 %vm1204_vm0, %v17758_v18  ;;  %16561 = vmatmul.mubr.msk.bf16.gmra.mrb[80].mxu1 %vm1204_vm0, %v17759_v31  ;;  %v17764_v31 = vld [vmem:[%s18048_s22 + $0x3f8] sm:$0xff]  }
 0x2b7   : > { %16272 = vmatprep.mubr.msk.bf16.mxu0 %vm1204_vm0, %v17760_v47  ;;  %16564 = vmatprep.mubr.msk.bf16.mxu1 %vm1204_vm0, %v17761_v29 }
 0x2b9   : > { %v20126_v15 = vpop.f32.mrb[232].mxu0  ;;  %v20128_v13 = vpop.f32.mrb[232].mxu1 }
 0x2ba   : > { %24066 = vst [vmem:[#allocation420_spill] sm:$0xff] %v20126_v15  ;;  %24067 = vst [vmem:[#allocation421_spill] sm:$0xff] %v20128_v13  ;;  %v20130_v48 = vpop.f32.mrb[233].mxu0  ;;  %v20135_v9 = vpop.f32.mrb[233].mxu1 }
 0x2bb   : > { %24068 = vst [vmem:[#allocation422_spill] sm:$0xff] %v20130_v48  ;;  %24069 = vst [vmem:[#allocation423_spill] sm:$0xff] %v20135_v9  ;;  %v20137_v18 = vpop.f32.mrb[234].mxu0  ;;  %v20143_v47 = vpop.f32.mrb[234].mxu1 }
 0x2bc   : > { %24070 = vst [vmem:[#allocation424_spill] sm:$0xff] %v20137_v18  ;;  %24071 = vst [vmem:[#allocation425_spill] sm:$0xff] %v20143_v47  ;;  %v20145_v57 = vpop.f32.mrb[235].mxu0  ;;  %v20150_v13 = vpop.f32.mrb[235].mxu1  ;;  %v17769_v18 = vld [vmem:[%s18048_s22 + $0x450] sm:$0xff]  }
 0x2bd   : > { %24072 = vst [vmem:[#allocation426_spill] sm:$0xff] %v20145_v57  ;;  %24073 = vst [vmem:[#allocation427_spill] sm:$0xff] %v20150_v13  ;;  %v17767_v13 = vld [vmem:[%s18048_s22 + $0x448] sm:$0xff]   ;;  %v17770_v47 = vld [vmem:[%s18048_s22 + $0x410] sm:$0xff]  }
 0x2be   : > { %16273 = vmatmul.mubr.msk.bf16.gmra.mrb[84].mxu0 %vm1204_vm0, %v17762_v63  ;;  %16565 = vmatmul.mubr.msk.bf16.gmra.mrb[84].mxu1 %vm1204_vm0, %v17763_v45  ;;  %v17768_v45 = vld [vmem:[%s18048_s22 + $0x408] sm:$0xff]  }
 0x2bf   : > { %16276 = vmatprep.mubr.msk.bf16.mxu0 %vm1204_vm0, %v17764_v31  ;;  %16568 = vmatprep.mubr.msk.bf16.mxu1 %vm1204_vm0, %v17765_v60 }
 0x2c1   : > { %v20158_v29 = vpop.f32.mrb[236].mxu0  ;;  %v20160_v9 = vpop.f32.mrb[236].mxu1 }
 0x2c2   : > { %24074 = vst [vmem:[#allocation428_spill] sm:$0xff] %v20158_v29  ;;  %24075 = vst [vmem:[#allocation429_spill] sm:$0xff] %v20160_v9  ;;  %v20162_v48 = vpop.f32.mrb[237].mxu0  ;;  %v20167_v15 = vpop.f32.mrb[237].mxu1 }
 0x2c3   : > { %24076 = vst [vmem:[#allocation430_spill] sm:$0xff] %v20162_v48  ;;  %24077 = vst [vmem:[#allocation431_spill] sm:$0xff] %v20167_v15  ;;  %v20169_v63 = vpop.f32.mrb[238].mxu0  ;;  %v20175_v31 = vpop.f32.mrb[238].mxu1 }
 0x2c4   : > { %24078 = vst [vmem:[#allocation432_spill] sm:$0xff] %v20169_v63  ;;  %24079 = vst [vmem:[#allocation433_spill] sm:$0xff] %v20175_v31  ;;  %v20177_v57 = vpop.f32.mrb[239].mxu0  ;;  %v20182_v9 = vpop.f32.mrb[239].mxu1  ;;  %v17773_v63 = vld [vmem:[%s18048_s22 + $0x460] sm:$0xff]  }
 0x2c5   : > { %24080 = vst [vmem:[#allocation434_spill] sm:$0xff] %v20177_v57  ;;  %24081 = vst [vmem:[#allocation435_spill] sm:$0xff] %v20182_v9  ;;  %v17771_v9 = vld [vmem:[%s18048_s22 + $0x458] sm:$0xff]   ;;  %v17774_v31 = vld [vmem:[%s18048_s22 + $0x420] sm:$0xff]  }
 0x2c6   : > { %16277 = vmatmul.mubr.msk.bf16.gmra.mrb[88].mxu0 %vm1204_vm0, %v17766_v6  ;;  %16569 = vmatmul.mubr.msk.bf16.gmra.mrb[88].mxu1 %vm1204_vm0, %v17767_v13  ;;  %v17772_v13 = vld [vmem:[%s18048_s22 + $0x418] sm:$0xff]  }
 0x2c7   : > { %16280 = vmatprep.mubr.msk.bf16.mxu0 %vm1204_vm0, %v17768_v45  ;;  %16572 = vmatprep.mubr.msk.bf16.mxu1 %vm1204_vm0, %v17769_v18 }
 0x2c9   : > { %v20190_v60 = vpop.f32.mrb[240].mxu0  ;;  %v20192_v15 = vpop.f32.mrb[240].mxu1 }
 0x2ca   : > { %24082 = vst [vmem:[#allocation436_spill] sm:$0xff] %v20190_v60  ;;  %24083 = vst [vmem:[#allocation437_spill] sm:$0xff] %v20192_v15  ;;  %v20194_v48 = vpop.f32.mrb[241].mxu0  ;;  %v20199_v29 = vpop.f32.mrb[241].mxu1 }
 0x2cb   : > { %24084 = vst [vmem:[#allocation438_spill] sm:$0xff] %v20194_v48  ;;  %24085 = vst [vmem:[#allocation439_spill] sm:$0xff] %v20199_v29  ;;  %v20201_v6 = vpop.f32.mrb[242].mxu0  ;;  %v20207_v45 = vpop.f32.mrb[242].mxu1 }
 0x2cc   : > { %24086 = vst [vmem:[#allocation440_spill] sm:$0xff] %v20201_v6  ;;  %24087 = vst [vmem:[#allocation441_spill] sm:$0xff] %v20207_v45  ;;  %v20209_v57 = vpop.f32.mrb[243].mxu0  ;;  %v20214_v15 = vpop.f32.mrb[243].mxu1  ;;  %v17777_v6 = vld [vmem:[%s18048_s22 + $0x470] sm:$0xff]  }
 0x2cd   : > { %24088 = vst [vmem:[#allocation442_spill] sm:$0xff] %v20209_v57  ;;  %24089 = vst [vmem:[#allocation443_spill] sm:$0xff] %v20214_v15  ;;  %v17775_v15 = vld [vmem:[%s18048_s22 + $0x468] sm:$0xff]   ;;  %v17778_v45 = vld [vmem:[%s18048_s22 + $0x430] sm:$0xff]  }
 0x2ce   : > { %16281 = vmatmul.mubr.msk.bf16.gmra.mrb[92].mxu0 %vm1204_vm0, %v17770_v47  ;;  %16573 = vmatmul.mubr.msk.bf16.gmra.mrb[92].mxu1 %vm1204_vm0, %v17771_v9  ;;  %v17776_v9 = vld [vmem:[%s18048_s22 + $0x428] sm:$0xff]  }
 0x2cf   : > { %16284 = vmatprep.mubr.msk.bf16.mxu0 %vm1204_vm0, %v17772_v13  ;;  %16576 = vmatprep.mubr.msk.bf16.mxu1 %vm1204_vm0, %v17773_v63 }
 0x2d1   : > { %v20222_v18 = vpop.f32.mrb[244].mxu0  ;;  %v20224_v29 = vpop.f32.mrb[244].mxu1 }
 0x2d2   : > { %24090 = vst [vmem:[#allocation444_spill] sm:$0xff] %v20222_v18  ;;  %24091 = vst [vmem:[#allocation445_spill] sm:$0xff] %v20224_v29  ;;  %v20226_v48 = vpop.f32.mrb[245].mxu0  ;;  %v20231_v60 = vpop.f32.mrb[245].mxu1 }
 0x2d3   : > { %24092 = vst [vmem:[#allocation446_spill] sm:$0xff] %v20226_v48  ;;  %24093 = vst [vmem:[#allocation447_spill] sm:$0xff] %v20231_v60  ;;  %v20233_v47 = vpop.f32.mrb[246].mxu0  ;;  %v20239_v13 = vpop.f32.mrb[246].mxu1 }
 0x2d4   : > { %24094 = vst [vmem:[#allocation448_spill] sm:$0xff] %v20233_v47  ;;  %24095 = vst [vmem:[#allocation449_spill] sm:$0xff] %v20239_v13  ;;  %v20241_v57 = vpop.f32.mrb[247].mxu0  ;;  %v20246_v29 = vpop.f32.mrb[247].mxu1  ;;  %v17781_v47 = vld [vmem:[%s18048_s22 + $0x558] sm:$0xff]  }
 0x2d5   : > { %24096 = vst [vmem:[#allocation450_spill] sm:$0xff] %v20241_v57  ;;  %24097 = vst [vmem:[#allocation451_spill] sm:$0xff] %v20246_v29  ;;  %v17779_v29 = vld [vmem:[%s18048_s22 + $0x478] sm:$0xff]  }
 0x2d6   : > { %16285 = vmatmul.mubr.msk.bf16.gmra.mrb[96].mxu0 %vm1204_vm0, %v17774_v31  ;;  %16577 = vmatmul.mubr.msk.bf16.gmra.mrb[96].mxu1 %vm1204_vm0, %v17775_v15  ;;  %v17780_v15 = vld [vmem:[%s18048_s22 + $0x510] sm:$0xff]   ;;  %v17782_v13 = vld [vmem:[%s18048_s22 + $0x518] sm:$0xff]  }
 0x2d7   : > { %16288 = vmatprep.mubr.msk.bf16.mxu0 %vm1204_vm0, %v17776_v9  ;;  %16580 = vmatprep.mubr.msk.bf16.mxu1 %vm1204_vm0, %v17777_v6 }
 0x2d9   : > { %v20254_v63 = vpop.f32.mrb[248].mxu0  ;;  %v20256_v60 = vpop.f32.mrb[248].mxu1 }
 0x2da   : > { %24098 = vst [vmem:[#allocation452_spill] sm:$0xff] %v20254_v63  ;;  %24099 = vst [vmem:[#allocation453_spill] sm:$0xff] %v20256_v60  ;;  %v20258_v48 = vpop.f32.mrb[249].mxu0  ;;  %v20263_v18 = vpop.f32.mrb[249].mxu1 }
 0x2db   : > { %24100 = vst [vmem:[#allocation454_spill] sm:$0xff] %v20258_v48  ;;  %24101 = vst [vmem:[#allocation455_spill] sm:$0xff] %v20263_v18  ;;  %v20265_v31 = vpop.f32.mrb[250].mxu0  ;;  %v20271_v9 = vpop.f32.mrb[250].mxu1 }
 0x2dc   : > { %24102 = vst [vmem:[#allocation456_spill] sm:$0xff] %v20265_v31  ;;  %24103 = vst [vmem:[#allocation457_spill] sm:$0xff] %v20271_v9  ;;  %v20273_v57 = vpop.f32.mrb[251].mxu0  ;;  %v20278_v60 = vpop.f32.mrb[251].mxu1  ;;  %v17785_v31 = vld [vmem:[%s18048_s22 + $0x568] sm:$0xff]  }
 0x2dd   : > { %24104 = vst [vmem:[#allocation458_spill] sm:$0xff] %v20273_v57  ;;  %24105 = vst [vmem:[#allocation459_spill] sm:$0xff] %v20278_v60  ;;  %v17783_v60 = vld [vmem:[%s18048_s22 + $0x560] sm:$0xff]   ;;  %v17786_v9 = vld [vmem:[%s18048_s22 + $0x528] sm:$0xff]  }
 0x2de   : > { %16289 = vmatmul.mubr.msk.bf16.gmra.mrb[100].mxu0 %vm1204_vm0, %v17778_v45  ;;  %16581 = vmatmul.mubr.msk.bf16.gmra.mrb[100].mxu1 %vm1204_vm0, %v17779_v29  ;;  %v17784_v29 = vld [vmem:[%s18048_s22 + $0x520] sm:$0xff]  }
 0x2df   : > { %16292 = vmatprep.mubr.msk.bf16.mxu0 %vm1204_vm0, %v17780_v15  ;;  %16584 = vmatprep.mubr.msk.bf16.mxu1 %vm1204_vm0, %v17781_v47 }
 0x2e1   : > { %v20286_v6 = vpop.f32.mrb[252].mxu0  ;;  %v20288_v18 = vpop.f32.mrb[252].mxu1 }
 0x2e2   : > { %24106 = vst [vmem:[#allocation460_spill] sm:$0xff] %v20286_v6  ;;  %24107 = vst [vmem:[#allocation461_spill] sm:$0xff] %v20288_v18  ;;  %v20290_v48 = vpop.f32.mrb[253].mxu0  ;;  %v20295_v63 = vpop.f32.mrb[253].mxu1 }
 0x2e3   : > { %24108 = vst [vmem:[#allocation462_spill] sm:$0xff] %v20290_v48  ;;  %24109 = vst [vmem:[#allocation463_spill] sm:$0xff] %v20295_v63  ;;  %v20297_v45 = vpop.f32.mrb[254].mxu0  ;;  %v20303_v15 = vpop.f32.mrb[254].mxu1 }
 0x2e4   : > { %24110 = vst [vmem:[#allocation464_spill] sm:$0xff] %v20297_v45  ;;  %24111 = vst [vmem:[#allocation465_spill] sm:$0xff] %v20303_v15  ;;  %v20305_v57 = vpop.f32.mrb[255].mxu0  ;;  %v20310_v18 = vpop.f32.mrb[255].mxu1  ;;  %v17789_v45 = vld [vmem:[%s18048_s22 + $0x578] sm:$0xff]  }
 0x2e5   : > { %24112 = vst [vmem:[#allocation466_spill] sm:$0xff] %v20305_v57  ;;  %24113 = vst [vmem:[#allocation467_spill] sm:$0xff] %v20310_v18  ;;  %v17787_v18 = vld [vmem:[%s18048_s22 + $0x570] sm:$0xff]   ;;  %v17790_v15 = vld [vmem:[%s18048_s22 + $0x538] sm:$0xff]  }
 0x2e6   : > { %16293 = vmatmul.mubr.msk.bf16.gmra.mrb[104].mxu0 %vm1204_vm0, %v17782_v13  ;;  %16585 = vmatmul.mubr.msk.bf16.gmra.mrb[104].mxu1 %vm1204_vm0, %v17783_v60  ;;  %v17788_v60 = vld [vmem:[%s18048_s22 + $0x530] sm:$0xff]  }
 0x2e7   : > { %16296 = vmatprep.mubr.msk.bf16.mxu0 %vm1204_vm0, %v17784_v29  ;;  %16588 = vmatprep.mubr.msk.bf16.mxu1 %vm1204_vm0, %v17785_v31 }
 0x2e9   : > { %v20318_v47 = vpop.f32.mrb[0].mxu0  ;;  %v20320_v63 = vpop.f32.mrb[0].mxu1 }
 0x2ea   : > { %24114 = vst [vmem:[#allocation468_spill] sm:$0xff] %v20318_v47  ;;  %24115 = vst [vmem:[#allocation469_spill] sm:$0xff] %v20320_v63  ;;  %v20322_v48 = vpop.f32.mrb[1].mxu0  ;;  %v20327_v6 = vpop.f32.mrb[1].mxu1 }
 0x2eb   : > { %24116 = vst [vmem:[#allocation470_spill] sm:$0xff] %v20322_v48  ;;  %24117 = vst [vmem:[#allocation471_spill] sm:$0xff] %v20327_v6  ;;  %v20329_v13 = vpop.f32.mrb[2].mxu0  ;;  %v20335_v29 = vpop.f32.mrb[2].mxu1 }
 0x2ec   : > { %24118 = vst [vmem:[#allocation472_spill] sm:$0xff] %v20329_v13  ;;  %24119 = vst [vmem:[#allocation473_spill] sm:$0xff] %v20335_v29  ;;  %v20337_v57 = vpop.f32.mrb[3].mxu0  ;;  %v20342_v63 = vpop.f32.mrb[3].mxu1  ;;  %v17793_v13 = vld [vmem:[%s18048_s22 + $0x588] sm:$0xff]  }
 0x2ed   : > { %24120 = vst [vmem:[#allocation474_spill] sm:$0xff] %v20337_v57  ;;  %24121 = vst [vmem:[#allocation475_spill] sm:$0xff] %v20342_v63  ;;  %v17791_v63 = vld [vmem:[%s18048_s22 + $0x580] sm:$0xff]   ;;  %v17794_v29 = vld [vmem:[%s18048_s22 + $0x548] sm:$0xff]  }
 0x2ee   : > { %16297 = vmatmul.mubr.msk.bf16.gmra.mrb[108].mxu0 %vm1204_vm0, %v17786_v9  ;;  %16589 = vmatmul.mubr.msk.bf16.gmra.mrb[108].mxu1 %vm1204_vm0, %v17787_v18  ;;  %v17792_v18 = vld [vmem:[%s18048_s22 + $0x540] sm:$0xff]  }
 0x2ef   : > { %16300 = vmatprep.mubr.msk.bf16.mxu0 %vm1204_vm0, %v17788_v60  ;;  %16592 = vmatprep.mubr.msk.bf16.mxu1 %vm1204_vm0, %v17789_v45 }
 0x2f1   : > { %v20350_v31 = vpop.f32.mrb[4].mxu0  ;;  %v20352_v6 = vpop.f32.mrb[4].mxu1 }
 0x2f2   : > { %24122 = vst [vmem:[#allocation476_spill] sm:$0xff] %v20350_v31  ;;  %24123 = vst [vmem:[#allocation477_spill] sm:$0xff] %v20352_v6  ;;  %v20354_v48 = vpop.f32.mrb[5].mxu0  ;;  %v20359_v47 = vpop.f32.mrb[5].mxu1 }
 0x2f3   : > { %24124 = vst [vmem:[#allocation478_spill] sm:$0xff] %v20354_v48  ;;  %24125 = vst [vmem:[#allocation479_spill] sm:$0xff] %v20359_v47  ;;  %v20361_v9 = vpop.f32.mrb[6].mxu0  ;;  %v20367_v60 = vpop.f32.mrb[6].mxu1 }
 0x2f4   : > { %24126 = vst [vmem:[#allocation480_spill] sm:$0xff] %v20361_v9  ;;  %24127 = vst [vmem:[#allocation481_spill] sm:$0xff] %v20367_v60  ;;  %v20369_v57 = vpop.f32.mrb[7].mxu0  ;;  %v20374_v6 = vpop.f32.mrb[7].mxu1  ;;  %v17797_v9 = vld [vmem:[%s18048_s22 + $0x598] sm:$0xff]   ;;  %v17798_v60 = vld [vmem:[%s18048_s22 + $0x630] sm:$0xff]  }
 0x2f5   : > { %24128 = vst [vmem:[#allocation482_spill] sm:$0xff] %v20369_v57  ;;  %24129 = vst [vmem:[#allocation483_spill] sm:$0xff] %v20374_v6  ;;  %v17795_v6 = vld [vmem:[%s18048_s22 + $0x590] sm:$0xff]  }
 0x2f6   : > { %16301 = vmatmul.mubr.msk.bf16.gmra.mrb[112].mxu0 %vm1204_vm0, %v17790_v15  ;;  %16593 = vmatmul.mubr.msk.bf16.gmra.mrb[112].mxu1 %vm1204_vm0, %v17791_v63  ;;  %v17796_v63 = vld [vmem:[%s18048_s22 + $0x550] sm:$0xff]  }
 0x2f7   : > { %16304 = vmatprep.mubr.msk.bf16.mxu0 %vm1204_vm0, %v17792_v18  ;;  %16596 = vmatprep.mubr.msk.bf16.mxu1 %vm1204_vm0, %v17793_v13 }
 0x2f9   : > { %v20382_v45 = vpop.f32.mrb[8].mxu0  ;;  %v20384_v47 = vpop.f32.mrb[8].mxu1 }
 0x2fa   : > { %24130 = vst [vmem:[#allocation484_spill] sm:$0xff] %v20382_v45  ;;  %24131 = vst [vmem:[#allocation485_spill] sm:$0xff] %v20384_v47  ;;  %v20386_v48 = vpop.f32.mrb[9].mxu0  ;;  %v20391_v31 = vpop.f32.mrb[9].mxu1 }
 0x2fb   : > { %24132 = vst [vmem:[#allocation486_spill] sm:$0xff] %v20386_v48  ;;  %24133 = vst [vmem:[#allocation487_spill] sm:$0xff] %v20391_v31  ;;  %v20393_v15 = vpop.f32.mrb[10].mxu0  ;;  %v20399_v18 = vpop.f32.mrb[10].mxu1 }
 0x2fc   : > { %24134 = vst [vmem:[#allocation488_spill] sm:$0xff] %v20393_v15  ;;  %24135 = vst [vmem:[#allocation489_spill] sm:$0xff] %v20399_v18  ;;  %v20401_v57 = vpop.f32.mrb[11].mxu0  ;;  %v20406_v47 = vpop.f32.mrb[11].mxu1  ;;  %v17801_v15 = vld [vmem:[%s18048_s22 + $0x680] sm:$0xff]  }
 0x2fd   : > { %24136 = vst [vmem:[#allocation490_spill] sm:$0xff] %v20401_v57  ;;  %24137 = vst [vmem:[#allocation491_spill] sm:$0xff] %v20406_v47  ;;  %v17799_v47 = vld [vmem:[%s18048_s22 + $0x678] sm:$0xff]   ;;  %v17802_v18 = vld [vmem:[%s18048_s22 + $0x640] sm:$0xff]  }
 0x2fe   : > { %16305 = vmatmul.mubr.msk.bf16.gmra.mrb[116].mxu0 %vm1204_vm0, %v17794_v29  ;;  %16597 = vmatmul.mubr.msk.bf16.gmra.mrb[116].mxu1 %vm1204_vm0, %v17795_v6  ;;  %v17800_v6 = vld [vmem:[%s18048_s22 + $0x638] sm:$0xff]  }
 0x2ff   : > { %16308 = vmatprep.mubr.msk.bf16.mxu0 %vm1204_vm0, %v17796_v63  ;;  %16600 = vmatprep.mubr.msk.bf16.mxu1 %vm1204_vm0, %v17797_v9 }
 0x301   : > { %v20414_v13 = vpop.f32.mrb[12].mxu0  ;;  %v20416_v31 = vpop.f32.mrb[12].mxu1 }
 0x302   : > { %24138 = vst [vmem:[#allocation492_spill] sm:$0xff] %v20414_v13  ;;  %24139 = vst [vmem:[#allocation493_spill] sm:$0xff] %v20416_v31  ;;  %v20418_v48 = vpop.f32.mrb[13].mxu0  ;;  %v20423_v45 = vpop.f32.mrb[13].mxu1 }
 0x303   : > { %24140 = vst [vmem:[#allocation494_spill] sm:$0xff] %v20418_v48  ;;  %24141 = vst [vmem:[#allocation495_spill] sm:$0xff] %v20423_v45  ;;  %v20425_v29 = vpop.f32.mrb[14].mxu0  ;;  %v20431_v63 = vpop.f32.mrb[14].mxu1 }
 0x304   : > { %24142 = vst [vmem:[#allocation496_spill] sm:$0xff] %v20425_v29  ;;  %24143 = vst [vmem:[#allocation497_spill] sm:$0xff] %v20431_v63  ;;  %v20433_v57 = vpop.f32.mrb[15].mxu0  ;;  %v20438_v31 = vpop.f32.mrb[15].mxu1  ;;  %v17805_v29 = vld [vmem:[%s18048_s22 + $0x690] sm:$0xff]  }
 0x305   : > { %24144 = vst [vmem:[#allocation498_spill] sm:$0xff] %v20433_v57  ;;  %24145 = vst [vmem:[#allocation499_spill] sm:$0xff] %v20438_v31  ;;  %v17803_v31 = vld [vmem:[%s18048_s22 + $0x688] sm:$0xff]   ;;  %v17806_v63 = vld [vmem:[%s18048_s22 + $0x650] sm:$0xff]  }
 0x306   : > { %16309 = vmatmul.mubr.msk.bf16.gmra.mrb[120].mxu0 %vm1204_vm0, %v17798_v60  ;;  %16601 = vmatmul.mubr.msk.bf16.gmra.mrb[120].mxu1 %vm1204_vm0, %v17799_v47  ;;  %v17804_v47 = vld [vmem:[%s18048_s22 + $0x648] sm:$0xff]  }
 0x307   : > { %16312 = vmatprep.mubr.msk.bf16.mxu0 %vm1204_vm0, %v17800_v6  ;;  %16604 = vmatprep.mubr.msk.bf16.mxu1 %vm1204_vm0, %v17801_v15 }
 0x309   : > { %v20446_v9 = vpop.f32.mrb[16].mxu0  ;;  %v20448_v45 = vpop.f32.mrb[16].mxu1 }
 0x30a   : > { %24146 = vst [vmem:[#allocation500_spill] sm:$0xff] %v20446_v9  ;;  %24147 = vst [vmem:[#allocation501_spill] sm:$0xff] %v20448_v45  ;;  %v20450_v48 = vpop.f32.mrb[17].mxu0  ;;  %v20455_v13 = vpop.f32.mrb[17].mxu1 }
 0x30b   : > { %24148 = vst [vmem:[#allocation502_spill] sm:$0xff] %v20450_v48  ;;  %24149 = vst [vmem:[#allocation503_spill] sm:$0xff] %v20455_v13  ;;  %v20457_v60 = vpop.f32.mrb[18].mxu0  ;;  %v20463_v6 = vpop.f32.mrb[18].mxu1 }
 0x30c   : > { %24150 = vst [vmem:[#allocation504_spill] sm:$0xff] %v20457_v60  ;;  %24151 = vst [vmem:[#allocation505_spill] sm:$0xff] %v20463_v6  ;;  %v20465_v57 = vpop.f32.mrb[19].mxu0  ;;  %v20470_v45 = vpop.f32.mrb[19].mxu1  ;;  %v17809_v60 = vld [vmem:[%s18048_s22 + $0x6a0] sm:$0xff]  }
 0x30d   : > { %24152 = vst [vmem:[#allocation506_spill] sm:$0xff] %v20465_v57  ;;  %24153 = vst [vmem:[#allocation507_spill] sm:$0xff] %v20470_v45  ;;  %v17807_v45 = vld [vmem:[%s18048_s22 + $0x698] sm:$0xff]   ;;  %v17810_v6 = vld [vmem:[%s18048_s22 + $0x660] sm:$0xff]  }
 0x30e   : > { %16313 = vmatmul.mubr.msk.bf16.gmra.mrb[124].mxu0 %vm1204_vm0, %v17802_v18  ;;  %16605 = vmatmul.mubr.msk.bf16.gmra.mrb[124].mxu1 %vm1204_vm0, %v17803_v31  ;;  %v17808_v31 = vld [vmem:[%s18048_s22 + $0x658] sm:$0xff]  }
 0x30f   : > { %16316 = vmatprep.mubr.msk.bf16.mxu0 %vm1204_vm0, %v17804_v47  ;;  %16608 = vmatprep.mubr.msk.bf16.mxu1 %vm1204_vm0, %v17805_v29 }
 0x311   : > { %v20478_v15 = vpop.f32.mrb[20].mxu0  ;;  %v20480_v13 = vpop.f32.mrb[20].mxu1 }
 0x312   : > { %24154 = vst [vmem:[#allocation508_spill] sm:$0xff] %v20478_v15  ;;  %24155 = vst [vmem:[#allocation509_spill] sm:$0xff] %v20480_v13  ;;  %v20482_v48 = vpop.f32.mrb[21].mxu0  ;;  %v20487_v9 = vpop.f32.mrb[21].mxu1 }
 0x313   : > { %24156 = vst [vmem:[#allocation510_spill] sm:$0xff] %v20482_v48  ;;  %24157 = vst [vmem:[#allocation511_spill] sm:$0xff] %v20487_v9  ;;  %v20489_v18 = vpop.f32.mrb[22].mxu0  ;;  %v20495_v47 = vpop.f32.mrb[22].mxu1 }
 0x314   : > { %24158 = vst [vmem:[#allocation512_spill] sm:$0xff] %v20489_v18  ;;  %24159 = vst [vmem:[#allocation513_spill] sm:$0xff] %v20495_v47  ;;  %v20497_v57 = vpop.f32.mrb[23].mxu0  ;;  %v20502_v13 = vpop.f32.mrb[23].mxu1  ;;  %v17813_v18 = vld [vmem:[%s18048_s22 + $0x6b0] sm:$0xff]  }
 0x315   : > { %24160 = vst [vmem:[#allocation514_spill] sm:$0xff] %v20497_v57  ;;  %24161 = vst [vmem:[#allocation515_spill] sm:$0xff] %v20502_v13  ;;  %v17811_v13 = vld [vmem:[%s18048_s22 + $0x6a8] sm:$0xff]   ;;  %v17814_v47 = vld [vmem:[%s18048_s22 + $0x670] sm:$0xff]  }
 0x316   : > { %16317 = vmatmul.mubr.msk.bf16.gmra.mrb[128].mxu0 %vm1204_vm0, %v17806_v63  ;;  %16609 = vmatmul.mubr.msk.bf16.gmra.mrb[128].mxu1 %vm1204_vm0, %v17807_v45  ;;  %v17812_v45 = vld [vmem:[%s18048_s22 + $0x668] sm:$0xff]  }
 0x317   : > { %16320 = vmatprep.mubr.msk.bf16.mxu0 %vm1204_vm0, %v17808_v31  ;;  %16612 = vmatprep.mubr.msk.bf16.mxu1 %vm1204_vm0, %v17809_v60 }
 0x319   : > { %v20510_v29 = vpop.f32.mrb[24].mxu0  ;;  %v20512_v9 = vpop.f32.mrb[24].mxu1 }
 0x31a   : > { %24162 = vst [vmem:[#allocation516_spill] sm:$0xff] %v20510_v29  ;;  %24163 = vst [vmem:[#allocation517_spill] sm:$0xff] %v20512_v9  ;;  %v20514_v48 = vpop.f32.mrb[25].mxu0  ;;  %v20519_v15 = vpop.f32.mrb[25].mxu1 }
 0x31b   : > { %24164 = vst [vmem:[#allocation518_spill] sm:$0xff] %v20514_v48  ;;  %24165 = vst [vmem:[#allocation519_spill] sm:$0xff] %v20519_v15  ;;  %v20521_v63 = vpop.f32.mrb[26].mxu0  ;;  %v20527_v31 = vpop.f32.mrb[26].mxu1 }
 0x31c   : > { %24166 = vst [vmem:[#allocation520_spill] sm:$0xff] %v20521_v63  ;;  %24167 = vst [vmem:[#allocation521_spill] sm:$0xff] %v20527_v31  ;;  %v20529_v57 = vpop.f32.mrb[27].mxu0  ;;  %v20534_v9 = vpop.f32.mrb[27].mxu1  ;;  %v17817_v63 = vld [vmem:[%s18048_s22 + $0x798] sm:$0xff]  }
 0x31d   : > { %24168 = vst [vmem:[#allocation522_spill] sm:$0xff] %v20529_v57  ;;  %24169 = vst [vmem:[#allocation523_spill] sm:$0xff] %v20534_v9  ;;  %v17815_v9 = vld [vmem:[%s18048_s22 + $0x6b8] sm:$0xff]  }
 0x31e   : > { %16321 = vmatmul.mubr.msk.bf16.gmra.mrb[132].mxu0 %vm1204_vm0, %v17810_v6  ;;  %16613 = vmatmul.mubr.msk.bf16.gmra.mrb[132].mxu1 %vm1204_vm0, %v17811_v13  ;;  %v17816_v13 = vld [vmem:[%s18048_s22 + $0x750] sm:$0xff]  }
 0x31f   : > { %16324 = vmatprep.mubr.msk.bf16.mxu0 %vm1204_vm0, %v17812_v45  ;;  %16616 = vmatprep.mubr.msk.bf16.mxu1 %vm1204_vm0, %v17813_v18 }
 0x321   : > { %v20542_v60 = vpop.f32.mrb[28].mxu0  ;;  %v20544_v15 = vpop.f32.mrb[28].mxu1 }
 0x322   : > { %24170 = vst [vmem:[#allocation524_spill] sm:$0xff] %v20542_v60  ;;  %24171 = vst [vmem:[#allocation525_spill] sm:$0xff] %v20544_v15  ;;  %v20546_v48 = vpop.f32.mrb[29].mxu0  ;;  %v20551_v29 = vpop.f32.mrb[29].mxu1 }
 0x323   : > { %24172 = vst [vmem:[#allocation526_spill] sm:$0xff] %v20546_v48  ;;  %24173 = vst [vmem:[#allocation527_spill] sm:$0xff] %v20551_v29  ;;  %v20553_v6 = vpop.f32.mrb[30].mxu0  ;;  %v20559_v45 = vpop.f32.mrb[30].mxu1 }
 0x324   : > { %24174 = vst [vmem:[#allocation528_spill] sm:$0xff] %v20553_v6  ;;  %24175 = vst [vmem:[#allocation529_spill] sm:$0xff] %v20559_v45  ;;  %v20561_v57 = vpop.f32.mrb[31].mxu0  ;;  %v20566_v15 = vpop.f32.mrb[31].mxu1  ;;  %v17819_v6 = vld [vmem:[%s18048_s22 + $0x7a0] sm:$0xff]  }
 0x325   : > { %24176 = vst [vmem:[#allocation530_spill] sm:$0xff] %v20561_v57  ;;  %24177 = vst [vmem:[#allocation531_spill] sm:$0xff] %v20566_v15 }
 0x326   : > { %16325 = vmatmul.mubr.msk.bf16.gmra.mrb[136].mxu0 %vm1204_vm0, %v17814_v47  ;;  %16617 = vmatmul.mubr.msk.bf16.gmra.mrb[136].mxu1 %vm1204_vm0, %v17815_v9  ;;  %v17821_v47 = vld [vmem:[%s18048_s22 + $0x7a8] sm:$0xff]   ;;  %v24178_v9 = vmax.f32 %v18271_v49, %v18275_v52  ;;  %v24181_v49 = vmax.f32 %v18289_v59, %v18294_v62  ;;  %v24182_v59 = vmax.f32 %v18303_v1, %v18307_v4 }
 0x327   : > { %16328 = vmatprep.mubr.msk.bf16.mxu0 %vm1204_vm0, %v17816_v13  ;;  %16620 = vmatprep.mubr.msk.bf16.mxu1 %vm1204_vm0, %v17817_v63  ;;  %v24185_v1 = vmax.f32 %v18321_v11, %v18326_v14  ;;  %v24186_v11 = vmax.f32 %v18335_v17, %v18339_v20  ;;  %v24189_v17 = vmax.f32 %v18353_v27, %v18358_v30 }
 0x328   : > { %v24190_v27 = vmax.f32 %v18367_v33, %v18371_v36  ;;  %v24193_v33 = vmax.f32 %v18385_v43, %v18390_v46 }
 0x329   : > { %v16222_v18 = vpop.f32.mrb[32].mxu0  ;;  %v16514_v29 = vpop.f32.mrb[32].mxu1 }
 0x32a   : > { %v7209_v48 = vpop.f32.mrb[33].mxu0  ;;  %v10987_v54 = vmax.f32 %v16222_v18, %v16514_v29  ;;  %v9834_v31 = vpop.f32.mrb[33].mxu1  ;;  %v24179_v29 = vmax.f32 %v18277_v53, %v18281_v55 }
 0x32b   : > { %v16223_v45 = vpop.f32.mrb[34].mxu0  ;;  %v10985_v25 = vmax.f32 %v7209_v48, %v9834_v31  ;;  %v16515_v60 = vpop.f32.mrb[34].mxu1  ;;  %v24180_v31 = vmax.f32 %v18283_v56, %v18287_v58 }
 0x32c   : > { %v7212_v15 = vpop.f32.mrb[35].mxu0  ;;  %v20581_v13 = vmax.f32 %v24178_v9, %v10987_v54  ;;  %v10988_v63 = vmax.f32 %v16223_v45, %v16515_v60  ;;  %v9837_v57 = vpop.f32.mrb[35].mxu1  ;;  %v24183_v9 = vmax.f32 %v18309_v5, %v18313_v7 }
 0x32d   : > { %v10986_v38 = vmax.f32 %v7212_v15, %v9837_v57  ;;  %v20587_v48 = vmax.f32 %v24179_v29, %v10985_v25  ;;  %v17822_v57 = vld [vmem:[%s18048_s22 + $0x768] sm:$0xff]   ;;  %v17824_v15 = vld [vmem:[%s18048_s22 + $0x770] sm:$0xff]  }
 0x32e   : > { %16329 = vmatmul.mubr.msk.bf16.gmra.mrb[140].mxu0 %vm1204_vm0, %v17818_v61  ;;  %v20592_v18 = vmax.f32 %v24180_v31, %v10988_v63  ;;  %16621 = vmatmul.mubr.msk.bf16.gmra.mrb[140].mxu1 %vm1204_vm0, %v17819_v6  ;;  %v17823_v61 = vld [vmem:[%s18048_s22 + $0x7b0] sm:$0xff]   ;;  %v24184_v31 = vmax.f32 %v18315_v8, %v18319_v10 }
 0x32f   : > { %16332 = vmatprep.mubr.msk.bf16.mxu0 %vm1204_vm0, %v17820_v22  ;;  %v20599_v52 = vmax.f32 %v24181_v49, %v10986_v38  ;;  %16624 = vmatprep.mubr.msk.bf16.mxu1 %vm1204_vm0, %v17821_v47  ;;  %v17825_v22 = vld [vmem:[%s18048_s22 + $0x7b8] sm:$0xff]  }
 0x331   : > { %v16226_v53 = vpop.f32.mrb[36].mxu0  ;;  %v16518_v55 = vpop.f32.mrb[36].mxu1 }
 0x332   : > { %v7225_v25 = vpop.f32.mrb[37].mxu0  ;;  %v10991_v54 = vmax.f32 %v16226_v53, %v16518_v55  ;;  %v9850_v56 = vpop.f32.mrb[37].mxu1  ;;  %v17826_v55 = vld [vmem:[%s18048_s22 + $0x778] sm:$0xff]  }
 0x333   : > { %v16227_v58 = vpop.f32.mrb[38].mxu0  ;;  %v10989_v60 = vmax.f32 %v7225_v25, %v9850_v56  ;;  %v16519_v6 = vpop.f32.mrb[38].mxu1 }
 0x334   : > { %v7228_v45 = vpop.f32.mrb[39].mxu0  ;;  %v20609_v62 = vmax.f32 %v24182_v59, %v10991_v54  ;;  %v10992_v38 = vmax.f32 %v16227_v58, %v16519_v6  ;;  %v9853_v47 = vpop.f32.mrb[39].mxu1  ;;  %v17828_v54 = vld [vmem:[%s18048_s22 + $0x780] sm:$0xff]  }
 0x335   : > { %v20614_v63 = vmax.f32 %v24183_v9, %v10989_v60  ;;  %v10990_v29 = vmax.f32 %v7228_v45, %v9853_v47  ;;  %v24187_v45 = vmax.f32 %v18341_v21, %v18345_v23 }
 0x336   : > { %16333 = vmatmul.mubr.msk.bf16.gmra.mrb[144].mxu0 %vm1204_vm0, %v17822_v57  ;;  %v20620_v49 = vmax.f32 %v24184_v31, %v10992_v38  ;;  %16625 = vmatmul.mubr.msk.bf16.gmra.mrb[144].mxu1 %vm1204_vm0, %v17823_v61  ;;  %v17827_v57 = vld [vmem:[%s18048_s22 + $0x7c0] sm:$0xff]   ;;  %v24188_v38 = vmax.f32 %v18347_v24, %v18351_v26 }
 0x337   : > { %16336 = vmatprep.mubr.msk.bf16.mxu0 %vm1204_vm0, %v17824_v15  ;;  %v20627_v4 = vmax.f32 %v24185_v1, %v10990_v29  ;;  %16628 = vmatprep.mubr.msk.bf16.mxu1 %vm1204_vm0, %v17825_v22  ;;  %v17829_v15 = vld [vmem:[%s18048_s22 + $0x7c8] sm:$0xff]   ;;  %v17831_v1 = vld [vmem:[%s18048_s22 + $0x7d0] sm:$0xff]  }
 0x338   : > { %v17830_v29 = vld [vmem:[%s18048_s22 + $0x788] sm:$0xff]  }
 0x339   : > { %v16230_v5 = vpop.f32.mrb[40].mxu0  ;;  %v16522_v7 = vpop.f32.mrb[40].mxu1 }
 0x33a   : > { %v7241_v53 = vpop.f32.mrb[41].mxu0  ;;  %v10995_v25 = vmax.f32 %v16230_v5, %v16522_v7  ;;  %v9866_v8 = vpop.f32.mrb[41].mxu1  ;;  %v17832_v5 = vld [vmem:[%s18048_s22 + $0x790] sm:$0xff]  }
 0x33b   : > { %v16231_v10 = vpop.f32.mrb[42].mxu0  ;;  %v10993_v56 = vmax.f32 %v7241_v53, %v9866_v8  ;;  %v16523_v58 = vpop.f32.mrb[42].mxu1 }
 0x33c   : > { %v7244_v61 = vpop.f32.mrb[43].mxu0  ;;  %v20637_v14 = vmax.f32 %v24186_v11, %v10995_v25  ;;  %v10996_v60 = vmax.f32 %v16231_v10, %v16523_v58  ;;  %v9869_v6 = vpop.f32.mrb[43].mxu1  ;;  %v17833_v25 = vld [vmem:[%s18048_s22 + $0x7d8] sm:$0xff]   ;;  %v24192_v58 = vmax.f32 %v18379_v40, %v18383_v42  ;;  %v17834_v11 = vld [vmem:[%s18048_s22 + $0x870] sm:$0xff]   ;;  %v20690_v40 = vld [vmem:[%s23116_s2] ss:$0 sm:$0xff] }
 0x33d   : > { %v20642_v22 = vmax.f32 %v24187_v45, %v10993_v56  ;;  %v10994_v59 = vmax.f32 %v7244_v61, %v9869_v6  ;;  %v17835_v45 = vld [vmem:[%s18048_s22 + $0x8b8] sm:$0xff]  }
 0x33e   : > { %16337 = vmatmul.mubr.msk.bf16.gmra.mrb[148].mxu0 %vm1204_vm0, %v17826_v55  ;;  %v20648_v47 = vmax.f32 %v24188_v38, %v10996_v60  ;;  %16629 = vmatmul.mubr.msk.bf16.gmra.mrb[148].mxu1 %vm1204_vm0, %v17827_v57  ;;  %v24191_v57 = vmax.f32 %v18373_v37, %v18377_v39 }
 0x33f   : > { %16340 = vmatprep.mubr.msk.bf16.mxu0 %vm1204_vm0, %v17828_v54  ;;  %v20655_v20 = vmax.f32 %v24189_v17, %v10994_v59  ;;  %16632 = vmatprep.mubr.msk.bf16.mxu1 %vm1204_vm0, %v17829_v15  ;;  %v17836_v59 = vld [vmem:[%s18048_s22 + $0x878] sm:$0xff]   ;;  %v17837_v17 = vld [vmem:[%s18048_s22 + $0x8c0] sm:$0xff]  }
 0x341   : > { %v16234_v21 = vpop.f32.mrb[44].mxu0  ;;  %v16526_v23 = vpop.f32.mrb[44].mxu1 }
 0x342   : > { %v7257_v9 = vpop.f32.mrb[45].mxu0  ;;  %v10999_v31 = vmax.f32 %v16234_v21, %v16526_v23  ;;  %v9882_v24 = vpop.f32.mrb[45].mxu1 }
 0x343   : > { %v16235_v26 = vpop.f32.mrb[46].mxu0  ;;  %v10997_v7 = vmax.f32 %v7257_v9, %v9882_v24  ;;  %v16527_v53 = vpop.f32.mrb[46].mxu1  ;;  %v24194_v9 = vmax.f32 %v18399_v50, %v18403_v0  ;;  %v11569_v0 = vadd.f32 %v20690_v40, %v20599_v52 }
 0x344   : > { %v7260_v55 = vpop.f32.mrb[47].mxu0  ;;  %v20665_v30 = vmax.f32 %v24190_v27, %v10999_v31  ;;  %v11000_v8 = vmax.f32 %v16235_v26, %v16527_v53  ;;  %v9885_v10 = vpop.f32.mrb[47].mxu1  ;;  %v11568_v31 = vadd.f32 %v20690_v40, %v20587_v48  ;;  %v24195_v26 = vmax.f32 %v18405_v2, %v18409_v12  ;;  %v17838_v27 = vld [vmem:[%s18048_s22 + $0x880] sm:$0xff]  }
 0x345   : > { %v20670_v54 = vmax.f32 %v24191_v57, %v10997_v7  ;;  %v10998_v56 = vmax.f32 %v7260_v55, %v9885_v10  ;;  %v24197_v48 = vmax.f32 %v18417_v28, %v18422_v35  ;;  %v11857_v28 = vmax.f32 %v11569_v0, 0.0 }
 0x346   : > { %16341 = vmatmul.mubr.msk.bf16.gmra.mrb[152].mxu0 %vm1204_vm0, %v17830_v29  ;;  %v20676_v61 = vmax.f32 %v24192_v58, %v11000_v8  ;;  %16633 = vmatmul.mubr.msk.bf16.gmra.mrb[152].mxu1 %vm1204_vm0, %v17831_v1  ;;  %v17840_v58 = vld [vmem:[%s18048_s22 + $0x888] sm:$0xff]  }
 0x347   : > { %16344 = vmatprep.mubr.msk.bf16.mxu0 %vm1204_vm0, %v17832_v5  ;;  %v20683_v36 = vmax.f32 %v24193_v33, %v10998_v56  ;;  %16636 = vmatprep.mubr.msk.bf16.mxu1 %vm1204_vm0, %v17833_v25  ;;  %v24196_v5 = vmax.f32 %v18411_v16, %v18415_v19  ;;  %v11856_v16 = vmax.f32 %v11568_v31, 0.0  ;;  %v17839_v56 = vld [vmem:[%s18048_s22 + $0x8c8] sm:$0xff]  }
 0x349   : > { %v16238_v37 = vpop.f32.mrb[48].mxu0  ;;  %v16530_v39 = vpop.f32.mrb[48].mxu1 }
 0x34a   : > { %v7273_v15 = vpop.f32.mrb[49].mxu0  ;;  %v11003_v42 = vmax.f32 %v16238_v37, %v16530_v39  ;;  %v9898_v60 = vpop.f32.mrb[49].mxu1 }
 0x34b   : > { %v16239_v6 = vpop.f32.mrb[50].mxu0  ;;  %v11001_v43 = vmax.f32 %v7273_v15, %v9898_v60  ;;  %v16531_v46 = vpop.f32.mrb[50].mxu1  ;;  %v17841_v15 = vld [vmem:[%s18048_s22 + $0x8d0] sm:$0xff]  }
 0x34c   : > { %v7276_v38 = vpop.f32.mrb[51].mxu0  ;;  %v11004_v21 = vmax.f32 %v16239_v6, %v16531_v46  ;;  %v9901_v23 = vpop.f32.mrb[51].mxu1  ;;  %v11291_v29 = vmax.f32 %v24194_v9, %v11003_v42  ;;  %v24198_v42 = vmax.f32 %v18431_v3, %v18435_v34  ;;  %v24199_v46 = vmax.f32 %v18437_v41, %v18441_v44  ;;  %v24201_v44 = vld [vmem:[#allocation2_spill] sm:$0xff] }
 0x34d   : > { %v11002_v24 = vmax.f32 %v7276_v38, %v9901_v23  ;;  %v20704_v1 = vmax.f32 %v24195_v26, %v11001_v43  ;;  %v11572_v43 = vadd.f32 %v20690_v40, %v20614_v63  ;;  %v24200_v3 = vmax.f32 %v18443_v51, %v18447_v32 }
 0x34e   : > { %16345 = vmatmul.mubr.msk.bf16.gmra.mrb[156].mxu0 %vm1204_vm0, %v17834_v11  ;;  %v11292_v7 = vmax.f32 %v24196_v5, %v11004_v21  ;;  %16637 = vmatmul.mubr.msk.bf16.gmra.mrb[156].mxu1 %vm1204_vm0, %v17835_v45  ;;  %v11586_v50 = vadd.f32 %v20690_v40, %v11291_v29  ;;  %v11570_v11 = vadd.f32 %v20690_v40, %v20581_v13  ;;  %v24202_v21 = vld [vmem:[#allocation3_spill] sm:$0xff] }
 0x34f   : > { %16348 = vmatprep.mubr.msk.bf16.mxu0 %vm1204_vm0, %v17836_v59  ;;  %v20717_v2 = vmax.f32 %v24197_v48, %v11002_v24  ;;  %16640 = vmatprep.mubr.msk.bf16.mxu1 %vm1204_vm0, %v17837_v17  ;;  %v11571_v13 = vadd.f32 %v20690_v40, %v20592_v18  ;;  %v11573_v41 = vadd.f32 %v20690_v40, %v20627_v4  ;;  %v11860_v29 = vmax.f32 %v11572_v43, 0.0 }
 0x350   : > { %v11874_v19 = vmax.f32 %v11586_v50, 0.0  ;;  %v11587_v53 = vadd.f32 %v20690_v40, %v11292_v7  ;;  %v24203_v23 = vmax.f32 %v24201_v44, %v24202_v21  ;;  %v11858_v32 = vmax.f32 %v11570_v11, 0.0  ;;  %v17842_v7 = vld [vmem:[%s18048_s22 + $0x890] sm:$0xff]  }
 0x351   : > { %v16242_v12 = vpop.f32.mrb[52].mxu0  ;;  %v16534_v55 = vpop.f32.mrb[52].mxu1  ;;  %v11859_v0 = vmax.f32 %v11571_v13, 0.0  ;;  %v11574_v48 = vadd.f32 %v20690_v40, %v20609_v62  ;;  %v24205_v62 = vld [vmem:[#allocation5_spill] sm:$0xff] }
 0x352   : > { %v7289_v25 = vpop.f32.mrb[53].mxu0  ;;  %v11007_v8 = vmax.f32 %v16242_v12, %v16534_v55  ;;  %v9914_v10 = vpop.f32.mrb[53].mxu1  ;;  %v16834_v57 = vpack.i.bf16 %v11874_v19, %v11856_v16  ;;  %v11875_v35 = vmax.f32 %v11587_v53, 0.0  ;;  %v17843_v53 = vld [vmem:[%s18048_s22 + $0x8d8] sm:$0xff]  }
 0x353   : > { %v16243_v52 = vpop.f32.mrb[54].mxu0  ;;  %v11005_v33 = vmax.f32 %v7289_v25, %v9914_v10  ;;  %v16535_v37 = vpop.f32.mrb[54].mxu1  ;;  %v17844_v55 = vld [vmem:[%s18048_s22 + $0x898] sm:$0xff]  }
 0x354   : > { %v7292_v39 = vpop.f32.mrb[55].mxu0  ;;  %v11295_v60 = vmax.f32 %v24198_v42, %v11007_v8  ;;  %v11008_v6 = vmax.f32 %v16243_v52, %v16535_v37  ;;  %v9917_v45 = vpop.f32.mrb[55].mxu1  ;;  %16835 = vxpose.xlu0.b32.start [1/16] (narrow) %v16834_v57, 32  ;;  %v16836_v59 = vpack.i.bf16 %v11875_v35, %v11857_v28  ;;  %v17845_v35 = vld [vmem:[%s18048_s22 + $0x8e0] sm:$0xff]  }
 0x355   : > { %v11293_v38 = vmax.f32 %v24199_v46, %v11005_v33  ;;  %v11006_v17 = vmax.f32 %v7292_v39, %v9917_v45  ;;  %v24204_v33 = vld [vmem:[#allocation4_spill] sm:$0xff]  ;;  %v24208_v45 = vld [vmem:[#allocation7_spill] sm:$0xff] }
 0x356   : > { %16349 = vmatmul.mubr.msk.bf16.gmra.mrb[160].mxu0 %vm1204_vm0, %v17838_v27  ;;  %v11296_v34 = vmax.f32 %v24200_v3, %v11008_v6  ;;  %16641 = vmatmul.mubr.msk.bf16.gmra.mrb[160].mxu1 %vm1204_vm0, %v17839_v56  ;;  %v11590_v63 = vadd.f32 %v20690_v40, %v11295_v60  ;;  %v11861_v27 = vmax.f32 %v11573_v41, 0.0  ;;  %v24206_v37 = vmax.f32 %v24204_v33, %v24205_v62  ;;  %v24207_v6 = vld [vmem:[#allocation6_spill] sm:$0xff]  ;;  %v24214_v41 = vld [vmem:[#allocation11_spill] sm:$0xff] }
 0x357   : > { %16352 = vmatprep.mubr.msk.bf16.mxu0 %vm1204_vm0, %v17840_v58  ;;  %v11294_v9 = vmax.f32 %v24203_v23, %v11006_v17  ;;  %16644 = vmatprep.mubr.msk.bf16.mxu1 %vm1204_vm0, %v17841_v15  ;;  %v11588_v18 = vadd.f32 %v20690_v40, %v11293_v38  ;;  %v11575_v58 = vadd.f32 %v20690_v40, %v20620_v49  ;;  %v24210_v38 = vld [vmem:[#allocation8_spill] sm:$0xff]  ;;  %v24211_v17 = vld [vmem:[#allocation9_spill] sm:$0xff] }
 0x358   : > { %16837 = vxpose.xlu0.b32.cont [2/16] (narrow) %v16836_v59, 32  ;;  %v11878_v31 = vmax.f32 %v11590_v63, 0.0  ;;  %v11591_v24 = vadd.f32 %v20690_v40, %v11296_v34  ;;  %v11576_v60 = vadd.f32 %v20690_v40, %v20642_v22  ;;  %v24209_v59 = vmax.f32 %v24207_v6, %v24208_v45  ;;  %v24213_v63 = vld [vmem:[#allocation10_spill] sm:$0xff] }
 0x359   : > { %v16246_v51 = vpop.f32.mrb[56].mxu0  ;;  %v16538_v26 = vpop.f32.mrb[56].mxu1  ;;  %v11876_v4 = vmax.f32 %v11588_v18, 0.0  ;;  %v11589_v50 = vadd.f32 %v20690_v40, %v11294_v9  ;;  %v24212_v13 = vmax.f32 %v24210_v38, %v24211_v17  ;;  %v11577_v34 = vadd.f32 %v20690_v40, %v20655_v20  ;;  %v17846_v20 = vld [vmem:[%s18048_s22 + $0x8a0] sm:$0xff]  }
 0x35a   : > { %v7305_v5 = vpop.f32.mrb[57].mxu0  ;;  %v11011_v12 = vmax.f32 %v16246_v51, %v16538_v26  ;;  %v9930_v16 = vpop.f32.mrb[57].mxu1  ;;  %v20758_v25 = vpack.i.bf16 %v11878_v31, %v11860_v29  ;;  %v11879_v8 = vmax.f32 %v11591_v24, 0.0  ;;  %v24215_v44 = vmax.f32 %v24213_v63, %v24214_v41  ;;  %v17850_v41 = vld [vmem:[%s18048_s22 + $0x8b0] sm:$0xff]  }
 0x35b   : > { %v16247_v19 = vpop.f32.mrb[58].mxu0  ;;  %v11009_v10 = vmax.f32 %v7305_v5, %v9930_v16  ;;  %v16539_v52 = vpop.f32.mrb[58].mxu1  ;;  %v16838_v56 = vpack.i.bf16 %v11876_v4, %v11858_v32  ;;  %v11877_v28 = vmax.f32 %v11589_v50, 0.0  ;;  %v11862_v18 = vmax.f32 %v11574_v48, 0.0  ;;  %v17848_v16 = vld [vmem:[%s18048_s22 + $0x8a8] sm:$0xff]  }
 0x35c   : > { %v7308_v57 = vpop.f32.mrb[59].mxu0  ;;  %v11299_v39 = vmax.f32 %v24206_v37, %v11011_v12  ;;  %v11012_v15 = vmax.f32 %v16247_v19, %v16539_v52  ;;  %v9933_v11 = vpop.f32.mrb[59].mxu1  ;;  %v20766_v42 = vpack.i.bf16 %v11879_v8, %v11861_v27  ;;  %v11864_v51 = vmax.f32 %v11576_v60, 0.0  ;;  %v17847_v12 = vld [vmem:[%s18048_s22 + $0x8e8] sm:$0xff]   ;;  %v17849_v52 = vld [vmem:[%s18048_s22 + $0x8f0] sm:$0xff]  }
 0x35d   : > { %v11297_v43 = vmax.f32 %v24209_v59, %v11009_v10  ;;  %v11010_v46 = vmax.f32 %v7308_v57, %v9933_v11  ;;  %16839 = vxpose.xlu0.b32.cont [3/16] (narrow) %v16838_v56, 32  ;;  %v16840_v49 = vpack.i.bf16 %v11877_v28, %v11859_v0  ;;  %v11863_v4 = vmax.f32 %v11575_v58, 0.0  ;;  %v24219_v11 = vld [vmem:[#allocation14_spill] sm:$0xff]  ;;  %v24220_v60 = vld [vmem:[#allocation15_spill] sm:$0xff] }
 0x35e   : > { %16353 = vmatmul.mubr.msk.bf16.gmra.mrb[164].mxu0 %vm1204_vm0, %v17842_v7  ;;  %v11300_v3 = vmax.f32 %v24212_v13, %v11012_v15  ;;  %16645 = vmatmul.mubr.msk.bf16.gmra.mrb[164].mxu1 %vm1204_vm0, %v17843_v53  ;;  %v11594_v22 = vadd.f32 %v20690_v40, %v11299_v39  ;;  %v11578_v7 = vadd.f32 %v20690_v40, %v20637_v14  ;;  %v11865_v53 = vmax.f32 %v11577_v34, 0.0  ;;  %v24217_v14 = vld [vmem:[#allocation13_spill] sm:$0xff]  ;;  %v24225_v13 = vld [vmem:[#allocation18_spill] sm:$0xff] }
 0x35f   : > { %16356 = vmatprep.mubr.msk.bf16.mxu0 %vm1204_vm0, %v17844_v55  ;;  %v11298_v21 = vmax.f32 %v24215_v44, %v11010_v46  ;;  %16648 = vmatprep.mubr.msk.bf16.mxu1 %vm1204_vm0, %v17845_v35  ;;  %v11592_v23 = vadd.f32 %v20690_v40, %v11297_v43  ;;  %v11579_v28 = vadd.f32 %v20690_v40, %v20648_v47  ;;  %v24216_v35 = vld [vmem:[#allocation12_spill] sm:$0xff]  ;;  %v24223_v46 = vld [vmem:[#allocation17_spill] sm:$0xff] }
 0x360   : > { %v11882_v32 = vmax.f32 %v11594_v22, 0.0  ;;  %v11595_v29 = vadd.f32 %v20690_v40, %v11300_v3  ;;  %v24218_v58 = vmax.f32 %v24216_v35, %v24217_v14  ;;  %v11580_v15 = vadd.f32 %v20690_v40, %v20670_v54  ;;  %v24222_v43 = vld [vmem:[#allocation16_spill] sm:$0xff]  ;;  %v24226_v3 = vld [vmem:[#allocation19_spill] sm:$0xff] }
 0x361   : > { %v16250_v9 = vpop.f32.mrb[60].mxu0  ;;  %v16542_v31 = vpop.f32.mrb[60].mxu1  ;;  %16841 = vxpose.xlu0.b32.cont [4/16] (narrow) %v16840_v49, 32  ;;  %v11880_v26 = vmax.f32 %v11592_v23, 0.0  ;;  %v11593_v5 = vadd.f32 %v20690_v40, %v11298_v21  ;;  %v24221_v6 = vmax.f32 %v24219_v11, %v24220_v60  ;;  %v24224_v49 = vmax.f32 %v24222_v43, %v24223_v46  ;;  %v24234_v11 = vld [vmem:[#allocation24_spill] sm:$0xff]  ;;  %v24235_v60 = vld [vmem:[#allocation25_spill] sm:$0xff] }
 0x362   : > { %v7321_v24 = vpop.f32.mrb[61].mxu0  ;;  %v11015_v50 = vmax.f32 %v16250_v9, %v16542_v31  ;;  %v9946_v0 = vpop.f32.mrb[61].mxu1  ;;  %v20794_v19 = vpack.i.bf16 %v11882_v32, %v11864_v51  ;;  %v11883_v55 = vmax.f32 %v11595_v29, 0.0  ;;  %v11581_v17 = vadd.f32 %v20690_v40, %v20683_v36  ;;  %v24237_v43 = vld [vmem:[#allocation26_spill] sm:$0xff] }
 0x363   : > { %v16251_v48 = vpop.f32.mrb[62].mxu0  ;;  %v11013_v27 = vmax.f32 %v7321_v24, %v9946_v0  ;;  %v16543_v8 = vpop.f32.mrb[62].mxu1  ;;  %v16846_v57 = vpack.i.bf16 %v11880_v26, %v11862_v18  ;;  %v11881_v56 = vmax.f32 %v11593_v5, 0.0  ;;  %v24227_v22 = vmax.f32 %v24225_v13, %v24226_v3  ;;  %v17851_v26 = vld [vmem:[%s18048_s22 + $0x8f8] sm:$0xff]   ;;  %v17852_v5 = vld [vmem:[%s18048_s22 + $0x990] sm:$0xff]  }
 0x364   : > { %v7324_v10 = vpop.f32.mrb[63].mxu0  ;;  %v11303_v33 = vmax.f32 %v24218_v58, %v11015_v50  ;;  %v11016_v62 = vmax.f32 %v16251_v48, %v16543_v8  ;;  %v9949_v37 = vpop.f32.mrb[63].mxu1  ;;  %v20802_v39 = vpack.i.bf16 %v11883_v55, %v11865_v53  ;;  %v11868_v44 = vmax.f32 %v11580_v15, 0.0  ;;  %v24229_v8 = vld [vmem:[#allocation21_spill] sm:$0xff]  ;;  %v24231_v58 = vld [vmem:[#allocation22_spill] sm:$0xff] }
 0x365   : > { %v11301_v45 = vmax.f32 %v24221_v6, %v11013_v27  ;;  %v11014_v59 = vmax.f32 %v7324_v10, %v9949_v37  ;;  %16843 = vxpose.xlu0.b32.cont [5/16] (narrow) %v20758_v25, 32  ;;  %v16848_v47 = vpack.i.bf16 %v11881_v56, %v11863_v4  ;;  %v11866_v18 = vmax.f32 %v11578_v7, 0.0  ;;  %v24228_v27 = vld [vmem:[#allocation20_spill] sm:$0xff] }
 0x366   : > { %16357 = vmatmul.mubr.msk.bf16.gmra.mrb[168].mxu0 %vm1204_vm0, %v17846_v20  ;;  %v11304_v38 = vmax.f32 %v24224_v49, %v11016_v62  ;;  %16649 = vmatmul.mubr.msk.bf16.gmra.mrb[168].mxu1 %vm1204_vm0, %v17847_v12  ;;  %v11598_v54 = vadd.f32 %v20690_v40, %v11303_v33  ;;  %v11867_v29 = vmax.f32 %v11579_v28, 0.0  ;;  %v11869_v50 = vmax.f32 %v11581_v17, 0.0  ;;  %v24232_v33 = vld [vmem:[#allocation23_spill] sm:$0xff] }
 0x367   : > { %16360 = vmatprep.mubr.msk.bf16.mxu0 %vm1204_vm0, %v17848_v16  ;;  %v11302_v25 = vmax.f32 %v24227_v22, %v11014_v59  ;;  %16652 = vmatprep.mubr.msk.bf16.mxu1 %vm1204_vm0, %v17849_v52  ;;  %v11596_v34 = vadd.f32 %v20690_v40, %v11301_v45  ;;  %v11582_v55 = vadd.f32 %v20690_v40, %v20665_v30 }
 0x368   : > { %v11886_v21 = vmax.f32 %v11598_v54, 0.0  ;;  %v11599_v23 = vadd.f32 %v20690_v40, %v11304_v38  ;;  %v24230_v10 = vmax.f32 %v24228_v27, %v24229_v8  ;;  %v11584_v35 = vadd.f32 %v20690_v40, %v20704_v1  ;;  %v24244_v27 = vld [vmem:[#allocation31_spill] sm:$0xff] }
 0x369   : > { %v16254_v63 = vpop.f32.mrb[64].mxu0  ;;  %v16546_v9 = vpop.f32.mrb[64].mxu1  ;;  %16845 = vxpose.xlu0.b32.cont [6/16] (narrow) %v20766_v42, 32  ;;  %v11884_v51 = vmax.f32 %v11596_v34, 0.0  ;;  %v11597_v32 = vadd.f32 %v20690_v40, %v11302_v25  ;;  %v17853_v42 = vld [vmem:[%s18048_s22 + $0x9d8] sm:$0xff]   ;;  %v24233_v62 = vmax.f32 %v24231_v58, %v24232_v33  ;;  %v24236_v6 = vmax.f32 %v24234_v11, %v24235_v60 }
 0x36a   : > { %v7337_v36 = vpop.f32.mrb[65].mxu0  ;;  %v11019_v31 = vmax.f32 %v16254_v63, %v16546_v9  ;;  %v9962_v24 = vpop.f32.mrb[65].mxu1  ;;  %v20830_v4 = vpack.i.bf16 %v11886_v21, %v11868_v44  ;;  %v11887_v0 = vmax.f32 %v11599_v23, 0.0  ;;  %v11585_v59 = vadd.f32 %v20690_v40, %v20717_v2  ;;  %v17854_v34 = vld [vmem:[%s18048_s22 + $0x998] sm:$0xff]  }
 0x36b   : > { %v16255_v20 = vpop.f32.mrb[66].mxu0  ;;  %v11017_v48 = vmax.f32 %v7337_v36, %v9962_v24  ;;  %v16547_v12 = vpop.f32.mrb[66].mxu1  ;;  %v20833_v53 = vpack.i.bf16 %v11884_v51, %v11866_v18  ;;  %v11885_v7 = vmax.f32 %v11597_v32, 0.0  ;;  %v11583_v54 = vadd.f32 %v20690_v40, %v20676_v61  ;;  %v17855_v36 = vld [vmem:[%s18048_s22 + $0x9e0] sm:$0xff]  }
 0x36c   : > { %v7340_v16 = vpop.f32.mrb[67].mxu0  ;;  %v11307_v52 = vmax.f32 %v24230_v10, %v11019_v31  ;;  %v11020_v56 = vmax.f32 %v16255_v20, %v16547_v12  ;;  %v9965_v28 = vpop.f32.mrb[67].mxu1  ;;  %v20842_v14 = vpack.i.bf16 %v11887_v0, %v11869_v50  ;;  %v11872_v13 = vmax.f32 %v11584_v35, 0.0  ;;  %v17856_v32 = vld [vmem:[%s18048_s22 + $0x9a0] sm:$0xff]   ;;  %v17857_v20 = vld [vmem:[%s18048_s22 + $0x9e8] sm:$0xff]   ;;  %v24240_v50 = vld [vmem:[#allocation28_spill] sm:$0xff] }
 0x36d   : > { %v11305_v37 = vmax.f32 %v24233_v62, %v11017_v48  ;;  %v11018_v15 = vmax.f32 %v7340_v16, %v9965_v28  ;;  %16847 = vxpose.xlu0.b32.cont [7/16] (narrow) %v16846_v57, 32  ;;  %v20848_v30 = vpack.i.bf16 %v11885_v7, %v11867_v29  ;;  %v24238_v57 = vld [vmem:[#allocation27_spill] sm:$0xff]  ;;  %v11870_v63 = vmax.f32 %v11582_v55, 0.0  ;;  %v24241_v0 = vld [vmem:[#allocation29_spill] sm:$0xff]  ;;  %v24243_v55 = vld [vmem:[#allocation30_spill] sm:$0xff] }
 0x36e   : > { %16361 = vmatmul.mubr.msk.bf16.gmra.mrb[172].mxu0 %vm1204_vm0, %v17850_v41  ;;  %v11308_v45 = vmax.f32 %v24236_v6, %v11020_v56  ;;  %16653 = vmatmul.mubr.msk.bf16.gmra.mrb[172].mxu1 %vm1204_vm0, %v17851_v26  ;;  %v11602_v1 = vadd.f32 %v20690_v40, %v11307_v52  ;;  %v24239_v46 = vmax.f32 %v24237_v43, %v24238_v57  ;;  %v11873_v18 = vmax.f32 %v11585_v59, 0.0  ;;  %v24246_v28 = vld [vmem:[#allocation32_spill] sm:$0xff]  ;;  %v24247_v35 = vld [vmem:[#allocation33_spill] sm:$0xff]  ;;  %v24249_v62 = vld [vmem:[#allocation34_spill] sm:$0xff] }
 0x36f   : > { %16364 = vmatprep.mubr.msk.bf16.mxu0 %vm1204_vm0, %v17852_v5  ;;  %16656 = vmatprep.mubr.msk.bf16.mxu1 %vm1204_vm0, %v17853_v42  ;;  %v11600_v38 = vadd.f32 %v20690_v40, %v11305_v37  ;;  %v11871_v26 = vmax.f32 %v11583_v54, 0.0  ;;  %v24242_v48 = vmax.f32 %v24240_v50, %v24241_v0  ;;  %v24245_v8 = vmax.f32 %v24243_v55, %v24244_v27  ;;  %v24250_v37 = vld [vmem:[#allocation35_spill] sm:$0xff]  ;;  %v17859_v57 = vld [vmem:[%s18048_s22 + $0x9f0] sm:$0xff]   ;;  %v17863_v0 = vld [vmem:[%s18048_s22 + $0xa00] sm:$0xff]  }
 0x370   : > { %v11306_v49 = vmax.f32 %v24239_v46, %v11018_v15  ;;  %v11890_v3 = vmax.f32 %v11602_v1, 0.0  ;;  %v11603_v22 = vadd.f32 %v20690_v40, %v11308_v45  ;;  %v24248_v58 = vmax.f32 %v24246_v28, %v24247_v35  ;;  %v17858_v45 = vld [vmem:[%s18048_s22 + $0x9a8] sm:$0xff]   ;;  %v17860_v46 = vld [vmem:[%s18048_s22 + $0x9b0] sm:$0xff]  }
 0x371   : > { %v16258_v17 = vpop.f32.mrb[68].mxu0  ;;  %v16550_v25 = vpop.f32.mrb[68].mxu1  ;;  %16849 = vxpose.xlu0.b32.cont [8/16] (narrow) %v16848_v47, 32  ;;  %v11888_v41 = vmax.f32 %v11600_v38, 0.0  ;;  %v24251_v15 = vmax.f32 %v24249_v62, %v24250_v37  ;;  %v17865_v55 = vld [vmem:[%s18048_s22 + $0xa08] sm:$0xff]   ;;  %v24264_v27 = vld [vmem:[#allocation44_spill] sm:$0xff] }
 0x372   : > { %v7353_v2 = vpop.f32.mrb[69].mxu0  ;;  %v11601_v44 = vadd.f32 %v20690_v40, %v11306_v49  ;;  %v11023_v21 = vmax.f32 %v16258_v17, %v16550_v25  ;;  %v9978_v23 = vpop.f32.mrb[69].mxu1  ;;  %v16810_v61 = vpack.i.bf16 %v11890_v3, %v11872_v13  ;;  %v11891_v51 = vmax.f32 %v11603_v22, 0.0  ;;  %v17861_v17 = vld [vmem:[%s18048_s22 + $0x9f8] sm:$0xff]   ;;  %v24252_v13 = vld [vmem:[#allocation36_spill] sm:$0xff]  ;;  %v24268_v62 = vld [vmem:[#allocation47_spill] sm:$0xff] }
 0x373   : > { %v16259_v9 = vpop.f32.mrb[70].mxu0  ;;  %v11021_v29 = vmax.f32 %v7353_v2, %v9978_v23  ;;  %v16551_v31 = vpop.f32.mrb[70].mxu1  ;;  %v20871_v47 = vpack.i.bf16 %v11888_v41, %v11870_v63  ;;  %v24253_v3 = vld [vmem:[#allocation37_spill] sm:$0xff]  ;;  %v24256_v63 = vld [vmem:[#allocation39_spill] sm:$0xff]  ;;  %v24258_v23 = vld [vmem:[#allocation40_spill] sm:$0xff] }
 0x374   : > { %v7356_v24 = vpop.f32.mrb[71].mxu0  ;;  %v11889_v5 = vmax.f32 %v11601_v44, 0.0  ;;  %v20876_v12 = vmax.f32 %v24242_v48, %v11023_v21  ;;  %v11024_v16 = vmax.f32 %v16259_v9, %v16551_v31  ;;  %v9981_v42 = vpop.f32.mrb[71].mxu1  ;;  %16811 = vxpose.xlu1.b32.start [1/2] (short) (narrow) %v16810_v61, 32  ;;  %v16812_v7 = vpack.i.bf16 %v11891_v51, %v11873_v18  ;;  %v24259_v9 = vld [vmem:[#allocation41_spill] sm:$0xff]  ;;  %v24261_v18 = vld [vmem:[#allocation42_spill] sm:$0xff] }
 0x375   : > { %v20881_v10 = vmax.f32 %v24245_v8, %v11021_v29  ;;  %v11022_v52 = vmax.f32 %v7356_v24, %v9981_v42  ;;  %16851 = vxpose.xlu0.b32.cont [9/16] (narrow) %v20794_v19, 32  ;;  %v24254_v22 = vmax.f32 %v24252_v13, %v24253_v3  ;;  %v24260_v61 = vmax.f32 %v24258_v23, %v24259_v9  ;;  %v24262_v51 = vld [vmem:[#allocation43_spill] sm:$0xff]  ;;  %v17864_v48 = vld [vmem:[%s18048_s22 + $0x9c0] sm:$0xff]   ;;  %v24265_v8 = vld [vmem:[#allocation45_spill] sm:$0xff] }
 0x376   : > { %16365 = vmatmul.mubr.msk.bf16.gmra.mrb[176].mxu0 %vm1204_vm0, %v17854_v34  ;;  %v20885_v56 = vpack.i.bf16 %v11889_v5, %v11871_v26  ;;  %v20890_v33 = vmax.f32 %v24248_v58, %v11024_v16  ;;  %16657 = vmatmul.mubr.msk.bf16.gmra.mrb[176].mxu1 %vm1204_vm0, %v17855_v36  ;;  %v24277_v23 = vld [vmem:[#allocation53_spill] sm:$0xff] }
 0x377   : > { %16368 = vmatprep.mubr.msk.bf16.mxu0 %vm1204_vm0, %v17856_v32  ;;  %v20897_v11 = vmax.f32 %v24251_v15, %v11022_v52  ;;  %16660 = vmatprep.mubr.msk.bf16.mxu1 %vm1204_vm0, %v17857_v20  ;;  %v24263_v32 = vmax.f32 %v24261_v18, %v24262_v51  ;;  %v17862_v20 = vld [vmem:[%s18048_s22 + $0x9b8] sm:$0xff]   ;;  %v24266_v52 = vmax.f32 %v24264_v27, %v24265_v8  ;;  %v17870_v27 = vld [vmem:[%s18048_s22 + $0xab0] sm:$0xff]  }
 0x378   : > { %16813 = vxpose.xlu1.b32.end [2/2] (short) (narrow) %v16812_v7, 32 }
 0x379   : > { %v16262_v19 = vpop.f32.mrb[72].mxu0  ;;  %v16554_v60 = vpop.f32.mrb[72].mxu1  ;;  %16853 = vxpose.xlu0.b32.cont [10/16] (narrow) %v20802_v39, 32  ;;  %v24255_v39 = vld [vmem:[#allocation38_spill] sm:$0xff] }
 0x37a   : > { %v7369_v6 = vpop.f32.mrb[73].mxu0  ;;  %v11027_v1 = vmax.f32 %v16262_v19, %v16554_v60  ;;  %v9994_v59 = vpop.f32.mrb[73].mxu1  ;;  %v24257_v41 = vmax.f32 %v24255_v39, %v24256_v63  ;;  %v24270_v60 = vld [vmem:[#allocation48_spill] sm:$0xff] }
 0x37b   : > { %v16263_v43 = vpop.f32.mrb[74].mxu0  ;;  %v11025_v49 = vmax.f32 %v7369_v6, %v9994_v59  ;;  %v16555_v38 = vpop.f32.mrb[74].mxu1  ;;  %v24271_v6 = vld [vmem:[#allocation49_spill] sm:$0xff]  ;;  %v24273_v59 = vld [vmem:[#allocation50_spill] sm:$0xff] }
 0x37c   : > { %v7372_v54 = vpop.f32.mrb[75].mxu0  ;;  %v20908_v25 = vmax.f32 %v24254_v22, %v11027_v1  ;;  %v11028_v2 = vmax.f32 %v16263_v43, %v16555_v38  ;;  %v9997_v34 = vpop.f32.mrb[75].mxu1  ;;  %v24274_v43 = vld [vmem:[#allocation51_spill] sm:$0xff]  ;;  %v17867_v22 = vld [vmem:[%s18048_s22 + $0xa10] sm:$0xff]  }
 0x37d   : > { %v20913_v44 = vmax.f32 %v24257_v41, %v11025_v49  ;;  %v11026_v21 = vmax.f32 %v7372_v54, %v9997_v34  ;;  %16855 = vxpose.xlu0.b32.cont [11/16] (narrow) %v20833_v53, 32  ;;  %v17866_v54 = vld [vmem:[%s18048_s22 + $0x9c8] sm:$0xff]   ;;  %v17869_v41 = vld [vmem:[%s18048_s22 + $0xa18] sm:$0xff]  }
 0x37e   : > { %16369 = vmatmul.mubr.msk.bf16.gmra.mrb[180].mxu0 %vm1204_vm0, %v17858_v45  ;;  %v20920_v36 = vmax.f32 %v24260_v61, %v11028_v2  ;;  %16661 = vmatmul.mubr.msk.bf16.gmra.mrb[180].mxu1 %vm1204_vm0, %v17859_v57  ;;  %v24272_v45 = vmax.f32 %v24270_v60, %v24271_v6  ;;  %v24275_v57 = vmax.f32 %v24273_v59, %v24274_v43  ;;  %v17868_v2 = vld [vmem:[%s18048_s22 + $0x9d0] sm:$0xff]   ;;  %v17873_v60 = vld [vmem:[%s18048_s22 + $0xb00] sm:$0xff]  }
 0x37f   : > { %16372 = vmatprep.mubr.msk.bf16.mxu0 %vm1204_vm0, %v17860_v46  ;;  %v20927_v29 = vmax.f32 %v24263_v32, %v11026_v21  ;;  %16664 = vmatprep.mubr.msk.bf16.mxu1 %vm1204_vm0, %v17861_v17  ;;  %v24276_v21 = vld [vmem:[#allocation52_spill] sm:$0xff]  ;;  %v24280_v32 = vld [vmem:[#allocation55_spill] sm:$0xff] }
 0x380   : > { %v24278_v9 = vmax.f32 %v24276_v21, %v24277_v23  ;;  %v24288_v6 = vld [vmem:[#allocation60_spill] sm:$0xff] }
 0x381   : > { %v16266_v53 = vpop.f32.mrb[76].mxu0  ;;  %v16558_v31 = vpop.f32.mrb[76].mxu1  ;;  %16857 = vxpose.xlu0.b32.cont [12/16] (narrow) %v20848_v30, 32  ;;  %v24267_v30 = vld [vmem:[#allocation46_spill] sm:$0xff] }
 0x382   : > { %v7385_v24 = vpop.f32.mrb[77].mxu0  ;;  %v11031_v26 = vmax.f32 %v16266_v53, %v16558_v31  ;;  %v10010_v5 = vpop.f32.mrb[77].mxu1  ;;  %v24269_v37 = vmax.f32 %v24267_v30, %v24268_v62  ;;  %v17872_v30 = vld [vmem:[%s18048_s22 + $0xab8] sm:$0xff]  }
 0x383   : > { %v16267_v50 = vpop.f32.mrb[78].mxu0  ;;  %v11029_v16 = vmax.f32 %v7385_v24, %v10010_v5  ;;  %v16559_v42 = vpop.f32.mrb[78].mxu1 }
 0x384   : > { %v7388_v7 = vpop.f32.mrb[79].mxu0  ;;  %v20938_v28 = vmax.f32 %v24266_v52, %v11031_v26  ;;  %v11032_v35 = vmax.f32 %v16267_v50, %v16559_v42  ;;  %v10013_v58 = vpop.f32.mrb[79].mxu1  ;;  %v24283_v26 = vld [vmem:[#allocation57_spill] sm:$0xff] }
 0x385   : > { %v20943_v15 = vmax.f32 %v24269_v37, %v11029_v16  ;;  %v11030_v19 = vmax.f32 %v7388_v7, %v10013_v58  ;;  %16859 = vxpose.xlu0.b32.cont [13/16] (narrow) %v20830_v4, 32  ;;  %v17871_v58 = vld [vmem:[%s18048_s22 + $0xaf8] sm:$0xff]  }
 0x386   : > { %16373 = vmatmul.mubr.msk.bf16.gmra.mrb[184].mxu0 %vm1204_vm0, %v17862_v20  ;;  %v20950_v1 = vmax.f32 %v24272_v45, %v11032_v35  ;;  %16665 = vmatmul.mubr.msk.bf16.gmra.mrb[184].mxu1 %vm1204_vm0, %v17863_v0  ;;  %v24282_v20 = vld [vmem:[#allocation56_spill] sm:$0xff]  ;;  %v24285_v0 = vld [vmem:[#allocation58_spill] sm:$0xff]  ;;  %v24289_v45 = vld [vmem:[#allocation61_spill] sm:$0xff] }
 0x387   : > { %16376 = vmatprep.mubr.msk.bf16.mxu0 %vm1204_vm0, %v17864_v48  ;;  %v20957_v46 = vmax.f32 %v24275_v57, %v11030_v19  ;;  %16668 = vmatprep.mubr.msk.bf16.mxu1 %vm1204_vm0, %v17865_v55  ;;  %v24284_v5 = vmax.f32 %v24282_v20, %v24283_v26  ;;  %v24286_v48 = vld [vmem:[#allocation59_spill] sm:$0xff]  ;;  %v24290_v59 = vmax.f32 %v24288_v6, %v24289_v45 }
 0x388   : > { %v24287_v16 = vmax.f32 %v24285_v0, %v24286_v48  ;;  %v11607_v45 = vadd.f32 %v20690_v40, %v20890_v33 }
 0x389   : > { %v16270_v4 = vpop.f32.mrb[80].mxu0  ;;  %v16562_v49 = vpop.f32.mrb[80].mxu1  ;;  %16861 = vxpose.xlu0.b32.cont [14/16] (narrow) %v20842_v14, 32  ;;  %v24279_v14 = vld [vmem:[#allocation54_spill] sm:$0xff] }
 0x38a   : > { %v7401_v38 = vpop.f32.mrb[81].mxu0  ;;  %v11035_v17 = vmax.f32 %v16270_v4, %v16562_v49  ;;  %v10026_v13 = vpop.f32.mrb[81].mxu1  ;;  %v24281_v53 = vmax.f32 %v24279_v14, %v24280_v32  ;;  %v24291_v49 = vld [vmem:[#allocation62_spill] sm:$0xff] }
 0x38b   : > { %v16271_v3 = vpop.f32.mrb[82].mxu0  ;;  %v11033_v34 = vmax.f32 %v7401_v38, %v10026_v13  ;;  %v16563_v39 = vpop.f32.mrb[82].mxu1  ;;  %v24292_v38 = vld [vmem:[#allocation63_spill] sm:$0xff] }
 0x38c   : > { %v7404_v63 = vpop.f32.mrb[83].mxu0  ;;  %v20968_v61 = vmax.f32 %v24278_v9, %v11035_v17  ;;  %v11036_v18 = vmax.f32 %v16271_v3, %v16563_v39  ;;  %v10029_v51 = vpop.f32.mrb[83].mxu1  ;;  %v11605_v3 = vadd.f32 %v20690_v40, %v20897_v11 }
 0x38d   : > { %v20973_v31 = vmax.f32 %v24281_v53, %v11033_v34  ;;  %v11034_v24 = vmax.f32 %v7404_v63, %v10029_v51  ;;  %16863 = vxpose.xlu0.b32.cont [15/16] (narrow) %v20871_v47, 32  ;;  %v24297_v63 = vld [vmem:[#allocation66_spill] sm:$0xff] }
 0x38e   : > { %16377 = vmatmul.mubr.msk.bf16.gmra.mrb[188].mxu0 %vm1204_vm0, %v17866_v54  ;;  %v20980_v50 = vmax.f32 %v24284_v5, %v11036_v18  ;;  %16669 = vmatmul.mubr.msk.bf16.gmra.mrb[188].mxu1 %vm1204_vm0, %v17867_v22  ;;  %v24293_v54 = vmax.f32 %v24291_v49, %v24292_v38  ;;  %v24294_v22 = vld [vmem:[#allocation64_spill] sm:$0xff]  ;;  %v17874_v53 = vld [vmem:[%s18048_s22 + $0xac0] sm:$0xff]   ;;  %v24307_v38 = vld [vmem:[#allocation73_spill] sm:$0xff] }
 0x38f   : > { %16380 = vmatprep.mubr.msk.bf16.mxu0 %vm1204_vm0, %v17868_v2  ;;  %v20987_v42 = vmax.f32 %v24287_v16, %v11034_v24  ;;  %16672 = vmatprep.mubr.msk.bf16.mxu1 %vm1204_vm0, %v17869_v41  ;;  %v24295_v2 = vld [vmem:[#allocation65_spill] sm:$0xff]  ;;  %v24298_v41 = vld [vmem:[#allocation67_spill] sm:$0xff]  ;;  %v11893_v24 = vmax.f32 %v11605_v3, 0.0  ;;  %v24306_v49 = vld [vmem:[#allocation72_spill] sm:$0xff] }
 0x390   : > { %v24296_v34 = vmax.f32 %v24294_v22, %v24295_v2  ;;  %v24299_v21 = vmax.f32 %v24297_v63, %v24298_v41  ;;  %v17875_v16 = vld [vmem:[%s18048_s22 + $0xb08] sm:$0xff]   ;;  %v24309_v3 = vld [vmem:[#allocation74_spill] sm:$0xff] }
 0x391   : > { %v16274_v47 = vpop.f32.mrb[84].mxu0  ;;  %v16566_v7 = vpop.f32.mrb[84].mxu1  ;;  %16865 = vxpose.xlu0.b32.end [16/16] (narrow) %v20885_v56, 32  ;;  %v11604_v56 = vadd.f32 %v20690_v40, %v20881_v10  ;;  %v24310_v22 = vld [vmem:[#allocation75_spill] sm:$0xff] }
 0x392   : > { %v7417_v55 = vpop.f32.mrb[85].mxu0  ;;  %v11039_v8 = vmax.f32 %v16274_v47, %v16566_v7  ;;  %v10042_v52 = vpop.f32.mrb[85].mxu1  ;;  %v17876_v47 = vld [vmem:[%s18048_s22 + $0xac8] sm:$0xff]   ;;  %v11606_v7 = vadd.f32 %v20690_v40, %v20876_v12  ;;  %v24311_v2 = vmax.f32 %v24309_v3, %v24310_v22 }
 0x393   : > { %v16275_v35 = vpop.f32.mrb[86].mxu0  ;;  %v11037_v62 = vmax.f32 %v7417_v55, %v10042_v52  ;;  %v16567_v37 = vpop.f32.mrb[86].mxu1  ;;  %v11892_v18 = vmax.f32 %v11604_v56, 0.0  ;;  %v17877_v52 = vld [vmem:[%s18048_s22 + $0xb10] sm:$0xff]   ;;  %v24304_v12 = vld [vmem:[#allocation71_spill] sm:$0xff] }
 0x394   : > { %v7420_v19 = vpop.f32.mrb[87].mxu0  ;;  %v11327_v43 = vmax.f32 %v24290_v59, %v11039_v8  ;;  %v11040_v57 = vmax.f32 %v16275_v35, %v16567_v37  ;;  %v10045_v4 = vpop.f32.mrb[87].mxu1  ;;  %v11608_v35 = vadd.f32 %v20690_v40, %v20913_v44  ;;  %v24303_v59 = vld [vmem:[#allocation70_spill] sm:$0xff]  ;;  %v11609_v44 = vadd.f32 %v20690_v40, %v20927_v29 }
 0x395   : > { %v21003_v17 = vmax.f32 %v24293_v54, %v11037_v62  ;;  %v11038_v13 = vmax.f32 %v7420_v19, %v10045_v4  ;;  %v24308_v54 = vmax.f32 %v24306_v49, %v24307_v38  ;;  %v11894_v29 = vmax.f32 %v11606_v7, 0.0 }
 0x396   : > { %16381 = vmatmul.mubr.msk.bf16.gmra.mrb[192].mxu0 %vm1204_vm0, %v17870_v27  ;;  %v11328_v39 = vmax.f32 %v24296_v34, %v11040_v57  ;;  %16673 = vmatmul.mubr.msk.bf16.gmra.mrb[192].mxu1 %vm1204_vm0, %v17871_v58  ;;  %v11622_v10 = vadd.f32 %v20690_v40, %v11327_v43  ;;  %v24300_v58 = vld [vmem:[#allocation68_spill] sm:$0xff]  ;;  %v24305_v43 = vmax.f32 %v24303_v59, %v24304_v12 }
 0x397   : > { %16384 = vmatprep.mubr.msk.bf16.mxu0 %vm1204_vm0, %v17872_v30  ;;  %v21017_v23 = vmax.f32 %v24299_v21, %v11038_v13  ;;  %16676 = vmatprep.mubr.msk.bf16.mxu1 %vm1204_vm0, %v17873_v60  ;;  %v24301_v30 = vld [vmem:[#allocation69_spill] sm:$0xff]  ;;  %v11895_v21 = vmax.f32 %v11607_v45, 0.0  ;;  %v24315_v45 = vld [vmem:[#allocation78_spill] sm:$0xff] }
 0x398   : > { %v11623_v11 = vadd.f32 %v20690_v40, %v11328_v39  ;;  %v11910_v51 = vmax.f32 %v11622_v10, 0.0  ;;  %v24302_v62 = vmax.f32 %v24300_v58, %v24301_v30  ;;  %v11896_v39 = vmax.f32 %v11608_v35, 0.0  ;;  %v24312_v58 = vld [vmem:[#allocation76_spill] sm:$0xff]  ;;  %v24313_v30 = vld [vmem:[#allocation77_spill] sm:$0xff] }
 0x399   : > { %v16278_v9 = vpop.f32.mrb[88].mxu0  ;;  %v16570_v14 = vpop.f32.mrb[88].mxu1  ;;  %v11612_v35 = vadd.f32 %v20690_v40, %v20943_v15  ;;  %v11613_v15 = vadd.f32 %v20690_v40, %v20957_v46 }
 0x39a   : > { %v7433_v32 = vpop.f32.mrb[89].mxu0  ;;  %v11911_v20 = vmax.f32 %v11623_v11, 0.0  ;;  %v11043_v26 = vmax.f32 %v16278_v9, %v16570_v14  ;;  %v10058_v5 = vpop.f32.mrb[89].mxu1  ;;  %v16910_v48 = vpack.i.bf16 %v11910_v51, %v11892_v18  ;;  %v21054_v11 = vadd.f32 %v20690_v40, %v20908_v25 }
 0x39b   : > { %v16279_v0 = vpop.f32.mrb[90].mxu0  ;;  %v11041_v55 = vmax.f32 %v7433_v32, %v10058_v5  ;;  %v16571_v27 = vpop.f32.mrb[90].mxu1  ;;  %v17878_v32 = vld [vmem:[%s18048_s22 + $0xad0] sm:$0xff]  }
 0x39c   : > { %v7436_v8 = vpop.f32.mrb[91].mxu0  ;;  %v11331_v37 = vmax.f32 %v24302_v62, %v11043_v26  ;;  %v11044_v19 = vmax.f32 %v16279_v0, %v16571_v27  ;;  %v10061_v60 = vpop.f32.mrb[91].mxu1  ;;  %16911 = vxpose.xlu1.b32.start [1/16] (narrow) %v16910_v48, 32  ;;  %v16912_v6 = vpack.i.bf16 %v11911_v20, %v11893_v24  ;;  %v17879_v0 = vld [vmem:[%s18048_s22 + $0xb18] sm:$0xff]   ;;  %v24314_v62 = vmax.f32 %v24312_v58, %v24313_v30 }
 0x39d   : > { %v11329_v57 = vmax.f32 %v24305_v43, %v11041_v55  ;;  %v11042_v4 = vmax.f32 %v7436_v8, %v10061_v60  ;;  %v17880_v48 = vld [vmem:[%s18048_s22 + $0xad8] sm:$0xff]   ;;  %v11898_v46 = vmax.f32 %v21054_v11, 0.0 }
 0x39e   : > { %16385 = vmatmul.mubr.msk.bf16.gmra.mrb[196].mxu0 %vm1204_vm0, %v17874_v53  ;;  %v11626_v56 = vadd.f32 %v20690_v40, %v11331_v37  ;;  %v11332_v13 = vmax.f32 %v24308_v54, %v11044_v19  ;;  %16677 = vmatmul.mubr.msk.bf16.gmra.mrb[196].mxu1 %vm1204_vm0, %v17875_v16  ;;  %v11897_v53 = vmax.f32 %v11609_v44, 0.0  ;;  %v24318_v44 = vld [vmem:[#allocation80_spill] sm:$0xff] }
 0x39f   : > { %16388 = vmatprep.mubr.msk.bf16.mxu0 %vm1204_vm0, %v17876_v47  ;;  %v11624_v33 = vadd.f32 %v20690_v40, %v11329_v57  ;;  %v11330_v34 = vmax.f32 %v24311_v2, %v11042_v4  ;;  %16680 = vmatprep.mubr.msk.bf16.mxu1 %vm1204_vm0, %v17877_v52  ;;  %v21062_v47 = vadd.f32 %v20690_v40, %v20920_v36  ;;  %v17881_v52 = vld [vmem:[%s18048_s22 + $0xb20] sm:$0xff]   ;;  %v24316_v36 = vld [vmem:[#allocation79_spill] sm:$0xff]  ;;  %v11900_v2 = vmax.f32 %v11612_v35, 0.0 }
 0x3a0   : > { %v11914_v10 = vmax.f32 %v11626_v56, 0.0  ;;  %v11627_v63 = vadd.f32 %v20690_v40, %v11332_v13  ;;  %16913 = vxpose.xlu1.b32.cont [2/16] (narrow) %v16912_v6, 32  ;;  %v24317_v59 = vmax.f32 %v24315_v45, %v24316_v36  ;;  %v24319_v56 = vld [vmem:[#allocation81_spill] sm:$0xff]  ;;  %v24321_v13 = vld [vmem:[#allocation82_spill] sm:$0xff] }
 0x3a1   : > { %v16282_v41 = vpop.f32.mrb[92].mxu0  ;;  %v11912_v9 = vmax.f32 %v11624_v33, 0.0  ;;  %v11625_v18 = vadd.f32 %v20690_v40, %v11330_v34  ;;  %v16574_v51 = vpop.f32.mrb[92].mxu1  ;;  %v24320_v49 = vmax.f32 %v24318_v44, %v24319_v56  ;;  %v24322_v33 = vld [vmem:[#allocation83_spill] sm:$0xff] }
 0x3a2   : > { %v7449_v14 = vpop.f32.mrb[93].mxu0  ;;  %v11915_v24 = vmax.f32 %v11627_v63, 0.0  ;;  %v11047_v20 = vmax.f32 %v16282_v41, %v16574_v51  ;;  %v10074_v26 = vpop.f32.mrb[93].mxu1  ;;  %v16918_v16 = vpack.i.bf16 %v11914_v10, %v11896_v39  ;;  %v24323_v3 = vmax.f32 %v24321_v13, %v24322_v33  ;;  %v24334_v56 = vld [vmem:[#allocation91_spill] sm:$0xff] }
 0x3a3   : > { %v16283_v5 = vpop.f32.mrb[94].mxu0  ;;  %v11913_v25 = vmax.f32 %v11625_v18, 0.0  ;;  %v11045_v7 = vmax.f32 %v7449_v14, %v10074_v26  ;;  %v16575_v55 = vpop.f32.mrb[94].mxu1  ;;  %v16914_v8 = vpack.i.bf16 %v11912_v9, %v11894_v29  ;;  %v11899_v10 = vmax.f32 %v21062_v47, 0.0  ;;  %v17882_v18 = vld [vmem:[%s18048_s22 + $0xae0] sm:$0xff]   ;;  %v17884_v26 = vld [vmem:[%s18048_s22 + $0xae8] sm:$0xff]  }
 0x3a4   : > { %v7452_v27 = vpop.f32.mrb[95].mxu0  ;;  %v11335_v37 = vmax.f32 %v24314_v62, %v11047_v20  ;;  %v11048_v19 = vmax.f32 %v16283_v5, %v16575_v55  ;;  %v10077_v60 = vpop.f32.mrb[95].mxu1  ;;  %v21070_v6 = vpack.i.bf16 %v11915_v24, %v11897_v53  ;;  %v21094_v63 = vadd.f32 %v20690_v40, %v20938_v28  ;;  %v17883_v20 = vld [vmem:[%s18048_s22 + $0xb28] sm:$0xff]  }
 0x3a5   : > { %v11333_v12 = vmax.f32 %v24317_v59, %v11045_v7  ;;  %v11046_v43 = vmax.f32 %v7452_v27, %v10077_v60  ;;  %16915 = vxpose.xlu1.b32.cont [3/16] (narrow) %v16914_v8, 32  ;;  %v16916_v57 = vpack.i.bf16 %v11913_v25, %v11895_v21  ;;  %v11901_v51 = vmax.f32 %v11613_v15, 0.0  ;;  %v17885_v7 = vld [vmem:[%s18048_s22 + $0xb30] sm:$0xff]   ;;  %v24328_v60 = vld [vmem:[#allocation87_spill] sm:$0xff] }
 0x3a6   : > { %16389 = vmatmul.mubr.msk.bf16.gmra.mrb[200].mxu0 %vm1204_vm0, %v17878_v32  ;;  %v11630_v4 = vadd.f32 %v20690_v40, %v11335_v37  ;;  %v11336_v38 = vmax.f32 %v24320_v49, %v11048_v19  ;;  %16681 = vmatmul.mubr.msk.bf16.gmra.mrb[200].mxu1 %vm1204_vm0, %v17879_v0  ;;  %v11615_v28 = vadd.f32 %v20690_v40, %v20950_v1  ;;  %v24324_v8 = vld [vmem:[#allocation84_spill] sm:$0xff]  ;;  %v24327_v19 = vld [vmem:[#allocation86_spill] sm:$0xff] }
 0x3a7   : > { %16392 = vmatprep.mubr.msk.bf16.mxu0 %vm1204_vm0, %v17880_v48  ;;  %v11628_v54 = vadd.f32 %v20690_v40, %v11333_v12  ;;  %v11334_v22 = vmax.f32 %v24323_v3, %v11046_v43  ;;  %16684 = vmatprep.mubr.msk.bf16.mxu1 %vm1204_vm0, %v17881_v52  ;;  %v11616_v27 = vadd.f32 %v20690_v40, %v20973_v31  ;;  %v24325_v52 = vld [vmem:[#allocation85_spill] sm:$0xff]  ;;  %v24330_v43 = vld [vmem:[#allocation88_spill] sm:$0xff] }
 0x3a8   : > { %v11918_v34 = vmax.f32 %v11630_v4, 0.0  ;;  %v11631_v29 = vadd.f32 %v20690_v40, %v11336_v38  ;;  %v24326_v35 = vmax.f32 %v24324_v8, %v24325_v52  ;;  %v24329_v1 = vmax.f32 %v24327_v19, %v24328_v60  ;;  %v17886_v3 = vld [vmem:[%s18048_s22 + $0xaf0] sm:$0xff]   ;;  %v24339_v52 = vld [vmem:[#allocation94_spill] sm:$0xff]  ;;  %v24343_v60 = vld [vmem:[#allocation97_spill] sm:$0xff] }
 0x3a9   : > { %v16286_v39 = vpop.f32.mrb[96].mxu0  ;;  %v11916_v41 = vmax.f32 %v11628_v54, 0.0  ;;  %v11629_v21 = vadd.f32 %v20690_v40, %v11334_v22  ;;  %v16578_v9 = vpop.f32.mrb[96].mxu1  ;;  %16917 = vxpose.xlu1.b32.cont [4/16] (narrow) %v16916_v57, 32  ;;  %v11617_v31 = vadd.f32 %v20690_v40, %v20987_v42  ;;  %v24331_v57 = vld [vmem:[#allocation89_spill] sm:$0xff]  ;;  %v11904_v54 = vmax.f32 %v11616_v27, 0.0 }
 0x3aa   : > { %v7465_v11 = vpop.f32.mrb[97].mxu0  ;;  %v11919_v14 = vmax.f32 %v11631_v29, 0.0  ;;  %v11051_v32 = vmax.f32 %v16286_v39, %v16578_v9  ;;  %v10090_v53 = vpop.f32.mrb[97].mxu1  ;;  %v21100_v5 = vpack.i.bf16 %v11918_v34, %v11900_v2  ;;  %v24332_v15 = vmax.f32 %v24330_v43, %v24331_v57  ;;  %v21161_v19 = vld [vmem:[%s23116_s2] ss:$0 sm:$0xff]  ;;  %v24346_v43 = vld [vmem:[#allocation99_spill] sm:$0xff] }
 0x3ab   : > { %v16287_v24 = vpop.f32.mrb[98].mxu0  ;;  %v11917_v0 = vmax.f32 %v11629_v21, 0.0  ;;  %v11049_v48 = vmax.f32 %v7465_v11, %v10090_v53  ;;  %v16579_v47 = vpop.f32.mrb[98].mxu1  ;;  %v16922_v55 = vpack.i.bf16 %v11916_v41, %v11898_v46  ;;  %v11902_v22 = vmax.f32 %v21094_v63, 0.0 }
 0x3ac   : > { %v7468_v25 = vpop.f32.mrb[99].mxu0  ;;  %v11339_v58 = vmax.f32 %v24326_v35, %v11051_v32  ;;  %v11052_v30 = vmax.f32 %v16287_v24, %v16579_v47  ;;  %v10093_v62 = vpop.f32.mrb[99].mxu1  ;;  %v21110_v37 = vpack.i.bf16 %v11919_v14, %v11901_v51  ;;  %v11903_v46 = vmax.f32 %v11615_v28, 0.0  ;;  %v17888_v51 = vld [vmem:[%s18048_s22 + $0xbd0] sm:$0xff]  }
 0x3ad   : > { %v11337_v45 = vmax.f32 %v24329_v1, %v11049_v48  ;;  %v11050_v36 = vmax.f32 %v7468_v25, %v10093_v62  ;;  %16919 = vxpose.xlu1.b32.cont [5/16] (narrow) %v16918_v16, 32  ;;  %v21116_v59 = vpack.i.bf16 %v11917_v0, %v11899_v10  ;;  %v24333_v16 = vld [vmem:[#allocation90_spill] sm:$0xff]  ;;  %v11905_v10 = vmax.f32 %v11617_v31, 0.0  ;;  %v24337_v0 = vld [vmem:[#allocation93_spill] sm:$0xff] }
 0x3ae   : > { %16393 = vmatmul.mubr.msk.bf16.gmra.mrb[204].mxu0 %vm1204_vm0, %v17882_v18  ;;  %v11634_v12 = vadd.f32 %v20690_v40, %v11339_v58  ;;  %v11340_v4 = vmax.f32 %v24332_v15, %v11052_v30  ;;  %16685 = vmatmul.mubr.msk.bf16.gmra.mrb[204].mxu1 %vm1204_vm0, %v17883_v20  ;;  %v24335_v49 = vmax.f32 %v24333_v16, %v24334_v56  ;;  %v17887_v18 = vld [vmem:[%s18048_s22 + $0xb38] sm:$0xff]  }
 0x3af   : > { %16396 = vmatprep.mubr.msk.bf16.mxu0 %vm1204_vm0, %v17884_v26  ;;  %v11632_v44 = vadd.f32 %v20690_v40, %v11337_v45  ;;  %16688 = vmatprep.mubr.msk.bf16.mxu1 %vm1204_vm0, %v17885_v7  ;;  %v11618_v63 = vadd.f32 %v20690_v40, %v20968_v61  ;;  %v17889_v26 = vld [vmem:[%s18048_s22 + $0xc18] sm:$0xff]   ;;  %v11620_v27 = vadd.f32 %v20690_v40, %v21003_v17  ;;  %v24340_v61 = vld [vmem:[#allocation95_spill] sm:$0xff]  ;;  %v24342_v17 = vld [vmem:[#allocation96_spill] sm:$0xff] }
 0x3b0   : > { %v11338_v38 = vmax.f32 %v24335_v49, %v11050_v36  ;;  %v11922_v42 = vmax.f32 %v11634_v12, 0.0  ;;  %v11635_v13 = vadd.f32 %v20690_v40, %v11340_v4  ;;  %v24341_v35 = vmax.f32 %v24339_v52, %v24340_v61  ;;  %v24345_v12 = vld [vmem:[#allocation98_spill] sm:$0xff] }
 0x3b1   : > { %v16290_v33 = vpop.f32.mrb[100].mxu0  ;;  %v11920_v2 = vmax.f32 %v11632_v44, 0.0  ;;  %v16582_v29 = vpop.f32.mrb[100].mxu1  ;;  %16921 = vxpose.xlu1.b32.cont [6/16] (narrow) %v21070_v6, 32  ;;  %v24336_v6 = vld [vmem:[#allocation92_spill] sm:$0xff]  ;;  %v24344_v1 = vmax.f32 %v24342_v17, %v24343_v60  ;;  %v11619_v36 = vadd.f32 %v21161_v19, %v20980_v50  ;;  %v24347_v57 = vmax.f32 %v24345_v12, %v24346_v43 }
 0x3b2   : > { %v11633_v34 = vadd.f32 %v20690_v40, %v11338_v38  ;;  %v7481_v39 = vpop.f32.mrb[101].mxu0  ;;  %v11923_v41 = vmax.f32 %v11635_v13, 0.0  ;;  %v11055_v21 = vmax.f32 %v16290_v33, %v16582_v29  ;;  %v10106_v9 = vpop.f32.mrb[101].mxu1  ;;  %v21138_v14 = vpack.i.bf16 %v11922_v42, %v11904_v54  ;;  %v17890_v42 = vld [vmem:[%s18048_s22 + $0xbd8] sm:$0xff]   ;;  %v17892_v29 = vld [vmem:[%s18048_s22 + $0xbe0] sm:$0xff]   ;;  %v17896_v12 = vld [vmem:[%s18048_s22 + $0xbf0] sm:$0xff]  }
 0x3b3   : > { %v16291_v11 = vpop.f32.mrb[102].mxu0  ;;  %v11053_v53 = vmax.f32 %v7481_v39, %v10106_v9  ;;  %v16583_v24 = vpop.f32.mrb[102].mxu1  ;;  %v21143_v28 = vpack.i.bf16 %v11920_v2, %v11902_v22  ;;  %v24338_v48 = vmax.f32 %v24336_v6, %v24337_v0  ;;  %v11621_v40 = vadd.f32 %v21161_v19, %v21017_v23  ;;  %v24352_v6 = vld [vmem:[#allocation103_spill] sm:$0xff] }
 0x3b4   : > { %v11921_v32 = vmax.f32 %v11633_v34, 0.0  ;;  %v7484_v20 = vpop.f32.mrb[103].mxu0  ;;  %v11056_v25 = vmax.f32 %v16291_v11, %v16583_v24  ;;  %v10109_v7 = vpop.f32.mrb[103].mxu1  ;;  %v21150_v8 = vpack.i.bf16 %v11923_v41, %v11905_v10  ;;  %v11908_v44 = vmax.f32 %v11620_v27, 0.0  ;;  %v17891_v34 = vld [vmem:[%s18048_s22 + $0xc20] sm:$0xff]   ;;  %v17893_v11 = vld [vmem:[%s18048_s22 + $0xc28] sm:$0xff]  }
 0x3b5   : > { %v11343_v47 = vmax.f32 %v24338_v48, %v11055_v21  ;;  %v11341_v58 = vmax.f32 %v24341_v35, %v11053_v53  ;;  %v11054_v30 = vmax.f32 %v7484_v20, %v10109_v7  ;;  %16923 = vxpose.xlu1.b32.cont [7/16] (narrow) %v16922_v55, 32  ;;  %v11906_v56 = vmax.f32 %v11618_v63, 0.0  ;;  %v24354_v7 = vld [vmem:[#allocation104_spill] sm:$0xff]  ;;  %v24355_v27 = vld [vmem:[#allocation105_spill] sm:$0xff]  ;;  %v24357_v35 = vld [vmem:[#allocation106_spill] sm:$0xff] }
 0x3b6   : > { %16397 = vmatmul.mubr.msk.bf16.gmra.mrb[208].mxu0 %vm1204_vm0, %v17886_v3  ;;  %v21156_v62 = vpack.i.bf16 %v11921_v32, %v11903_v46  ;;  %v11344_v45 = vmax.f32 %v24344_v1, %v11056_v25  ;;  %16689 = vmatmul.mubr.msk.bf16.gmra.mrb[208].mxu1 %vm1204_vm0, %v17887_v18  ;;  %v11909_v13 = vmax.f32 %v11621_v40, 0.0  ;;  %v11907_v39 = vmax.f32 %v11619_v36, 0.0  ;;  %v17894_v1 = vld [vmem:[%s18048_s22 + $0xbe8] sm:$0xff]  }
 0x3b7   : > { %v11638_v55 = vadd.f32 %v21161_v19, %v11343_v47  ;;  %16400 = vmatprep.mubr.msk.bf16.mxu0 %vm1204_vm0, %v17888_v51  ;;  %v11636_v31 = vadd.f32 %v21161_v19, %v11341_v58  ;;  %v11342_v23 = vmax.f32 %v24347_v57, %v11054_v30  ;;  %16692 = vmatprep.mubr.msk.bf16.mxu1 %vm1204_vm0, %v17889_v26  ;;  %v24349_v51 = vld [vmem:[#allocation101_spill] sm:$0xff]  ;;  %v24351_v26 = vld [vmem:[#allocation102_spill] sm:$0xff]  ;;  %v24358_v58 = vld [vmem:[#allocation107_spill] sm:$0xff] }
 0x3b8   : > { %v11639_v15 = vadd.f32 %v21161_v19, %v11344_v45  ;;  %v24353_v0 = vmax.f32 %v24351_v26, %v24352_v6  ;;  %v24356_v52 = vmax.f32 %v24354_v7, %v24355_v27  ;;  %v24359_v30 = vmax.f32 %v24357_v35, %v24358_v58  ;;  %v17901_v26 = vld [vmem:[%s18048_s22 + $0xc48] sm:$0xff]   ;;  %v24372_v6 = vld [vmem:[#allocation116_spill] sm:$0xff] }
 0x3b9   : > { %v16294_v4 = vpop.f32.mrb[104].mxu0  ;;  %v11926_v16 = vmax.f32 %v11638_v55, 0.0  ;;  %v11924_v49 = vmax.f32 %v11636_v31, 0.0  ;;  %v11637_v38 = vadd.f32 %v21161_v19, %v11342_v23  ;;  %v16586_v50 = vpop.f32.mrb[104].mxu1  ;;  %16925 = vxpose.xlu1.b32.cont [8/16] (narrow) %v21116_v59, 32  ;;  %v24348_v59 = vld [vmem:[#allocation100_spill] sm:$0xff] }
 0x3ba   : > { %v7497_v54 = vpop.f32.mrb[105].mxu0  ;;  %v11927_v33 = vmax.f32 %v11639_v15, 0.0  ;;  %v11059_v3 = vmax.f32 %v16294_v4, %v16586_v50  ;;  %v10122_v22 = vpop.f32.mrb[105].mxu1  ;;  %v24350_v63 = vmax.f32 %v24348_v59, %v24349_v51  ;;  %v17895_v31 = vld [vmem:[%s18048_s22 + $0xc30] sm:$0xff]   ;;  %v17897_v15 = vld [vmem:[%s18048_s22 + $0xc38] sm:$0xff]   ;;  %v24364_v50 = vld [vmem:[#allocation111_spill] sm:$0xff] }
 0x3bb   : > { %v16295_v46 = vpop.f32.mrb[106].mxu0  ;;  %v16886_v2 = vpack.i.bf16 %v11926_v16, %v11908_v44  ;;  %v11925_v10 = vmax.f32 %v11637_v38, 0.0  ;;  %v11057_v41 = vmax.f32 %v7497_v54, %v10122_v22  ;;  %v16587_v21 = vpop.f32.mrb[106].mxu1  ;;  %v21185_v18 = vpack.i.bf16 %v11924_v49, %v11906_v56  ;;  %v24360_v4 = vld [vmem:[#allocation108_spill] sm:$0xff]  ;;  %v24361_v44 = vld [vmem:[#allocation109_spill] sm:$0xff]  ;;  %v17899_v51 = vld [vmem:[%s18048_s22 + $0xc40] sm:$0xff]  }
 0x3bc   : > { %v7500_v9 = vpop.f32.mrb[107].mxu0  ;;  %v21190_v32 = vmax.f32 %v24350_v63, %v11059_v3  ;;  %v11060_v53 = vmax.f32 %v16295_v46, %v16587_v21  ;;  %v10125_v24 = vpop.f32.mrb[107].mxu1  ;;  %v16888_v20 = vpack.i.bf16 %v11927_v33, %v11909_v13  ;;  %v24362_v16 = vmax.f32 %v24360_v4, %v24361_v44  ;;  %v24366_v33 = vld [vmem:[#allocation112_spill] sm:$0xff]  ;;  %v24367_v3 = vld [vmem:[#allocation113_spill] sm:$0xff]  ;;  %v17900_v63 = vld [vmem:[%s18048_s22 + $0xc00] sm:$0xff]  }
 0x3bd   : > { %16887 = vxpose.xlu0.b32.start [1/2] (short) (narrow) %v16886_v2, 32  ;;  %v21195_v48 = vmax.f32 %v24353_v0, %v11057_v41  ;;  %v11058_v47 = vmax.f32 %v7500_v9, %v10125_v24  ;;  %16927 = vxpose.xlu1.b32.cont [9/16] (narrow) %v21100_v5, 32  ;;  %v21199_v25 = vpack.i.bf16 %v11925_v10, %v11907_v39  ;;  %v24369_v2 = vld [vmem:[#allocation114_spill] sm:$0xff]  ;;  %v17898_v21 = vld [vmem:[%s18048_s22 + $0xbf8] sm:$0xff]   ;;  %v24376_v35 = vld [vmem:[#allocation119_spill] sm:$0xff] }
 0x3be   : > { %16401 = vmatmul.mubr.msk.bf16.gmra.mrb[212].mxu0 %vm1204_vm0, %v17890_v42  ;;  %v21204_v61 = vmax.f32 %v24356_v52, %v11060_v53  ;;  %16693 = vmatmul.mubr.msk.bf16.gmra.mrb[212].mxu1 %vm1204_vm0, %v17891_v34  ;;  %v24368_v22 = vmax.f32 %v24366_v33, %v24367_v3  ;;  %v24370_v34 = vld [vmem:[#allocation115_spill] sm:$0xff]  ;;  %v24373_v0 = vld [vmem:[#allocation117_spill] sm:$0xff] }
 0x3bf   : > { %16404 = vmatprep.mubr.msk.bf16.mxu0 %vm1204_vm0, %v17892_v29  ;;  %v21211_v40 = vmax.f32 %v24359_v30, %v11058_v47  ;;  %16696 = vmatprep.mubr.msk.bf16.mxu1 %vm1204_vm0, %v17893_v11  ;;  %v24371_v29 = vmax.f32 %v24369_v2, %v24370_v34  ;;  %v24374_v47 = vmax.f32 %v24372_v6, %v24373_v0  ;;  %v24385_v33 = vld [vmem:[#allocation125_spill] sm:$0xff]  ;;  %v17906_v6 = vld [vmem:[%s18048_s22 + $0xcf0] sm:$0xff]  }
 0x3c1   : > { %16889 = vxpose.xlu0.b32.end [2/2] (short) (narrow) %v16888_v20, 32  ;;  %v16298_v5 = vpop.f32.mrb[108].mxu0  ;;  %v16590_v17 = vpop.f32.mrb[108].mxu1  ;;  %16929 = vxpose.xlu1.b32.cont [10/16] (narrow) %v21110_v37, 32  ;;  %v24363_v37 = vld [vmem:[#allocation110_spill] sm:$0xff] }
 0x3c2   : > { %v7513_v60 = vpop.f32.mrb[109].mxu0  ;;  %v11063_v45 = vmax.f32 %v16298_v5, %v16590_v17  ;;  %v10138_v55 = vpop.f32.mrb[109].mxu1  ;;  %v24365_v54 = vmax.f32 %v24363_v37, %v24364_v50  ;;  %v24378_v17 = vld [vmem:[#allocation120_spill] sm:$0xff] }
 0x3c3   : > { %v16299_v36 = vpop.f32.mrb[110].mxu0  ;;  %v11061_v43 = vmax.f32 %v7513_v60, %v10138_v55  ;;  %v16591_v57 = vpop.f32.mrb[110].mxu1  ;;  %v24379_v60 = vld [vmem:[#allocation121_spill] sm:$0xff]  ;;  %v24381_v55 = vld [vmem:[#allocation122_spill] sm:$0xff] }
 0x3c4   : > { %v7516_v23 = vpop.f32.mrb[111].mxu0  ;;  %v21222_v56 = vmax.f32 %v24362_v16, %v11063_v45  ;;  %v11064_v49 = vmax.f32 %v16299_v36, %v16591_v57  ;;  %v10141_v38 = vpop.f32.mrb[111].mxu1  ;;  %v24382_v36 = vld [vmem:[#allocation123_spill] sm:$0xff]  ;;  %v17903_v16 = vld [vmem:[%s18048_s22 + $0xc50] sm:$0xff]  }
 0x3c5   : > { %v21227_v42 = vmax.f32 %v24365_v54, %v11061_v43  ;;  %v11062_v13 = vmax.f32 %v7516_v23, %v10141_v38  ;;  %16931 = vxpose.xlu1.b32.cont [11/16] (narrow) %v21143_v28, 32  ;;  %v17902_v23 = vld [vmem:[%s18048_s22 + $0xc08] sm:$0xff]   ;;  %v17905_v54 = vld [vmem:[%s18048_s22 + $0xc58] sm:$0xff]  }
 0x3c6   : > { %16405 = vmatmul.mubr.msk.bf16.gmra.mrb[216].mxu0 %vm1204_vm0, %v17894_v1  ;;  %v21234_v46 = vmax.f32 %v24368_v22, %v11064_v49  ;;  %16697 = vmatmul.mubr.msk.bf16.gmra.mrb[216].mxu1 %vm1204_vm0, %v17895_v31  ;;  %v24380_v1 = vmax.f32 %v24378_v17, %v24379_v60  ;;  %v24383_v31 = vmax.f32 %v24381_v55, %v24382_v36  ;;  %v17904_v49 = vld [vmem:[%s18048_s22 + $0xc10] sm:$0xff]   ;;  %v17909_v17 = vld [vmem:[%s18048_s22 + $0xd40] sm:$0xff]  }
 0x3c7   : > { %16408 = vmatprep.mubr.msk.bf16.mxu0 %vm1204_vm0, %v17896_v12  ;;  %v21241_v39 = vmax.f32 %v24371_v29, %v11062_v13  ;;  %16700 = vmatprep.mubr.msk.bf16.mxu1 %vm1204_vm0, %v17897_v15  ;;  %v24384_v13 = vld [vmem:[#allocation124_spill] sm:$0xff]  ;;  %v24388_v29 = vld [vmem:[#allocation127_spill] sm:$0xff] }
 0x3c8   : > { %v24386_v3 = vmax.f32 %v24384_v13, %v24385_v33  ;;  %v24396_v60 = vld [vmem:[#allocation132_spill] sm:$0xff] }
 0x3c9   : > { %v16302_v28 = vpop.f32.mrb[112].mxu0  ;;  %v16594_v10 = vpop.f32.mrb[112].mxu1  ;;  %16933 = vxpose.xlu1.b32.cont [12/16] (narrow) %v21156_v62, 32  ;;  %v24375_v62 = vld [vmem:[#allocation118_spill] sm:$0xff] }
 0x3ca   : > { %v7529_v41 = vpop.f32.mrb[113].mxu0  ;;  %v11067_v9 = vmax.f32 %v16302_v28, %v16594_v10  ;;  %v10154_v11 = vpop.f32.mrb[113].mxu1  ;;  %v24377_v58 = vmax.f32 %v24375_v62, %v24376_v35  ;;  %v17908_v62 = vld [vmem:[%s18048_s22 + $0xcf8] sm:$0xff]  }
 0x3cb   : > { %v16303_v59 = vpop.f32.mrb[114].mxu0  ;;  %v11065_v53 = vmax.f32 %v7529_v41, %v10154_v11  ;;  %v16595_v24 = vpop.f32.mrb[114].mxu1 }
 0x3cc   : > { %v7532_v20 = vpop.f32.mrb[115].mxu0  ;;  %v21252_v7 = vmax.f32 %v24374_v47, %v11067_v9  ;;  %v11068_v27 = vmax.f32 %v16303_v59, %v16595_v24  ;;  %v10157_v52 = vpop.f32.mrb[115].mxu1  ;;  %v24391_v9 = vld [vmem:[#allocation129_spill] sm:$0xff] }
 0x3cd   : > { %v21257_v30 = vmax.f32 %v24377_v58, %v11065_v53  ;;  %v11066_v5 = vmax.f32 %v7532_v20, %v10157_v52  ;;  %16935 = vxpose.xlu1.b32.cont [13/16] (narrow) %v21138_v14, 32  ;;  %v17907_v52 = vld [vmem:[%s18048_s22 + $0xd38] sm:$0xff]  }
 0x3ce   : > { %16409 = vmatmul.mubr.msk.bf16.gmra.mrb[220].mxu0 %vm1204_vm0, %v17898_v21  ;;  %v21264_v45 = vmax.f32 %v24380_v1, %v11068_v27  ;;  %16701 = vmatmul.mubr.msk.bf16.gmra.mrb[220].mxu1 %vm1204_vm0, %v17899_v51  ;;  %v24390_v21 = vld [vmem:[#allocation128_spill] sm:$0xff]  ;;  %v24393_v51 = vld [vmem:[#allocation130_spill] sm:$0xff]  ;;  %v24397_v1 = vld [vmem:[#allocation133_spill] sm:$0xff] }
 0x3cf   : > { %16412 = vmatprep.mubr.msk.bf16.mxu0 %vm1204_vm0, %v17900_v63  ;;  %v21271_v12 = vmax.f32 %v24383_v31, %v11066_v5  ;;  %16704 = vmatprep.mubr.msk.bf16.mxu1 %vm1204_vm0, %v17901_v26  ;;  %v24392_v11 = vmax.f32 %v24390_v21, %v24391_v9  ;;  %v24394_v63 = vld [vmem:[#allocation131_spill] sm:$0xff]  ;;  %v24398_v55 = vmax.f32 %v24396_v60, %v24397_v1 }
 0x3d0   : > { %v24395_v53 = vmax.f32 %v24393_v51, %v24394_v63  ;;  %v11643_v1 = vadd.f32 %v21161_v19, %v21204_v61 }
 0x3d1   : > { %v16306_v14 = vpop.f32.mrb[116].mxu0  ;;  %v16598_v43 = vpop.f32.mrb[116].mxu1  ;;  %16937 = vxpose.xlu1.b32.cont [14/16] (narrow) %v21150_v8, 32  ;;  %v24387_v8 = vld [vmem:[#allocation126_spill] sm:$0xff] }
 0x3d2   : > { %v7545_v57 = vpop.f32.mrb[117].mxu0  ;;  %v11071_v15 = vmax.f32 %v16306_v14, %v16598_v43  ;;  %v10170_v4 = vpop.f32.mrb[117].mxu1  ;;  %v24389_v28 = vmax.f32 %v24387_v8, %v24388_v29  ;;  %v24399_v43 = vld [vmem:[#allocation134_spill] sm:$0xff] }
 0x3d3   : > { %v16307_v44 = vpop.f32.mrb[118].mxu0  ;;  %v11069_v38 = vmax.f32 %v7545_v57, %v10170_v4  ;;  %v16599_v37 = vpop.f32.mrb[118].mxu1  ;;  %v24400_v57 = vld [vmem:[#allocation135_spill] sm:$0xff] }
 0x3d4   : > { %v7548_v50 = vpop.f32.mrb[119].mxu0  ;;  %v21282_v22 = vmax.f32 %v24386_v3, %v11071_v15  ;;  %v11072_v2 = vmax.f32 %v16307_v44, %v16599_v37  ;;  %v10173_v34 = vpop.f32.mrb[119].mxu1  ;;  %v11641_v44 = vadd.f32 %v21161_v19, %v21211_v40 }
 0x3d5   : > { %v21287_v10 = vmax.f32 %v24389_v28, %v11069_v38  ;;  %v11070_v41 = vmax.f32 %v7548_v50, %v10173_v34  ;;  %16939 = vxpose.xlu1.b32.cont [15/16] (narrow) %v21185_v18, 32  ;;  %v24405_v50 = vld [vmem:[#allocation138_spill] sm:$0xff] }
 0x3d6   : > { %16413 = vmatmul.mubr.msk.bf16.gmra.mrb[224].mxu0 %vm1204_vm0, %v17902_v23  ;;  %v21294_v59 = vmax.f32 %v24392_v11, %v11072_v2  ;;  %16705 = vmatmul.mubr.msk.bf16.gmra.mrb[224].mxu1 %vm1204_vm0, %v17903_v16  ;;  %v24401_v23 = vmax.f32 %v24399_v43, %v24400_v57  ;;  %v24402_v16 = vld [vmem:[#allocation136_spill] sm:$0xff]  ;;  %v17910_v28 = vld [vmem:[%s18048_s22 + $0xd00] sm:$0xff]   ;;  %v24415_v57 = vld [vmem:[#allocation145_spill] sm:$0xff] }
 0x3d7   : > { %16416 = vmatprep.mubr.msk.bf16.mxu0 %vm1204_vm0, %v17904_v49  ;;  %v21301_v24 = vmax.f32 %v24395_v53, %v11070_v41  ;;  %16708 = vmatprep.mubr.msk.bf16.mxu1 %vm1204_vm0, %v17905_v54  ;;  %v24403_v49 = vld [vmem:[#allocation137_spill] sm:$0xff]  ;;  %v24406_v54 = vld [vmem:[#allocation139_spill] sm:$0xff]  ;;  %v11929_v41 = vmax.f32 %v11641_v44, 0.0  ;;  %v24414_v43 = vld [vmem:[#allocation144_spill] sm:$0xff] }
 0x3d8   : > { %v24404_v38 = vmax.f32 %v24402_v16, %v24403_v49  ;;  %v24407_v13 = vmax.f32 %v24405_v50, %v24406_v54  ;;  %v17911_v53 = vld [vmem:[%s18048_s22 + $0xd48] sm:$0xff]   ;;  %v24417_v44 = vld [vmem:[#allocation146_spill] sm:$0xff] }
 0x3d9   : > { %v16310_v18 = vpop.f32.mrb[120].mxu0  ;;  %v16602_v20 = vpop.f32.mrb[120].mxu1  ;;  %16941 = vxpose.xlu1.b32.end [16/16] (narrow) %v21199_v25, 32  ;;  %v11640_v25 = vadd.f32 %v21161_v19, %v21195_v48  ;;  %v24418_v16 = vld [vmem:[#allocation147_spill] sm:$0xff] }
 0x3da   : > { %v7561_v26 = vpop.f32.mrb[121].mxu0  ;;  %v11075_v0 = vmax.f32 %v16310_v18, %v16602_v20  ;;  %v10186_v47 = vpop.f32.mrb[121].mxu1  ;;  %v17912_v18 = vld [vmem:[%s18048_s22 + $0xd08] sm:$0xff]   ;;  %v11642_v20 = vadd.f32 %v21161_v19, %v21190_v32  ;;  %v24419_v49 = vmax.f32 %v24417_v44, %v24418_v16 }
 0x3db   : > { %v16311_v27 = vpop.f32.mrb[122].mxu0  ;;  %v11073_v35 = vmax.f32 %v7561_v26, %v10186_v47  ;;  %v16603_v58 = vpop.f32.mrb[122].mxu1  ;;  %v11928_v2 = vmax.f32 %v11640_v25, 0.0  ;;  %v17913_v47 = vld [vmem:[%s18048_s22 + $0xd50] sm:$0xff]   ;;  %v24412_v32 = vld [vmem:[#allocation143_spill] sm:$0xff] }
 0x3dc   : > { %v7564_v5 = vpop.f32.mrb[123].mxu0  ;;  %v11363_v36 = vmax.f32 %v24398_v55, %v11075_v0  ;;  %v11076_v31 = vmax.f32 %v16311_v27, %v16603_v58  ;;  %v10189_v14 = vpop.f32.mrb[123].mxu1  ;;  %v11644_v27 = vadd.f32 %v21161_v19, %v21227_v42  ;;  %v24411_v55 = vld [vmem:[#allocation142_spill] sm:$0xff]  ;;  %v11645_v42 = vadd.f32 %v21161_v19, %v21241_v39 }
 0x3dd   : > { %v21317_v15 = vmax.f32 %v24401_v23, %v11073_v35  ;;  %v11074_v4 = vmax.f32 %v7564_v5, %v10189_v14  ;;  %v24416_v23 = vmax.f32 %v24414_v43, %v24415_v57  ;;  %v11930_v39 = vmax.f32 %v11642_v20, 0.0 }
 0x3de   : > { %16417 = vmatmul.mubr.msk.bf16.gmra.mrb[228].mxu0 %vm1204_vm0, %v17906_v6  ;;  %v11364_v37 = vmax.f32 %v24404_v38, %v11076_v31  ;;  %16709 = vmatmul.mubr.msk.bf16.gmra.mrb[228].mxu1 %vm1204_vm0, %v17907_v52  ;;  %v11658_v48 = vadd.f32 %v21161_v19, %v11363_v36  ;;  %v24408_v52 = vld [vmem:[#allocation140_spill] sm:$0xff]  ;;  %v24413_v36 = vmax.f32 %v24411_v55, %v24412_v32 }
 0x3df   : > { %16420 = vmatprep.mubr.msk.bf16.mxu0 %vm1204_vm0, %v17908_v62  ;;  %v21331_v33 = vmax.f32 %v24407_v13, %v11074_v4  ;;  %16712 = vmatprep.mubr.msk.bf16.mxu1 %vm1204_vm0, %v17909_v17  ;;  %v24409_v62 = vld [vmem:[#allocation141_spill] sm:$0xff]  ;;  %v11931_v13 = vmax.f32 %v11643_v1, 0.0  ;;  %v24423_v1 = vld [vmem:[#allocation150_spill] sm:$0xff] }
 0x3e0   : > { %v11659_v40 = vadd.f32 %v21161_v19, %v11364_v37  ;;  %v11946_v34 = vmax.f32 %v11658_v48, 0.0  ;;  %v24410_v35 = vmax.f32 %v24408_v52, %v24409_v62  ;;  %v11932_v37 = vmax.f32 %v11644_v27, 0.0  ;;  %v24420_v52 = vld [vmem:[#allocation148_spill] sm:$0xff]  ;;  %v24421_v62 = vld [vmem:[#allocation149_spill] sm:$0xff] }
 0x3e1   : > { %v16314_v3 = vpop.f32.mrb[124].mxu0  ;;  %v16606_v8 = vpop.f32.mrb[124].mxu1  ;;  %v11648_v27 = vadd.f32 %v21161_v19, %v21257_v30  ;;  %v11649_v30 = vadd.f32 %v21161_v19, %v21271_v12 }
 0x3e2   : > { %v7577_v29 = vpop.f32.mrb[125].mxu0  ;;  %v11947_v21 = vmax.f32 %v11659_v40, 0.0  ;;  %v11079_v9 = vmax.f32 %v16314_v3, %v16606_v8  ;;  %v10202_v11 = vpop.f32.mrb[125].mxu1  ;;  %v16986_v63 = vpack.i.bf16 %v11946_v34, %v11928_v2  ;;  %v21368_v40 = vadd.f32 %v21161_v19, %v21222_v56 }
 0x3e3   : > { %v16315_v51 = vpop.f32.mrb[126].mxu0  ;;  %v11077_v26 = vmax.f32 %v7577_v29, %v10202_v11  ;;  %v16607_v6 = vpop.f32.mrb[126].mxu1  ;;  %v17914_v29 = vld [vmem:[%s18048_s22 + $0xd10] sm:$0xff]  }
 0x3e4   : > { %v7580_v0 = vpop.f32.mrb[127].mxu0  ;;  %v11367_v58 = vmax.f32 %v24410_v35, %v11079_v9  ;;  %v11080_v5 = vmax.f32 %v16315_v51, %v16607_v6  ;;  %v10205_v17 = vpop.f32.mrb[127].mxu1  ;;  %16987 = vxpose.xlu0.b32.start [1/16] (narrow) %v16986_v63, 32  ;;  %v16988_v60 = vpack.i.bf16 %v11947_v21, %v11929_v41  ;;  %v17915_v51 = vld [vmem:[%s18048_s22 + $0xd58] sm:$0xff]   ;;  %v24422_v35 = vmax.f32 %v24420_v52, %v24421_v62 }
 0x3e5   : > { %v11365_v31 = vmax.f32 %v24413_v36, %v11077_v26  ;;  %v11078_v14 = vmax.f32 %v7580_v0, %v10205_v17  ;;  %v17916_v63 = vld [vmem:[%s18048_s22 + $0xd18] sm:$0xff]   ;;  %v11934_v12 = vmax.f32 %v21368_v40, 0.0 }
 0x3e6   : > { %16421 = vmatmul.mubr.msk.bf16.gmra.mrb[232].mxu0 %vm1204_vm0, %v17910_v28  ;;  %v11662_v25 = vadd.f32 %v21161_v19, %v11367_v58  ;;  %v11368_v4 = vmax.f32 %v24416_v23, %v11080_v5  ;;  %16713 = vmatmul.mubr.msk.bf16.gmra.mrb[232].mxu1 %vm1204_vm0, %v17911_v53  ;;  %v11933_v28 = vmax.f32 %v11645_v42, 0.0  ;;  %v24426_v42 = vld [vmem:[#allocation152_spill] sm:$0xff] }
 0x3e7   : > { %16424 = vmatprep.mubr.msk.bf16.mxu0 %vm1204_vm0, %v17912_v18  ;;  %v11660_v61 = vadd.f32 %v21161_v19, %v11365_v31  ;;  %v11366_v38 = vmax.f32 %v24419_v49, %v11078_v14  ;;  %16716 = vmatprep.mubr.msk.bf16.mxu1 %vm1204_vm0, %v17913_v47  ;;  %v21376_v18 = vadd.f32 %v21161_v19, %v21234_v46  ;;  %v17917_v47 = vld [vmem:[%s18048_s22 + $0xd60] sm:$0xff]   ;;  %v24424_v46 = vld [vmem:[#allocation151_spill] sm:$0xff]  ;;  %v11936_v49 = vmax.f32 %v11648_v27, 0.0 }
 0x3e8   : > { %v11950_v48 = vmax.f32 %v11662_v25, 0.0  ;;  %v11663_v50 = vadd.f32 %v21161_v19, %v11368_v4  ;;  %16989 = vxpose.xlu0.b32.cont [2/16] (narrow) %v16988_v60, 32  ;;  %v24425_v55 = vmax.f32 %v24423_v1, %v24424_v46  ;;  %v24427_v25 = vld [vmem:[#allocation153_spill] sm:$0xff]  ;;  %v24429_v4 = vld [vmem:[#allocation154_spill] sm:$0xff] }
 0x3e9   : > { %v16318_v54 = vpop.f32.mrb[128].mxu0  ;;  %v11948_v3 = vmax.f32 %v11660_v61, 0.0  ;;  %v11661_v2 = vadd.f32 %v21161_v19, %v11366_v38  ;;  %v16610_v34 = vpop.f32.mrb[128].mxu1  ;;  %v24428_v43 = vmax.f32 %v24426_v42, %v24427_v25  ;;  %v24430_v61 = vld [vmem:[#allocation155_spill] sm:$0xff]  ;;  %v24441_v25 = vld [vmem:[#allocation162_spill] sm:$0xff] }
 0x3ea   : > { %v7593_v8 = vpop.f32.mrb[129].mxu0  ;;  %v11951_v41 = vmax.f32 %v11663_v50, 0.0  ;;  %v11083_v21 = vmax.f32 %v16318_v54, %v16610_v34  ;;  %v10218_v9 = vpop.f32.mrb[129].mxu1  ;;  %v16994_v53 = vpack.i.bf16 %v11950_v48, %v11932_v37  ;;  %v24431_v44 = vmax.f32 %v24429_v4, %v24430_v61 }
 0x3eb   : > { %v16319_v11 = vpop.f32.mrb[130].mxu0  ;;  %v11949_v56 = vmax.f32 %v11661_v2, 0.0  ;;  %v11081_v20 = vmax.f32 %v7593_v8, %v10218_v9  ;;  %v16611_v26 = vpop.f32.mrb[130].mxu1  ;;  %v16990_v0 = vpack.i.bf16 %v11948_v3, %v11930_v39  ;;  %v11935_v48 = vmax.f32 %v21376_v18, 0.0  ;;  %v17918_v2 = vld [vmem:[%s18048_s22 + $0xd20] sm:$0xff]   ;;  %v17920_v9 = vld [vmem:[%s18048_s22 + $0xd28] sm:$0xff]  }
 0x3ec   : > { %v7596_v6 = vpop.f32.mrb[131].mxu0  ;;  %v11371_v58 = vmax.f32 %v24422_v35, %v11083_v21  ;;  %v11084_v5 = vmax.f32 %v16319_v11, %v16611_v26  ;;  %v10221_v17 = vpop.f32.mrb[131].mxu1  ;;  %v21384_v60 = vpack.i.bf16 %v11951_v41, %v11933_v28  ;;  %v21408_v50 = vadd.f32 %v21161_v19, %v21252_v7  ;;  %v17919_v21 = vld [vmem:[%s18048_s22 + $0xd68] sm:$0xff]  }
 0x3ed   : > { %v11369_v32 = vmax.f32 %v24425_v55, %v11081_v20  ;;  %v11082_v36 = vmax.f32 %v7596_v6, %v10221_v17  ;;  %16991 = vxpose.xlu0.b32.cont [3/16] (narrow) %v16990_v0, 32  ;;  %v16992_v31 = vpack.i.bf16 %v11949_v56, %v11931_v13  ;;  %v11937_v34 = vmax.f32 %v11649_v30, 0.0  ;;  %v17921_v20 = vld [vmem:[%s18048_s22 + $0xd70] sm:$0xff]   ;;  %v24436_v17 = vld [vmem:[#allocation159_spill] sm:$0xff] }
 0x3ee   : > { %16425 = vmatmul.mubr.msk.bf16.gmra.mrb[236].mxu0 %vm1204_vm0, %v17914_v29  ;;  %v11666_v14 = vadd.f32 %v21161_v19, %v11371_v58  ;;  %v11372_v57 = vmax.f32 %v24428_v43, %v11084_v5  ;;  %16717 = vmatmul.mubr.msk.bf16.gmra.mrb[236].mxu1 %vm1204_vm0, %v17915_v51  ;;  %v11651_v7 = vadd.f32 %v21161_v19, %v21264_v45  ;;  %v24432_v0 = vld [vmem:[#allocation156_spill] sm:$0xff]  ;;  %v24435_v5 = vld [vmem:[#allocation158_spill] sm:$0xff] }
 0x3ef   : > { %16428 = vmatprep.mubr.msk.bf16.mxu0 %vm1204_vm0, %v17916_v63  ;;  %v11664_v23 = vadd.f32 %v21161_v19, %v11369_v32  ;;  %v11370_v16 = vmax.f32 %v24431_v44, %v11082_v36  ;;  %16720 = vmatprep.mubr.msk.bf16.mxu1 %vm1204_vm0, %v17917_v47  ;;  %v11652_v6 = vadd.f32 %v21161_v19, %v21287_v10  ;;  %v24433_v47 = vld [vmem:[#allocation157_spill] sm:$0xff]  ;;  %v24438_v36 = vld [vmem:[#allocation160_spill] sm:$0xff] }
 0x3f0   : > { %v11954_v38 = vmax.f32 %v11666_v14, 0.0  ;;  %v11667_v39 = vadd.f32 %v21161_v19, %v11372_v57  ;;  %v24434_v27 = vmax.f32 %v24432_v0, %v24433_v47  ;;  %v24437_v45 = vmax.f32 %v24435_v5, %v24436_v17  ;;  %v17922_v44 = vld [vmem:[%s18048_s22 + $0xd30] sm:$0xff]   ;;  %v24447_v47 = vld [vmem:[#allocation166_spill] sm:$0xff] }
 0x3f1   : > { %v16322_v37 = vpop.f32.mrb[132].mxu0  ;;  %v11952_v54 = vmax.f32 %v11664_v23, 0.0  ;;  %v11665_v13 = vadd.f32 %v21161_v19, %v11370_v16  ;;  %v16614_v3 = vpop.f32.mrb[132].mxu1  ;;  %16993 = vxpose.xlu0.b32.cont [4/16] (narrow) %v16992_v31, 32  ;;  %v11653_v10 = vadd.f32 %v21161_v19, %v21301_v24  ;;  %v24439_v31 = vld [vmem:[#allocation161_spill] sm:$0xff]  ;;  %v11940_v23 = vmax.f32 %v11652_v6, 0.0 }
 0x3f2   : > { %v7609_v40 = vpop.f32.mrb[133].mxu0  ;;  %v11955_v8 = vmax.f32 %v11667_v39, 0.0  ;;  %v11087_v29 = vmax.f32 %v16322_v37, %v16614_v3  ;;  %v10234_v28 = vpop.f32.mrb[133].mxu1  ;;  %v21414_v11 = vpack.i.bf16 %v11954_v38, %v11936_v49  ;;  %v24440_v30 = vmax.f32 %v24438_v36, %v24439_v31  ;;  %v24450_v17 = vld [vmem:[#allocation168_spill] sm:$0xff]  ;;  %v24454_v36 = vld [vmem:[#allocation171_spill] sm:$0xff] }
 0x3f3   : > { %v16323_v41 = vpop.f32.mrb[134].mxu0  ;;  %v11953_v51 = vmax.f32 %v11665_v13, 0.0  ;;  %v11085_v63 = vmax.f32 %v7609_v40, %v10234_v28  ;;  %v16615_v18 = vpop.f32.mrb[134].mxu1  ;;  %v16998_v26 = vpack.i.bf16 %v11952_v54, %v11934_v12  ;;  %v11938_v16 = vmax.f32 %v21408_v50, 0.0 }
 0x3f4   : > { %v7612_v56 = vpop.f32.mrb[135].mxu0  ;;  %v11375_v52 = vmax.f32 %v24434_v27, %v11087_v29  ;;  %v11088_v62 = vmax.f32 %v16323_v41, %v16615_v18  ;;  %v10237_v35 = vpop.f32.mrb[135].mxu1  ;;  %v21424_v58 = vpack.i.bf16 %v11955_v8, %v11937_v34  ;;  %v11939_v12 = vmax.f32 %v11651_v7, 0.0  ;;  %v17924_v34 = vld [vmem:[%s18048_s22 + $0xe10] sm:$0xff]  }
 0x3f5   : > { %v11373_v1 = vmax.f32 %v24437_v45, %v11085_v63  ;;  %v11086_v46 = vmax.f32 %v7612_v56, %v10237_v35  ;;  %16995 = vxpose.xlu0.b32.cont [5/16] (narrow) %v16994_v53, 32  ;;  %v17000_v55 = vpack.i.bf16 %v11953_v51, %v11935_v48  ;;  %v24442_v53 = vld [vmem:[#allocation163_spill] sm:$0xff]  ;;  %v11941_v48 = vmax.f32 %v11653_v10, 0.0  ;;  %v24445_v51 = vld [vmem:[#allocation165_spill] sm:$0xff] }
 0x3f6   : > { %16429 = vmatmul.mubr.msk.bf16.gmra.mrb[240].mxu0 %vm1204_vm0, %v17918_v2  ;;  %v11670_v32 = vadd.f32 %v21161_v19, %v11375_v52  ;;  %v11376_v14 = vmax.f32 %v24440_v30, %v11088_v62  ;;  %16721 = vmatmul.mubr.msk.bf16.gmra.mrb[240].mxu1 %vm1204_vm0, %v17919_v21  ;;  %v24443_v43 = vmax.f32 %v24441_v25, %v24442_v53  ;;  %v17923_v2 = vld [vmem:[%s18048_s22 + $0xd78] sm:$0xff]  }
 0x3f7   : > { %16432 = vmatprep.mubr.msk.bf16.mxu0 %vm1204_vm0, %v17920_v9  ;;  %v11668_v42 = vadd.f32 %v21161_v19, %v11373_v1  ;;  %16724 = vmatprep.mubr.msk.bf16.mxu1 %vm1204_vm0, %v17921_v20  ;;  %v11654_v50 = vadd.f32 %v21161_v19, %v21282_v22  ;;  %v17925_v9 = vld [vmem:[%s18048_s22 + $0xe58] sm:$0xff]   ;;  %v11656_v6 = vadd.f32 %v21161_v19, %v21317_v15  ;;  %v24448_v22 = vld [vmem:[#allocation167_spill] sm:$0xff] }
 0x3f8   : > { %v11374_v57 = vmax.f32 %v24443_v43, %v11086_v46  ;;  %v11958_v24 = vmax.f32 %v11670_v32, 0.0  ;;  %v11671_v4 = vadd.f32 %v21161_v19, %v11376_v14  ;;  %v24449_v27 = vmax.f32 %v24447_v47, %v24448_v22  ;;  %v24451_v45 = vld [vmem:[#allocation169_spill] sm:$0xff]  ;;  %v24453_v32 = vld [vmem:[#allocation170_spill] sm:$0xff] }
 0x3f9   : > { %v16326_v61 = vpop.f32.mrb[136].mxu0  ;;  %v11956_v49 = vmax.f32 %v11668_v42, 0.0  ;;  %v16618_v39 = vpop.f32.mrb[136].mxu1  ;;  %16997 = vxpose.xlu0.b32.cont [6/16] (narrow) %v21384_v60, 32  ;;  %v24444_v60 = vld [vmem:[#allocation164_spill] sm:$0xff]  ;;  %v11657_v5 = vadd.f32 %v21161_v19, %v21331_v33  ;;  %v24452_v1 = vmax.f32 %v24450_v17, %v24451_v45  ;;  %v24455_v31 = vmax.f32 %v24453_v32, %v24454_v36 }
 0x3fa   : > { %v11669_v38 = vadd.f32 %v21161_v19, %v11374_v57  ;;  %v7625_v37 = vpop.f32.mrb[137].mxu0  ;;  %v11959_v54 = vmax.f32 %v11671_v4, 0.0  ;;  %v11091_v13 = vmax.f32 %v16326_v61, %v16618_v39  ;;  %v10250_v3 = vpop.f32.mrb[137].mxu1  ;;  %v21450_v8 = vpack.i.bf16 %v11958_v24, %v11940_v23  ;;  %v17926_v24 = vld [vmem:[%s18048_s22 + $0xe18] sm:$0xff]   ;;  %v17928_v39 = vld [vmem:[%s18048_s22 + $0xe20] sm:$0xff]   ;;  %v17932_v32 = vld [vmem:[%s18048_s22 + $0xe30] sm:$0xff]  }
 0x3fb   : > { %v16327_v40 = vpop.f32.mrb[138].mxu0  ;;  %v11089_v28 = vmax.f32 %v7625_v37, %v10250_v3  ;;  %v16619_v41 = vpop.f32.mrb[138].mxu1  ;;  %v21455_v7 = vpack.i.bf16 %v11956_v49, %v11938_v16  ;;  %v24446_v63 = vmax.f32 %v24444_v60, %v24445_v51  ;;  %v11944_v42 = vmax.f32 %v11656_v6, 0.0  ;;  %v24460_v60 = vld [vmem:[#allocation175_spill] sm:$0xff]  ;;  %v24463_v6 = vld [vmem:[#allocation177_spill] sm:$0xff] }
 0x3fc   : > { %v11957_v29 = vmax.f32 %v11669_v38, 0.0  ;;  %v7628_v21 = vpop.f32.mrb[139].mxu0  ;;  %v11092_v56 = vmax.f32 %v16327_v40, %v16619_v41  ;;  %v10253_v20 = vpop.f32.mrb[139].mxu1  ;;  %v21462_v0 = vpack.i.bf16 %v11959_v54, %v11941_v48  ;;  %v11942_v53 = vmax.f32 %v11654_v50, 0.0  ;;  %v17927_v38 = vld [vmem:[%s18048_s22 + $0xe60] sm:$0xff]   ;;  %v17929_v40 = vld [vmem:[%s18048_s22 + $0xe68] sm:$0xff]  }
 0x3fd   : > { %v11379_v18 = vmax.f32 %v24446_v63, %v11091_v13  ;;  %v11377_v52 = vmax.f32 %v24449_v27, %v11089_v28  ;;  %v11090_v62 = vmax.f32 %v7628_v21, %v10253_v20  ;;  %16999 = vxpose.xlu0.b32.cont [7/16] (narrow) %v16998_v26, 32  ;;  %v11655_v26 = vadd.f32 %v21161_v19, %v21294_v59  ;;  %v24462_v20 = vld [vmem:[#allocation176_spill] sm:$0xff]  ;;  %v24465_v27 = vld [vmem:[#allocation178_spill] sm:$0xff] }
 0x3fe   : > { %16433 = vmatmul.mubr.msk.bf16.gmra.mrb[244].mxu0 %vm1204_vm0, %v17922_v44  ;;  %v21468_v35 = vpack.i.bf16 %v11957_v29, %v11939_v12  ;;  %v11380_v46 = vmax.f32 %v24452_v1, %v11092_v56  ;;  %16725 = vmatmul.mubr.msk.bf16.gmra.mrb[244].mxu1 %vm1204_vm0, %v17923_v2  ;;  %v11945_v4 = vmax.f32 %v11657_v5, 0.0  ;;  %v24464_v47 = vmax.f32 %v24462_v20, %v24463_v6  ;;  %v17930_v1 = vld [vmem:[%s18048_s22 + $0xe28] sm:$0xff]  }
 0x3ff   : > { %v11674_v15 = vadd.f32 %v21161_v19, %v11379_v18  ;;  %16436 = vmatprep.mubr.msk.bf16.mxu0 %vm1204_vm0, %v17924_v34  ;;  %v11672_v10 = vadd.f32 %v21161_v19, %v11377_v52  ;;  %v11378_v33 = vmax.f32 %v24455_v31, %v11090_v62  ;;  %16728 = vmatprep.mubr.msk.bf16.mxu1 %vm1204_vm0, %v17925_v9  ;;  %v11943_v37 = vmax.f32 %v11655_v26, 0.0  ;;  %v24457_v34 = vld [vmem:[#allocation173_spill] sm:$0xff]  ;;  %v24459_v9 = vld [vmem:[#allocation174_spill] sm:$0xff]  ;;  %v24466_v52 = vld [vmem:[#allocation179_spill] sm:$0xff] }
 0x400   : > { %v11675_v30 = vadd.f32 %v21161_v19, %v11380_v46  ;;  %v24461_v51 = vmax.f32 %v24459_v9, %v24460_v60  ;;  %v24467_v62 = vmax.f32 %v24465_v27, %v24466_v52  ;;  %v17937_v9 = vld [vmem:[%s18048_s22 + $0xe88] sm:$0xff]   ;;  %v24480_v60 = vld [vmem:[#allocation188_spill] sm:$0xff] }
 0x401   : > { %v16330_v14 = vpop.f32.mrb[140].mxu0  ;;  %v11962_v25 = vmax.f32 %v11674_v15, 0.0  ;;  %v11960_v43 = vmax.f32 %v11672_v10, 0.0  ;;  %v11673_v57 = vadd.f32 %v21161_v19, %v11378_v33  ;;  %v16622_v59 = vpop.f32.mrb[140].mxu1  ;;  %17001 = vxpose.xlu0.b32.cont [8/16] (narrow) %v17000_v55, 32  ;;  %v24456_v55 = vld [vmem:[#allocation172_spill] sm:$0xff] }
 0x402   : > { %v7641_v23 = vpop.f32.mrb[141].mxu0  ;;  %v11963_v61 = vmax.f32 %v11675_v30, 0.0  ;;  %v11095_v44 = vmax.f32 %v16330_v14, %v16622_v59  ;;  %v10266_v16 = vpop.f32.mrb[141].mxu1  ;;  %v24458_v50 = vmax.f32 %v24456_v55, %v24457_v34  ;;  %v17931_v10 = vld [vmem:[%s18048_s22 + $0xe70] sm:$0xff]   ;;  %v17933_v30 = vld [vmem:[%s18048_s22 + $0xe78] sm:$0xff]   ;;  %v24472_v59 = vld [vmem:[#allocation183_spill] sm:$0xff] }
 0x403   : > { %v16331_v12 = vpop.f32.mrb[142].mxu0  ;;  %v16962_v49 = vpack.i.bf16 %v11962_v25, %v11944_v42  ;;  %v11961_v48 = vmax.f32 %v11673_v57, 0.0  ;;  %v11093_v54 = vmax.f32 %v7641_v23, %v10266_v16  ;;  %v16623_v13 = vpop.f32.mrb[142].mxu1  ;;  %v21491_v2 = vpack.i.bf16 %v11960_v43, %v11942_v53  ;;  %v24468_v14 = vld [vmem:[#allocation180_spill] sm:$0xff]  ;;  %v24469_v42 = vld [vmem:[#allocation181_spill] sm:$0xff]  ;;  %v17935_v34 = vld [vmem:[%s18048_s22 + $0xe80] sm:$0xff]  }
 0x404   : > { %v7644_v3 = vpop.f32.mrb[143].mxu0  ;;  %v21496_v29 = vmax.f32 %v24458_v50, %v11095_v44  ;;  %v11096_v28 = vmax.f32 %v16331_v12, %v16623_v13  ;;  %v10269_v41 = vpop.f32.mrb[143].mxu1  ;;  %v16964_v21 = vpack.i.bf16 %v11963_v61, %v11945_v4  ;;  %v24470_v25 = vmax.f32 %v24468_v14, %v24469_v42  ;;  %v24474_v61 = vld [vmem:[#allocation184_spill] sm:$0xff]  ;;  %v24475_v44 = vld [vmem:[#allocation185_spill] sm:$0xff]  ;;  %v17936_v50 = vld [vmem:[%s18048_s22 + $0xe40] sm:$0xff]  }
 0x405   : > { %16963 = vxpose.xlu1.b32.start [1/2] (short) (narrow) %v16962_v49, 32  ;;  %v21501_v63 = vmax.f32 %v24461_v51, %v11093_v54  ;;  %v11094_v18 = vmax.f32 %v7644_v3, %v10269_v41  ;;  %17003 = vxpose.xlu0.b32.cont [9/16] (narrow) %v21414_v11, 32  ;;  %v21505_v56 = vpack.i.bf16 %v11961_v48, %v11943_v37  ;;  %v24477_v49 = vld [vmem:[#allocation186_spill] sm:$0xff]  ;;  %v17934_v13 = vld [vmem:[%s18048_s22 + $0xe38] sm:$0xff]   ;;  %v24484_v27 = vld [vmem:[#allocation191_spill] sm:$0xff] }
 0x406   : > { %16437 = vmatmul.mubr.msk.bf16.gmra.mrb[248].mxu0 %vm1204_vm0, %v17926_v24  ;;  %v21510_v22 = vmax.f32 %v24464_v47, %v11096_v28  ;;  %16729 = vmatmul.mubr.msk.bf16.gmra.mrb[248].mxu1 %vm1204_vm0, %v17927_v38  ;;  %v24476_v16 = vmax.f32 %v24474_v61, %v24475_v44  ;;  %v24478_v38 = vld [vmem:[#allocation187_spill] sm:$0xff]  ;;  %v24481_v51 = vld [vmem:[#allocation189_spill] sm:$0xff] }
 0x407   : > { %16440 = vmatprep.mubr.msk.bf16.mxu0 %vm1204_vm0, %v17928_v39  ;;  %v21517_v5 = vmax.f32 %v24467_v62, %v11094_v18  ;;  %16732 = vmatprep.mubr.msk.bf16.mxu1 %vm1204_vm0, %v17929_v40  ;;  %v24479_v39 = vmax.f32 %v24477_v49, %v24478_v38  ;;  %v24482_v18 = vmax.f32 %v24480_v60, %v24481_v51  ;;  %v24493_v61 = vld [vmem:[#allocation197_spill] sm:$0xff]  ;;  %v17942_v60 = vld [vmem:[%s18048_s22 + $0xf30] sm:$0xff]  }
 0x409   : > { %16965 = vxpose.xlu1.b32.end [2/2] (short) (narrow) %v16964_v21, 32  ;;  %v16334_v11 = vpop.f32.mrb[144].mxu0  ;;  %v16626_v17 = vpop.f32.mrb[144].mxu1  ;;  %17005 = vxpose.xlu0.b32.cont [10/16] (narrow) %v21424_v58, 32  ;;  %v24471_v58 = vld [vmem:[#allocation182_spill] sm:$0xff] }
 0x40a   : > { %v7657_v45 = vpop.f32.mrb[145].mxu0  ;;  %v11099_v46 = vmax.f32 %v16334_v11, %v16626_v17  ;;  %v10282_v15 = vpop.f32.mrb[145].mxu1  ;;  %v24473_v23 = vmax.f32 %v24471_v58, %v24472_v59  ;;  %v24486_v17 = vld [vmem:[#allocation192_spill] sm:$0xff] }
 0x40b   : > { %v16335_v26 = vpop.f32.mrb[146].mxu0  ;;  %v11097_v36 = vmax.f32 %v7657_v45, %v10282_v15  ;;  %v16627_v31 = vpop.f32.mrb[146].mxu1  ;;  %v24487_v45 = vld [vmem:[#allocation193_spill] sm:$0xff]  ;;  %v24489_v15 = vld [vmem:[#allocation194_spill] sm:$0xff] }
 0x40c   : > { %v7660_v33 = vpop.f32.mrb[147].mxu0  ;;  %v21528_v53 = vmax.f32 %v24470_v25, %v11099_v46  ;;  %v11100_v43 = vmax.f32 %v16335_v26, %v16627_v31  ;;  %v10285_v57 = vpop.f32.mrb[147].mxu1  ;;  %v24490_v26 = vld [vmem:[#allocation195_spill] sm:$0xff]  ;;  %v17939_v25 = vld [vmem:[%s18048_s22 + $0xe90] sm:$0xff]  }
 0x40d   : > { %v21533_v24 = vmax.f32 %v24473_v23, %v11097_v36  ;;  %v11098_v4 = vmax.f32 %v7660_v33, %v10285_v57  ;;  %17007 = vxpose.xlu0.b32.cont [11/16] (narrow) %v21455_v7, 32  ;;  %v17938_v33 = vld [vmem:[%s18048_s22 + $0xe48] sm:$0xff]   ;;  %v17941_v23 = vld [vmem:[%s18048_s22 + $0xe98] sm:$0xff]  }
 0x40e   : > { %16441 = vmatmul.mubr.msk.bf16.gmra.mrb[252].mxu0 %vm1204_vm0, %v17930_v1  ;;  %v21540_v12 = vmax.f32 %v24476_v16, %v11100_v43  ;;  %16733 = vmatmul.mubr.msk.bf16.gmra.mrb[252].mxu1 %vm1204_vm0, %v17931_v10  ;;  %v24488_v1 = vmax.f32 %v24486_v17, %v24487_v45  ;;  %v24491_v10 = vmax.f32 %v24489_v15, %v24490_v26  ;;  %v17940_v43 = vld [vmem:[%s18048_s22 + $0xe50] sm:$0xff]   ;;  %v17945_v17 = vld [vmem:[%s18048_s22 + $0xf80] sm:$0xff]  }
 0x40f   : > { %16444 = vmatprep.mubr.msk.bf16.mxu0 %vm1204_vm0, %v17932_v32  ;;  %v21547_v37 = vmax.f32 %v24479_v39, %v11098_v4  ;;  %16736 = vmatprep.mubr.msk.bf16.mxu1 %vm1204_vm0, %v17933_v30  ;;  %v24492_v4 = vld [vmem:[#allocation196_spill] sm:$0xff]  ;;  %v24496_v39 = vld [vmem:[#allocation199_spill] sm:$0xff] }
 0x410   : > { %v24494_v44 = vmax.f32 %v24492_v4, %v24493_v61  ;;  %v24504_v45 = vld [vmem:[#allocation204_spill] sm:$0xff] }
 0x411   : > { %v16338_v7 = vpop.f32.mrb[148].mxu0  ;;  %v16630_v48 = vpop.f32.mrb[148].mxu1  ;;  %17009 = vxpose.xlu0.b32.cont [12/16] (narrow) %v21468_v35, 32  ;;  %v24483_v35 = vld [vmem:[#allocation190_spill] sm:$0xff] }
 0x412   : > { %v7673_v54 = vpop.f32.mrb[149].mxu0  ;;  %v11103_v3 = vmax.f32 %v16338_v7, %v16630_v48  ;;  %v10298_v40 = vpop.f32.mrb[149].mxu1  ;;  %v24485_v52 = vmax.f32 %v24483_v35, %v24484_v27  ;;  %v17944_v35 = vld [vmem:[%s18048_s22 + $0xf38] sm:$0xff]  }
 0x413   : > { %v16339_v55 = vpop.f32.mrb[150].mxu0  ;;  %v11101_v28 = vmax.f32 %v7673_v54, %v10298_v40  ;;  %v16631_v41 = vpop.f32.mrb[150].mxu1 }
 0x414   : > { %v7676_v21 = vpop.f32.mrb[151].mxu0  ;;  %v21558_v20 = vmax.f32 %v24482_v18, %v11103_v3  ;;  %v11104_v6 = vmax.f32 %v16339_v55, %v16631_v41  ;;  %v10301_v47 = vpop.f32.mrb[151].mxu1  ;;  %v24499_v3 = vld [vmem:[#allocation201_spill] sm:$0xff] }
 0x415   : > { %v21563_v62 = vmax.f32 %v24485_v52, %v11101_v28  ;;  %v11102_v11 = vmax.f32 %v7676_v21, %v10301_v47  ;;  %17011 = vxpose.xlu0.b32.cont [13/16] (narrow) %v21450_v8, 32  ;;  %v17943_v47 = vld [vmem:[%s18048_s22 + $0xf78] sm:$0xff]  }
 0x416   : > { %16445 = vmatmul.mubr.msk.bf16.gmra.mrb[0].mxu0 %vm1204_vm0, %v17934_v13  ;;  %v21570_v46 = vmax.f32 %v24488_v1, %v11104_v6  ;;  %16737 = vmatmul.mubr.msk.bf16.gmra.mrb[0].mxu1 %vm1204_vm0, %v17935_v34  ;;  %v24498_v13 = vld [vmem:[#allocation200_spill] sm:$0xff]  ;;  %v24501_v34 = vld [vmem:[#allocation202_spill] sm:$0xff]  ;;  %v24505_v1 = vld [vmem:[#allocation205_spill] sm:$0xff] }
 0x417   : > { %16448 = vmatprep.mubr.msk.bf16.mxu0 %vm1204_vm0, %v17936_v50  ;;  %v21577_v32 = vmax.f32 %v24491_v10, %v11102_v11  ;;  %16740 = vmatprep.mubr.msk.bf16.mxu1 %vm1204_vm0, %v17937_v9  ;;  %v24500_v40 = vmax.f32 %v24498_v13, %v24499_v3  ;;  %v24502_v50 = vld [vmem:[#allocation203_spill] sm:$0xff]  ;;  %v24506_v15 = vmax.f32 %v24504_v45, %v24505_v1 }
 0x418   : > { %v24503_v28 = vmax.f32 %v24501_v34, %v24502_v50  ;;  %v11679_v1 = vadd.f32 %v21161_v19, %v21510_v22 }
 0x419   : > { %v16342_v8 = vpop.f32.mrb[152].mxu0  ;;  %v16634_v36 = vpop.f32.mrb[152].mxu1  ;;  %17013 = vxpose.xlu0.b32.cont [14/16] (narrow) %v21462_v0, 32  ;;  %v24495_v0 = vld [vmem:[#allocation198_spill] sm:$0xff] }
 0x41a   : > { %v7689_v31 = vpop.f32.mrb[153].mxu0  ;;  %v11107_v30 = vmax.f32 %v16342_v8, %v16634_v36  ;;  %v10314_v14 = vpop.f32.mrb[153].mxu1  ;;  %v24497_v7 = vmax.f32 %v24495_v0, %v24496_v39  ;;  %v24507_v36 = vld [vmem:[#allocation206_spill] sm:$0xff] }
 0x41b   : > { %v16343_v42 = vpop.f32.mrb[154].mxu0  ;;  %v11105_v57 = vmax.f32 %v7689_v31, %v10314_v14  ;;  %v16635_v58 = vpop.f32.mrb[154].mxu1  ;;  %v24508_v31 = vld [vmem:[#allocation207_spill] sm:$0xff] }
 0x41c   : > { %v7692_v59 = vpop.f32.mrb[155].mxu0  ;;  %v21588_v16 = vmax.f32 %v24494_v44, %v11107_v30  ;;  %v11108_v49 = vmax.f32 %v16343_v42, %v16635_v58  ;;  %v10317_v38 = vpop.f32.mrb[155].mxu1  ;;  %v11677_v42 = vadd.f32 %v21161_v19, %v21517_v5 }
 0x41d   : > { %v21593_v48 = vmax.f32 %v24497_v7, %v11105_v57  ;;  %v11106_v54 = vmax.f32 %v7692_v59, %v10317_v38  ;;  %17015 = vxpose.xlu0.b32.cont [15/16] (narrow) %v21491_v2, 32  ;;  %v24513_v59 = vld [vmem:[#allocation210_spill] sm:$0xff] }
 0x41e   : > { %16449 = vmatmul.mubr.msk.bf16.gmra.mrb[4].mxu0 %vm1204_vm0, %v17938_v33  ;;  %v21600_v55 = vmax.f32 %v24500_v40, %v11108_v49  ;;  %16741 = vmatmul.mubr.msk.bf16.gmra.mrb[4].mxu1 %vm1204_vm0, %v17939_v25  ;;  %v24509_v33 = vmax.f32 %v24507_v36, %v24508_v31  ;;  %v24510_v25 = vld [vmem:[#allocation208_spill] sm:$0xff]  ;;  %v17946_v7 = vld [vmem:[%s18048_s22 + $0xf40] sm:$0xff]  }
 0x41f   : > { %16452 = vmatprep.mubr.msk.bf16.mxu0 %vm1204_vm0, %v17940_v43  ;;  %v21607_v41 = vmax.f32 %v24503_v28, %v11106_v54  ;;  %16744 = vmatprep.mubr.msk.bf16.mxu1 %vm1204_vm0, %v17941_v23  ;;  %v24511_v43 = vld [vmem:[#allocation209_spill] sm:$0xff]  ;;  %v24514_v23 = vld [vmem:[#allocation211_spill] sm:$0xff]  ;;  %v11965_v54 = vmax.f32 %v11677_v42, 0.0  ;;  %v24522_v31 = vld [vmem:[#allocation216_spill] sm:$0xff] }
 0x420   : > { %v24512_v57 = vmax.f32 %v24510_v25, %v24511_v43  ;;  %v24515_v4 = vmax.f32 %v24513_v59, %v24514_v23  ;;  %v17947_v28 = vld [vmem:[%s18048_s22 + $0xf88] sm:$0xff]   ;;  %v24525_v25 = vld [vmem:[#allocation218_spill] sm:$0xff] }
 0x421   : > { %v16346_v2 = vpop.f32.mrb[156].mxu0  ;;  %v16638_v21 = vpop.f32.mrb[156].mxu1  ;;  %17017 = vxpose.xlu0.b32.end [16/16] (narrow) %v21505_v56, 32  ;;  %v11676_v56 = vadd.f32 %v21161_v19, %v21501_v63 }
 0x422   : > { %v7705_v9 = vpop.f32.mrb[157].mxu0  ;;  %v11111_v51 = vmax.f32 %v16346_v2, %v16638_v21  ;;  %v10330_v18 = vpop.f32.mrb[157].mxu1  ;;  %v17948_v2 = vld [vmem:[%s18048_s22 + $0xf48] sm:$0xff]   ;;  %v11678_v21 = vadd.f32 %v21161_v19, %v21496_v29 }
 0x423   : > { %v16347_v6 = vpop.f32.mrb[158].mxu0  ;;  %v11109_v27 = vmax.f32 %v7705_v9, %v10330_v18  ;;  %v16639_v52 = vpop.f32.mrb[158].mxu1  ;;  %v11964_v49 = vmax.f32 %v11676_v56, 0.0  ;;  %v17949_v18 = vld [vmem:[%s18048_s22 + $0xf90] sm:$0xff]   ;;  %v24520_v29 = vld [vmem:[#allocation215_spill] sm:$0xff] }
 0x424   : > { %v7708_v11 = vpop.f32.mrb[159].mxu0  ;;  %v11399_v26 = vmax.f32 %v24506_v15, %v11111_v51  ;;  %v11112_v10 = vmax.f32 %v16347_v6, %v16639_v52  ;;  %v10333_v8 = vpop.f32.mrb[159].mxu1  ;;  %v11680_v6 = vadd.f32 %v21161_v19, %v21533_v24  ;;  %v24519_v15 = vld [vmem:[#allocation214_spill] sm:$0xff]  ;;  %v11681_v24 = vadd.f32 %v21161_v19, %v21547_v37 }
 0x425   : > { %v21623_v30 = vmax.f32 %v24509_v33, %v11109_v27  ;;  %v11110_v14 = vmax.f32 %v7708_v11, %v10333_v8  ;;  %v21663_v56 = vld [vmem:[%s23116_s2] ss:$0 sm:$0xff]  ;;  %v24523_v33 = vld [vmem:[#allocation217_spill] sm:$0xff] }
 0x426   : > { %16453 = vmatmul.mubr.msk.bf16.gmra.mrb[8].mxu0 %vm1204_vm0, %v17942_v60  ;;  %v11400_v58 = vmax.f32 %v24512_v57, %v11112_v10  ;;  %16745 = vmatmul.mubr.msk.bf16.gmra.mrb[8].mxu1 %vm1204_vm0, %v17943_v47  ;;  %v11694_v63 = vadd.f32 %v21161_v19, %v11399_v26  ;;  %v24516_v47 = vld [vmem:[#allocation212_spill] sm:$0xff]  ;;  %v24521_v26 = vmax.f32 %v24519_v15, %v24520_v29  ;;  %v11966_v57 = vmax.f32 %v11678_v21, 0.0 }
 0x427   : > { %16456 = vmatprep.mubr.msk.bf16.mxu0 %vm1204_vm0, %v17944_v35  ;;  %v21637_v61 = vmax.f32 %v24515_v4, %v11110_v14  ;;  %16748 = vmatprep.mubr.msk.bf16.mxu1 %vm1204_vm0, %v17945_v17  ;;  %v24517_v35 = vld [vmem:[#allocation213_spill] sm:$0xff]  ;;  %v24524_v22 = vmax.f32 %v24522_v31, %v24523_v33  ;;  %v11967_v4 = vmax.f32 %v11679_v1, 0.0  ;;  %v24531_v1 = vld [vmem:[#allocation222_spill] sm:$0xff] }
 0x428   : > { %v11695_v5 = vadd.f32 %v21161_v19, %v11400_v58  ;;  %v11982_v38 = vmax.f32 %v11694_v63, 0.0  ;;  %v24518_v27 = vmax.f32 %v24516_v47, %v24517_v35  ;;  %v24526_v19 = vld [vmem:[#allocation219_spill] sm:$0xff]  ;;  %v11968_v58 = vmax.f32 %v11680_v6, 0.0  ;;  %v24528_v47 = vld [vmem:[#allocation220_spill] sm:$0xff]  ;;  %v24529_v35 = vld [vmem:[#allocation221_spill] sm:$0xff] }
 0x429   : > { %v16350_v44 = vpop.f32.mrb[160].mxu0  ;;  %v16642_v0 = vpop.f32.mrb[160].mxu1  ;;  %v24527_v37 = vmax.f32 %v24525_v25, %v24526_v19  ;;  %v11684_v6 = vadd.f32 %v21663_v56, %v21563_v62  ;;  %v11685_v62 = vadd.f32 %v21663_v56, %v21577_v32 }
 0x42a   : > { %v7721_v39 = vpop.f32.mrb[161].mxu0  ;;  %v11983_v13 = vmax.f32 %v11695_v5, 0.0  ;;  %v11115_v3 = vmax.f32 %v16350_v44, %v16642_v0  ;;  %v10346_v40 = vpop.f32.mrb[161].mxu1  ;;  %v17062_v50 = vpack.i.bf16 %v11982_v38, %v11964_v49  ;;  %v21679_v5 = vadd.f32 %v21663_v56, %v21528_v53 }
 0x42b   : > { %v16351_v34 = vpop.f32.mrb[162].mxu0  ;;  %v11113_v9 = vmax.f32 %v7721_v39, %v10346_v40  ;;  %v16643_v60 = vpop.f32.mrb[162].mxu1  ;;  %v17950_v39 = vld [vmem:[%s18048_s22 + $0xf50] sm:$0xff]  }
 0x42c   : > { %v7724_v51 = vpop.f32.mrb[163].mxu0  ;;  %v11403_v52 = vmax.f32 %v24518_v27, %v11115_v3  ;;  %v11116_v11 = vmax.f32 %v16351_v34, %v16643_v60  ;;  %v10349_v17 = vpop.f32.mrb[163].mxu1  ;;  %17063 = vxpose.xlu1.b32.start [1/16] (narrow) %v17062_v50, 32  ;;  %v17064_v45 = vpack.i.bf16 %v11983_v13, %v11965_v54  ;;  %v17951_v34 = vld [vmem:[%s18048_s22 + $0xf98] sm:$0xff]   ;;  %v24530_v27 = vmax.f32 %v24528_v47, %v24529_v35 }
 0x42d   : > { %v11401_v10 = vmax.f32 %v24521_v26, %v11113_v9  ;;  %v11114_v8 = vmax.f32 %v7724_v51, %v10349_v17  ;;  %v17952_v50 = vld [vmem:[%s18048_s22 + $0xf58] sm:$0xff]   ;;  %v11970_v32 = vmax.f32 %v21679_v5, 0.0 }
 0x42e   : > { %16457 = vmatmul.mubr.msk.bf16.gmra.mrb[12].mxu0 %vm1204_vm0, %v17946_v7  ;;  %v11698_v36 = vadd.f32 %v21663_v56, %v11403_v52  ;;  %v11404_v14 = vmax.f32 %v24524_v22, %v11116_v11  ;;  %16749 = vmatmul.mubr.msk.bf16.gmra.mrb[12].mxu1 %vm1204_vm0, %v17947_v28  ;;  %v11969_v7 = vmax.f32 %v11681_v24, 0.0  ;;  %v24534_v24 = vld [vmem:[#allocation224_spill] sm:$0xff] }
 0x42f   : > { %16460 = vmatprep.mubr.msk.bf16.mxu0 %vm1204_vm0, %v17948_v2  ;;  %v11696_v42 = vadd.f32 %v21663_v56, %v11401_v10  ;;  %v11402_v43 = vmax.f32 %v24527_v37, %v11114_v8  ;;  %16752 = vmatprep.mubr.msk.bf16.mxu1 %vm1204_vm0, %v17949_v18  ;;  %v21687_v2 = vadd.f32 %v21663_v56, %v21540_v12  ;;  %v17953_v18 = vld [vmem:[%s18048_s22 + $0xfa0] sm:$0xff]   ;;  %v24532_v12 = vld [vmem:[#allocation223_spill] sm:$0xff]  ;;  %v11972_v37 = vmax.f32 %v11684_v6, 0.0 }
 0x430   : > { %v11986_v63 = vmax.f32 %v11698_v36, 0.0  ;;  %v11699_v59 = vadd.f32 %v21663_v56, %v11404_v14  ;;  %17065 = vxpose.xlu1.b32.cont [2/16] (narrow) %v17064_v45, 32  ;;  %v24533_v15 = vmax.f32 %v24531_v1, %v24532_v12  ;;  %v24535_v36 = vld [vmem:[#allocation225_spill] sm:$0xff]  ;;  %v24537_v14 = vld [vmem:[#allocation226_spill] sm:$0xff] }
 0x431   : > { %v16354_v23 = vpop.f32.mrb[164].mxu0  ;;  %v11984_v44 = vmax.f32 %v11696_v42, 0.0  ;;  %v11697_v49 = vadd.f32 %v21663_v56, %v11402_v43  ;;  %v16646_v38 = vpop.f32.mrb[164].mxu1  ;;  %v24536_v31 = vmax.f32 %v24534_v24, %v24535_v36  ;;  %v24538_v42 = vld [vmem:[#allocation227_spill] sm:$0xff]  ;;  %v24549_v36 = vld [vmem:[#allocation234_spill] sm:$0xff] }
 0x432   : > { %v7737_v0 = vpop.f32.mrb[165].mxu0  ;;  %v11987_v54 = vmax.f32 %v11699_v59, 0.0  ;;  %v11119_v13 = vmax.f32 %v16354_v23, %v16646_v38  ;;  %v10362_v3 = vpop.f32.mrb[165].mxu1  ;;  %v17070_v28 = vpack.i.bf16 %v11986_v63, %v11968_v58  ;;  %v24539_v25 = vmax.f32 %v24537_v14, %v24538_v42 }
 0x433   : > { %v16355_v40 = vpop.f32.mrb[166].mxu0  ;;  %v11985_v53 = vmax.f32 %v11697_v49, 0.0  ;;  %v11117_v21 = vmax.f32 %v7737_v0, %v10362_v3  ;;  %v16647_v9 = vpop.f32.mrb[166].mxu1  ;;  %v17066_v51 = vpack.i.bf16 %v11984_v44, %v11966_v57  ;;  %v11971_v63 = vmax.f32 %v21687_v2, 0.0  ;;  %v17954_v49 = vld [vmem:[%s18048_s22 + $0xf60] sm:$0xff]   ;;  %v17956_v3 = vld [vmem:[%s18048_s22 + $0xf68] sm:$0xff]  }
 0x434   : > { %v7740_v60 = vpop.f32.mrb[167].mxu0  ;;  %v11407_v52 = vmax.f32 %v24530_v27, %v11119_v13  ;;  %v11120_v11 = vmax.f32 %v16355_v40, %v16647_v9  ;;  %v10365_v17 = vpop.f32.mrb[167].mxu1  ;;  %v21695_v45 = vpack.i.bf16 %v11987_v54, %v11969_v7  ;;  %v21719_v59 = vadd.f32 %v21663_v56, %v21558_v20  ;;  %v17955_v13 = vld [vmem:[%s18048_s22 + $0xfa8] sm:$0xff]  }
 0x435   : > { %v11405_v29 = vmax.f32 %v24533_v15, %v11117_v21  ;;  %v11118_v26 = vmax.f32 %v7740_v60, %v10365_v17  ;;  %17067 = vxpose.xlu1.b32.cont [3/16] (narrow) %v17066_v51, 32  ;;  %v17068_v10 = vpack.i.bf16 %v11985_v53, %v11967_v4  ;;  %v11973_v38 = vmax.f32 %v11685_v62, 0.0  ;;  %v17957_v21 = vld [vmem:[%s18048_s22 + $0xfb0] sm:$0xff]   ;;  %v24544_v17 = vld [vmem:[#allocation231_spill] sm:$0xff] }
 0x436   : > { %16461 = vmatmul.mubr.msk.bf16.gmra.mrb[16].mxu0 %vm1204_vm0, %v17950_v39  ;;  %v11702_v8 = vadd.f32 %v21663_v56, %v11407_v52  ;;  %v11408_v33 = vmax.f32 %v24536_v31, %v11120_v11  ;;  %16753 = vmatmul.mubr.msk.bf16.gmra.mrb[16].mxu1 %vm1204_vm0, %v17951_v34  ;;  %v11687_v20 = vadd.f32 %v21663_v56, %v21570_v46  ;;  %v24540_v51 = vld [vmem:[#allocation228_spill] sm:$0xff]  ;;  %v24543_v11 = vld [vmem:[#allocation230_spill] sm:$0xff] }
 0x437   : > { %16464 = vmatprep.mubr.msk.bf16.mxu0 %vm1204_vm0, %v17952_v50  ;;  %v11700_v22 = vadd.f32 %v21663_v56, %v11405_v29  ;;  %v11406_v19 = vmax.f32 %v24539_v25, %v11118_v26  ;;  %16756 = vmatprep.mubr.msk.bf16.mxu1 %vm1204_vm0, %v17953_v18  ;;  %v11688_v60 = vadd.f32 %v21663_v56, %v21593_v48  ;;  %v24541_v18 = vld [vmem:[#allocation229_spill] sm:$0xff]  ;;  %v24546_v26 = vld [vmem:[#allocation232_spill] sm:$0xff] }
 0x438   : > { %v11990_v43 = vmax.f32 %v11702_v8, 0.0  ;;  %v11703_v57 = vadd.f32 %v21663_v56, %v11408_v33  ;;  %v24542_v6 = vmax.f32 %v24540_v51, %v24541_v18  ;;  %v24545_v46 = vmax.f32 %v24543_v11, %v24544_v17  ;;  %v17958_v25 = vld [vmem:[%s18048_s22 + $0xf70] sm:$0xff]   ;;  %v24555_v18 = vld [vmem:[#allocation238_spill] sm:$0xff] }
 0x439   : > { %v16358_v58 = vpop.f32.mrb[168].mxu0  ;;  %v11988_v23 = vmax.f32 %v11700_v22, 0.0  ;;  %v11701_v4 = vadd.f32 %v21663_v56, %v11406_v19  ;;  %v16650_v44 = vpop.f32.mrb[168].mxu1  ;;  %17069 = vxpose.xlu1.b32.cont [4/16] (narrow) %v17068_v10, 32  ;;  %v11689_v48 = vadd.f32 %v21663_v56, %v21607_v41  ;;  %v24547_v10 = vld [vmem:[#allocation233_spill] sm:$0xff]  ;;  %v11976_v22 = vmax.f32 %v11688_v60, 0.0 }
 0x43a   : > { %v7753_v5 = vpop.f32.mrb[169].mxu0  ;;  %v11991_v0 = vmax.f32 %v11703_v57, 0.0  ;;  %v11123_v39 = vmax.f32 %v16358_v58, %v16650_v44  ;;  %v10378_v7 = vpop.f32.mrb[169].mxu1  ;;  %v21725_v40 = vpack.i.bf16 %v11990_v43, %v11972_v37  ;;  %v24548_v62 = vmax.f32 %v24546_v26, %v24547_v10  ;;  %v24558_v17 = vld [vmem:[#allocation240_spill] sm:$0xff]  ;;  %v24562_v26 = vld [vmem:[#allocation243_spill] sm:$0xff] }
 0x43b   : > { %v16359_v54 = vpop.f32.mrb[170].mxu0  ;;  %v11989_v34 = vmax.f32 %v11701_v4, 0.0  ;;  %v11121_v50 = vmax.f32 %v7753_v5, %v10378_v7  ;;  %v16651_v2 = vpop.f32.mrb[170].mxu1  ;;  %v17074_v9 = vpack.i.bf16 %v11988_v23, %v11970_v32  ;;  %v11974_v19 = vmax.f32 %v21719_v59, 0.0 }
 0x43c   : > { %v7756_v53 = vpop.f32.mrb[171].mxu0  ;;  %v11411_v47 = vmax.f32 %v24542_v6, %v11123_v39  ;;  %v11124_v35 = vmax.f32 %v16359_v54, %v16651_v2  ;;  %v10381_v27 = vpop.f32.mrb[171].mxu1  ;;  %v21735_v52 = vpack.i.bf16 %v11991_v0, %v11973_v38  ;;  %v11975_v32 = vmax.f32 %v11687_v20, 0.0  ;;  %v17960_v38 = vld [vmem:[%s18048_s22 + $0x1050] sm:$0xff]  }
 0x43d   : > { %v11409_v1 = vmax.f32 %v24545_v46, %v11121_v50  ;;  %v11122_v12 = vmax.f32 %v7756_v53, %v10381_v27  ;;  %17071 = vxpose.xlu1.b32.cont [5/16] (narrow) %v17070_v28, 32  ;;  %v17076_v15 = vpack.i.bf16 %v11989_v34, %v11971_v63  ;;  %v24550_v28 = vld [vmem:[#allocation235_spill] sm:$0xff]  ;;  %v11977_v63 = vmax.f32 %v11689_v48, 0.0  ;;  %v24553_v34 = vld [vmem:[#allocation237_spill] sm:$0xff] }
 0x43e   : > { %16465 = vmatmul.mubr.msk.bf16.gmra.mrb[20].mxu0 %vm1204_vm0, %v17954_v49  ;;  %v11706_v29 = vadd.f32 %v21663_v56, %v11411_v47  ;;  %v11412_v8 = vmax.f32 %v24548_v62, %v11124_v35  ;;  %16757 = vmatmul.mubr.msk.bf16.gmra.mrb[20].mxu1 %vm1204_vm0, %v17955_v13  ;;  %v24551_v31 = vmax.f32 %v24549_v36, %v24550_v28  ;;  %v17959_v49 = vld [vmem:[%s18048_s22 + $0xfb8] sm:$0xff]  }
 0x43f   : > { %16468 = vmatprep.mubr.msk.bf16.mxu0 %vm1204_vm0, %v17956_v3  ;;  %v11704_v24 = vadd.f32 %v21663_v56, %v11409_v1  ;;  %16760 = vmatprep.mubr.msk.bf16.mxu1 %vm1204_vm0, %v17957_v21  ;;  %v11690_v59 = vadd.f32 %v21663_v56, %v21588_v16  ;;  %v17961_v3 = vld [vmem:[%s18048_s22 + $0x1098] sm:$0xff]   ;;  %v11692_v60 = vadd.f32 %v21663_v56, %v21623_v30  ;;  %v24556_v16 = vld [vmem:[#allocation239_spill] sm:$0xff] }
 0x440   : > { %v11410_v33 = vmax.f32 %v24551_v31, %v11122_v12  ;;  %v11994_v41 = vmax.f32 %v11706_v29, 0.0  ;;  %v11707_v14 = vadd.f32 %v21663_v56, %v11412_v8  ;;  %v24557_v6 = vmax.f32 %v24555_v18, %v24556_v16  ;;  %v24559_v46 = vld [vmem:[#allocation241_spill] sm:$0xff]  ;;  %v24561_v29 = vld [vmem:[#allocation242_spill] sm:$0xff] }
 0x441   : > { %v16362_v42 = vpop.f32.mrb[172].mxu0  ;;  %v11992_v37 = vmax.f32 %v11704_v24, 0.0  ;;  %v16654_v57 = vpop.f32.mrb[172].mxu1  ;;  %17073 = vxpose.xlu1.b32.cont [6/16] (narrow) %v21695_v45, 32  ;;  %v24552_v45 = vld [vmem:[#allocation236_spill] sm:$0xff]  ;;  %v11693_v11 = vadd.f32 %v21663_v56, %v21637_v61  ;;  %v24560_v1 = vmax.f32 %v24558_v17, %v24559_v46  ;;  %v24563_v10 = vmax.f32 %v24561_v29, %v24562_v26 }
 0x442   : > { %v11705_v43 = vadd.f32 %v21663_v56, %v11410_v33  ;;  %v7769_v58 = vpop.f32.mrb[173].mxu0  ;;  %v11995_v23 = vmax.f32 %v11707_v14, 0.0  ;;  %v11127_v4 = vmax.f32 %v16362_v42, %v16654_v57  ;;  %v10394_v44 = vpop.f32.mrb[173].mxu1  ;;  %v21761_v0 = vpack.i.bf16 %v11994_v41, %v11976_v22  ;;  %v17962_v41 = vld [vmem:[%s18048_s22 + $0x1058] sm:$0xff]   ;;  %v17964_v57 = vld [vmem:[%s18048_s22 + $0x1060] sm:$0xff]   ;;  %v17968_v29 = vld [vmem:[%s18048_s22 + $0x1070] sm:$0xff]  }
 0x443   : > { %v16363_v5 = vpop.f32.mrb[174].mxu0  ;;  %v11125_v7 = vmax.f32 %v7769_v58, %v10394_v44  ;;  %v16655_v54 = vpop.f32.mrb[174].mxu1  ;;  %v21766_v20 = vpack.i.bf16 %v11992_v37, %v11974_v19  ;;  %v24554_v50 = vmax.f32 %v24552_v45, %v24553_v34  ;;  %v11980_v24 = vmax.f32 %v11692_v60, 0.0  ;;  %v24568_v45 = vld [vmem:[#allocation247_spill] sm:$0xff]  ;;  %v24571_v60 = vld [vmem:[#allocation249_spill] sm:$0xff] }
 0x444   : > { %v11993_v39 = vmax.f32 %v11705_v43, 0.0  ;;  %v7772_v13 = vpop.f32.mrb[175].mxu0  ;;  %v11128_v53 = vmax.f32 %v16363_v5, %v16655_v54  ;;  %v10397_v21 = vpop.f32.mrb[175].mxu1  ;;  %v21773_v51 = vpack.i.bf16 %v11995_v23, %v11977_v63  ;;  %v11978_v28 = vmax.f32 %v11690_v59, 0.0  ;;  %v17963_v43 = vld [vmem:[%s18048_s22 + $0x10a0] sm:$0xff]   ;;  %v17965_v5 = vld [vmem:[%s18048_s22 + $0x10a8] sm:$0xff]  }
 0x445   : > { %v11415_v2 = vmax.f32 %v24554_v50, %v11127_v4  ;;  %v11413_v47 = vmax.f32 %v24557_v6, %v11125_v7  ;;  %v11126_v35 = vmax.f32 %v7772_v13, %v10397_v21  ;;  %17075 = vxpose.xlu1.b32.cont [7/16] (narrow) %v17074_v9, 32  ;;  %v11691_v9 = vadd.f32 %v21663_v56, %v21600_v55  ;;  %v24570_v21 = vld [vmem:[#allocation248_spill] sm:$0xff]  ;;  %v24573_v6 = vld [vmem:[#allocation250_spill] sm:$0xff] }
 0x446   : > { %16469 = vmatmul.mubr.msk.bf16.gmra.mrb[24].mxu0 %vm1204_vm0, %v17958_v25  ;;  %v21779_v27 = vpack.i.bf16 %v11993_v39, %v11975_v32  ;;  %v11416_v12 = vmax.f32 %v24560_v1, %v11128_v53  ;;  %16761 = vmatmul.mubr.msk.bf16.gmra.mrb[24].mxu1 %vm1204_vm0, %v17959_v49  ;;  %v11981_v14 = vmax.f32 %v11693_v11, 0.0  ;;  %v24572_v18 = vmax.f32 %v24570_v21, %v24571_v60  ;;  %v17966_v1 = vld [vmem:[%s18048_s22 + $0x1068] sm:$0xff]  }
 0x447   : > { %v11710_v30 = vadd.f32 %v21663_v56, %v11415_v2  ;;  %16472 = vmatprep.mubr.msk.bf16.mxu0 %vm1204_vm0, %v17960_v38  ;;  %v11708_v48 = vadd.f32 %v21663_v56, %v11413_v47  ;;  %v11414_v61 = vmax.f32 %v24563_v10, %v11126_v35  ;;  %16764 = vmatprep.mubr.msk.bf16.mxu1 %vm1204_vm0, %v17961_v3  ;;  %v11979_v58 = vmax.f32 %v11691_v9, 0.0  ;;  %v24565_v38 = vld [vmem:[#allocation245_spill] sm:$0xff]  ;;  %v24567_v3 = vld [vmem:[#allocation246_spill] sm:$0xff]  ;;  %v24574_v47 = vld [vmem:[#allocation251_spill] sm:$0xff] }
 0x448   : > { %v11711_v62 = vadd.f32 %v21663_v56, %v11416_v12  ;;  %v24569_v34 = vmax.f32 %v24567_v3, %v24568_v45  ;;  %v24575_v35 = vmax.f32 %v24573_v6, %v24574_v47  ;;  %v17973_v3 = vld [vmem:[%s18048_s22 + $0x10c8] sm:$0xff]   ;;  %v24588_v45 = vld [vmem:[#allocation260_spill] sm:$0xff] }
 0x449   : > { %v16366_v8 = vpop.f32.mrb[176].mxu0  ;;  %v11998_v36 = vmax.f32 %v11710_v30, 0.0  ;;  %v11996_v31 = vmax.f32 %v11708_v48, 0.0  ;;  %v11709_v33 = vadd.f32 %v21663_v56, %v11414_v61  ;;  %v16658_v55 = vpop.f32.mrb[176].mxu1  ;;  %17077 = vxpose.xlu1.b32.cont [8/16] (narrow) %v17076_v15, 32  ;;  %v24564_v15 = vld [vmem:[#allocation244_spill] sm:$0xff] }
 0x44a   : > { %v7785_v22 = vpop.f32.mrb[177].mxu0  ;;  %v11999_v42 = vmax.f32 %v11711_v62, 0.0  ;;  %v11131_v25 = vmax.f32 %v16366_v8, %v16658_v55  ;;  %v10410_v19 = vpop.f32.mrb[177].mxu1  ;;  %v24566_v59 = vmax.f32 %v24564_v15, %v24565_v38  ;;  %v17967_v48 = vld [vmem:[%s18048_s22 + $0x10b0] sm:$0xff]   ;;  %v17969_v62 = vld [vmem:[%s18048_s22 + $0x10b8] sm:$0xff]   ;;  %v24580_v55 = vld [vmem:[#allocation255_spill] sm:$0xff] }
 0x44b   : > { %v16367_v32 = vpop.f32.mrb[178].mxu0  ;;  %v17038_v37 = vpack.i.bf16 %v11998_v36, %v11980_v24  ;;  %v11997_v63 = vmax.f32 %v11709_v33, 0.0  ;;  %v11129_v23 = vmax.f32 %v7785_v22, %v10410_v19  ;;  %v16659_v4 = vpop.f32.mrb[178].mxu1  ;;  %v21802_v49 = vpack.i.bf16 %v11996_v31, %v11978_v28  ;;  %v24576_v8 = vld [vmem:[#allocation252_spill] sm:$0xff]  ;;  %v24577_v24 = vld [vmem:[#allocation253_spill] sm:$0xff]  ;;  %v17971_v38 = vld [vmem:[%s18048_s22 + $0x10c0] sm:$0xff]  }
 0x44c   : > { %v7788_v44 = vpop.f32.mrb[179].mxu0  ;;  %v21807_v39 = vmax.f32 %v24566_v59, %v11131_v25  ;;  %v11132_v7 = vmax.f32 %v16367_v32, %v16659_v4  ;;  %v10413_v54 = vpop.f32.mrb[179].mxu1  ;;  %v17040_v13 = vpack.i.bf16 %v11999_v42, %v11981_v14  ;;  %v24578_v36 = vmax.f32 %v24576_v8, %v24577_v24  ;;  %v24582_v42 = vld [vmem:[#allocation256_spill] sm:$0xff]  ;;  %v24583_v25 = vld [vmem:[#allocation257_spill] sm:$0xff]  ;;  %v17972_v59 = vld [vmem:[%s18048_s22 + $0x1080] sm:$0xff]  }
 0x44d   : > { %17039 = vxpose.xlu0.b32.start [1/2] (short) (narrow) %v17038_v37, 32  ;;  %v21812_v50 = vmax.f32 %v24569_v34, %v11129_v23  ;;  %v11130_v2 = vmax.f32 %v7788_v44, %v10413_v54  ;;  %17079 = vxpose.xlu1.b32.cont [9/16] (narrow) %v21725_v40, 32  ;;  %v21816_v53 = vpack.i.bf16 %v11997_v63, %v11979_v58  ;;  %v24585_v37 = vld [vmem:[#allocation258_spill] sm:$0xff]  ;;  %v17970_v4 = vld [vmem:[%s18048_s22 + $0x1078] sm:$0xff]   ;;  %v24592_v6 = vld [vmem:[#allocation263_spill] sm:$0xff] }
 0x44e   : > { %16473 = vmatmul.mubr.msk.bf16.gmra.mrb[28].mxu0 %vm1204_vm0, %v17962_v41  ;;  %v21821_v16 = vmax.f32 %v24572_v18, %v11132_v7  ;;  %16765 = vmatmul.mubr.msk.bf16.gmra.mrb[28].mxu1 %vm1204_vm0, %v17963_v43  ;;  %v24584_v19 = vmax.f32 %v24582_v42, %v24583_v25  ;;  %v24586_v43 = vld [vmem:[#allocation259_spill] sm:$0xff]  ;;  %v24589_v34 = vld [vmem:[#allocation261_spill] sm:$0xff] }
 0x44f   : > { %16476 = vmatprep.mubr.msk.bf16.mxu0 %vm1204_vm0, %v17964_v57  ;;  %v21828_v11 = vmax.f32 %v24575_v35, %v11130_v2  ;;  %16768 = vmatprep.mubr.msk.bf16.mxu1 %vm1204_vm0, %v17965_v5  ;;  %v24587_v57 = vmax.f32 %v24585_v37, %v24586_v43  ;;  %v24590_v2 = vmax.f32 %v24588_v45, %v24589_v34  ;;  %v24601_v42 = vld [vmem:[#allocation269_spill] sm:$0xff]  ;;  %v17978_v45 = vld [vmem:[%s18048_s22 + $0x1170] sm:$0xff]  }
 0x451   : > { %17041 = vxpose.xlu0.b32.end [2/2] (short) (narrow) %v17040_v13, 32  ;;  %v16370_v40 = vpop.f32.mrb[180].mxu0  ;;  %v16662_v17 = vpop.f32.mrb[180].mxu1  ;;  %17081 = vxpose.xlu1.b32.cont [10/16] (narrow) %v21735_v52, 32  ;;  %v24579_v52 = vld [vmem:[#allocation254_spill] sm:$0xff] }
 0x452   : > { %v7801_v46 = vpop.f32.mrb[181].mxu0  ;;  %v11135_v12 = vmax.f32 %v16370_v40, %v16662_v17  ;;  %v10426_v30 = vpop.f32.mrb[181].mxu1  ;;  %v24581_v22 = vmax.f32 %v24579_v52, %v24580_v55  ;;  %v24594_v17 = vld [vmem:[#allocation264_spill] sm:$0xff] }
 0x453   : > { %v16371_v9 = vpop.f32.mrb[182].mxu0  ;;  %v11133_v26 = vmax.f32 %v7801_v46, %v10426_v30  ;;  %v16663_v10 = vpop.f32.mrb[182].mxu1  ;;  %v24595_v46 = vld [vmem:[#allocation265_spill] sm:$0xff]  ;;  %v24597_v30 = vld [vmem:[#allocation266_spill] sm:$0xff] }
 0x454   : > { %v7804_v61 = vpop.f32.mrb[183].mxu0  ;;  %v21839_v28 = vmax.f32 %v24578_v36, %v11135_v12  ;;  %v11136_v31 = vmax.f32 %v16371_v9, %v16663_v10  ;;  %v10429_v33 = vpop.f32.mrb[183].mxu1  ;;  %v24598_v9 = vld [vmem:[#allocation267_spill] sm:$0xff]  ;;  %v17975_v36 = vld [vmem:[%s18048_s22 + $0x10d0] sm:$0xff]  }
 0x455   : > { %v21844_v41 = vmax.f32 %v24581_v22, %v11133_v26  ;;  %v11134_v14 = vmax.f32 %v7804_v61, %v10429_v33  ;;  %17083 = vxpose.xlu1.b32.cont [11/16] (narrow) %v21766_v20, 32  ;;  %v17974_v61 = vld [vmem:[%s18048_s22 + $0x1088] sm:$0xff]   ;;  %v17977_v22 = vld [vmem:[%s18048_s22 + $0x10d8] sm:$0xff]  }
 0x456   : > { %16477 = vmatmul.mubr.msk.bf16.gmra.mrb[32].mxu0 %vm1204_vm0, %v17966_v1  ;;  %v21851_v32 = vmax.f32 %v24584_v19, %v11136_v31  ;;  %16769 = vmatmul.mubr.msk.bf16.gmra.mrb[32].mxu1 %vm1204_vm0, %v17967_v48  ;;  %v24596_v1 = vmax.f32 %v24594_v17, %v24595_v46  ;;  %v24599_v48 = vmax.f32 %v24597_v30, %v24598_v9  ;;  %v17976_v31 = vld [vmem:[%s18048_s22 + $0x1090] sm:$0xff]   ;;  %v17981_v17 = vld [vmem:[%s18048_s22 + $0x11c0] sm:$0xff]  }
 0x457   : > { %16480 = vmatprep.mubr.msk.bf16.mxu0 %vm1204_vm0, %v17968_v29  ;;  %v21858_v58 = vmax.f32 %v24587_v57, %v11134_v14  ;;  %16772 = vmatprep.mubr.msk.bf16.mxu1 %vm1204_vm0, %v17969_v62  ;;  %v24600_v14 = vld [vmem:[#allocation268_spill] sm:$0xff]  ;;  %v24604_v57 = vld [vmem:[#allocation271_spill] sm:$0xff] }
 0x458   : > { %v24602_v25 = vmax.f32 %v24600_v14, %v24601_v42  ;;  %v24612_v46 = vld [vmem:[#allocation276_spill] sm:$0xff] }
 0x459   : > { %v16374_v20 = vpop.f32.mrb[184].mxu0  ;;  %v16666_v63 = vpop.f32.mrb[184].mxu1  ;;  %17085 = vxpose.xlu1.b32.cont [12/16] (narrow) %v21779_v27, 32  ;;  %v24591_v27 = vld [vmem:[#allocation262_spill] sm:$0xff] }
 0x45a   : > { %v7817_v23 = vpop.f32.mrb[185].mxu0  ;;  %v11139_v44 = vmax.f32 %v16374_v20, %v16666_v63  ;;  %v10442_v5 = vpop.f32.mrb[185].mxu1  ;;  %v24593_v47 = vmax.f32 %v24591_v27, %v24592_v6  ;;  %v17980_v27 = vld [vmem:[%s18048_s22 + $0x1178] sm:$0xff]  }
 0x45b   : > { %v16375_v15 = vpop.f32.mrb[186].mxu0  ;;  %v11137_v7 = vmax.f32 %v7817_v23, %v10442_v5  ;;  %v16667_v54 = vpop.f32.mrb[186].mxu1 }
 0x45c   : > { %v7820_v13 = vpop.f32.mrb[187].mxu0  ;;  %v21869_v21 = vmax.f32 %v24590_v2, %v11139_v44  ;;  %v11140_v60 = vmax.f32 %v16375_v15, %v16667_v54  ;;  %v10445_v18 = vpop.f32.mrb[187].mxu1  ;;  %v24607_v44 = vld [vmem:[#allocation273_spill] sm:$0xff] }
 0x45d   : > { %v21874_v35 = vmax.f32 %v24593_v47, %v11137_v7  ;;  %v11138_v40 = vmax.f32 %v7820_v13, %v10445_v18  ;;  %17087 = vxpose.xlu1.b32.cont [13/16] (narrow) %v21761_v0, 32  ;;  %v17979_v18 = vld [vmem:[%s18048_s22 + $0x11b8] sm:$0xff]  }
 0x45e   : > { %16481 = vmatmul.mubr.msk.bf16.gmra.mrb[36].mxu0 %vm1204_vm0, %v17970_v4  ;;  %v21881_v12 = vmax.f32 %v24596_v1, %v11140_v60  ;;  %16773 = vmatmul.mubr.msk.bf16.gmra.mrb[36].mxu1 %vm1204_vm0, %v17971_v38  ;;  %v24606_v4 = vld [vmem:[#allocation272_spill] sm:$0xff]  ;;  %v24609_v38 = vld [vmem:[#allocation274_spill] sm:$0xff]  ;;  %v24613_v1 = vld [vmem:[#allocation277_spill] sm:$0xff] }
 0x45f   : > { %16484 = vmatprep.mubr.msk.bf16.mxu0 %vm1204_vm0, %v17972_v59  ;;  %v21888_v29 = vmax.f32 %v24599_v48, %v11138_v40  ;;  %16776 = vmatprep.mubr.msk.bf16.mxu1 %vm1204_vm0, %v17973_v3  ;;  %v24608_v5 = vmax.f32 %v24606_v4, %v24607_v44  ;;  %v24610_v59 = vld [vmem:[#allocation275_spill] sm:$0xff]  ;;  %v24614_v30 = vmax.f32 %v24612_v46, %v24613_v1 }
 0x460   : > { %v24611_v7 = vmax.f32 %v24609_v38, %v24610_v59  ;;  %v11715_v1 = vadd.f32 %v21663_v56, %v21821_v16 }
 0x461   : > { %v16378_v0 = vpop.f32.mrb[188].mxu0  ;;  %v16670_v26 = vpop.f32.mrb[188].mxu1  ;;  %17089 = vxpose.xlu1.b32.cont [14/16] (narrow) %v21773_v51, 32  ;;  %v24603_v51 = vld [vmem:[#allocation270_spill] sm:$0xff] }
 0x462   : > { %v7833_v10 = vpop.f32.mrb[189].mxu0  ;;  %v11143_v62 = vmax.f32 %v16378_v0, %v16670_v26  ;;  %v10458_v8 = vpop.f32.mrb[189].mxu1  ;;  %v24605_v20 = vmax.f32 %v24603_v51, %v24604_v57  ;;  %v24615_v26 = vld [vmem:[#allocation278_spill] sm:$0xff] }
 0x463   : > { %v16379_v24 = vpop.f32.mrb[190].mxu0  ;;  %v11141_v33 = vmax.f32 %v7833_v10, %v10458_v8  ;;  %v16671_v52 = vpop.f32.mrb[190].mxu1  ;;  %v24616_v10 = vld [vmem:[#allocation279_spill] sm:$0xff] }
 0x464   : > { %v7836_v55 = vpop.f32.mrb[191].mxu0  ;;  %v21899_v19 = vmax.f32 %v24602_v25, %v11143_v62  ;;  %v11144_v37 = vmax.f32 %v16379_v24, %v16671_v52  ;;  %v10461_v43 = vpop.f32.mrb[191].mxu1  ;;  %v11713_v24 = vadd.f32 %v21663_v56, %v21828_v11 }
 0x465   : > { %v21904_v63 = vmax.f32 %v24605_v20, %v11141_v33  ;;  %v11142_v23 = vmax.f32 %v7836_v55, %v10461_v43  ;;  %17091 = vxpose.xlu1.b32.cont [15/16] (narrow) %v21802_v49, 32  ;;  %v24621_v55 = vld [vmem:[#allocation282_spill] sm:$0xff] }
 0x466   : > { %16485 = vmatmul.mubr.msk.bf16.gmra.mrb[40].mxu0 %vm1204_vm0, %v17974_v61  ;;  %v21911_v15 = vmax.f32 %v24608_v5, %v11144_v37  ;;  %16777 = vmatmul.mubr.msk.bf16.gmra.mrb[40].mxu1 %vm1204_vm0, %v17975_v36  ;;  %v24617_v61 = vmax.f32 %v24615_v26, %v24616_v10  ;;  %v24618_v36 = vld [vmem:[#allocation280_spill] sm:$0xff]  ;;  %v17982_v20 = vld [vmem:[%s18048_s22 + $0x1180] sm:$0xff]   ;;  %v24631_v10 = vld [vmem:[#allocation289_spill] sm:$0xff] }
 0x467   : > { %16488 = vmatprep.mubr.msk.bf16.mxu0 %vm1204_vm0, %v17976_v31  ;;  %v21918_v54 = vmax.f32 %v24611_v7, %v11142_v23  ;;  %16780 = vmatprep.mubr.msk.bf16.mxu1 %vm1204_vm0, %v17977_v22  ;;  %v24619_v31 = vld [vmem:[#allocation281_spill] sm:$0xff]  ;;  %v24622_v22 = vld [vmem:[#allocation283_spill] sm:$0xff]  ;;  %v12001_v23 = vmax.f32 %v11713_v24, 0.0  ;;  %v24630_v26 = vld [vmem:[#allocation288_spill] sm:$0xff] }
 0x468   : > { %v24620_v33 = vmax.f32 %v24618_v36, %v24619_v31  ;;  %v24623_v14 = vmax.f32 %v24621_v55, %v24622_v22  ;;  %v17983_v7 = vld [vmem:[%s18048_s22 + $0x11c8] sm:$0xff]   ;;  %v24633_v24 = vld [vmem:[#allocation290_spill] sm:$0xff] }
 0x469   : > { %v16382_v49 = vpop.f32.mrb[192].mxu0  ;;  %v16674_v13 = vpop.f32.mrb[192].mxu1  ;;  %17093 = vxpose.xlu1.b32.end [16/16] (narrow) %v21816_v53, 32  ;;  %v11712_v53 = vadd.f32 %v21663_v56, %v21812_v50  ;;  %v24634_v36 = vld [vmem:[#allocation291_spill] sm:$0xff] }
 0x46a   : > { %v7849_v3 = vpop.f32.mrb[193].mxu0  ;;  %v11147_v34 = vmax.f32 %v16382_v49, %v16674_v13  ;;  %v10474_v2 = vpop.f32.mrb[193].mxu1  ;;  %v17984_v49 = vld [vmem:[%s18048_s22 + $0x1188] sm:$0xff]   ;;  %v11714_v13 = vadd.f32 %v21663_v56, %v21807_v39  ;;  %v24635_v31 = vmax.f32 %v24633_v24, %v24634_v36 }
 0x46b   : > { %v16383_v60 = vpop.f32.mrb[194].mxu0  ;;  %v11145_v6 = vmax.f32 %v7849_v3, %v10474_v2  ;;  %v16675_v47 = vpop.f32.mrb[194].mxu1  ;;  %v12000_v37 = vmax.f32 %v11712_v53, 0.0  ;;  %v17985_v2 = vld [vmem:[%s18048_s22 + $0x11d0] sm:$0xff]   ;;  %v24628_v39 = vld [vmem:[#allocation287_spill] sm:$0xff] }
 0x46c   : > { %v7852_v40 = vpop.f32.mrb[195].mxu0  ;;  %v11435_v9 = vmax.f32 %v24614_v30, %v11147_v34  ;;  %v11148_v48 = vmax.f32 %v16383_v60, %v16675_v47  ;;  %v10477_v0 = vpop.f32.mrb[195].mxu1  ;;  %v11716_v60 = vadd.f32 %v21663_v56, %v21844_v41  ;;  %v24627_v30 = vld [vmem:[#allocation286_spill] sm:$0xff]  ;;  %v11717_v41 = vadd.f32 %v21663_v56, %v21858_v58 }
 0x46d   : > { %v21934_v62 = vmax.f32 %v24617_v61, %v11145_v6  ;;  %v11146_v8 = vmax.f32 %v7852_v40, %v10477_v0  ;;  %v24632_v61 = vmax.f32 %v24630_v26, %v24631_v10  ;;  %v12002_v58 = vmax.f32 %v11714_v13, 0.0 }
 0x46e   : > { %16489 = vmatmul.mubr.msk.bf16.gmra.mrb[44].mxu0 %vm1204_vm0, %v17978_v45  ;;  %v11436_v52 = vmax.f32 %v24620_v33, %v11148_v48  ;;  %16781 = vmatmul.mubr.msk.bf16.gmra.mrb[44].mxu1 %vm1204_vm0, %v17979_v18  ;;  %v11730_v50 = vadd.f32 %v21663_v56, %v11435_v9  ;;  %v24624_v18 = vld [vmem:[#allocation284_spill] sm:$0xff]  ;;  %v24629_v9 = vmax.f32 %v24627_v30, %v24628_v39 }
 0x46f   : > { %16492 = vmatprep.mubr.msk.bf16.mxu0 %vm1204_vm0, %v17980_v27  ;;  %v21948_v42 = vmax.f32 %v24623_v14, %v11146_v8  ;;  %16784 = vmatprep.mubr.msk.bf16.mxu1 %vm1204_vm0, %v17981_v17  ;;  %v24625_v27 = vld [vmem:[#allocation285_spill] sm:$0xff]  ;;  %v12003_v14 = vmax.f32 %v11715_v1, 0.0  ;;  %v24639_v1 = vld [vmem:[#allocation294_spill] sm:$0xff] }
 0x470   : > { %v11731_v11 = vadd.f32 %v21663_v56, %v11436_v52  ;;  %v12018_v43 = vmax.f32 %v11730_v50, 0.0  ;;  %v24626_v6 = vmax.f32 %v24624_v18, %v24625_v27  ;;  %v12004_v52 = vmax.f32 %v11716_v60, 0.0  ;;  %v24636_v18 = vld [vmem:[#allocation292_spill] sm:$0xff]  ;;  %v24637_v27 = vld [vmem:[#allocation293_spill] sm:$0xff] }
 0x471   : > { %v16386_v25 = vpop.f32.mrb[196].mxu0  ;;  %v16678_v51 = vpop.f32.mrb[196].mxu1  ;;  %v11720_v60 = vadd.f32 %v21663_v56, %v21874_v35  ;;  %v11721_v35 = vadd.f32 %v21663_v56, %v21888_v29 }
 0x472   : > { %v7865_v57 = vpop.f32.mrb[197].mxu0  ;;  %v12019_v4 = vmax.f32 %v11731_v11, 0.0  ;;  %v11151_v44 = vmax.f32 %v16386_v25, %v16678_v51  ;;  %v10490_v5 = vpop.f32.mrb[197].mxu1  ;;  %v17138_v59 = vpack.i.bf16 %v12018_v43, %v12000_v37  ;;  %v21985_v11 = vadd.f32 %v21663_v56, %v21839_v28 }
 0x473   : > { %v16387_v38 = vpop.f32.mrb[198].mxu0  ;;  %v11149_v3 = vmax.f32 %v7865_v57, %v10490_v5  ;;  %v16679_v45 = vpop.f32.mrb[198].mxu1  ;;  %v17986_v57 = vld [vmem:[%s18048_s22 + $0x1190] sm:$0xff]  }
 0x474   : > { %v7868_v34 = vpop.f32.mrb[199].mxu0  ;;  %v11439_v47 = vmax.f32 %v24626_v6, %v11151_v44  ;;  %v11152_v40 = vmax.f32 %v16387_v38, %v16679_v45  ;;  %v10493_v17 = vpop.f32.mrb[199].mxu1  ;;  %17139 = vxpose.xlu0.b32.start [1/16] (narrow) %v17138_v59, 32  ;;  %v17140_v46 = vpack.i.bf16 %v12019_v4, %v12001_v23  ;;  %v17987_v38 = vld [vmem:[%s18048_s22 + $0x11d8] sm:$0xff]   ;;  %v24638_v6 = vmax.f32 %v24636_v18, %v24637_v27 }
 0x475   : > { %v11437_v48 = vmax.f32 %v24629_v9, %v11149_v3  ;;  %v11150_v0 = vmax.f32 %v7868_v34, %v10493_v17  ;;  %v17988_v59 = vld [vmem:[%s18048_s22 + $0x1198] sm:$0xff]   ;;  %v12006_v29 = vmax.f32 %v21985_v11, 0.0 }
 0x476   : > { %16493 = vmatmul.mubr.msk.bf16.gmra.mrb[48].mxu0 %vm1204_vm0, %v17982_v20  ;;  %v11734_v53 = vadd.f32 %v21663_v56, %v11439_v47  ;;  %v11440_v8 = vmax.f32 %v24632_v61, %v11152_v40  ;;  %16785 = vmatmul.mubr.msk.bf16.gmra.mrb[48].mxu1 %vm1204_vm0, %v17983_v7  ;;  %v12005_v20 = vmax.f32 %v11717_v41, 0.0  ;;  %v24642_v41 = vld [vmem:[#allocation296_spill] sm:$0xff] }
 0x477   : > { %16496 = vmatprep.mubr.msk.bf16.mxu0 %vm1204_vm0, %v17984_v49  ;;  %v11732_v16 = vadd.f32 %v21663_v56, %v11437_v48  ;;  %v11438_v33 = vmax.f32 %v24635_v31, %v11150_v0  ;;  %16788 = vmatprep.mubr.msk.bf16.mxu1 %vm1204_vm0, %v17985_v2  ;;  %v21993_v49 = vadd.f32 %v21663_v56, %v21851_v32  ;;  %v17989_v2 = vld [vmem:[%s18048_s22 + $0x11e0] sm:$0xff]   ;;  %v24640_v32 = vld [vmem:[#allocation295_spill] sm:$0xff]  ;;  %v12008_v31 = vmax.f32 %v11720_v60, 0.0 }
 0x478   : > { %v12022_v50 = vmax.f32 %v11734_v53, 0.0  ;;  %v11735_v55 = vadd.f32 %v21663_v56, %v11440_v8  ;;  %17141 = vxpose.xlu0.b32.cont [2/16] (narrow) %v17140_v46, 32  ;;  %v24641_v30 = vmax.f32 %v24639_v1, %v24640_v32  ;;  %v24643_v53 = vld [vmem:[#allocation297_spill] sm:$0xff]  ;;  %v24645_v8 = vld [vmem:[#allocation298_spill] sm:$0xff] }
 0x479   : > { %v16390_v22 = vpop.f32.mrb[200].mxu0  ;;  %v12020_v25 = vmax.f32 %v11732_v16, 0.0  ;;  %v11733_v37 = vadd.f32 %v21663_v56, %v11438_v33  ;;  %v16682_v43 = vpop.f32.mrb[200].mxu1  ;;  %v24644_v26 = vmax.f32 %v24642_v41, %v24643_v53  ;;  %v24646_v16 = vld [vmem:[#allocation299_spill] sm:$0xff]  ;;  %v24657_v53 = vld [vmem:[#allocation306_spill] sm:$0xff] }
 0x47a   : > { %v7881_v51 = vpop.f32.mrb[201].mxu0  ;;  %v12023_v23 = vmax.f32 %v11735_v55, 0.0  ;;  %v11155_v4 = vmax.f32 %v16390_v22, %v16682_v43  ;;  %v10506_v44 = vpop.f32.mrb[201].mxu1  ;;  %v17146_v7 = vpack.i.bf16 %v12022_v50, %v12004_v52  ;;  %v24647_v24 = vmax.f32 %v24645_v8, %v24646_v16 }
 0x47b   : > { %v16391_v5 = vpop.f32.mrb[202].mxu0  ;;  %v12021_v28 = vmax.f32 %v11733_v37, 0.0  ;;  %v11153_v13 = vmax.f32 %v7881_v51, %v10506_v44  ;;  %v16683_v3 = vpop.f32.mrb[202].mxu1  ;;  %v17142_v34 = vpack.i.bf16 %v12020_v25, %v12002_v58  ;;  %v12007_v50 = vmax.f32 %v21993_v49, 0.0  ;;  %v17990_v37 = vld [vmem:[%s18048_s22 + $0x11a0] sm:$0xff]   ;;  %v17992_v44 = vld [vmem:[%s18048_s22 + $0x11a8] sm:$0xff]  }
 0x47c   : > { %v7884_v45 = vpop.f32.mrb[203].mxu0  ;;  %v11443_v47 = vmax.f32 %v24638_v6, %v11155_v4  ;;  %v11156_v40 = vmax.f32 %v16391_v5, %v16683_v3  ;;  %v10509_v17 = vpop.f32.mrb[203].mxu1  ;;  %v22001_v46 = vpack.i.bf16 %v12023_v23, %v12005_v20  ;;  %v22025_v55 = vadd.f32 %v21663_v56, %v21869_v21  ;;  %v17991_v4 = vld [vmem:[%s18048_s22 + $0x11e8] sm:$0xff]  }
 0x47d   : > { %v11441_v39 = vmax.f32 %v24641_v30, %v11153_v13  ;;  %v11154_v9 = vmax.f32 %v7884_v45, %v10509_v17  ;;  %17143 = vxpose.xlu0.b32.cont [3/16] (narrow) %v17142_v34, 32  ;;  %v17144_v48 = vpack.i.bf16 %v12021_v28, %v12003_v14  ;;  %v12009_v43 = vmax.f32 %v11721_v35, 0.0  ;;  %v17993_v13 = vld [vmem:[%s18048_s22 + $0x11f0] sm:$0xff]   ;;  %v24652_v17 = vld [vmem:[#allocation303_spill] sm:$0xff] }
 0x47e   : > { %16497 = vmatmul.mubr.msk.bf16.gmra.mrb[52].mxu0 %vm1204_vm0, %v17986_v57  ;;  %v11738_v0 = vadd.f32 %v21663_v56, %v11443_v47  ;;  %v11444_v10 = vmax.f32 %v24644_v26, %v11156_v40  ;;  %16789 = vmatmul.mubr.msk.bf16.gmra.mrb[52].mxu1 %vm1204_vm0, %v17987_v38  ;;  %v11723_v21 = vadd.f32 %v21663_v56, %v21881_v12  ;;  %v24648_v34 = vld [vmem:[#allocation300_spill] sm:$0xff]  ;;  %v24651_v40 = vld [vmem:[#allocation302_spill] sm:$0xff] }
 0x47f   : > { %16500 = vmatprep.mubr.msk.bf16.mxu0 %vm1204_vm0, %v17988_v59  ;;  %v11736_v61 = vadd.f32 %v21663_v56, %v11441_v39  ;;  %v11442_v36 = vmax.f32 %v24647_v24, %v11154_v9  ;;  %16792 = vmatprep.mubr.msk.bf16.mxu1 %vm1204_vm0, %v17989_v2  ;;  %v11724_v45 = vadd.f32 %v21663_v56, %v21904_v63  ;;  %v24649_v2 = vld [vmem:[#allocation301_spill] sm:$0xff]  ;;  %v24654_v9 = vld [vmem:[#allocation304_spill] sm:$0xff] }
 0x480   : > { %v12026_v33 = vmax.f32 %v11738_v0, 0.0  ;;  %v11739_v58 = vadd.f32 %v21663_v56, %v11444_v10  ;;  %v24650_v60 = vmax.f32 %v24648_v34, %v24649_v2  ;;  %v24653_v12 = vmax.f32 %v24651_v40, %v24652_v17  ;;  %v17994_v24 = vld [vmem:[%s18048_s22 + $0x11b0] sm:$0xff]   ;;  %v24664_v34 = vld [vmem:[#allocation311_spill] sm:$0xff]  ;;  %v24667_v40 = vld [vmem:[#allocation313_spill] sm:$0xff] }
 0x481   : > { %v16394_v52 = vpop.f32.mrb[204].mxu0  ;;  %v12024_v22 = vmax.f32 %v11736_v61, 0.0  ;;  %v11737_v14 = vadd.f32 %v21663_v56, %v11442_v36  ;;  %v16686_v25 = vpop.f32.mrb[204].mxu1  ;;  %17145 = vxpose.xlu0.b32.cont [4/16] (narrow) %v17144_v48, 32  ;;  %v11725_v63 = vadd.f32 %v21663_v56, %v21918_v54  ;;  %v24655_v48 = vld [vmem:[#allocation305_spill] sm:$0xff]  ;;  %v12012_v61 = vmax.f32 %v11724_v45, 0.0 }
 0x482   : > { %v7897_v11 = vpop.f32.mrb[205].mxu0  ;;  %v12027_v51 = vmax.f32 %v11739_v58, 0.0  ;;  %v11159_v57 = vmax.f32 %v16394_v52, %v16686_v25  ;;  %v10522_v20 = vpop.f32.mrb[205].mxu1  ;;  %v22031_v5 = vpack.i.bf16 %v12026_v33, %v12008_v31  ;;  %v24656_v35 = vmax.f32 %v24654_v9, %v24655_v48  ;;  %v24663_v45 = vld [vmem:[#allocation310_spill] sm:$0xff] }
 0x483   : > { %v16395_v23 = vpop.f32.mrb[206].mxu0  ;;  %v12025_v38 = vmax.f32 %v11737_v14, 0.0  ;;  %v11157_v59 = vmax.f32 %v7897_v11, %v10522_v20  ;;  %v16687_v49 = vpop.f32.mrb[206].mxu1  ;;  %v17150_v3 = vpack.i.bf16 %v12024_v22, %v12006_v29  ;;  %v12010_v36 = vmax.f32 %v22025_v55, 0.0 }
 0x484   : > { %v7900_v28 = vpop.f32.mrb[207].mxu0  ;;  %v11447_v18 = vmax.f32 %v24650_v60, %v11159_v57  ;;  %v11160_v27 = vmax.f32 %v16395_v23, %v16687_v49  ;;  %v10525_v6 = vpop.f32.mrb[207].mxu1  ;;  %v22041_v47 = vpack.i.bf16 %v12027_v51, %v12009_v43  ;;  %v12011_v29 = vmax.f32 %v11723_v21, 0.0 }
 0x485   : > { %v11445_v1 = vmax.f32 %v24653_v12, %v11157_v59  ;;  %v11158_v32 = vmax.f32 %v7900_v28, %v10525_v6  ;;  %17147 = vxpose.xlu0.b32.cont [5/16] (narrow) %v17146_v7, 32  ;;  %v17152_v30 = vpack.i.bf16 %v12025_v38, %v12007_v50  ;;  %v24658_v7 = vld [vmem:[#allocation307_spill] sm:$0xff]  ;;  %v12013_v50 = vmax.f32 %v11725_v63, 0.0  ;;  %v24666_v6 = vld [vmem:[#allocation312_spill] sm:$0xff] }
 0x486   : > { %16501 = vmatmul.mubr.msk.bf16.gmra.mrb[56].mxu0 %vm1204_vm0, %v17990_v37  ;;  %v11742_v39 = vadd.f32 %v21663_v56, %v11447_v18  ;;  %v11448_v0 = vmax.f32 %v24656_v35, %v11160_v27  ;;  %16793 = vmatmul.mubr.msk.bf16.gmra.mrb[56].mxu1 %vm1204_vm0, %v17991_v4  ;;  %v24659_v26 = vmax.f32 %v24657_v53, %v24658_v7  ;;  %v17995_v37 = vld [vmem:[%s18048_s22 + $0x11f8] sm:$0xff]   ;;  %v24670_v63 = vld [vmem:[#allocation315_spill] sm:$0xff] }
 0x487   : > { %16504 = vmatprep.mubr.msk.bf16.mxu0 %vm1204_vm0, %v17992_v44  ;;  %v11740_v41 = vadd.f32 %v21663_v56, %v11445_v1  ;;  %16796 = vmatprep.mubr.msk.bf16.mxu1 %vm1204_vm0, %v17993_v13  ;;  %v11726_v51 = vadd.f32 %v21663_v56, %v21899_v19  ;;  %v24660_v44 = vld [vmem:[#allocation308_spill] sm:$0xff]  ;;  %v11728_v28 = vadd.f32 %v21663_v56, %v21934_v62 }
 0x488   : > { %v11446_v10 = vmax.f32 %v24659_v26, %v11158_v32  ;;  %v12030_v54 = vmax.f32 %v11742_v39, 0.0  ;;  %v11743_v8 = vadd.f32 %v21663_v56, %v11448_v0  ;;  %v24665_v19 = vmax.f32 %v24663_v45, %v24664_v34 }
 0x489   : > { %v16398_v16 = vpop.f32.mrb[208].mxu0  ;;  %v12028_v31 = vmax.f32 %v11740_v41, 0.0  ;;  %v16690_v58 = vpop.f32.mrb[208].mxu1  ;;  %17149 = vxpose.xlu0.b32.cont [6/16] (narrow) %v22001_v46, 32  ;;  %v24661_v46 = vld [vmem:[#allocation309_spill] sm:$0xff]  ;;  %v11729_v27 = vadd.f32 %v21663_v56, %v21948_v42  ;;  %v24668_v17 = vmax.f32 %v24666_v6, %v24667_v40  ;;  %v11727_v1 = vadd.f32 %v21663_v56, %v21911_v15 }
 0x48a   : > { %v11741_v33 = vadd.f32 %v21663_v56, %v11446_v10  ;;  %v7913_v52 = vpop.f32.mrb[209].mxu0  ;;  %v12031_v22 = vmax.f32 %v11743_v8, 0.0  ;;  %v11163_v14 = vmax.f32 %v16398_v16, %v16690_v58  ;;  %v10538_v25 = vpop.f32.mrb[209].mxu1  ;;  %v22066_v43 = vpack.i.bf16 %v12030_v54, %v12012_v61 }
 0x48b   : > { %v16399_v11 = vpop.f32.mrb[210].mxu0  ;;  %v11161_v57 = vmax.f32 %v7913_v52, %v10538_v25  ;;  %v16691_v20 = vpop.f32.mrb[210].mxu1  ;;  %v22070_v4 = vpack.i.bf16 %v12028_v31, %v12010_v36  ;;  %v24662_v21 = vmax.f32 %v24660_v44, %v24661_v46  ;;  %v12016_v35 = vmax.f32 %v11728_v28, 0.0  ;;  %v24678_v44 = vld [vmem:[#allocation320_spill] sm:$0xff]  ;;  %v24679_v46 = vld [vmem:[#allocation321_spill] sm:$0xff] }
 0x48c   : > { %v12029_v55 = vmax.f32 %v11741_v33, 0.0  ;;  %v7916_v23 = vpop.f32.mrb[211].mxu0  ;;  %v11164_v59 = vmax.f32 %v16399_v11, %v16691_v20  ;;  %v10541_v49 = vpop.f32.mrb[211].mxu1  ;;  %v22077_v13 = vpack.i.bf16 %v12031_v22, %v12013_v50  ;;  %v12014_v41 = vmax.f32 %v11726_v51, 0.0  ;;  %v24672_v50 = vld [vmem:[#allocation316_spill] sm:$0xff]  ;;  %v24673_v22 = vld [vmem:[#allocation317_spill] sm:$0xff] }
 0x48d   : > { %v11451_v38 = vmax.f32 %v24662_v21, %v11163_v14  ;;  %v11449_v2 = vmax.f32 %v24665_v19, %v11161_v57  ;;  %v11162_v60 = vmax.f32 %v7916_v23, %v10541_v49  ;;  %17151 = vxpose.xlu0.b32.cont [7/16] (narrow) %v17150_v3, 32  ;;  %v24669_v3 = vld [vmem:[#allocation314_spill] sm:$0xff]  ;;  %v12017_v61 = vmax.f32 %v11729_v27, 0.0  ;;  %v24676_v51 = vld [vmem:[#allocation319_spill] sm:$0xff] }
 0x48e   : > { %16505 = vmatmul.mubr.msk.bf16.gmra.mrb[60].mxu0 %vm1204_vm0, %v17994_v24  ;;  %v17160_v18 = vpack.i.bf16 %v12029_v55, %v12011_v29  ;;  %v11452_v12 = vmax.f32 %v24668_v17, %v11164_v59  ;;  %16797 = vmatmul.mubr.msk.bf16.gmra.mrb[60].mxu1 %vm1204_vm0, %v17995_v37  ;;  %v24671_v39 = vmax.f32 %v24669_v3, %v24670_v63  ;;  %v12015_v36 = vmax.f32 %v11727_v1, 0.0  ;;  %v24675_v37 = vld [vmem:[#allocation318_spill] sm:$0xff]  ;;  %v24682_v49 = vld [vmem:[#allocation323_spill] sm:$0xff] }
 0x48f   : > { %v11746_v62 = vadd.f32 %v21663_v56, %v11451_v38  ;;  %v11744_v32 = vadd.f32 %v21663_v56, %v11449_v2  ;;  %v24674_v14 = vmax.f32 %v24672_v50, %v24673_v22  ;;  %v24677_v55 = vmax.f32 %v24675_v37, %v24676_v51  ;;  %v24681_v59 = vld [vmem:[#allocation322_spill] sm:$0xff] }
 0x490   : > { %v11450_v9 = vmax.f32 %v24671_v39, %v11162_v60  ;;  %v11747_v48 = vadd.f32 %v21663_v56, %v11452_v12  ;;  %v24680_v21 = vmax.f32 %v24678_v44, %v24679_v46  ;;  %v24683_v28 = vmax.f32 %v24681_v59, %v24682_v49  ;;  %v24684_v12 = vld [vmem:[#allocation324_spill] sm:$0xff]  ;;  %v24687_v39 = vld [vmem:[#allocation326_spill] sm:$0xff]  ;;  %v24706_v59 = vld [vmem:[#allocation339_spill] sm:$0xff] }
 0x491   : > { %v16402_v42 = vpop.f32.mrb[212].mxu0  ;;  %v12034_v0 = vmax.f32 %v11746_v62, 0.0  ;;  %v12032_v53 = vmax.f32 %v11744_v32, 0.0  ;;  %v16694_v26 = vpop.f32.mrb[212].mxu1  ;;  %17153 = vxpose.xlu0.b32.cont [8/16] (narrow) %v17152_v30, 32  ;;  %v24685_v62 = vld [vmem:[#allocation325_spill] sm:$0xff] }
 0x492   : > { %v11745_v7 = vadd.f32 %v21663_v56, %v11450_v9  ;;  %v7929_v10 = vpop.f32.mrb[213].mxu0  ;;  %v12035_v15 = vmax.f32 %v11747_v48, 0.0  ;;  %v11167_v54 = vmax.f32 %v16402_v42, %v16694_v26  ;;  %v10554_v8 = vpop.f32.mrb[213].mxu1  ;;  %v24686_v1 = vmax.f32 %v24684_v12, %v24685_v62  ;;  %v24688_v9 = vld [vmem:[#allocation327_spill] sm:$0xff]  ;;  %v24709_v12 = vld [vmem:[#allocation341_spill] sm:$0xff] }
 0x493   : > { %v16403_v16 = vpop.f32.mrb[214].mxu0  ;;  %v17114_v24 = vpack.i.bf16 %v12034_v0, %v12016_v35  ;;  %v11165_v31 = vmax.f32 %v7929_v10, %v10554_v8  ;;  %v16695_v33 = vpop.f32.mrb[214].mxu1  ;;  %v22098_v52 = vpack.i.bf16 %v12032_v53, %v12014_v41  ;;  %v24689_v48 = vmax.f32 %v24687_v39, %v24688_v9  ;;  %v24690_v35 = vld [vmem:[#allocation328_spill] sm:$0xff]  ;;  %v24691_v0 = vld [vmem:[#allocation329_spill] sm:$0xff]  ;;  %v24694_v26 = vld [vmem:[#allocation331_spill] sm:$0xff] }
 0x494   : > { %v12033_v29 = vmax.f32 %v11745_v7, 0.0  ;;  %v7932_v58 = vpop.f32.mrb[215].mxu0  ;;  %v22103_v56 = vmax.f32 %v24674_v14, %v11167_v54  ;;  %v11168_v30 = vmax.f32 %v16403_v16, %v16695_v33  ;;  %v10557_v25 = vpop.f32.mrb[215].mxu1  ;;  %v17116_v11 = vpack.i.bf16 %v12035_v15, %v12017_v61  ;;  %v24693_v7 = vld [vmem:[#allocation330_spill] sm:$0xff]  ;;  %v24696_v33 = vld [vmem:[#allocation332_spill] sm:$0xff]  ;;  %v24712_v9 = vld [vmem:[#allocation343_spill] sm:$0xff] }
 0x495   : > { %17115 = vxpose.xlu1.b32.start [1/2] (short) (narrow) %v17114_v24, 32  ;;  %v22108_v57 = vmax.f32 %v24677_v55, %v11165_v31  ;;  %v11166_v20 = vmax.f32 %v7932_v58, %v10557_v25  ;;  %17155 = vxpose.xlu0.b32.cont [9/16] (narrow) %v22031_v5, 32  ;;  %v24692_v41 = vmax.f32 %v24690_v35, %v24691_v0  ;;  %v24697_v58 = vld [vmem:[#allocation333_spill] sm:$0xff]  ;;  %v24699_v25 = vld [vmem:[#allocation334_spill] sm:$0xff]  ;;  %v24702_v55 = vld [vmem:[#allocation336_spill] sm:$0xff] }
 0x496   : > { %v17168_v23 = vpack.i.bf16 %v12033_v29, %v12015_v36  ;;  %v22114_v38 = vmax.f32 %v24680_v21, %v11168_v30  ;;  %v24695_v10 = vmax.f32 %v24693_v7, %v24694_v26  ;;  %v24698_v50 = vmax.f32 %v24696_v33, %v24697_v58  ;;  %v24705_v21 = vld [vmem:[#allocation338_spill] sm:$0xff]  ;;  %v24714_v35 = vld [vmem:[#allocation344_spill] sm:$0xff]  ;;  %v24715_v0 = vld [vmem:[#allocation345_spill] sm:$0xff] }
 0x497   : > { %v22119_v45 = vmax.f32 %v24683_v28, %v11166_v20  ;;  %v24703_v20 = vld [vmem:[#allocation337_spill] sm:$0xff]  ;;  %v24707_v49 = vmax.f32 %v24705_v21, %v24706_v59  ;;  %v24711_v39 = vld [vmem:[#allocation342_spill] sm:$0xff]  ;;  %v24720_v58 = vld [vmem:[#allocation348_spill] sm:$0xff] }
 0x498   : > { %v24704_v44 = vmax.f32 %v24702_v55, %v24703_v20  ;;  %v24717_v26 = vld [vmem:[#allocation346_spill] sm:$0xff]  ;;  %v24724_v55 = vld [vmem:[#allocation351_spill] sm:$0xff] }
 0x499   : > { %17117 = vxpose.xlu1.b32.end [2/2] (short) (narrow) %v17116_v11, 32  ;;  %v16406_v34 = vpop.f32.mrb[216].mxu0  ;;  %v16698_v19 = vpop.f32.mrb[216].mxu1  ;;  %17157 = vxpose.xlu0.b32.cont [10/16] (narrow) %v22041_v47, 32  ;;  %v24700_v11 = vld [vmem:[#allocation335_spill] sm:$0xff] }
 0x49a   : > { %v7945_v2 = vpop.f32.mrb[217].mxu0  ;;  %v11171_v60 = vmax.f32 %v16406_v34, %v16698_v19  ;;  %v10570_v27 = vpop.f32.mrb[217].mxu1  ;;  %v24701_v37 = vmax.f32 %v24699_v25, %v24700_v11 }
 0x49b   : > { %v16407_v5 = vpop.f32.mrb[218].mxu0  ;;  %v11169_v6 = vmax.f32 %v7945_v2, %v10570_v27  ;;  %v16699_v40 = vpop.f32.mrb[218].mxu1 }
 0x49c   : > { %v7948_v17 = vpop.f32.mrb[219].mxu0  ;;  %v22125_v32 = vmax.f32 %v24686_v1, %v11171_v60  ;;  %v11172_v3 = vmax.f32 %v16407_v5, %v16699_v40  ;;  %v10573_v63 = vpop.f32.mrb[219].mxu1 }
 0x49d   : > { %v22130_v42 = vmax.f32 %v24689_v48, %v11169_v6  ;;  %v11170_v47 = vmax.f32 %v7948_v17, %v10573_v63  ;;  %17159 = vxpose.xlu0.b32.cont [11/16] (narrow) %v22070_v4, 32  ;;  %v24708_v17 = vld [vmem:[#allocation340_spill] sm:$0xff]  ;;  %v24713_v48 = vmax.f32 %v24711_v39, %v24712_v9 }
 0x49e   : > { %v22136_v53 = vmax.f32 %v24692_v41, %v11172_v3  ;;  %v24710_v62 = vmax.f32 %v24708_v17, %v24709_v12  ;;  %v24716_v41 = vmax.f32 %v24714_v35, %v24715_v0 }
 0x49f   : > { %v22141_v61 = vmax.f32 %v24695_v10, %v11170_v47  ;;  %v24718_v10 = vld [vmem:[#allocation347_spill] sm:$0xff] }
 0x4a1   : > { %v16410_v15 = vpop.f32.mrb[220].mxu0  ;;  %v16702_v54 = vpop.f32.mrb[220].mxu1  ;;  %17161 = vxpose.xlu0.b32.cont [12/16] (narrow) %v17160_v18, 32 }
 0x4a2   : > { %v7961_v8 = vpop.f32.mrb[221].mxu0  ;;  %v11175_v16 = vmax.f32 %v16410_v15, %v16702_v54  ;;  %v10586_v24 = vpop.f32.mrb[221].mxu1  ;;  %v24719_v15 = vmax.f32 %v24717_v26, %v24718_v10  ;;  %v24732_v10 = vld [vmem:[#allocation356_spill] sm:$0xff] }
 0x4a3   : > { %v16411_v36 = vpop.f32.mrb[222].mxu0  ;;  %v11173_v29 = vmax.f32 %v7961_v8, %v10586_v24  ;;  %v16703_v31 = vpop.f32.mrb[222].mxu1 }
 0x4a4   : > { %v7964_v4 = vpop.f32.mrb[223].mxu0  ;;  %v22146_v22 = vmax.f32 %v24698_v50, %v11175_v16  ;;  %v11176_v14 = vmax.f32 %v16411_v36, %v16703_v31  ;;  %v10589_v30 = vpop.f32.mrb[223].mxu1  ;;  %v24721_v50 = vld [vmem:[#allocation349_spill] sm:$0xff] }
 0x4a5   : > { %v22151_v51 = vmax.f32 %v24701_v37, %v11173_v29  ;;  %v11174_v18 = vmax.f32 %v7964_v4, %v10589_v30  ;;  %17163 = vxpose.xlu0.b32.cont [13/16] (narrow) %v22066_v43, 32  ;;  %v22192_v37 = vld [vmem:[%s23116_s2] ss:$0 sm:$0xff] }
 0x4a6   : > { %v22157_v46 = vmax.f32 %v24704_v44, %v11176_v14  ;;  %v24722_v14 = vmax.f32 %v24720_v58, %v24721_v50  ;;  %v11749_v59 = vadd.f32 %v22192_v37, %v22119_v45  ;;  %v11752_v26 = vadd.f32 %v22192_v37, %v22130_v42 }
 0x4a7   : > { %v22162_v28 = vmax.f32 %v24707_v49, %v11174_v18  ;;  %v24723_v18 = vld [vmem:[#allocation350_spill] sm:$0xff]  ;;  %v24726_v49 = vld [vmem:[#allocation352_spill] sm:$0xff] }
 0x4a8   : > { %v24725_v20 = vmax.f32 %v24723_v18, %v24724_v55  ;;  %v11751_v18 = vadd.f32 %v22192_v37, %v22114_v38 }
 0x4a9   : > { %v16414_v34 = vpop.f32.mrb[224].mxu0  ;;  %v16706_v19 = vpop.f32.mrb[224].mxu1  ;;  %17165 = vxpose.xlu0.b32.cont [14/16] (narrow) %v22077_v13, 32 }
 0x4aa   : > { %v7977_v2 = vpop.f32.mrb[225].mxu0  ;;  %v11179_v60 = vmax.f32 %v16414_v34, %v16706_v19  ;;  %v10602_v27 = vpop.f32.mrb[225].mxu1  ;;  %v24727_v34 = vld [vmem:[#allocation353_spill] sm:$0xff] }
 0x4ab   : > { %v16415_v5 = vpop.f32.mrb[226].mxu0  ;;  %v11177_v6 = vmax.f32 %v7977_v2, %v10602_v27  ;;  %v16707_v43 = vpop.f32.mrb[226].mxu1  ;;  %v24728_v19 = vmax.f32 %v24726_v49, %v24727_v34  ;;  %v24729_v27 = vld [vmem:[#allocation354_spill] sm:$0xff]  ;;  %v12040_v49 = vmax.f32 %v11752_v26, 0.0 }
 0x4ac   : > { %v7980_v40 = vpop.f32.mrb[227].mxu0  ;;  %v22168_v1 = vmax.f32 %v24710_v62, %v11179_v60  ;;  %v11180_v3 = vmax.f32 %v16415_v5, %v16707_v43  ;;  %v10605_v63 = vpop.f32.mrb[227].mxu1  ;;  %v24730_v5 = vld [vmem:[#allocation355_spill] sm:$0xff] }
 0x4ad   : > { %v22173_v47 = vmax.f32 %v24713_v48, %v11177_v6  ;;  %v11178_v13 = vmax.f32 %v7980_v40, %v10605_v63  ;;  %17167 = vxpose.xlu0.b32.cont [15/16] (narrow) %v22098_v52, 32  ;;  %v24731_v6 = vmax.f32 %v24729_v27, %v24730_v5  ;;  %v12037_v63 = vmax.f32 %v11749_v59, 0.0 }
 0x4ae   : > { %v22179_v7 = vmax.f32 %v24716_v41, %v11180_v3 }
 0x4af   : > { %v22184_v54 = vmax.f32 %v24719_v15, %v11178_v13  ;;  %v24733_v15 = vld [vmem:[#allocation357_spill] sm:$0xff] }
 0x4b1   : > { %v16418_v8 = vpop.f32.mrb[228].mxu0  ;;  %v16710_v16 = vpop.f32.mrb[228].mxu1  ;;  %17169 = vxpose.xlu0.b32.end [16/16] (narrow) %v17168_v23, 32  ;;  %v11748_v23 = vadd.f32 %v22192_v37, %v22108_v57 }
 0x4b2   : > { %v7993_v24 = vpop.f32.mrb[229].mxu0  ;;  %v11183_v36 = vmax.f32 %v16418_v8, %v16710_v16  ;;  %v10618_v29 = vpop.f32.mrb[229].mxu1  ;;  %v24734_v8 = vmax.f32 %v24732_v10, %v24733_v15 }
 0x4b3   : > { %v16419_v31 = vpop.f32.mrb[230].mxu0  ;;  %v11181_v4 = vmax.f32 %v7993_v24, %v10618_v29  ;;  %v16711_v33 = vpop.f32.mrb[230].mxu1  ;;  %v12036_v17 = vmax.f32 %v11748_v23, 0.0 }
 0x4b4   : > { %v7996_v52 = vpop.f32.mrb[231].mxu0  ;;  %v11471_v30 = vmax.f32 %v24722_v14, %v11183_v36  ;;  %v11184_v25 = vmax.f32 %v16419_v31, %v16711_v33  ;;  %v10621_v11 = vpop.f32.mrb[231].mxu1  ;;  %v11750_v31 = vadd.f32 %v22192_v37, %v22103_v56  ;;  %v24736_v33 = vld [vmem:[#allocation359_spill] sm:$0xff]  ;;  %v11753_v14 = vadd.f32 %v22192_v37, %v22141_v61  ;;  %v24741_v56 = vld [vmem:[#allocation362_spill] sm:$0xff] }
 0x4b5   : > { %v22199_v44 = vmax.f32 %v24725_v20, %v11181_v4  ;;  %v11182_v21 = vmax.f32 %v7996_v52, %v10621_v11  ;;  %v24735_v4 = vld [vmem:[#allocation358_spill] sm:$0xff]  ;;  %v24742_v20 = vld [vmem:[#allocation363_spill] sm:$0xff] }
 0x4b6   : > { %v11472_v2 = vmax.f32 %v24728_v19, %v11184_v25  ;;  %v11766_v60 = vadd.f32 %v22192_v37, %v11471_v30  ;;  %v24737_v52 = vmax.f32 %v24735_v4, %v24736_v33  ;;  %v24738_v30 = vld [vmem:[#allocation360_spill] sm:$0xff]  ;;  %v24739_v25 = vld [vmem:[#allocation361_spill] sm:$0xff] }
 0x4b7   : > { %v22210_v43 = vmax.f32 %v24731_v6, %v11182_v21  ;;  %v24740_v11 = vmax.f32 %v24738_v30, %v24739_v25  ;;  %v24743_v21 = vmax.f32 %v24741_v56, %v24742_v20  ;;  %v11755_v30 = vadd.f32 %v22192_v37, %v22136_v53  ;;  %v24753_v25 = vld [vmem:[#allocation370_spill] sm:$0xff] }
 0x4b8   : > { %v11767_v57 = vadd.f32 %v22192_v37, %v11472_v2  ;;  %v12054_v12 = vmax.f32 %v11766_v60, 0.0  ;;  %v12038_v2 = vmax.f32 %v11750_v31, 0.0 }
 0x4b9   : > { %v16422_v40 = vpop.f32.mrb[232].mxu0  ;;  %v16714_v62 = vpop.f32.mrb[232].mxu1 }
 0x4ba   : > { %v8009_v3 = vpop.f32.mrb[233].mxu0  ;;  %v12055_v45 = vmax.f32 %v11767_v57, 0.0  ;;  %v11187_v39 = vmax.f32 %v16422_v40, %v16714_v62  ;;  %v10634_v9 = vpop.f32.mrb[233].mxu1  ;;  %v17214_v13 = vpack.i.bf16 %v12054_v12, %v12036_v17  ;;  %v12041_v57 = vmax.f32 %v11753_v14, 0.0 }
 0x4bb   : > { %v16423_v48 = vpop.f32.mrb[234].mxu0  ;;  %v11185_v35 = vmax.f32 %v8009_v3, %v10634_v9  ;;  %v16715_v0 = vpop.f32.mrb[234].mxu1  ;;  %v12039_v3 = vmax.f32 %v11751_v18, 0.0 }
 0x4bc   : > { %v8012_v41 = vpop.f32.mrb[235].mxu0  ;;  %v11475_v16 = vmax.f32 %v24734_v8, %v11187_v39  ;;  %v11188_v24 = vmax.f32 %v16423_v48, %v16715_v0  ;;  %v10637_v36 = vpop.f32.mrb[235].mxu1  ;;  %17215 = vxpose.xlu1.b32.start [1/16] (narrow) %v17214_v13, 32  ;;  %v17216_v29 = vpack.i.bf16 %v12055_v45, %v12037_v63  ;;  %v11756_v13 = vadd.f32 %v22192_v37, %v22151_v51  ;;  %v24745_v0 = vld [vmem:[#allocation365_spill] sm:$0xff] }
 0x4bd   : > { %v11473_v58 = vmax.f32 %v24737_v52, %v11185_v35  ;;  %v11186_v50 = vmax.f32 %v8012_v41, %v10637_v36  ;;  %v24744_v35 = vld [vmem:[#allocation364_spill] sm:$0xff]  ;;  %v24748_v36 = vld [vmem:[#allocation367_spill] sm:$0xff]  ;;  %v11757_v51 = vadd.f32 %v22192_v37, %v22162_v28 }
 0x4be   : > { %v11770_v42 = vadd.f32 %v22192_v37, %v11475_v16  ;;  %v11476_v23 = vmax.f32 %v24740_v11, %v11188_v24  ;;  %v24746_v41 = vmax.f32 %v24744_v35, %v24745_v0  ;;  %v11754_v16 = vadd.f32 %v22192_v37, %v22125_v32  ;;  %v24747_v24 = vld [vmem:[#allocation366_spill] sm:$0xff]  ;;  %v24754_v11 = vld [vmem:[#allocation371_spill] sm:$0xff] }
 0x4bf   : > { %v11768_v55 = vadd.f32 %v22192_v37, %v11473_v58  ;;  %v11474_v59 = vmax.f32 %v24743_v21, %v11186_v50  ;;  %v24750_v58 = vld [vmem:[#allocation368_spill] sm:$0xff]  ;;  %v24751_v50 = vld [vmem:[#allocation369_spill] sm:$0xff]  ;;  %v11758_v0 = vadd.f32 %v22192_v37, %v22146_v22 }
 0x4c0   : > { %v12058_v34 = vmax.f32 %v11770_v42, 0.0  ;;  %v11771_v19 = vadd.f32 %v22192_v37, %v11476_v23  ;;  %17217 = vxpose.xlu1.b32.cont [2/16] (narrow) %v17216_v29, 32  ;;  %v24749_v29 = vmax.f32 %v24747_v24, %v24748_v36  ;;  %v24752_v14 = vmax.f32 %v24750_v58, %v24751_v50  ;;  %v24766_v58 = vld [vmem:[#allocation379_spill] sm:$0xff] }
 0x4c1   : > { %v16426_v61 = vpop.f32.mrb[236].mxu0  ;;  %v12056_v60 = vmax.f32 %v11768_v55, 0.0  ;;  %v11769_v27 = vadd.f32 %v22192_v37, %v11474_v59  ;;  %v16718_v5 = vpop.f32.mrb[236].mxu1  ;;  %v24755_v23 = vmax.f32 %v24753_v25, %v24754_v11  ;;  %v12044_v55 = vmax.f32 %v11756_v13, 0.0 }
 0x4c2   : > { %v8025_v6 = vpop.f32.mrb[237].mxu0  ;;  %v12059_v38 = vmax.f32 %v11771_v19, 0.0  ;;  %v11191_v40 = vmax.f32 %v16426_v61, %v16718_v5  ;;  %v10650_v17 = vpop.f32.mrb[237].mxu1  ;;  %v17222_v62 = vpack.i.bf16 %v12058_v34, %v12040_v49  ;;  %v12042_v21 = vmax.f32 %v11754_v16, 0.0 }
 0x4c3   : > { %v16427_v12 = vpop.f32.mrb[238].mxu0  ;;  %v12057_v63 = vmax.f32 %v11769_v27, 0.0  ;;  %v11189_v45 = vmax.f32 %v8025_v6, %v10650_v17  ;;  %v16719_v39 = vpop.f32.mrb[238].mxu1  ;;  %v17218_v48 = vpack.i.bf16 %v12056_v60, %v12038_v2  ;;  %v12045_v61 = vmax.f32 %v11757_v51, 0.0 }
 0x4c4   : > { %v8028_v9 = vpop.f32.mrb[239].mxu0  ;;  %v11479_v26 = vmax.f32 %v24746_v41, %v11191_v40  ;;  %v11192_v10 = vmax.f32 %v16427_v12, %v16719_v39  ;;  %v10653_v15 = vpop.f32.mrb[239].mxu1  ;;  %v17224_v8 = vpack.i.bf16 %v12059_v38, %v12041_v57  ;;  %v12043_v6 = vmax.f32 %v11755_v30, 0.0  ;;  %v24759_v41 = vld [vmem:[#allocation374_spill] sm:$0xff] }
 0x4c5   : > { %v11477_v31 = vmax.f32 %v24749_v29, %v11189_v45  ;;  %v11190_v4 = vmax.f32 %v8028_v9, %v10653_v15  ;;  %17219 = vxpose.xlu1.b32.cont [3/16] (narrow) %v17218_v48, 32  ;;  %v17220_v33 = vpack.i.bf16 %v12057_v63, %v12039_v3  ;;  %v11760_v3 = vadd.f32 %v22192_v37, %v22173_v47  ;;  %v24756_v63 = vld [vmem:[#allocation372_spill] sm:$0xff]  ;;  %v24757_v45 = vld [vmem:[#allocation373_spill] sm:$0xff] }
 0x4c6   : > { %v11774_v52 = vadd.f32 %v22192_v37, %v11479_v26  ;;  %v11480_v42 = vmax.f32 %v24752_v14, %v11192_v10  ;;  %v24758_v39 = vmax.f32 %v24756_v63, %v24757_v45  ;;  %v24760_v26 = vld [vmem:[#allocation375_spill] sm:$0xff]  ;;  %v11761_v47 = vadd.f32 %v22192_v37, %v22184_v54  ;;  %v24762_v29 = vld [vmem:[#allocation376_spill] sm:$0xff] }
 0x4c7   : > { %v11772_v32 = vadd.f32 %v22192_v37, %v11477_v31  ;;  %v11478_v18 = vmax.f32 %v24755_v23, %v11190_v4  ;;  %v24761_v10 = vmax.f32 %v24759_v41, %v24760_v26  ;;  %v24763_v31 = vld [vmem:[#allocation377_spill] sm:$0xff]  ;;  %v11759_v51 = vadd.f32 %v22192_v37, %v22157_v46  ;;  %v24772_v63 = vld [vmem:[#allocation383_spill] sm:$0xff] }
 0x4c8   : > { %v12062_v56 = vmax.f32 %v11774_v52, 0.0  ;;  %v11775_v20 = vadd.f32 %v22192_v37, %v11480_v42  ;;  %v24764_v4 = vmax.f32 %v24762_v29, %v24763_v31  ;;  %v24765_v52 = vld [vmem:[#allocation378_spill] sm:$0xff]  ;;  %v24775_v41 = vld [vmem:[#allocation385_spill] sm:$0xff] }
 0x4c9   : > { %v16430_v28 = vpop.f32.mrb[240].mxu0  ;;  %v12060_v59 = vmax.f32 %v11772_v32, 0.0  ;;  %v11773_v49 = vadd.f32 %v22192_v37, %v11478_v18  ;;  %v16722_v34 = vpop.f32.mrb[240].mxu1  ;;  %17221 = vxpose.xlu1.b32.cont [4/16] (narrow) %v17220_v33, 32  ;;  %v24767_v50 = vmax.f32 %v24765_v52, %v24766_v58  ;;  %v12046_v32 = vmax.f32 %v11758_v0, 0.0  ;;  %v24774_v0 = vld [vmem:[#allocation384_spill] sm:$0xff] }
 0x4ca   : > { %v8041_v19 = vpop.f32.mrb[241].mxu0  ;;  %v12063_v53 = vmax.f32 %v11775_v20, 0.0  ;;  %v11195_v2 = vmax.f32 %v16430_v28, %v16722_v34  ;;  %v10666_v60 = vpop.f32.mrb[241].mxu1  ;;  %v22261_v5 = vpack.i.bf16 %v12062_v56, %v12044_v55  ;;  %v12049_v55 = vmax.f32 %v11761_v47, 0.0  ;;  %v24778_v47 = vld [vmem:[#allocation387_spill] sm:$0xff] }
 0x4cb   : > { %v16431_v27 = vpop.f32.mrb[242].mxu0  ;;  %v12061_v57 = vmax.f32 %v11773_v49, 0.0  ;;  %v11193_v38 = vmax.f32 %v8041_v19, %v10666_v60  ;;  %v16723_v40 = vpop.f32.mrb[242].mxu1  ;;  %v17226_v12 = vpack.i.bf16 %v12060_v59, %v12042_v21  ;;  %v12047_v59 = vmax.f32 %v11759_v51, 0.0  ;;  %v24769_v60 = vld [vmem:[#allocation381_spill] sm:$0xff] }
 0x4cc   : > { %v8044_v17 = vpop.f32.mrb[243].mxu0  ;;  %v11483_v9 = vmax.f32 %v24758_v39, %v11195_v2  ;;  %v11196_v48 = vmax.f32 %v16431_v27, %v16723_v40  ;;  %v10669_v13 = vpop.f32.mrb[243].mxu1  ;;  %v22268_v35 = vpack.i.bf16 %v12063_v53, %v12045_v61  ;;  %v24768_v2 = vld [vmem:[#allocation380_spill] sm:$0xff]  ;;  %v24776_v26 = vmax.f32 %v24774_v0, %v24775_v41 }
 0x4cd   : > { %v11481_v15 = vmax.f32 %v24761_v10, %v11193_v38  ;;  %v11194_v16 = vmax.f32 %v8044_v17, %v10669_v13  ;;  %17223 = vxpose.xlu1.b32.cont [5/16] (narrow) %v17222_v62, 32  ;;  %v17228_v24 = vpack.i.bf16 %v12061_v57, %v12043_v6  ;;  %v12048_v62 = vmax.f32 %v11760_v3, 0.0  ;;  %v24771_v3 = vld [vmem:[#allocation382_spill] sm:$0xff] }
 0x4ce   : > { %v11778_v36 = vadd.f32 %v22192_v37, %v11483_v9  ;;  %v11484_v33 = vmax.f32 %v24764_v4, %v11196_v48  ;;  %v24770_v27 = vmax.f32 %v24768_v2, %v24769_v60  ;;  %v11764_v38 = vadd.f32 %v22192_v37, %v22199_v44 }
 0x4cf   : > { %v11776_v22 = vadd.f32 %v22192_v37, %v11481_v15  ;;  %v11482_v14 = vmax.f32 %v24767_v50, %v11194_v16  ;;  %v11762_v17 = vadd.f32 %v22192_v37, %v22168_v1  ;;  %v24773_v45 = vmax.f32 %v24771_v3, %v24772_v63  ;;  %v24777_v16 = vld [vmem:[#allocation386_spill] sm:$0xff] }
 0x4d0   : > { %v12066_v42 = vmax.f32 %v11778_v36, 0.0  ;;  %v11779_v30 = vadd.f32 %v22192_v37, %v11484_v33  ;;  %v11765_v13 = vadd.f32 %v22192_v37, %v22210_v43  ;;  %v11763_v15 = vadd.f32 %v22192_v37, %v22179_v7 }
 0x4d1   : > { %v16434_v54 = vpop.f32.mrb[244].mxu0  ;;  %v12064_v25 = vmax.f32 %v11776_v22, 0.0  ;;  %v11777_v11 = vadd.f32 %v22192_v37, %v11482_v14  ;;  %v16726_v23 = vpop.f32.mrb[244].mxu1  ;;  %17225 = vxpose.xlu1.b32.cont [6/16] (narrow) %v17224_v8, 32  ;;  %v24779_v36 = vmax.f32 %v24777_v16, %v24778_v47  ;;  %v12052_v4 = vmax.f32 %v11764_v38, 0.0  ;;  %v24789_v38 = vld [vmem:[#allocation394_spill] sm:$0xff] }
 0x4d2   : > { %v8057_v18 = vpop.f32.mrb[245].mxu0  ;;  %v12067_v46 = vmax.f32 %v11779_v30, 0.0  ;;  %v11199_v56 = vmax.f32 %v16434_v54, %v16726_v23  ;;  %v10682_v20 = vpop.f32.mrb[245].mxu1  ;;  %v22289_v21 = vpack.i.bf16 %v12066_v42, %v12048_v62  ;;  %v12050_v33 = vmax.f32 %v11762_v17, 0.0  ;;  %v24790_v17 = vld [vmem:[#allocation395_spill] sm:$0xff] }
 0x4d3   : > { %v16435_v28 = vpop.f32.mrb[246].mxu0  ;;  %v12065_v49 = vmax.f32 %v11777_v11, 0.0  ;;  %v11197_v34 = vmax.f32 %v8057_v18, %v10682_v20  ;;  %v16727_v19 = vpop.f32.mrb[246].mxu1  ;;  %v22291_v53 = vpack.i.bf16 %v12064_v25, %v12046_v32  ;;  %v12053_v50 = vmax.f32 %v11765_v13, 0.0 }
 0x4d4   : > { %v8060_v61 = vpop.f32.mrb[247].mxu0  ;;  %v11487_v6 = vmax.f32 %v24770_v27, %v11199_v56  ;;  %v11200_v8 = vmax.f32 %v16435_v28, %v16727_v19  ;;  %v10685_v57 = vpop.f32.mrb[247].mxu1  ;;  %v22298_v40 = vpack.i.bf16 %v12067_v46, %v12049_v55  ;;  %v12051_v54 = vmax.f32 %v11763_v15, 0.0  ;;  %v24780_v55 = vld [vmem:[#allocation388_spill] sm:$0xff]  ;;  %v24781_v46 = vld [vmem:[#allocation389_spill] sm:$0xff] }
 0x4d5   : > { %v11485_v39 = vmax.f32 %v24773_v45, %v11197_v34  ;;  %v11198_v9 = vmax.f32 %v8060_v61, %v10685_v57  ;;  %17227 = vxpose.xlu1.b32.cont [7/16] (narrow) %v17226_v12, 32  ;;  %v17236_v48 = vpack.i.bf16 %v12065_v49, %v12047_v59  ;;  %v24782_v56 = vmax.f32 %v24780_v55, %v24781_v46  ;;  %v24783_v49 = vld [vmem:[#allocation390_spill] sm:$0xff]  ;;  %v24784_v34 = vld [vmem:[#allocation391_spill] sm:$0xff]  ;;  %v24786_v27 = vld [vmem:[#allocation392_spill] sm:$0xff] }
 0x4d6   : > { %v11488_v10 = vmax.f32 %v24776_v26, %v11200_v8  ;;  %v11782_v44 = vadd.f32 %v22192_v37, %v11487_v6  ;;  %v24785_v19 = vmax.f32 %v24783_v49, %v24784_v34  ;;  %v24787_v6 = vld [vmem:[#allocation393_spill] sm:$0xff]  ;;  %v24791_v3 = vmax.f32 %v24789_v38, %v24790_v17  ;;  %v24804_v55 = vld [vmem:[#allocation404_spill] sm:$0xff]  ;;  %v24808_v49 = vld [vmem:[#allocation407_spill] sm:$0xff] }
 0x4d7   : > { %v11780_v1 = vadd.f32 %v22192_v37, %v11485_v39  ;;  %v11486_v29 = vmax.f32 %v24779_v36, %v11198_v9  ;;  %v24788_v8 = vmax.f32 %v24786_v27, %v24787_v6  ;;  %v24793_v15 = vld [vmem:[#allocation397_spill] sm:$0xff]  ;;  %v24810_v27 = vld [vmem:[#allocation408_spill] sm:$0xff]  ;;  %v24813_v17 = vld [vmem:[#allocation410_spill] sm:$0xff] }
 0x4d8   : > { %v11783_v12 = vadd.f32 %v22192_v37, %v11488_v10  ;;  %v12070_v43 = vmax.f32 %v11782_v44, 0.0  ;;  %v24792_v44 = vld [vmem:[#allocation396_spill] sm:$0xff]  ;;  %v24811_v6 = vld [vmem:[#allocation409_spill] sm:$0xff] }
 0x4d9   : > { %v16438_v31 = vpop.f32.mrb[248].mxu0  ;;  %v12068_v51 = vmax.f32 %v11780_v1, 0.0  ;;  %v11781_v22 = vadd.f32 %v22192_v37, %v11486_v29  ;;  %v16730_v52 = vpop.f32.mrb[248].mxu1  ;;  %17229 = vxpose.xlu1.b32.cont [8/16] (narrow) %v17228_v24, 32  ;;  %v24794_v1 = vmax.f32 %v24792_v44, %v24793_v15  ;;  %v24795_v29 = vld [vmem:[#allocation398_spill] sm:$0xff] }
 0x4da   : > { %v8073_v58 = vpop.f32.mrb[249].mxu0  ;;  %v12071_v7 = vmax.f32 %v11783_v12, 0.0  ;;  %v11203_v14 = vmax.f32 %v16438_v31, %v16730_v52  ;;  %v10698_v62 = vpop.f32.mrb[249].mxu1  ;;  %v17190_v30 = vpack.i.bf16 %v12070_v43, %v12052_v4  ;;  %v24796_v12 = vld [vmem:[#allocation399_spill] sm:$0xff]  ;;  %v24801_v52 = vld [vmem:[#allocation402_spill] sm:$0xff] }
 0x4db   : > { %v16439_v42 = vpop.f32.mrb[250].mxu0  ;;  %v12069_v32 = vmax.f32 %v11781_v22, 0.0  ;;  %v11201_v25 = vmax.f32 %v8073_v58, %v10698_v62  ;;  %v16731_v11 = vpop.f32.mrb[250].mxu1  ;;  %v22319_v18 = vpack.i.bf16 %v12068_v51, %v12050_v33  ;;  %v24797_v31 = vmax.f32 %v24795_v29, %v24796_v12  ;;  %v24799_v33 = vld [vmem:[#allocation401_spill] sm:$0xff]  ;;  %v24802_v58 = vld [vmem:[#allocation403_spill] sm:$0xff]  ;;  %v24816_v29 = vld [vmem:[#allocation412_spill] sm:$0xff] }
 0x4dc   : > { %v8076_v23 = vpop.f32.mrb[251].mxu0  ;;  %v11491_v20 = vmax.f32 %v24782_v56, %v11203_v14  ;;  %v11204_v28 = vmax.f32 %v16439_v42, %v16731_v11  ;;  %v10701_v24 = vpop.f32.mrb[251].mxu1  ;;  %17191 = vxpose.xlu0.b32.start [1/2] (short) (narrow) %v17190_v30, 32  ;;  %v17192_v59 = vpack.i.bf16 %v12071_v7, %v12053_v50  ;;  %v24803_v50 = vmax.f32 %v24801_v52, %v24802_v58  ;;  %v24817_v12 = vld [vmem:[#allocation413_spill] sm:$0xff]  ;;  %v24820_v52 = vld [vmem:[#allocation415_spill] sm:$0xff] }
 0x4dd   : > { %v11489_v61 = vmax.f32 %v24785_v19, %v11201_v25  ;;  %v11202_v2 = vmax.f32 %v8076_v23, %v10701_v24  ;;  %17231 = vxpose.xlu1.b32.cont [9/16] (narrow) %v22261_v5, 32  ;;  %v22328_v60 = vpack.i.bf16 %v12069_v32, %v12051_v54 }
 0x4de   : > { %v11492_v57 = vmax.f32 %v24788_v8, %v11204_v28  ;;  %v24812_v8 = vmax.f32 %v24810_v27, %v24811_v6 }
 0x4df   : > { %v11490_v63 = vmax.f32 %v24791_v3, %v11202_v2  ;;  %v24814_v3 = vld [vmem:[#allocation411_spill] sm:$0xff] }
 0x4e0   : > { %17193 = vxpose.xlu0.b32.end [2/2] (short) (narrow) %v17192_v59, 32  ;;  %v24807_v59 = vld [vmem:[#allocation406_spill] sm:$0xff] }
 0x4e1   : > { %v16442_v45 = vpop.f32.mrb[252].mxu0  ;;  %v16734_v39 = vpop.f32.mrb[252].mxu1  ;;  %17233 = vxpose.xlu1.b32.cont [10/16] (narrow) %v22268_v35, 32  ;;  %v24798_v35 = vld [vmem:[#allocation400_spill] sm:$0xff]  ;;  %v24809_v34 = vmax.f32 %v24807_v59, %v24808_v49 }
 0x4e2   : > { %v8089_v9 = vpop.f32.mrb[253].mxu0  ;;  %v11207_v13 = vmax.f32 %v16442_v45, %v16734_v39  ;;  %v10714_v0 = vpop.f32.mrb[253].mxu1  ;;  %v24800_v51 = vmax.f32 %v24798_v35, %v24799_v33  ;;  %v24815_v45 = vmax.f32 %v24813_v17, %v24814_v3 }
 0x4e3   : > { %v16443_v41 = vpop.f32.mrb[254].mxu0  ;;  %v11205_v5 = vmax.f32 %v8089_v9, %v10714_v0  ;;  %v16735_v26 = vpop.f32.mrb[254].mxu1  ;;  %v22367_v9 = vadd.f32 %v22192_v37, %v11489_v61 }
 0x4e4   : > { %v8092_v10 = vpop.f32.mrb[255].mxu0  ;;  %v11495_v16 = vmax.f32 %v24794_v1, %v11207_v13  ;;  %v11208_v47 = vmax.f32 %v16443_v41, %v16735_v26  ;;  %v10717_v36 = vpop.f32.mrb[255].mxu1 }
 0x4e5   : > { %v11493_v4 = vmax.f32 %v24797_v31, %v11205_v5  ;;  %v11206_v43 = vmax.f32 %v8092_v10, %v10717_v36  ;;  %17235 = vxpose.xlu1.b32.cont [11/16] (narrow) %v22291_v53, 32  ;;  %v24805_v53 = vld [vmem:[#allocation405_spill] sm:$0xff]  ;;  %v22375_v5 = vadd.f32 %v22192_v37, %v11490_v63  ;;  %v12072_v36 = vmax.f32 %v22367_v9, 0.0 }
 0x4e6   : > { %v11496_v22 = vmax.f32 %v24800_v51, %v11208_v47  ;;  %v24806_v46 = vmax.f32 %v24804_v55, %v24805_v53  ;;  %v22378_v15 = vadd.f32 %v22192_v37, %v11495_v16  ;;  %v24818_v31 = vmax.f32 %v24816_v29, %v24817_v12  ;;  %v24819_v51 = vld [vmem:[#allocation414_spill] sm:$0xff]  ;;  %v24826_v55 = vld [vmem:[#allocation419_spill] sm:$0xff] }
 0x4e7   : > { %v11494_v7 = vmax.f32 %v24803_v50, %v11206_v43  ;;  %v22381_v61 = vadd.f32 %v22192_v37, %v11493_v4  ;;  %v24821_v58 = vmax.f32 %v24819_v51, %v24820_v52 }
 0x4e9   : > { %v16446_v14 = vpop.f32.mrb[0].mxu0  ;;  %v16738_v62 = vpop.f32.mrb[0].mxu1  ;;  %17237 = vxpose.xlu1.b32.cont [12/16] (narrow) %v17236_v48, 32  ;;  %v22358_v48 = vadd.f32 %v22192_v37, %v11491_v20  ;;  %v22372_v20 = vadd.f32 %v22192_v37, %v11492_v57  ;;  %v22385_v57 = vadd.f32 %v22192_v37, %v11496_v22  ;;  %v22388_v63 = vadd.f32 %v22192_v37, %v11494_v7 }
 0x4ea   : > { %v8105_v42 = vpop.f32.mrb[1].mxu0  ;;  %v11211_v30 = vmax.f32 %v16446_v14, %v16738_v62  ;;  %v10730_v54 = vpop.f32.mrb[1].mxu1 }
 0x4eb   : > { %v16447_v32 = vpop.f32.mrb[2].mxu0  ;;  %v11209_v25 = vmax.f32 %v8105_v42, %v10730_v54  ;;  %v16739_v11 = vpop.f32.mrb[2].mxu1  ;;  %v24822_v42 = vld [vmem:[#allocation416_spill] sm:$0xff] }
 0x4ec   : > { %v8108_v23 = vpop.f32.mrb[3].mxu0  ;;  %v11499_v56 = vmax.f32 %v24806_v46, %v11211_v30  ;;  %v11212_v28 = vmax.f32 %v16447_v32, %v16739_v11  ;;  %v10733_v24 = vpop.f32.mrb[3].mxu1  ;;  %v24823_v30 = vld [vmem:[#allocation417_spill] sm:$0xff]  ;;  %v12073_v11 = vmax.f32 %v22375_v5, 0.0 }
 0x4ed   : > { %v11497_v19 = vmax.f32 %v24809_v34, %v11209_v25  ;;  %v11210_v2 = vmax.f32 %v8108_v23, %v10733_v24  ;;  %17239 = vxpose.xlu1.b32.cont [13/16] (narrow) %v22289_v21, 32  ;;  %v12074_v21 = vmax.f32 %v22358_v48, 0.0  ;;  %v24824_v54 = vmax.f32 %v24822_v42, %v24823_v30  ;;  %v24834_v42 = vld [vmem:[#allocation424_spill] sm:$0xff]  ;;  %v24835_v30 = vld [vmem:[#allocation425_spill] sm:$0xff] }
 0x4ee   : > { %v11500_v38 = vmax.f32 %v24812_v8, %v11212_v28  ;;  %v22394_v4 = vadd.f32 %v22192_v37, %v11499_v56  ;;  %v12075_v25 = vmax.f32 %v22372_v20, 0.0  ;;  %v12078_v56 = vmax.f32 %v22378_v15, 0.0 }
 0x4ef   : > { %v11498_v39 = vmax.f32 %v24815_v45, %v11210_v2  ;;  %v22397_v33 = vadd.f32 %v22192_v37, %v11497_v19  ;;  %v12076_v28 = vmax.f32 %v22381_v61, 0.0  ;;  %v12079_v24 = vmax.f32 %v22385_v57, 0.0 }
 0x4f0   : > { %v22404_v7 = vadd.f32 %v22192_v37, %v11500_v38  ;;  %v12077_v34 = vmax.f32 %v22388_v63, 0.0  ;;  %v12082_v19 = vmax.f32 %v22394_v4, 0.0  ;;  %v24881_v4 = vld [vmem:[#allocation454_spill] sm:$0xff] }
 0x4f1   : > { %v16450_v13 = vpop.f32.mrb[4].mxu0  ;;  %v16742_v0 = vpop.f32.mrb[4].mxu1  ;;  %17241 = vxpose.xlu1.b32.cont [14/16] (narrow) %v22298_v40, 32  ;;  %v22407_v14 = vadd.f32 %v22192_v37, %v11498_v39  ;;  %v12080_v2 = vmax.f32 %v22397_v33, 0.0 }
 0x4f2   : > { %v8121_v41 = vpop.f32.mrb[5].mxu0  ;;  %v11215_v26 = vmax.f32 %v16450_v13, %v16742_v0  ;;  %v10746_v10 = vpop.f32.mrb[5].mxu1  ;;  %v12083_v38 = vmax.f32 %v22404_v7, 0.0 }
 0x4f3   : > { %v16451_v44 = vpop.f32.mrb[6].mxu0  ;;  %v11213_v1 = vmax.f32 %v8121_v41, %v10746_v10  ;;  %v16743_v40 = vpop.f32.mrb[6].mxu1  ;;  %v12081_v17 = vmax.f32 %v22407_v14, 0.0 }
 0x4f4   : > { %v8124_v47 = vpop.f32.mrb[7].mxu0  ;;  %v11503_v43 = vmax.f32 %v24818_v31, %v11215_v26  ;;  %v11216_v16 = vmax.f32 %v16451_v44, %v16743_v40  ;;  %v10749_v35 = vpop.f32.mrb[7].mxu1  ;;  %v24829_v40 = vld [vmem:[#allocation421_spill] sm:$0xff] }
 0x4f5   : > { %v11501_v22 = vmax.f32 %v24821_v58, %v11213_v1  ;;  %v11214_v50 = vmax.f32 %v8124_v47, %v10749_v35  ;;  %17243 = vxpose.xlu1.b32.cont [15/16] (narrow) %v22319_v18, 32  ;;  %v24825_v18 = vld [vmem:[#allocation418_spill] sm:$0xff]  ;;  %v24828_v1 = vld [vmem:[#allocation420_spill] sm:$0xff]  ;;  %v24832_v35 = vld [vmem:[#allocation423_spill] sm:$0xff] }
 0x4f6   : > { %v22410_v62 = vadd.f32 %v22192_v37, %v11503_v43  ;;  %v11504_v32 = vmax.f32 %v24824_v54, %v11216_v16  ;;  %v24827_v53 = vmax.f32 %v24825_v18, %v24826_v55  ;;  %v24830_v47 = vmax.f32 %v24828_v1, %v24829_v40  ;;  %v16814_v43 = vpop.trf.xlu1  ;;  %v24831_v16 = vld [vmem:[#allocation422_spill] sm:$0xff] }
 0x4f7   : > { %v22418_v23 = vadd.f32 %v22192_v37, %v11501_v22  ;;  %v24833_v51 = vmax.f32 %v24831_v16, %v24832_v35  ;;  %v16818_v22 = vunpack.i.h.bf16 %v16814_v43  ;;  %v24836_v54 = vmax.f32 %v24834_v42, %v24835_v30 }
 0x4f8   : > { %v11502_v46 = vmax.f32 %v24827_v53, %v11214_v50  ;;  %v22427_v59 = vadd.f32 %v22192_v37, %v11504_v32  ;;  %v12086_v3 = vmax.f32 %v22410_v62, 0.0  ;;  %v16866_v50 = vpop.trf.xlu0  ;;  %v16815_v55 = vunpack.i.l.bf16 %v16814_v43  ;;  %v24837_v53 = vld [vmem:[#allocation426_spill] sm:$0xff] }
 0x4f9   : > { %v16454_v49 = vpop.f32.mrb[8].mxu0  ;;  %v16746_v6 = vpop.f32.mrb[8].mxu1  ;;  %17245 = vxpose.xlu1.b32.end [16/16] (narrow) %v22328_v60, 32  ;;  %v12084_v0 = vmax.f32 %v22418_v23, 0.0  ;;  %v24893_v62 = vld [vmem:[#allocation462_spill] sm:$0xff] }
 0x4fa   : > { %v22433_v27 = vadd.f32 %v22192_v37, %v11502_v46  ;;  %v8137_v8 = vpop.f32.mrb[9].mxu0  ;;  %v11219_v45 = vmax.f32 %v16454_v49, %v16746_v6  ;;  %v10762_v39 = vpop.f32.mrb[9].mxu1  ;;  %v12087_v41 = vmax.f32 %v22427_v59, 0.0  ;;  %v24838_v46 = vld [vmem:[#allocation427_spill] sm:$0xff] }
 0x4fb   : > { %v16455_v13 = vpop.f32.mrb[10].mxu0  ;;  %v11217_v26 = vmax.f32 %v8137_v8, %v10762_v39  ;;  %v16747_v10 = vpop.f32.mrb[10].mxu1  ;;  %v24839_v49 = vmax.f32 %v24837_v53, %v24838_v46 }
 0x4fc   : > { %v8140_v44 = vpop.f32.mrb[11].mxu0  ;;  %v12085_v60 = vmax.f32 %v22433_v27, 0.0  ;;  %v11507_v29 = vmax.f32 %v24830_v47, %v11219_v45  ;;  %v11220_v12 = vmax.f32 %v16455_v13, %v16747_v10  ;;  %v10765_v31 = vpop.f32.mrb[11].mxu1  ;;  %v16870_v45 = vunpack.i.h.bf16 %v16866_v50  ;;  %v24884_v27 = vld [vmem:[#allocation456_spill] sm:$0xff] }
 0x4fd   : > { %v11505_v52 = vmax.f32 %v24833_v51, %v11217_v26  ;;  %v11218_v58 = vmax.f32 %v8140_v44, %v10765_v31  ;;  %v16867_v44 = vunpack.i.l.bf16 %v16866_v50  ;;  %v16819_v1 = vpop.trf.xlu1 }
 0x4fe   : > { %v11508_v32 = vmax.f32 %v24836_v54, %v11220_v12  ;;  %v11802_v18 = vadd.f32 %v22192_v37, %v11507_v29  ;;  %v14988_v31 = vpack.c.bf16 %v16818_v22, %v16870_v45  ;;  %v16823_v43 = vunpack.i.h.bf16 %v16819_v1  ;;  %v24843_v22 = vld [vmem:[#allocation429_spill] sm:$0xff]  ;;  %v24845_v45 = vld [vmem:[#allocation430_spill] sm:$0xff] }
 0x4ff   : > { %v11506_v6 = vmax.f32 %v24839_v49, %v11218_v58  ;;  %v22457_v8 = vadd.f32 %v22192_v37, %v11505_v52  ;;  %v14984_v50 = vpack.c.bf16 %v16815_v55, %v16867_v44  ;;  %v16871_v55 = vpop.trf.xlu0 }
 0x500   : > { %v11803_v39 = vadd.f32 %v22192_v37, %v11508_v32  ;;  %v12090_v26 = vmax.f32 %v11802_v18, 0.0  ;;  %14865 = vst.msk [vmem:[%s22463_s7 + $0x20] sm:$0xff] %vm22467_vm3, %v14988_v31  ;;  %v24842_v18 = vld [vmem:[#allocation428_spill] sm:$0xff]  ;;  %v16872_v5 = vunpack.i.l.bf16 %v16871_v55 }
 0x501   : > { %v16458_v13 = vpop.f32.mrb[12].mxu0  ;;  %v22472_v40 = vadd.f32 %v22192_v37, %v11506_v6  ;;  %v16750_v47 = vpop.f32.mrb[12].mxu1  ;;  %v12088_v12 = vmax.f32 %v22457_v8, 0.0  ;;  %v24844_v53 = vmax.f32 %v24842_v18, %v24843_v22  ;;  %12235 = vst.msk [vmem:[%s22463_s7] sm:$0xff] %vm22467_vm3, %v14984_v50 }
 0x502   : > { %v8153_v29 = vpop.f32.mrb[13].mxu0  ;;  %v12091_v16 = vmax.f32 %v11803_v39, 0.0  ;;  %v11223_v35 = vmax.f32 %v16458_v13, %v16750_v47  ;;  %v10778_v51 = vpop.f32.mrb[13].mxu1  ;;  %v17290_v58 = vpack.i.bf16 %v12090_v26, %v12072_v36  ;;  %v16820_v36 = vunpack.i.l.bf16 %v16819_v1  ;;  %v24846_v39 = vld [vmem:[#allocation431_spill] sm:$0xff] }
 0x503   : > { %v16459_v52 = vpop.f32.mrb[14].mxu0  ;;  %v12089_v42 = vmax.f32 %v22472_v40, 0.0  ;;  %v11221_v30 = vmax.f32 %v8153_v29, %v10778_v51  ;;  %v16751_v54 = vpop.f32.mrb[14].mxu1  ;;  %v24847_v13 = vmax.f32 %v24845_v45, %v24846_v39  ;;  %v16875_v47 = vunpack.i.h.bf16 %v16871_v55  ;;  %v24849_v51 = vld [vmem:[#allocation433_spill] sm:$0xff]  ;;  %v24852_v1 = vld [vmem:[#allocation435_spill] sm:$0xff] }
 0x504   : > { %v8156_v32 = vpop.f32.mrb[15].mxu0  ;;  %v11511_v46 = vmax.f32 %v24844_v53, %v11223_v35  ;;  %v11224_v49 = vmax.f32 %v16459_v52, %v16751_v54  ;;  %v10781_v6 = vpop.f32.mrb[15].mxu1  ;;  %17291 = vxpose.xlu0.b32.start [1/16] (narrow) %v17290_v58, 32  ;;  %v17292_v9 = vpack.i.bf16 %v12091_v16, %v12073_v11  ;;  %v24848_v35 = vld [vmem:[#allocation432_spill] sm:$0xff]  ;;  %v24851_v16 = vld [vmem:[#allocation434_spill] sm:$0xff] }
 0x505   : > { %v11509_v26 = vmax.f32 %v24847_v13, %v11221_v30  ;;  %v11222_v44 = vmax.f32 %v8156_v32, %v10781_v6  ;;  %v16824_v29 = vpop.trf.xlu1  ;;  %v24850_v52 = vmax.f32 %v24848_v35, %v24849_v51  ;;  %v24853_v50 = vmax.f32 %v24851_v16, %v24852_v1  ;;  %v16876_v6 = vpop.trf.xlu0  ;;  %v22647_v40 = vld [vmem:[%s23116_s2] ss:$0 sm:$0xff] }
 0x506   : > { %v11806_v31 = vadd.f32 %v22192_v37, %v11511_v46  ;;  %v14989_v18 = vpack.c.bf16 %v16823_v43, %v16875_v47  ;;  %v16828_v22 = vunpack.i.h.bf16 %v16824_v29  ;;  %v14985_v46 = vpack.c.bf16 %v16820_v36, %v16872_v5  ;;  %v24855_v5 = vld [vmem:[#allocation437_spill] sm:$0xff] }
 0x507   : > { %v11512_v58 = vmax.f32 %v24850_v52, %v11224_v49  ;;  %v11804_v11 = vadd.f32 %v22192_v37, %v11509_v26  ;;  %v11510_v54 = vmax.f32 %v24853_v50, %v11222_v44  ;;  %v16825_v13 = vunpack.i.l.bf16 %v16824_v29  ;;  %v24854_v29 = vld [vmem:[#allocation436_spill] sm:$0xff] }
 0x508   : > { %v12094_v30 = vmax.f32 %v11806_v31, 0.0  ;;  %17293 = vxpose.xlu0.b32.cont [2/16] (narrow) %v17292_v9, 32  ;;  %14866 = vst.msk [vmem:[%s22463_s7 + $0x28] sm:$0xff] %vm22467_vm3, %v14989_v18  ;;  %12236 = vst.msk [vmem:[%s22463_s7 + $0x8] sm:$0xff] %vm22467_vm3, %v14985_v46  ;;  %v16880_v9 = vunpack.i.h.bf16 %v16876_v6  ;;  %v24857_v18 = vld [vmem:[#allocation438_spill] sm:$0xff]  ;;  %v16877_v63 = vunpack.i.l.bf16 %v16876_v6 }
 0x509   : > { %v11807_v32 = vadd.f32 %v22192_v37, %v11512_v58  ;;  %v16462_v53 = vpop.f32.mrb[16].mxu0  ;;  %v12092_v45 = vmax.f32 %v11804_v11, 0.0  ;;  %v11805_v49 = vadd.f32 %v22192_v37, %v11510_v54  ;;  %v16754_v55 = vpop.f32.mrb[16].mxu1  ;;  %v24856_v11 = vmax.f32 %v24854_v29, %v24855_v5 }
 0x50a   : > { %v8169_v39 = vpop.f32.mrb[17].mxu0  ;;  %v11227_v43 = vmax.f32 %v16462_v53, %v16754_v55  ;;  %v10794_v44 = vpop.f32.mrb[17].mxu1  ;;  %v17298_v31 = vpack.i.bf16 %v12094_v30, %v12076_v28  ;;  %v14990_v28 = vpack.c.bf16 %v16828_v22, %v16880_v9  ;;  %v24858_v30 = vld [vmem:[#allocation439_spill] sm:$0xff] }
 0x50b   : > { %v12095_v26 = vmax.f32 %v11807_v32, 0.0  ;;  %v16463_v47 = vpop.f32.mrb[18].mxu0  ;;  %v12093_v36 = vmax.f32 %v11805_v49, 0.0  ;;  %v11225_v35 = vmax.f32 %v8169_v39, %v10794_v44  ;;  %v16755_v51 = vpop.f32.mrb[18].mxu1  ;;  %v17294_v58 = vpack.i.bf16 %v12092_v45, %v12074_v21  ;;  %v24860_v45 = vld [vmem:[#allocation440_spill] sm:$0xff]  ;;  %v24861_v49 = vld [vmem:[#allocation441_spill] sm:$0xff] }
 0x50c   : > { %v8172_v52 = vpop.f32.mrb[19].mxu0  ;;  %v11515_v16 = vmax.f32 %v24856_v11, %v11227_v43  ;;  %v11228_v1 = vmax.f32 %v16463_v47, %v16755_v51  ;;  %v10797_v50 = vpop.f32.mrb[19].mxu1  ;;  %v24859_v32 = vmax.f32 %v24857_v18, %v24858_v30  ;;  %v24862_v55 = vmax.f32 %v24860_v45, %v24861_v49  ;;  %14867 = vst.msk [vmem:[%s22463_s7 + $0x30] sm:$0xff] %vm22467_vm3, %v14990_v28  ;;  %v24863_v43 = vld [vmem:[#allocation442_spill] sm:$0xff]  ;;  %v24864_v44 = vld [vmem:[#allocation443_spill] sm:$0xff] }
 0x50d   : > { %v22517_v61 = vpack.i.bf16 %v12095_v26, %v12077_v34  ;;  %v16829_v54 = vpop.trf.xlu1  ;;  %v11226_v46 = vmax.f32 %v8172_v52, %v10797_v50  ;;  %17295 = vxpose.xlu0.b32.cont [3/16] (narrow) %v17294_v58, 32  ;;  %v17296_v48 = vpack.i.bf16 %v12093_v36, %v12075_v25  ;;  %v16881_v22 = vpop.trf.xlu0  ;;  %v24865_v47 = vmax.f32 %v24863_v43, %v24864_v44  ;;  %v24870_v43 = vld [vmem:[#allocation447_spill] sm:$0xff] }
 0x50e   : > { %v11513_v53 = vmax.f32 %v24859_v32, %v11225_v35  ;;  %v11810_v21 = vadd.f32 %v22192_v37, %v11515_v16  ;;  %v11516_v39 = vmax.f32 %v24862_v55, %v11228_v1  ;;  %v16833_v34 = vunpack.i.h.bf16 %v16829_v54 }
 0x50f   : > { %v11514_v9 = vmax.f32 %v24865_v47, %v11226_v46  ;;  %v14986_v35 = vpack.c.bf16 %v16825_v13, %v16877_v63  ;;  %v16830_v51 = vunpack.i.l.bf16 %v16829_v54  ;;  %v16885_v11 = vunpack.i.h.bf16 %v16881_v22 }
 0x510   : > { %v11808_v26 = vadd.f32 %v22192_v37, %v11513_v53  ;;  %v12098_v20 = vmax.f32 %v11810_v21, 0.0  ;;  %v11811_v25 = vadd.f32 %v22192_v37, %v11516_v39  ;;  %v24867_v21 = vld [vmem:[#allocation445_spill] sm:$0xff]  ;;  %v16882_v39 = vunpack.i.l.bf16 %v16881_v22 }
 0x511   : > { %v16466_v36 = vpop.f32.mrb[20].mxu0  ;;  %v16942_v52 = vpop.trf.xlu1  ;;  %v11809_v29 = vadd.f32 %v22192_v37, %v11514_v9  ;;  %17297 = vxpose.xlu0.b32.cont [4/16] (narrow) %v17296_v48, 32  ;;  %12237 = vst.msk [vmem:[%s22463_s7 + $0x10] sm:$0xff] %vm22467_vm3, %v14986_v35  ;;  %v14991_v46 = vpack.c.bf16 %v16833_v34, %v16885_v11  ;;  %v24866_v48 = vld [vmem:[#allocation444_spill] sm:$0xff]  ;;  %v24873_v9 = vld [vmem:[#allocation449_spill] sm:$0xff]  ;;  %v24875_v35 = vld [vmem:[#allocation450_spill] sm:$0xff] }
 0x512   : > { %v12096_v58 = vmax.f32 %v11808_v26, 0.0  ;;  %v16758_v6 = vpop.f32.mrb[20].mxu1  ;;  %v8185_v5 = vpop.f32.mrb[21].mxu0  ;;  %v12099_v16 = vmax.f32 %v11811_v25, 0.0  ;;  %v22539_v18 = vpack.i.bf16 %v12098_v20, %v12080_v2  ;;  %v24868_v45 = vmax.f32 %v24866_v48, %v24867_v21  ;;  %v24869_v26 = vld [vmem:[#allocation446_spill] sm:$0xff] }
 0x513   : > { %v11231_v1 = vmax.f32 %v16466_v36, %v16758_v6  ;;  %v10810_v50 = vpop.f32.mrb[21].mxu1  ;;  %v16467_v28 = vpop.f32.mrb[22].mxu0  ;;  %v12097_v13 = vmax.f32 %v11809_v29, 0.0  ;;  %v24871_v44 = vmax.f32 %v24869_v26, %v24870_v43  ;;  %14868 = vst.msk [vmem:[%s22463_s7 + $0x38] sm:$0xff] %vm22467_vm3, %v14991_v46  ;;  %v14987_v25 = vpack.c.bf16 %v16830_v51, %v16882_v39  ;;  %v24879_v26 = vld [vmem:[#allocation453_spill] sm:$0xff] }
 0x514   : > { %v11229_v54 = vmax.f32 %v8185_v5, %v10810_v50  ;;  %v16759_v30 = vpop.f32.mrb[22].mxu1  ;;  %v8188_v32 = vpop.f32.mrb[23].mxu0  ;;  %v17302_v53 = vpack.i.bf16 %v12096_v58, %v12078_v56  ;;  %v22551_v2 = vpack.i.bf16 %v12099_v16, %v12081_v17  ;;  %v24872_v17 = vld [vmem:[#allocation448_spill] sm:$0xff]  ;;  %v24876_v58 = vld [vmem:[#allocation451_spill] sm:$0xff]  ;;  %v16946_v16 = vunpack.i.h.bf16 %v16942_v52 }
 0x515   : > { %v11519_v49 = vmax.f32 %v24868_v45, %v11231_v1  ;;  %v11232_v55 = vmax.f32 %v16467_v28, %v16759_v30  ;;  %v10813_v33 = vpop.f32.mrb[23].mxu1  ;;  %v16890_v63 = vpop.trf.xlu0  ;;  %17299 = vxpose.xlu0.b32.cont [5/16] (narrow) %v17298_v31, 32  ;;  %v17304_v56 = vpack.i.bf16 %v12097_v13, %v12079_v24  ;;  %v24874_v22 = vmax.f32 %v24872_v17, %v24873_v9 }
 0x516   : > { %v11517_v47 = vmax.f32 %v24871_v44, %v11229_v54  ;;  %v11230_v15 = vmax.f32 %v8188_v32, %v10813_v33  ;;  %v16894_v34 = vunpack.i.h.bf16 %v16890_v63  ;;  %v24877_v29 = vmax.f32 %v24875_v35, %v24876_v58  ;;  %v16947_v57 = vpop.trf.xlu1  ;;  %12238 = vst.msk [vmem:[%s22463_s7 + $0x18] sm:$0xff] %vm22467_vm3, %v14987_v25 }
 0x517   : > { %v11814_v14 = vadd.f32 %v22192_v37, %v11519_v49  ;;  %v11520_v20 = vmax.f32 %v24874_v22, %v11232_v55  ;;  %v16891_v6 = vunpack.i.l.bf16 %v16890_v63  ;;  %v16943_v54 = vunpack.i.l.bf16 %v16942_v52  ;;  %v24878_v63 = vld [vmem:[#allocation452_spill] sm:$0xff] }
 0x518   : > { %v11812_v36 = vadd.f32 %v22192_v37, %v11517_v47  ;;  %v11518_v31 = vmax.f32 %v24877_v29, %v11230_v15  ;;  %v14996_v45 = vpack.c.bf16 %v16894_v34, %v16946_v16  ;;  %v24880_v43 = vmax.f32 %v24878_v63, %v24879_v26  ;;  %v24891_v63 = vld [vmem:[#allocation461_spill] sm:$0xff] }
 0x519   : > { %v12102_v24 = vmax.f32 %v11814_v14, 0.0  ;;  %v11815_v5 = vadd.f32 %v22192_v37, %v11520_v20  ;;  %v16470_v11 = vpop.f32.mrb[24].mxu0  ;;  %v16895_v1 = vpop.trf.xlu0  ;;  %17301 = vxpose.xlu0.b32.cont [6/16] (narrow) %v22517_v61, 32  ;;  %v14992_v52 = vpack.c.bf16 %v16891_v6, %v16943_v54  ;;  %v24888_v6 = vld [vmem:[#allocation459_spill] sm:$0xff]  ;;  %v16951_v7 = vunpack.i.h.bf16 %v16947_v57 }
 0x51a   : > { %v12100_v50 = vmax.f32 %v11812_v36, 0.0  ;;  %v11813_v51 = vadd.f32 %v22192_v37, %v11518_v31  ;;  %v16762_v28 = vpop.f32.mrb[24].mxu1  ;;  %v8201_v13 = vpop.f32.mrb[25].mxu0  ;;  %14881 = vst.msk [vmem:[%s22463_s7 + $0x60] sm:$0xff] %vm22467_vm3, %v14996_v45  ;;  %v16896_v35 = vunpack.i.l.bf16 %v16895_v1  ;;  %v24887_v31 = vld [vmem:[#allocation458_spill] sm:$0xff]  ;;  %v16948_v16 = vunpack.i.l.bf16 %v16947_v57 }
 0x51b   : > { %v12103_v30 = vmax.f32 %v11815_v5, 0.0  ;;  %v11235_v32 = vmax.f32 %v16470_v11, %v16762_v28  ;;  %v10826_v46 = vpop.f32.mrb[25].mxu1  ;;  %v16471_v48 = vpop.f32.mrb[26].mxu0  ;;  %v22577_v21 = vpack.i.bf16 %v12102_v24, %v12084_v0  ;;  %v16899_v0 = vunpack.i.h.bf16 %v16895_v1  ;;  %14873 = vst.msk [vmem:[%s22463_s7 + $0x40] sm:$0xff] %vm22467_vm3, %v14992_v52  ;;  %v24890_v52 = vld [vmem:[#allocation460_spill] sm:$0xff] }
 0x51c   : > { %v12101_v49 = vmax.f32 %v11813_v51, 0.0  ;;  %v11233_v55 = vmax.f32 %v8201_v13, %v10826_v46  ;;  %v16763_v33 = vpop.f32.mrb[26].mxu1  ;;  %v8204_v39 = vpop.f32.mrb[27].mxu0  ;;  %v22581_v61 = vpack.i.bf16 %v12100_v50, %v12082_v19  ;;  %v24882_v19 = vld [vmem:[#allocation455_spill] sm:$0xff]  ;;  %v24892_v26 = vmax.f32 %v24890_v52, %v24891_v63  ;;  %v24905_v63 = vld [vmem:[#allocation470_spill] sm:$0xff] }
 0x51d   : > { %v11523_v44 = vmax.f32 %v24880_v43, %v11235_v32  ;;  %v11236_v47 = vmax.f32 %v16471_v48, %v16763_v33  ;;  %v10829_v15 = vpop.f32.mrb[27].mxu1  ;;  %v22588_v23 = vpack.i.bf16 %v12103_v30, %v12085_v60  ;;  %v22593_v34 = vpop.trf.xlu0  ;;  %v24883_v14 = vmax.f32 %v24881_v4, %v24882_v19  ;;  %17303 = vxpose.xlu0.b32.cont [7/16] (narrow) %v17302_v53, 32  ;;  %v24885_v60 = vld [vmem:[#allocation457_spill] sm:$0xff] }
 0x51e   : > { %v11234_v9 = vmax.f32 %v8204_v39, %v10829_v15  ;;  %v22600_v22 = vpack.i.bf16 %v12101_v49, %v12083_v38  ;;  %v24886_v20 = vmax.f32 %v24884_v27, %v24885_v60  ;;  %v16952_v58 = vpop.trf.xlu1  ;;  %v24889_v53 = vmax.f32 %v24887_v31, %v24888_v6 }
 0x51f   : > { %v11521_v17 = vmax.f32 %v24883_v14, %v11233_v55  ;;  %v11818_v36 = vadd.f32 %v22192_v37, %v11523_v44  ;;  %v14997_v54 = vpack.c.bf16 %v16899_v0, %v16951_v7  ;;  %v16904_v30 = vunpack.i.h.bf16 %v22593_v34 }
 0x520   : > { %v11524_v25 = vmax.f32 %v24886_v20, %v11236_v47  ;;  %v11522_v24 = vmax.f32 %v24889_v53, %v11234_v9  ;;  %v14993_v49 = vpack.c.bf16 %v16896_v35, %v16948_v16  ;;  %v16901_v14 = vunpack.i.l.bf16 %v22593_v34  ;;  %v24897_v9 = vld [vmem:[#allocation465_spill] sm:$0xff] }
 0x521   : > { %v11816_v29 = vadd.f32 %v22192_v37, %v11521_v17  ;;  %v16474_v5 = vpop.f32.mrb[28].mxu0  ;;  %v12106_v11 = vmax.f32 %v11818_v36, 0.0  ;;  %v22614_v50 = vpop.trf.xlu0  ;;  %17305 = vxpose.xlu0.b32.cont [8/16] (narrow) %v17304_v56, 32  ;;  %14882 = vst.msk [vmem:[%s22463_s7 + $0x68] sm:$0xff] %vm22467_vm3, %v14997_v54  ;;  %v24896_v17 = vld [vmem:[#allocation464_spill] sm:$0xff]  ;;  %v16956_v20 = vunpack.i.h.bf16 %v16952_v58  ;;  %v16953_v34 = vunpack.i.l.bf16 %v16952_v58 }
 0x522   : > { %v11819_v38 = vadd.f32 %v22192_v37, %v11524_v25  ;;  %v11817_v28 = vadd.f32 %v22192_v37, %v11522_v24  ;;  %v16766_v13 = vpop.f32.mrb[28].mxu1  ;;  %v8217_v1 = vpop.f32.mrb[29].mxu0  ;;  %14874 = vst.msk [vmem:[%s22463_s7 + $0x48] sm:$0xff] %vm22467_vm3, %v14993_v49  ;;  %v24898_v27 = vmax.f32 %v24896_v17, %v24897_v9  ;;  %v24900_v25 = vld [vmem:[#allocation467_spill] sm:$0xff]  ;;  %v16909_v24 = vunpack.i.h.bf16 %v22614_v50  ;;  %v24911_v9 = vld [vmem:[#allocation474_spill] sm:$0xff] }
 0x523   : > { %v12104_v51 = vmax.f32 %v11816_v29, 0.0  ;;  %v11239_v46 = vmax.f32 %v16474_v5, %v16766_v13  ;;  %v10842_v48 = vpop.f32.mrb[29].mxu1  ;;  %v16475_v45 = vpop.f32.mrb[30].mxu0  ;;  %v17266_v57 = vpack.i.bf16 %v12106_v11, %v12088_v12  ;;  %v14998_v53 = vpack.c.bf16 %v16904_v30, %v16956_v20 }
 0x524   : > { %v12107_v32 = vmax.f32 %v11819_v38, 0.0  ;;  %v12105_v55 = vmax.f32 %v11817_v28, 0.0  ;;  %v11237_v33 = vmax.f32 %v8217_v1, %v10842_v48  ;;  %v16767_v39 = vpop.f32.mrb[30].mxu1  ;;  %v8220_v37 = vpop.f32.mrb[31].mxu0  ;;  %v14994_v16 = vpack.c.bf16 %v16901_v14, %v16953_v34 }
 0x525   : > { %v22622_v56 = vpack.i.bf16 %v12104_v51, %v12086_v3  ;;  %v11527_v43 = vmax.f32 %v24892_v26, %v11239_v46  ;;  %v11240_v44 = vmax.f32 %v16475_v45, %v16767_v39  ;;  %v10845_v47 = vpop.f32.mrb[31].mxu1  ;;  %17267 = vxpose.xlu1.b32.start [1/2] (short) (narrow) %v17266_v57, 32  ;;  %v16957_v12 = vpop.trf.xlu1  ;;  %v24894_v3 = vld [vmem:[#allocation463_spill] sm:$0xff]  ;;  %17307 = vxpose.xlu0.b32.cont [9/16] (narrow) %v22539_v18, 32  ;;  %v24899_v18 = vld [vmem:[#allocation466_spill] sm:$0xff]  ;;  %v16906_v54 = vunpack.i.l.bf16 %v22614_v50  ;;  %v24902_v45 = vld [vmem:[#allocation468_spill] sm:$0xff] }
 0x526   : > { %v17268_v8 = vpack.i.bf16 %v12107_v32, %v12089_v42  ;;  %v24895_v15 = vmax.f32 %v24893_v62, %v24894_v3  ;;  %v11238_v4 = vmax.f32 %v8220_v37, %v10845_v47  ;;  %v22641_v19 = vpack.i.bf16 %v12105_v55, %v12087_v41  ;;  %v22661_v35 = vpop.trf.xlu0  ;;  %14883 = vst.msk [vmem:[%s22463_s7 + $0x70] sm:$0xff] %vm22467_vm3, %v14998_v53  ;;  %v24903_v57 = vld [vmem:[#allocation469_spill] sm:$0xff]  ;;  %v24906_v50 = vld [vmem:[#allocation471_spill] sm:$0xff]  ;;  %v24908_v3 = vld [vmem:[#allocation472_spill] sm:$0xff] }
 0x527   : > { %v22650_v42 = vadd.f32 %v22647_v40, %v11527_v43  ;;  %v11528_v60 = vmax.f32 %v24898_v27, %v11240_v44  ;;  %v24901_v59 = vmax.f32 %v24899_v18, %v24900_v25  ;;  %14875 = vst.msk [vmem:[%s22463_s7 + $0x50] sm:$0xff] %vm22467_vm3, %v14994_v16  ;;  %v24904_v49 = vmax.f32 %v24902_v45, %v24903_v57  ;;  %v24912_v27 = vld [vmem:[#allocation475_spill] sm:$0xff]  ;;  %v24914_v57 = vld [vmem:[#allocation476_spill] sm:$0xff] }
 0x528   : > { %v11525_v0 = vmax.f32 %v24895_v15, %v11237_v33  ;;  %v16958_v37 = vunpack.i.l.bf16 %v16957_v12  ;;  %v24907_v26 = vmax.f32 %v24905_v63, %v24906_v50  ;;  %v24909_v15 = vld [vmem:[#allocation473_spill] sm:$0xff]  ;;  %v24917_v63 = vld [vmem:[#allocation478_spill] sm:$0xff]  ;;  %v24918_v50 = vld [vmem:[#allocation479_spill] sm:$0xff] }
 0x529   : > { %v11526_v41 = vmax.f32 %v24901_v59, %v11238_v4  ;;  %v12110_v29 = vmax.f32 %v22650_v42, 0.0  ;;  %v22665_v31 = vadd.f32 %v22647_v40, %v11528_v60  ;;  %17269 = vxpose.xlu1.b32.end [2/2] (short) (narrow) %v17268_v8, 32  ;;  %v16478_v6 = vpop.f32.mrb[32].mxu0  ;;  %v16966_v7 = vpop.trf.xlu1  ;;  %17309 = vxpose.xlu0.b32.cont [10/16] (narrow) %v22551_v2, 32  ;;  %v16961_v2 = vunpack.i.h.bf16 %v16957_v12  ;;  %v24965_v42 = vld [vmem:[#allocation510_spill] sm:$0xff] }
 0x52a   : > { %v22659_v36 = vadd.f32 %v22647_v40, %v11525_v0  ;;  %v16770_v5 = vpop.f32.mrb[32].mxu1  ;;  %v8233_v58 = vpop.f32.mrb[33].mxu0  ;;  %v16970_v8 = vunpack.i.h.bf16 %v16966_v7  ;;  %v24910_v0 = vmax.f32 %v24908_v3, %v24909_v15  ;;  %v14995_v14 = vpack.c.bf16 %v16906_v54, %v16958_v37  ;;  %v24920_v3 = vld [vmem:[#allocation480_spill] sm:$0xff]  ;;  %v24921_v15 = vld [vmem:[#allocation481_spill] sm:$0xff] }
 0x52b   : > { %v22669_v38 = vadd.f32 %v22647_v40, %v11526_v41  ;;  %v12111_v51 = vmax.f32 %v22665_v31, 0.0  ;;  %v11243_v28 = vmax.f32 %v16478_v6, %v16770_v5  ;;  %v10858_v13 = vpop.f32.mrb[33].mxu1  ;;  %v16479_v1 = vpop.f32.mrb[34].mxu0  ;;  %v14999_v47 = vpack.c.bf16 %v16909_v24, %v16961_v2 }
 0x52c   : > { %v12108_v11 = vmax.f32 %v22659_v36, 0.0  ;;  %v11241_v32 = vmax.f32 %v8233_v58, %v10858_v13  ;;  %v16771_v46 = vpop.f32.mrb[34].mxu1  ;;  %v8236_v48 = vpop.f32.mrb[35].mxu0  ;;  %v24913_v60 = vmax.f32 %v24911_v9, %v24912_v27  ;;  %14876 = vst.msk [vmem:[%s22463_s7 + $0x58] sm:$0xff] %vm22467_vm3, %v14995_v14  ;;  %v17022_v41 = vunpack.i.h.bf16 %v22661_v35  ;;  %v24923_v9 = vld [vmem:[#allocation482_spill] sm:$0xff]  ;;  %v24924_v27 = vld [vmem:[#allocation483_spill] sm:$0xff] }
 0x52d   : > { %v12109_v30 = vmax.f32 %v22669_v38, 0.0  ;;  %v11531_v55 = vmax.f32 %v24904_v49, %v11243_v28  ;;  %v11244_v33 = vmax.f32 %v16479_v1, %v16771_v46  ;;  %v10861_v39 = vpop.f32.mrb[35].mxu1  ;;  %v16971_v52 = vpop.trf.xlu1  ;;  %17311 = vxpose.xlu0.b32.cont [11/16] (narrow) %v22581_v61, 32  ;;  %14884 = vst.msk [vmem:[%s22463_s7 + $0x78] sm:$0xff] %vm22467_vm3, %v14999_v47  ;;  %v16967_v61 = vunpack.i.l.bf16 %v16966_v7 }
 0x52e   : > { %v11529_v43 = vmax.f32 %v24907_v26, %v11241_v32  ;;  %v11242_v44 = vmax.f32 %v8236_v48, %v10861_v39  ;;  %v17023_v12 = vpop.trf.xlu0  ;;  %v17019_v5 = vunpack.i.l.bf16 %v22661_v35  ;;  %v15004_v1 = vpack.c.bf16 %v16970_v8, %v17022_v41 }
 0x52f   : > { %v22690_v62 = vadd.f32 %v22647_v40, %v11531_v55  ;;  %v11532_v4 = vmax.f32 %v24910_v0, %v11244_v33  ;;  %v16975_v54 = vunpack.i.h.bf16 %v16971_v52  ;;  %v16972_v39 = vunpack.i.l.bf16 %v16971_v52 }
 0x530   : > { %v22696_v17 = vadd.f32 %v22647_v40, %v11529_v43  ;;  %v11530_v20 = vmax.f32 %v24913_v60, %v11242_v44  ;;  %v15000_v45 = vpack.c.bf16 %v16967_v61, %v17019_v5  ;;  %14897 = vst.msk [vmem:[%s22463_s7 + $0xa0] sm:$0xff] %vm22467_vm3, %v15004_v1  ;;  %v24919_v26 = vmax.f32 %v24917_v63, %v24918_v50 }
 0x531   : > { %v12114_v18 = vmax.f32 %v22690_v62, 0.0  ;;  %v22706_v25 = vadd.f32 %v22647_v40, %v11532_v4  ;;  %v16482_v59 = vpop.f32.mrb[36].mxu0  ;;  %v22712_v34 = vpop.trf.xlu1  ;;  %17313 = vxpose.xlu0.b32.cont [12/16] (narrow) %v22600_v22, 32  ;;  %v24915_v22 = vld [vmem:[#allocation477_spill] sm:$0xff]  ;;  %v17027_v47 = vunpack.i.h.bf16 %v17023_v12  ;;  %v24922_v0 = vmax.f32 %v24920_v3, %v24921_v15  ;;  %v24929_v3 = vld [vmem:[#allocation486_spill] sm:$0xff]  ;;  %v24930_v15 = vld [vmem:[#allocation487_spill] sm:$0xff] }
 0x532   : > { %v12112_v6 = vmax.f32 %v22696_v17, 0.0  ;;  %v22716_v53 = vadd.f32 %v22647_v40, %v11530_v20  ;;  %v16774_v24 = vpop.f32.mrb[36].mxu1  ;;  %v8249_v7 = vpop.f32.mrb[37].mxu0  ;;  %v24916_v49 = vmax.f32 %v24914_v57, %v24915_v22  ;;  %14889 = vst.msk [vmem:[%s22463_s7 + $0x80] sm:$0xff] %vm22467_vm3, %v15000_v45  ;;  %v17024_v52 = vunpack.i.l.bf16 %v17023_v12  ;;  %v24977_v62 = vld [vmem:[#allocation518_spill] sm:$0xff] }
 0x533   : > { %v12115_v58 = vmax.f32 %v22706_v25, 0.0  ;;  %v11247_v16 = vmax.f32 %v16482_v59, %v16774_v24  ;;  %v10874_v28 = vpop.f32.mrb[37].mxu1  ;;  %v16483_v13 = vpop.f32.mrb[38].mxu0  ;;  %v24925_v60 = vmax.f32 %v24923_v9, %v24924_v27  ;;  %v15005_v20 = vpack.c.bf16 %v16975_v54, %v17027_v47  ;;  %v24932_v27 = vld [vmem:[#allocation488_spill] sm:$0xff] }
 0x534   : > { %v12113_v32 = vmax.f32 %v22716_v53, 0.0  ;;  %v11245_v46 = vmax.f32 %v8249_v7, %v10874_v28  ;;  %v16775_v48 = vpop.f32.mrb[38].mxu1  ;;  %v8252_v2 = vpop.f32.mrb[39].mxu0  ;;  %v16980_v61 = vunpack.i.h.bf16 %v22712_v34  ;;  %v15001_v12 = vpack.c.bf16 %v16972_v39, %v17024_v52  ;;  %v24927_v39 = vld [vmem:[#allocation485_spill] sm:$0xff] }
 0x535   : > { %v11535_v55 = vmax.f32 %v24916_v49, %v11247_v16  ;;  %v11248_v33 = vmax.f32 %v16483_v13, %v16775_v48  ;;  %v10877_v35 = vpop.f32.mrb[39].mxu1  ;;  %v17028_v37 = vpop.trf.xlu0  ;;  %17315 = vxpose.xlu0.b32.cont [13/16] (narrow) %v22577_v21, 32  ;;  %14898 = vst.msk [vmem:[%s22463_s7 + $0xa8] sm:$0xff] %vm22467_vm3, %v15005_v20  ;;  %v16977_v54 = vunpack.i.l.bf16 %v22712_v34 }
 0x536   : > { %v11533_v43 = vmax.f32 %v24919_v26, %v11245_v46  ;;  %v11246_v44 = vmax.f32 %v8252_v2, %v10877_v35  ;;  %v16981_v59 = vpop.trf.xlu1  ;;  %14890 = vst.msk [vmem:[%s22463_s7 + $0x88] sm:$0xff] %vm22467_vm3, %v15001_v12  ;;  %v17032_v57 = vunpack.i.h.bf16 %v17028_v37  ;;  %v24926_v35 = vld [vmem:[#allocation484_spill] sm:$0xff] }
 0x537   : > { %v22736_v8 = vadd.f32 %v22647_v40, %v11535_v55  ;;  %v11536_v4 = vmax.f32 %v24922_v0, %v11248_v33  ;;  %v17029_v33 = vunpack.i.l.bf16 %v17028_v37  ;;  %v24928_v63 = vmax.f32 %v24926_v35, %v24927_v39 }
 0x538   : > { %v22742_v14 = vadd.f32 %v22647_v40, %v11533_v43  ;;  %v11534_v21 = vmax.f32 %v24925_v60, %v11246_v44  ;;  %v15006_v43 = vpack.c.bf16 %v16980_v61, %v17032_v57  ;;  %v16985_v44 = vunpack.i.h.bf16 %v16981_v59  ;;  %v24933_v60 = vld [vmem:[#allocation489_spill] sm:$0xff] }
 0x539   : > { %v12118_v41 = vmax.f32 %v22736_v8, 0.0  ;;  %v22750_v24 = vadd.f32 %v22647_v40, %v11536_v4  ;;  %v16486_v7 = vpop.f32.mrb[40].mxu0  ;;  %v17033_v5 = vpop.trf.xlu0  ;;  %17317 = vxpose.xlu0.b32.cont [14/16] (narrow) %v22588_v23, 32  ;;  %v24931_v0 = vmax.f32 %v24929_v3, %v24930_v15  ;;  %v15002_v9 = vpack.c.bf16 %v16977_v54, %v17029_v33  ;;  %v24990_v8 = vld [vmem:[#allocation527_spill] sm:$0xff] }
 0x53a   : > { %v12116_v16 = vmax.f32 %v22742_v14, 0.0  ;;  %v22754_v28 = vadd.f32 %v22647_v40, %v11534_v21  ;;  %v16778_v13 = vpop.f32.mrb[40].mxu1  ;;  %v8265_v1 = vpop.f32.mrb[41].mxu0  ;;  %v24934_v21 = vmax.f32 %v24932_v27, %v24933_v60  ;;  %14899 = vst.msk [vmem:[%s22463_s7 + $0xb0] sm:$0xff] %vm22467_vm3, %v15006_v43  ;;  %v16982_v61 = vunpack.i.l.bf16 %v16981_v59 }
 0x53b   : > { %v12119_v46 = vmax.f32 %v22750_v24, 0.0  ;;  %v11251_v48 = vmax.f32 %v16486_v7, %v16778_v13  ;;  %v10890_v2 = vpop.f32.mrb[41].mxu1  ;;  %v16487_v45 = vpop.f32.mrb[42].mxu0  ;;  %v24935_v13 = vld [vmem:[#allocation490_spill] sm:$0xff]  ;;  %14891 = vst.msk [vmem:[%s22463_s7 + $0x90] sm:$0xff] %vm22467_vm3, %v15002_v9  ;;  %v17037_v54 = vunpack.i.h.bf16 %v17033_v5  ;;  %v24939_v9 = vld [vmem:[#allocation493_spill] sm:$0xff] }
 0x53c   : > { %v12117_v22 = vmax.f32 %v22754_v28, 0.0  ;;  %v11249_v49 = vmax.f32 %v8265_v1, %v10890_v2  ;;  %v16779_v23 = vpop.f32.mrb[42].mxu1  ;;  %v8268_v55 = vpop.f32.mrb[43].mxu0  ;;  %v24936_v1 = vld [vmem:[#allocation491_spill] sm:$0xff]  ;;  %v24981_v28 = vld [vmem:[#allocation521_spill] sm:$0xff]  ;;  %v24995_v24 = vld [vmem:[#allocation530_spill] sm:$0xff] }
 0x53d   : > { %v11539_v34 = vmax.f32 %v24928_v63, %v11251_v48  ;;  %v11252_v50 = vmax.f32 %v16487_v45, %v16779_v23  ;;  %v10893_v26 = vpop.f32.mrb[43].mxu1  ;;  %v17042_v47 = vpop.trf.xlu0  ;;  %17319 = vxpose.xlu0.b32.cont [15/16] (narrow) %v22622_v56, 32  ;;  %v24937_v48 = vmax.f32 %v24935_v13, %v24936_v1  ;;  %v15007_v39 = vpack.c.bf16 %v16985_v44, %v17037_v54  ;;  %v24941_v13 = vld [vmem:[#allocation494_spill] sm:$0xff]  ;;  %v24942_v1 = vld [vmem:[#allocation495_spill] sm:$0xff] }
 0x53e   : > { %v11537_v4 = vmax.f32 %v24931_v0, %v11249_v49  ;;  %v11250_v52 = vmax.f32 %v8268_v55, %v10893_v26  ;;  %v17094_v7 = vpop.trf.xlu1  ;;  %v17034_v49 = vunpack.i.l.bf16 %v17033_v5  ;;  %v17046_v63 = vunpack.i.h.bf16 %v17042_v47 }
 0x53f   : > { %v22774_v37 = vadd.f32 %v22647_v40, %v11539_v34  ;;  %v11540_v20 = vmax.f32 %v24934_v21, %v11252_v50  ;;  %14900 = vst.msk [vmem:[%s22463_s7 + $0xb8] sm:$0xff] %vm22467_vm3, %v15007_v39 }
 0x540   : > { %v22783_v12 = vadd.f32 %v22647_v40, %v11537_v4  ;;  %v11538_v56 = vmax.f32 %v24937_v48, %v11250_v52  ;;  %v15003_v43 = vpack.c.bf16 %v16982_v61, %v17034_v49  ;;  %v17043_v52 = vunpack.i.l.bf16 %v17042_v47  ;;  %v24944_v49 = vld [vmem:[#allocation496_spill] sm:$0xff]  ;;  %v24945_v47 = vld [vmem:[#allocation497_spill] sm:$0xff] }
 0x541   : > { %v12122_v2 = vmax.f32 %v22774_v37, 0.0  ;;  %v22793_v45 = vadd.f32 %v22647_v40, %v11540_v20  ;;  %v16490_v57 = vpop.f32.mrb[44].mxu0  ;;  %v22795_v59 = vpop.trf.xlu0  ;;  %17321 = vxpose.xlu0.b32.end [16/16] (narrow) %v22641_v19, 32  ;;  %v24938_v19 = vld [vmem:[#allocation492_spill] sm:$0xff]  ;;  %v17098_v20 = vunpack.i.h.bf16 %v17094_v7  ;;  %v24943_v48 = vmax.f32 %v24941_v13, %v24942_v1 }
 0x542   : > { %v12120_v23 = vmax.f32 %v22783_v12, 0.0  ;;  %v22799_v55 = vadd.f32 %v22647_v40, %v11538_v56  ;;  %v16782_v33 = vpop.f32.mrb[44].mxu1  ;;  %v8281_v35 = vpop.f32.mrb[45].mxu0  ;;  %v24940_v44 = vmax.f32 %v24938_v19, %v24939_v9  ;;  %14892 = vst.msk [vmem:[%s22463_s7 + $0x98] sm:$0xff] %vm22467_vm3, %v15003_v43  ;;  %v24947_v43 = vld [vmem:[#allocation498_spill] sm:$0xff] }
 0x543   : > { %v12123_v34 = vmax.f32 %v22793_v45, 0.0  ;;  %v11255_v50 = vmax.f32 %v16490_v57, %v16782_v33  ;;  %v10906_v26 = vpop.f32.mrb[45].mxu1  ;;  %v16491_v5 = vpop.f32.mrb[46].mxu0  ;;  %v17095_v57 = vunpack.i.l.bf16 %v17094_v7  ;;  %v24946_v33 = vmax.f32 %v24944_v49, %v24945_v47 }
 0x544   : > { %v12121_v3 = vmax.f32 %v22799_v55, 0.0  ;;  %v11253_v15 = vmax.f32 %v8281_v35, %v10906_v26  ;;  %v16783_v0 = vpop.f32.mrb[46].mxu1  ;;  %v8284_v4 = vpop.f32.mrb[47].mxu0  ;;  %v17051_v26 = vunpack.i.h.bf16 %v22795_v59 }
 0x545   : > { %v11543_v27 = vmax.f32 %v24940_v44, %v11255_v50  ;;  %v11256_v60 = vmax.f32 %v16491_v5, %v16783_v0  ;;  %v10909_v21 = vpop.f32.mrb[47].mxu1  ;;  %v17099_v61 = vpop.trf.xlu1  ;;  %v15012_v50 = vpack.c.bf16 %v17046_v63, %v17098_v20  ;;  %v24948_v0 = vld [vmem:[#allocation499_spill] sm:$0xff]  ;;  %v15008_v7 = vpack.c.bf16 %v17043_v52, %v17095_v57 }
 0x546   : > { %v11541_v56 = vmax.f32 %v24943_v48, %v11253_v15  ;;  %v11254_v54 = vmax.f32 %v8284_v4, %v10909_v21  ;;  %v22821_v5 = vpop.trf.xlu0  ;;  %v24949_v19 = vmax.f32 %v24947_v43, %v24948_v0  ;;  %v17048_v63 = vunpack.i.l.bf16 %v22795_v59  ;;  %v24950_v43 = vld [vmem:[#allocation500_spill] sm:$0xff]  ;;  %v24951_v0 = vld [vmem:[#allocation501_spill] sm:$0xff] }
 0x547   : > { %v11544_v35 = vmax.f32 %v24946_v33, %v11256_v60  ;;  %v11838_v39 = vadd.f32 %v22647_v40, %v11543_v27  ;;  %14913 = vst.msk [vmem:[%s22463_s7 + $0xe0] sm:$0xff] %vm22467_vm3, %v15012_v50  ;;  %14905 = vst.msk [vmem:[%s22463_s7 + $0xc0] sm:$0xff] %vm22467_vm3, %v15008_v7  ;;  %v17103_v52 = vunpack.i.h.bf16 %v17099_v61  ;;  %v17100_v50 = vunpack.i.l.bf16 %v17099_v61 }
 0x548   : > { %v11542_v9 = vmax.f32 %v24949_v19, %v11254_v54  ;;  %v22827_v15 = vadd.f32 %v22647_v40, %v11541_v56  ;;  %v24952_v19 = vmax.f32 %v24950_v43, %v24951_v0  ;;  %v24959_v43 = vld [vmem:[#allocation506_spill] sm:$0xff]  ;;  %v24960_v0 = vld [vmem:[#allocation507_spill] sm:$0xff] }
 0x549   : > { %v11839_v4 = vadd.f32 %v22647_v40, %v11544_v35  ;;  %v16494_v44 = vpop.f32.mrb[48].mxu0  ;;  %v12126_v60 = vmax.f32 %v11838_v39, 0.0  ;;  %v17104_v27 = vpop.trf.xlu1  ;;  %v15013_v39 = vpack.c.bf16 %v17051_v26, %v17103_v52  ;;  %v15009_v52 = vpack.c.bf16 %v17048_v63, %v17100_v50 }
 0x54a   : > { %v22835_v21 = vadd.f32 %v22647_v40, %v11542_v9  ;;  %v16786_v20 = vpop.f32.mrb[48].mxu1  ;;  %v8297_v13 = vpop.f32.mrb[49].mxu0  ;;  %v12124_v1 = vmax.f32 %v22827_v15, 0.0 }
 0x54b   : > { %v12127_v48 = vmax.f32 %v11839_v4, 0.0  ;;  %v11259_v56 = vmax.f32 %v16494_v44, %v16786_v20  ;;  %v10922_v54 = vpop.f32.mrb[49].mxu1  ;;  %v16495_v57 = vpop.f32.mrb[50].mxu0  ;;  %v17342_v49 = vpack.i.bf16 %v12126_v60, %v12108_v11  ;;  %v17056_v11 = vunpack.i.h.bf16 %v22821_v5  ;;  %v24953_v60 = vld [vmem:[#allocation502_spill] sm:$0xff]  ;;  %v24954_v20 = vld [vmem:[#allocation503_spill] sm:$0xff]  ;;  %14914 = vst.msk [vmem:[%s22463_s7 + $0xe8] sm:$0xff] %vm22467_vm3, %v15013_v39 }
 0x54c   : > { %v12125_v59 = vmax.f32 %v22835_v21, 0.0  ;;  %v11257_v47 = vmax.f32 %v8297_v13, %v10922_v54  ;;  %v16787_v33 = vpop.f32.mrb[50].mxu1  ;;  %v8300_v35 = vpop.f32.mrb[51].mxu0  ;;  %v24955_v13 = vmax.f32 %v24953_v60, %v24954_v20  ;;  %v24956_v54 = vld [vmem:[#allocation504_spill] sm:$0xff]  ;;  %14906 = vst.msk [vmem:[%s22463_s7 + $0xc8] sm:$0xff] %vm22467_vm3, %v15009_v52 }
 0x54d   : > { %v11547_v9 = vmax.f32 %v24952_v19, %v11259_v56  ;;  %v11260_v7 = vmax.f32 %v16495_v57, %v16787_v33  ;;  %v10925_v4 = vpop.f32.mrb[51].mxu1  ;;  %17343 = vxpose.xlu1.b32.start [1/16] (narrow) %v17342_v49, 32  ;;  %v17344_v36 = vpack.i.bf16 %v12127_v48, %v12109_v30  ;;  %v22850_v44 = vpop.trf.xlu0  ;;  %v24957_v57 = vld [vmem:[#allocation505_spill] sm:$0xff]  ;;  %v17053_v30 = vunpack.i.l.bf16 %v22821_v5 }
 0x54e   : > { %v11545_v26 = vmax.f32 %v24955_v13, %v11257_v47  ;;  %v11258_v61 = vmax.f32 %v8300_v35, %v10925_v4  ;;  %v24958_v49 = vmax.f32 %v24956_v54, %v24957_v57  ;;  %v17109_v48 = vpop.trf.xlu1  ;;  %v24961_v19 = vmax.f32 %v24959_v43, %v24960_v0  ;;  %v24963_v0 = vld [vmem:[#allocation509_spill] sm:$0xff] }
 0x54f   : > { %v11842_v56 = vadd.f32 %v22647_v40, %v11547_v9  ;;  %v17108_v35 = vunpack.i.h.bf16 %v17104_v27  ;;  %v17105_v9 = vunpack.i.l.bf16 %v17104_v27 }
 0x550   : > { %v11548_v38 = vmax.f32 %v24958_v49, %v11260_v7  ;;  %v11840_v33 = vadd.f32 %v22647_v40, %v11545_v26  ;;  %v11546_v47 = vmax.f32 %v24961_v19, %v11258_v61  ;;  %v17061_v26 = vunpack.i.h.bf16 %v22850_v44 }
 0x551   : > { %v12130_v63 = vmax.f32 %v11842_v56, 0.0  ;;  %17345 = vxpose.xlu1.b32.cont [2/16] (narrow) %v17344_v36, 32  ;;  %v16498_v50 = vpop.f32.mrb[52].mxu0  ;;  %v22871_v7 = vpop.trf.xlu0  ;;  %v15014_v13 = vpack.c.bf16 %v17056_v11, %v17108_v35  ;;  %v15010_v27 = vpack.c.bf16 %v17053_v30, %v17105_v9  ;;  %v24962_v11 = vld [vmem:[#allocation508_spill] sm:$0xff] }
 0x552   : > { %v11843_v39 = vadd.f32 %v22647_v40, %v11548_v38  ;;  %v12128_v5 = vmax.f32 %v11840_v33, 0.0  ;;  %v11841_v4 = vadd.f32 %v22647_v40, %v11546_v47  ;;  %v16790_v60 = vpop.f32.mrb[52].mxu1  ;;  %v8313_v20 = vpop.f32.mrb[53].mxu0  ;;  %v24964_v19 = vmax.f32 %v24962_v11, %v24963_v0 }
 0x553   : > { %v11263_v52 = vmax.f32 %v16498_v50, %v16790_v60  ;;  %v10938_v56 = vpop.f32.mrb[53].mxu1  ;;  %v16499_v54 = vpop.f32.mrb[54].mxu0  ;;  %v17350_v36 = vpack.i.bf16 %v12130_v63, %v12112_v6  ;;  %14915 = vst.msk [vmem:[%s22463_s7 + $0xf0] sm:$0xff] %vm22467_vm3, %v15014_v13  ;;  %14907 = vst.msk [vmem:[%s22463_s7 + $0xd0] sm:$0xff] %vm22467_vm3, %v15010_v27  ;;  %v17113_v13 = vunpack.i.h.bf16 %v17109_v48 }
 0x554   : > { %v12131_v61 = vmax.f32 %v11843_v39, 0.0  ;;  %v12129_v57 = vmax.f32 %v11841_v4, 0.0  ;;  %v11261_v49 = vmax.f32 %v8313_v20, %v10938_v56  ;;  %v16791_v38 = vpop.f32.mrb[54].mxu1  ;;  %v8316_v33 = vpop.f32.mrb[55].mxu0  ;;  %v17346_v43 = vpack.i.bf16 %v12128_v5, %v12110_v29  ;;  %v24966_v29 = vld [vmem:[#allocation511_spill] sm:$0xff]  ;;  %v24969_v4 = vld [vmem:[#allocation513_spill] sm:$0xff] }
 0x555   : > { %v11551_v47 = vmax.f32 %v24964_v19, %v11263_v52  ;;  %v11264_v35 = vmax.f32 %v16499_v54, %v16791_v38  ;;  %v10941_v39 = vpop.f32.mrb[55].mxu1  ;;  %v22892_v6 = vpop.trf.xlu1  ;;  %v24967_v30 = vmax.f32 %v24965_v42, %v24966_v29  ;;  %v17058_v5 = vunpack.i.l.bf16 %v22850_v44  ;;  %v24971_v52 = vld [vmem:[#allocation514_spill] sm:$0xff]  ;;  %v24972_v56 = vld [vmem:[#allocation515_spill] sm:$0xff] }
 0x556   : > { %v22887_v17 = vpack.i.bf16 %v12131_v61, %v12113_v32  ;;  %v11262_v50 = vmax.f32 %v8316_v33, %v10941_v39  ;;  %17347 = vxpose.xlu1.b32.cont [3/16] (narrow) %v17346_v43, 32  ;;  %v17348_v9 = vpack.i.bf16 %v12129_v57, %v12111_v51  ;;  %v24968_v32 = vld [vmem:[#allocation512_spill] sm:$0xff]  ;;  %v24973_v54 = vmax.f32 %v24971_v52, %v24972_v56  ;;  %v22908_v38 = vpop.trf.xlu0 }
 0x557   : > { %v11549_v63 = vmax.f32 %v24967_v30, %v11261_v49  ;;  %v11846_v53 = vadd.f32 %v22647_v40, %v11551_v47  ;;  %v24970_v60 = vmax.f32 %v24968_v32, %v24969_v4  ;;  %v17110_v49 = vunpack.i.l.bf16 %v17109_v48  ;;  %v24974_v32 = vld [vmem:[#allocation516_spill] sm:$0xff]  ;;  %v24975_v4 = vld [vmem:[#allocation517_spill] sm:$0xff] }
 0x558   : > { %v11550_v27 = vmax.f32 %v24973_v54, %v11262_v50  ;;  %v15015_v57 = vpack.c.bf16 %v17061_v26, %v17113_v13  ;;  %v17122_v33 = vunpack.i.h.bf16 %v22892_v6  ;;  %v24976_v14 = vmax.f32 %v24974_v32, %v24975_v4 }
 0x559   : > { %v11552_v20 = vmax.f32 %v24970_v60, %v11264_v35  ;;  %v11844_v61 = vadd.f32 %v22647_v40, %v11549_v63  ;;  %v12134_v31 = vmax.f32 %v11846_v53, 0.0  ;;  %v16502_v44 = vpop.f32.mrb[56].mxu0  ;;  %v22912_v43 = vpop.trf.xlu1  ;;  %v15011_v48 = vpack.c.bf16 %v17058_v5, %v17110_v49 }
 0x55a   : > { %v11845_v0 = vadd.f32 %v22647_v40, %v11550_v27  ;;  %v16794_v19 = vpop.f32.mrb[56].mxu1  ;;  %17349 = vxpose.xlu1.b32.cont [4/16] (narrow) %v17348_v9, 32  ;;  %v8329_v47 = vpop.f32.mrb[57].mxu0  ;;  %14916 = vst.msk [vmem:[%s22463_s7 + $0xf8] sm:$0xff] %vm22467_vm3, %v15015_v57  ;;  %v17119_v5 = vunpack.i.l.bf16 %v22892_v6  ;;  %v17127_v25 = vunpack.i.h.bf16 %v22912_v43 }
 0x55b   : > { %v11847_v51 = vadd.f32 %v22647_v40, %v11552_v20  ;;  %v12132_v11 = vmax.f32 %v11844_v61, 0.0  ;;  %v11267_v39 = vmax.f32 %v16502_v44, %v16794_v19  ;;  %v10954_v42 = vpop.f32.mrb[57].mxu1  ;;  %v16503_v29 = vpop.f32.mrb[58].mxu0  ;;  %v22917_v30 = vpack.i.bf16 %v12134_v31, %v12116_v16  ;;  %14908 = vst.msk [vmem:[%s22463_s7 + $0xd8] sm:$0xff] %vm22467_vm3, %v15011_v48  ;;  %v24980_v31 = vld [vmem:[#allocation520_spill] sm:$0xff]  ;;  %v24984_v19 = vld [vmem:[#allocation523_spill] sm:$0xff] }
 0x55c   : > { %v12133_v26 = vmax.f32 %v11845_v0, 0.0  ;;  %v11265_v63 = vmax.f32 %v8329_v47, %v10954_v42  ;;  %v16795_v50 = vpop.f32.mrb[58].mxu1  ;;  %v8332_v53 = vpop.f32.mrb[59].mxu0  ;;  %v17174_v61 = vunpack.i.h.bf16 %v22871_v7  ;;  %v24983_v0 = vld [vmem:[#allocation522_spill] sm:$0xff] }
 0x55d   : > { %v12135_v35 = vmax.f32 %v11847_v51, 0.0  ;;  %v17354_v9 = vpack.i.bf16 %v12132_v11, %v12114_v18  ;;  %v11555_v16 = vmax.f32 %v24976_v14, %v11267_v39  ;;  %v11268_v60 = vmax.f32 %v16503_v29, %v16795_v50  ;;  %v10957_v20 = vpop.f32.mrb[59].mxu1  ;;  %v22936_v52 = vpop.trf.xlu1  ;;  %v24978_v18 = vld [vmem:[#allocation519_spill] sm:$0xff] }
 0x55e   : > { %v24979_v56 = vmax.f32 %v24977_v62, %v24978_v18  ;;  %v11266_v6 = vmax.f32 %v8332_v53, %v10957_v20  ;;  %17351 = vxpose.xlu1.b32.cont [5/16] (narrow) %v17350_v36, 32  ;;  %v17356_v27 = vpack.i.bf16 %v12133_v26, %v12115_v58  ;;  %v15020_v44 = vpack.c.bf16 %v17122_v33, %v17174_v61  ;;  %v22947_v57 = vpop.trf.xlu0 }
 0x55f   : > { %v22933_v13 = vpack.i.bf16 %v12135_v35, %v12117_v22  ;;  %v11850_v49 = vadd.f32 %v22647_v40, %v11555_v16  ;;  %v24982_v22 = vmax.f32 %v24980_v31, %v24981_v28  ;;  %v24985_v47 = vmax.f32 %v24983_v0, %v24984_v19  ;;  %v24989_v28 = vld [vmem:[#allocation526_spill] sm:$0xff]  ;;  %v24992_v0 = vld [vmem:[#allocation528_spill] sm:$0xff]  ;;  %v24993_v19 = vld [vmem:[#allocation529_spill] sm:$0xff] }
 0x560   : > { %v11553_v54 = vmax.f32 %v24979_v56, %v11265_v63  ;;  %v17171_v36 = vunpack.i.l.bf16 %v22871_v7  ;;  %14929 = vst.msk [vmem:[%s22463_s7 + $0x120] sm:$0xff] %vm22467_vm3, %v15020_v44  ;;  %v17124_v50 = vunpack.i.l.bf16 %v22912_v43  ;;  %v24986_v43 = vld [vmem:[#allocation524_spill] sm:$0xff] }
 0x561   : > { %v11556_v51 = vmax.f32 %v24982_v22, %v11268_v60  ;;  %v11554_v48 = vmax.f32 %v24985_v47, %v11266_v6  ;;  %v12138_v58 = vmax.f32 %v11850_v49, 0.0  ;;  %v16506_v39 = vpop.f32.mrb[60].mxu0  ;;  %v22959_v33 = vpop.trf.xlu1  ;;  %v17179_v60 = vunpack.i.h.bf16 %v22908_v38 }
 0x562   : > { %v11848_v11 = vadd.f32 %v22647_v40, %v11553_v54  ;;  %v16798_v26 = vpop.f32.mrb[60].mxu1  ;;  %17353 = vxpose.xlu1.b32.cont [6/16] (narrow) %v22887_v17, 32  ;;  %v8345_v63 = vpop.f32.mrb[61].mxu0  ;;  %v15016_v7 = vpack.c.bf16 %v17119_v5, %v17171_v36  ;;  %v24987_v5 = vld [vmem:[#allocation525_spill] sm:$0xff]  ;;  %v24991_v22 = vmax.f32 %v24989_v28, %v24990_v8  ;;  %v24994_v47 = vmax.f32 %v24992_v0, %v24993_v19 }
 0x563   : > { %v11851_v35 = vadd.f32 %v22647_v40, %v11556_v51  ;;  %v11849_v29 = vadd.f32 %v22647_v40, %v11554_v48  ;;  %v11271_v32 = vmax.f32 %v16506_v39, %v16798_v26  ;;  %v10970_v4 = vpop.f32.mrb[61].mxu1  ;;  %v16507_v14 = vpop.f32.mrb[62].mxu0  ;;  %v22966_v16 = vpack.i.bf16 %v12138_v58, %v12120_v23 }
 0x564   : > { %v12136_v42 = vmax.f32 %v11848_v11, 0.0  ;;  %v11269_v61 = vmax.f32 %v8345_v63, %v10970_v4  ;;  %v16799_v62 = vpop.f32.mrb[62].mxu1  ;;  %v8348_v18 = vpop.f32.mrb[63].mxu0  ;;  %14921 = vst.msk [vmem:[%s22463_s7 + $0x100] sm:$0xff] %vm22467_vm3, %v15016_v7  ;;  %v24988_v56 = vmax.f32 %v24986_v43, %v24987_v5  ;;  %v15021_v49 = vpack.c.bf16 %v17127_v25, %v17179_v60 }
 0x565   : > { %v12139_v53 = vmax.f32 %v11851_v35, 0.0  ;;  %v12137_v20 = vmax.f32 %v11849_v29, 0.0  ;;  %v11272_v23 = vmax.f32 %v16507_v14, %v16799_v62  ;;  %v10973_v54 = vpop.f32.mrb[63].mxu1  ;;  %v17185_v31 = vpop.trf.xlu0  ;;  %v17132_v36 = vunpack.i.h.bf16 %v22936_v52 }
 0x566   : > { %v22971_v17 = vpack.i.bf16 %v12136_v42, %v12118_v41  ;;  %v11559_v12 = vmax.f32 %v24988_v56, %v11271_v32  ;;  %v11557_v41 = vmax.f32 %v24991_v22, %v11269_v61  ;;  %v11270_v51 = vmax.f32 %v8348_v18, %v10973_v54  ;;  %17355 = vxpose.xlu1.b32.cont [7/16] (narrow) %v17354_v9, 32  ;;  %v17246_v11 = vpop.trf.xlu1 }
 0x567   : > { %v22981_v6 = vpack.i.bf16 %v12139_v53, %v12121_v3  ;;  %v22988_v44 = vpack.i.bf16 %v12137_v20, %v12119_v46  ;;  %v11560_v48 = vmax.f32 %v24994_v47, %v11272_v23  ;;  %14930 = vst.msk [vmem:[%s22463_s7 + $0x128] sm:$0xff] %vm22467_vm3, %v15021_v49  ;;  %v17176_v3 = vunpack.i.l.bf16 %v22908_v38  ;;  %v24996_v46 = vld [vmem:[#allocation531_spill] sm:$0xff] }
 0x568   : > { %v11854_v55 = vadd.f32 %v22647_v40, %v11559_v12  ;;  %v11852_v9 = vadd.f32 %v22647_v40, %v11557_v41  ;;  %v24997_v25 = vmax.f32 %v24995_v24, %v24996_v46  ;;  %v17129_v29 = vunpack.i.l.bf16 %v22936_v52 }
 0x569   : > { %v11855_v35 = vadd.f32 %v22647_v40, %v11560_v48  ;;  %v15017_v42 = vpack.c.bf16 %v17124_v50, %v17176_v3  ;;  %v17194_v26 = vpop.trf.xlu0  ;;  %v17184_v38 = vunpack.i.h.bf16 %v22947_v57  ;;  %v17181_v50 = vunpack.i.l.bf16 %v22947_v57 }
 0x56a   : > { %v11558_v58 = vmax.f32 %v24997_v25, %v11270_v51  ;;  %v12142_v39 = vmax.f32 %v11854_v55, 0.0  ;;  %v12140_v63 = vmax.f32 %v11852_v9, 0.0  ;;  %17357 = vxpose.xlu1.b32.cont [8/16] (narrow) %v17356_v27, 32  ;;  %v17251_v53 = vpop.trf.xlu1  ;;  %v17137_v27 = vunpack.i.h.bf16 %v22959_v33 }
 0x56b   : > { %v12143_v32 = vmax.f32 %v11855_v35, 0.0  ;;  %14922 = vst.msk [vmem:[%s22463_s7 + $0x108] sm:$0xff] %vm22467_vm3, %v15017_v42  ;;  %v15018_v20 = vpack.c.bf16 %v17129_v29, %v17181_v50  ;;  %v17134_v37 = vunpack.i.l.bf16 %v22959_v33  ;;  %v17186_v21 = vunpack.i.l.bf16 %v17185_v31 }
 0x56c   : > { %v11853_v7 = vadd.f32 %v22647_v40, %v11558_v58  ;;  %v17394_v4 = vpack.i.bf16 %v12142_v39, %v12124_v1  ;;  %v17370_v14 = vpack.i.bf16 %v12140_v63, %v12122_v2  ;;  %v15022_v40 = vpack.c.bf16 %v17132_v36, %v17184_v38 }
 0x56d   : > { %v17396_v60 = vpack.i.bf16 %v12143_v32, %v12125_v59  ;;  %v17199_v15 = vpop.trf.xlu0  ;;  %v17189_v2 = vunpack.i.h.bf16 %v17185_v31  ;;  %14923 = vst.msk [vmem:[%s22463_s7 + $0x110] sm:$0xff] %vm22467_vm3, %v15018_v20  ;;  %v17198_v59 = vunpack.i.h.bf16 %v17194_v26  ;;  %v17250_v62 = vunpack.i.h.bf16 %v17246_v11 }
 0x56e   : > { %v12141_v52 = vmax.f32 %v11853_v7, 0.0  ;;  %17395 = vxpose.xlu0.b32.start [1/2] (short) (narrow) %v17394_v4, 32  ;;  %17359 = vxpose.xlu1.b32.cont [9/16] (narrow) %v22917_v30, 32  ;;  %14931 = vst.msk [vmem:[%s22463_s7 + $0x130] sm:$0xff] %vm22467_vm3, %v15022_v40  ;;  %v17256_v57 = vpop.trf.xlu1  ;;  %v17195_v30 = vunpack.i.l.bf16 %v17194_v26  ;;  %v15019_v45 = vpack.c.bf16 %v17134_v37, %v17186_v21  ;;  %v17203_v43 = vunpack.i.h.bf16 %v17199_v15 }
 0x56f   : > { %v15023_v61 = vpack.c.bf16 %v17137_v27, %v17189_v2  ;;  %v15028_v33 = vpack.c.bf16 %v17198_v59, %v17250_v62  ;;  %v17200_v56 = vunpack.i.l.bf16 %v17199_v15  ;;  %v17255_v12 = vunpack.i.h.bf16 %v17251_v53 }
 0x570   : > { %v17372_v1 = vpack.i.bf16 %v12141_v52, %v12123_v34  ;;  %v17247_v34 = vunpack.i.l.bf16 %v17246_v11  ;;  %14924 = vst.msk [vmem:[%s22463_s7 + $0x118] sm:$0xff] %vm22467_vm3, %v15019_v45  ;;  %v17252_v23 = vunpack.i.l.bf16 %v17251_v53  ;;  %v17260_v31 = vunpack.i.h.bf16 %v17256_v57 }
 0x571   : > { %v17204_v18 = vpop.trf.xlu0  ;;  %14932 = vst.msk [vmem:[%s22463_s7 + $0x138] sm:$0xff] %vm22467_vm3, %v15023_v61  ;;  %14945 = vst.msk [vmem:[%s22463_s7 + $0x160] sm:$0xff] %vm22467_vm3, %v15028_v33  ;;  %v17257_v41 = vunpack.i.l.bf16 %v17256_v57 }
 0x572   : > { %17397 = vxpose.xlu0.b32.end [2/2] (short) (narrow) %v17396_v60, 32  ;;  %17361 = vxpose.xlu1.b32.cont [10/16] (narrow) %v22933_v13, 32  ;;  %v15024_v5 = vpack.c.bf16 %v17195_v30, %v17247_v34  ;;  %v17208_v54 = vunpack.i.h.bf16 %v17204_v18  ;;  %v15029_v13 = vpack.c.bf16 %v17203_v43, %v17255_v12  ;;  %v17205_v49 = vunpack.i.l.bf16 %v17204_v18  ;;  %v17261_v8 = vpop.trf.xlu1 }
 0x573   : > { %v15025_v22 = vpack.c.bf16 %v17200_v56, %v17252_v23  ;;  %v17265_v47 = vunpack.i.h.bf16 %v17261_v8  ;;  %v17262_v48 = vunpack.i.l.bf16 %v17261_v8 }
 0x574   : > { %14937 = vst.msk [vmem:[%s22463_s7 + $0x140] sm:$0xff] %vm22467_vm3, %v15024_v5  ;;  %14946 = vst.msk [vmem:[%s22463_s7 + $0x168] sm:$0xff] %vm22467_vm3, %v15029_v13  ;;  %v15030_v51 = vpack.c.bf16 %v17208_v54, %v17260_v31  ;;  %v15026_v0 = vpack.c.bf16 %v17205_v49, %v17257_v41 }
 0x575   : > { %v17209_v28 = vpop.trf.xlu0  ;;  %14938 = vst.msk [vmem:[%s22463_s7 + $0x148] sm:$0xff] %vm22467_vm3, %v15025_v22 }
 0x576   : > { %17363 = vxpose.xlu1.b32.cont [11/16] (narrow) %v22971_v17, 32  ;;  %v17213_v11 = vunpack.i.h.bf16 %v17209_v28  ;;  %v17210_v19 = vunpack.i.l.bf16 %v17209_v28  ;;  %14947 = vst.msk [vmem:[%s22463_s7 + $0x170] sm:$0xff] %vm22467_vm3, %v15030_v51  ;;  %14939 = vst.msk [vmem:[%s22463_s7 + $0x150] sm:$0xff] %vm22467_vm3, %v15026_v0 }
 0x578   : > { %v15031_v17 = vpack.c.bf16 %v17213_v11, %v17265_v47  ;;  %v15027_v55 = vpack.c.bf16 %v17210_v19, %v17262_v48 }
 0x57a   : > { %17365 = vxpose.xlu1.b32.cont [12/16] (narrow) %v22988_v44, 32  ;;  %14948 = vst.msk [vmem:[%s22463_s7 + $0x178] sm:$0xff] %vm22467_vm3, %v15031_v17  ;;  %14940 = vst.msk [vmem:[%s22463_s7 + $0x158] sm:$0xff] %vm22467_vm3, %v15027_v55 }
 0x57e   : > { %17367 = vxpose.xlu1.b32.cont [13/16] (narrow) %v22966_v16, 32 }
 0x582   : > { %17369 = vxpose.xlu1.b32.cont [14/16] (narrow) %v22981_v6, 32 }
 0x585   : > { %v17322_v3 = vpop.trf.xlu0 }
 0x586   : > { %17371 = vxpose.xlu1.b32.cont [15/16] (narrow) %v17370_v14, 32  ;;  %v17326_v24 = vunpack.i.h.bf16 %v17322_v3  ;;  %v17323_v46 = vunpack.i.l.bf16 %v17322_v3 }
 0x589   : > { %v17327_v44 = vpop.trf.xlu0 }
 0x58a   : > { %17373 = vxpose.xlu1.b32.end [16/16] (narrow) %v17372_v1, 32  ;;  %v17331_v16 = vunpack.i.h.bf16 %v17327_v44  ;;  %v17328_v29 = vunpack.i.l.bf16 %v17327_v44 }
 0x58d   : > { %v17332_v36 = vpop.trf.xlu0 }
 0x58e   : > { %v17336_v53 = vunpack.i.h.bf16 %v17332_v36  ;;  %v17333_v32 = vunpack.i.l.bf16 %v17332_v36 }
 0x591   : > { %v17337_v9 = vpop.trf.xlu0 }
 0x592   : > { %v17341_v27 = vunpack.i.h.bf16 %v17337_v9  ;;  %v17338_v60 = vunpack.i.l.bf16 %v17337_v9 }
 0x5a5   : > { %v17270_v25 = vpop.trf.xlu1 }
 0x5a6   : > { %v17274_v58 = vunpack.i.h.bf16 %v17270_v25  ;;  %v17271_v35 = vunpack.i.l.bf16 %v17270_v25 }
 0x5a8   : > { %v15036_v39 = vpack.c.bf16 %v17274_v58, %v17326_v24  ;;  %v15032_v42 = vpack.c.bf16 %v17271_v35, %v17323_v46 }
 0x5a9   : > { %v17275_v6 = vpop.trf.xlu1 }
 0x5aa   : > { %14961 = vst.msk [vmem:[%s22463_s7 + $0x1a0] sm:$0xff] %vm22467_vm3, %v15036_v39  ;;  %14953 = vst.msk [vmem:[%s22463_s7 + $0x180] sm:$0xff] %vm22467_vm3, %v15032_v42  ;;  %v17279_v26 = vunpack.i.h.bf16 %v17275_v6  ;;  %v17276_v63 = vunpack.i.l.bf16 %v17275_v6 }
 0x5ac   : > { %v15037_v7 = vpack.c.bf16 %v17279_v26, %v17331_v16  ;;  %v15033_v38 = vpack.c.bf16 %v17276_v63, %v17328_v29 }
 0x5ad   : > { %v17280_v4 = vpop.trf.xlu1 }
 0x5ae   : > { %14962 = vst.msk [vmem:[%s22463_s7 + $0x1a8] sm:$0xff] %vm22467_vm3, %v15037_v7  ;;  %14954 = vst.msk [vmem:[%s22463_s7 + $0x188] sm:$0xff] %vm22467_vm3, %v15033_v38  ;;  %v17284_v50 = vunpack.i.h.bf16 %v17280_v4  ;;  %v17281_v52 = vunpack.i.l.bf16 %v17280_v4 }
 0x5b0   : > { %v15038_v14 = vpack.c.bf16 %v17284_v50, %v17336_v53  ;;  %v15034_v40 = vpack.c.bf16 %v17281_v52, %v17333_v32 }
 0x5b1   : > { %v17285_v20 = vpop.trf.xlu1 }
 0x5b2   : > { %14963 = vst.msk [vmem:[%s22463_s7 + $0x1b0] sm:$0xff] %vm22467_vm3, %v15038_v14  ;;  %14955 = vst.msk [vmem:[%s22463_s7 + $0x190] sm:$0xff] %vm22467_vm3, %v15034_v40  ;;  %v17289_v15 = vunpack.i.h.bf16 %v17285_v20  ;;  %v17286_v1 = vunpack.i.l.bf16 %v17285_v20 }
 0x5b4   : > { %v15039_v37 = vpack.c.bf16 %v17289_v15, %v17341_v27  ;;  %v15035_v2 = vpack.c.bf16 %v17286_v1, %v17338_v60 }
 0x5b6   : > { %14964 = vst.msk [vmem:[%s22463_s7 + $0x1b8] sm:$0xff] %vm22467_vm3, %v15039_v37  ;;  %14956 = vst.msk [vmem:[%s22463_s7 + $0x198] sm:$0xff] %vm22467_vm3, %v15035_v2 }
 0x5ce   : > { %v17374_v21 = vpop.trf.xlu1 }
 0x5cf   : > { %v17378_v30 = vunpack.i.h.bf16 %v17374_v21  ;;  %v17375_v62 = vunpack.i.l.bf16 %v17374_v21 }
 0x5d2   : > { %v17379_v59 = vpop.trf.xlu1 }
 0x5d3   : > { %v17383_v5 = vunpack.i.h.bf16 %v17379_v59  ;;  %v17380_v56 = vunpack.i.l.bf16 %v17379_v59 }
 0x5d6   : > { %v17384_v57 = vpop.trf.xlu1 }
 0x5d7   : > { %v17388_v31 = vunpack.i.h.bf16 %v17384_v57  ;;  %v17385_v28 = vunpack.i.l.bf16 %v17384_v57 }
 0x5da   : > { %v17389_v61 = vpop.trf.xlu1 }
 0x5db   : > { %v17393_v0 = vunpack.i.h.bf16 %v17389_v61  ;;  %v17390_v19 = vunpack.i.l.bf16 %v17389_v61 }
 0x5ee   : > { %v17398_v45 = vpop.trf.xlu0 }
 0x5ef   : > { %v17402_v34 = vunpack.i.h.bf16 %v17398_v45  ;;  %v17399_v18 = vunpack.i.l.bf16 %v17398_v45 }
 0x5f1   : > { %v15044_v33 = vpack.c.bf16 %v17402_v34, %v17378_v30  ;;  %v15040_v43 = vpack.c.bf16 %v17399_v18, %v17375_v62 }
 0x5f2   : > { %v17403_v12 = vpop.trf.xlu0 }
 0x5f3   : > { %14977 = vst.msk [vmem:[%s22463_s7 + $0x1e0] sm:$0xff] %vm22467_vm3, %v15044_v33  ;;  %14969 = vst.msk [vmem:[%s22463_s7 + $0x1c0] sm:$0xff] %vm22467_vm3, %v15040_v43  ;;  %v17407_v23 = vunpack.i.h.bf16 %v17403_v12  ;;  %v17404_v54 = vunpack.i.l.bf16 %v17403_v12 }
 0x5f5   : > { %v15045_v13 = vpack.c.bf16 %v17407_v23, %v17383_v5  ;;  %v15041_v49 = vpack.c.bf16 %v17404_v54, %v17380_v56 }
 0x5f6   : > { %v17408_v8 = vpop.trf.xlu0 }
 0x5f7   : > { %14978 = vst.msk [vmem:[%s22463_s7 + $0x1e8] sm:$0xff] %vm22467_vm3, %v15045_v13  ;;  %14970 = vst.msk [vmem:[%s22463_s7 + $0x1c8] sm:$0xff] %vm22467_vm3, %v15041_v49  ;;  %v17412_v22 = vunpack.i.h.bf16 %v17408_v8  ;;  %v17409_v41 = vunpack.i.l.bf16 %v17408_v8 }
 0x5f9   : > { %v15046_v51 = vpack.c.bf16 %v17412_v22, %v17388_v31  ;;  %v15042_v11 = vpack.c.bf16 %v17409_v41, %v17385_v28 }
 0x5fa   : > { %v17413_v47 = vpop.trf.xlu0 }
 0x5fb   : > { %14979 = vst.msk [vmem:[%s22463_s7 + $0x1f0] sm:$0xff] %vm22467_vm3, %v15046_v51  ;;  %14971 = vst.msk [vmem:[%s22463_s7 + $0x1d0] sm:$0xff] %vm22467_vm3, %v15042_v11  ;;  %v17417_v48 = vunpack.i.h.bf16 %v17413_v47  ;;  %v17414_v17 = vunpack.i.l.bf16 %v17413_v47 }
 0x5fd   : > { %v15047_v55 = vpack.c.bf16 %v17417_v48, %v17393_v0  ;;  %v15043_v3 = vpack.c.bf16 %v17414_v17, %v17390_v19 }
 0x5ff   : > { %14980 = vst.msk [vmem:[%s22463_s7 + $0x1f8] sm:$0xff] %vm22467_vm3, %v15047_v55  ;;  %14972 = vst.msk [vmem:[%s22463_s7 + $0x1d8] sm:$0xff] %vm22467_vm3, %v15043_v3 }
 0x600 PF: > { %s13_s12 = sadd.s32 1, %s18006_s12  }
 0x601   : > { %p10_p4 = scmp.ge.s32.totalorder %s13_s12, 4  }
 0x603   :  { %12 = sbr.rel (!%p10_p4) target bundleno = 1 (0x1), region = 77 }

// kernel: net_forward.3
= control target key start
LH: loop header
LB: loop body
LE: loop exit
PB: predicated region body
PF: predicated region fallthrough
CT: control target
= control target key end

     0   :  { %s4863_s18 = smov 0   ;;  %s5848_s0 = inlined_call_operand.vmem [shape: bf16[32,4608], index: 0, kind: input, shape index: {}]   ;;  %s5849_s1 = inlined_call_operand.vmem [shape: bf16[4608,128], index: 1, kind: input, shape index: {}]   ;;  %s5850_s2 = inlined_call_operand.vmem [shape: f32[1,128], index: 2, kind: input, shape index: {}]   ;;  %s5851_s3 = inlined_call_operand.vmem [shape: f32[128,10], index: 3, kind: input, shape index: {}]   ;;  %s5852_s4 = inlined_call_operand.vmem [shape: f32[1,10], index: 4, kind: input, shape index: {}]   ;;  %s5853_s5 = inlined_call_operand.vmem [shape: f32[32,10], index: 5, kind: output, shape index: {}]  }
   0x1 LB: > { %s3656_s19 = sadd.s32 4294967295, %s4831_s18   ;;  %p3660_p0 = scmp.ge.s32.totalorder %s4831_s18, 1  ;;  %s4831_s18 = sphi %s4863_s18, %s15_s18  }
   0x2   : > { %p189_p1 = scmp.lt.s32.totalorder %s4831_s18, 3 }
   0x4   : > { %p190_p2 = pnand %p3660_p0, %p189_p1 }
   0x5   : > { %v4483_v0 = vld [vmem:[%s5849_s1 + $0x40] sm:$0xff] (!%p190_p2)   ;;  %v4487_v4 = vld [vmem:[%s5849_s1 + $0x48] sm:$0xff] (!%p190_p2)   ;;  %v4491_v8 = vld [vmem:[%s5849_s1 + $0x50] sm:$0xff] (!%p190_p2)   ;;  %s3661_s27 = sshll.u32 (!%p190_p2), %s3656_s19, 1  ;;  %vm3597_vm0 = vcmask (!%p190_p2), 80896  }
   0x6   : > { %193 = sbr.rel (%p190_p2) target bundleno = 734 (0x2de), region = 40  ;;  %v4484_v1 = vld [vmem:[%s5849_s1 + $0xc0] sm:$0xff] (!%p190_p2)   ;;  %3993 = vmatprep.subr.bf16.mxu0 (!%p190_p2), %v4483_v0  ;;  %v4488_v5 = vld [vmem:[%s5849_s1 + $0xc8] sm:$0xff] (!%p190_p2)   ;;  %v4492_v9 = vld [vmem:[%s5849_s1 + $0xd0] sm:$0xff] (!%p190_p2)   ;;  %p219_p3 = scmp.lt.s32.totalorder (!%p190_p2), %s3661_s27, 3 }
   0x7   : > { %v4485_v2 = vld [vmem:[%s5849_s1] sm:$0xff] (!%p190_p2)   ;;  %4015 = vmatprep.subr.bf16.mxu1 (!%p190_p2), %v4484_v1  ;;  %v4489_v6 = vld [vmem:[%s5849_s1 + $0x8] sm:$0xff] (!%p190_p2)   ;;  %v4493_v10 = vld [vmem:[%s5849_s1 + $0x10] sm:$0xff] (!%p190_p2)  }
   0x8   : > { %v4486_v3 = vld [vmem:[%s5849_s1 + $0x80] sm:$0xff] (!%p190_p2)   ;;  %3994 = vmatpush3.bf16.msra.mxu0 (!%p190_p2), %v4485_v2  ;;  %v4490_v7 = vld [vmem:[%s5849_s1 + $0x88] sm:$0xff] (!%p190_p2)   ;;  %v4494_v11 = vld [vmem:[%s5849_s1 + $0x90] sm:$0xff] (!%p190_p2)  }
   0x9   : > { %4016 = vmatpush3.bf16.msra.mxu1 (!%p190_p2), %v4486_v3  ;;  %3995 = vmatprep.subr.bf16.mxu0 (!%p190_p2), %v4487_v4  ;;  %v4495_v12 = vld [vmem:[%s5849_s1 + $0x58] sm:$0xff] (!%p190_p2)   ;;  %v4499_v16 = vld [vmem:[%s5849_s1 + $0x60] sm:$0xff] (!%p190_p2)   ;;  %v4503_v20 = vld [vmem:[%s5849_s1 + $0x68] sm:$0xff] (!%p190_p2)  }
   0xa   : > { %4017 = vmatprep.subr.bf16.mxu1 (!%p190_p2), %v4488_v5  ;;  %v4496_v13 = vld [vmem:[%s5849_s1 + $0xd8] sm:$0xff] (!%p190_p2)   ;;  %v4500_v17 = vld [vmem:[%s5849_s1 + $0xe0] sm:$0xff] (!%p190_p2)   ;;  %v4504_v21 = vld [vmem:[%s5849_s1 + $0xe8] sm:$0xff] (!%p190_p2)  }
   0xb   : > { %v4497_v14 = vld [vmem:[%s5849_s1 + $0x18] sm:$0xff] (!%p190_p2)   ;;  %v4501_v18 = vld [vmem:[%s5849_s1 + $0x20] sm:$0xff] (!%p190_p2)   ;;  %v4505_v22 = vld [vmem:[%s5849_s1 + $0x28] sm:$0xff] (!%p190_p2)  }
   0xc   : > { %3996 = vmatpush3.bf16.msra.mxu0 (!%p190_p2), %v4489_v6  ;;  %v4498_v15 = vld [vmem:[%s5849_s1 + $0x98] sm:$0xff] (!%p190_p2)   ;;  %v4502_v19 = vld [vmem:[%s5849_s1 + $0xa0] sm:$0xff] (!%p190_p2)   ;;  %v4506_v23 = vld [vmem:[%s5849_s1 + $0xa8] sm:$0xff] (!%p190_p2)  }
   0xd   : > { %4018 = vmatpush3.bf16.msra.mxu1 %v4490_v7  ;;  %3997 = vmatprep.subr.bf16.mxu0 %v4491_v8  ;;  %s5855_s27 = smov (!%p219_p3, %s3661_s27), 3  ;;  %v4507_v24 = vld [vmem:[%s5849_s1 + $0x70] sm:$0xff]   ;;  %v4511_v28 = vld [vmem:[%s5849_s1 + $0x78] sm:$0xff]   ;;  %v4521_v36 = vld [vmem:[%s5849_s1 + $0x140] sm:$0xff]  }
   0xe   : > { %4019 = vmatprep.subr.bf16.mxu1 %v4492_v9  ;;  %v4508_v25 = vld [vmem:[%s5849_s1 + $0xf0] sm:$0xff]   ;;  %s4474_s26 = smul.u32 144, %s5855_s27  ;;  %v4512_v29 = vld [vmem:[%s5849_s1 + $0xf8] sm:$0xff]   ;;  %v4522_v37 = vld [vmem:[%s5849_s1 + $0x1c0] sm:$0xff]   ;;  %s3664_s19 = sshll.u32 %s5855_s27, 3 }
   0xf   : > { %v4509_v26 = vld [vmem:[%s5849_s1 + $0x30] sm:$0xff]   ;;  %v4513_v30 = vld [vmem:[%s5849_s1 + $0x38] sm:$0xff]   ;;  %v4523_v38 = vld [vmem:[%s5849_s1 + $0x100] sm:$0xff]   ;;  %s229_s16 = scalar_lea.vmem %s5853_s5, %s3664_s19 }
  0x10   : > { %3998 = vmatpush3.bf16.msra.mxu0 %v4493_v10  ;;  %v4510_v27 = vld [vmem:[%s5849_s1 + $0xb0] sm:$0xff]   ;;  %s4969_s12 = scalar_lea.vmem %s5848_s0, %s4474_s26  ;;  %v4514_v31 = vld [vmem:[%s5849_s1 + $0xb8] sm:$0xff]   ;;  %v4524_v39 = vld [vmem:[%s5849_s1 + $0x180] sm:$0xff]  }
  0x11   : > { %4020 = vmatpush3.bf16.msra.mxu1 %v4494_v11  ;;  %3999 = vmatprep.subr.bf16.mxu0 %v4495_v12  ;;  %v4515_v32 = vld [vmem:[%s4969_s12] ss:$144 sps:$4 sm:$0xff]   ;;  %v4517_v33 = vld [vmem:[%s4969_s12 + $0x4] ss:$144 sps:$4 sm:$0xff]   ;;  %v4518_v34 = vld [vmem:[%s4969_s12 + $0x8] ss:$144 sps:$4 sm:$0xff]  }
  0x12   : > { %4021 = vmatprep.subr.bf16.mxu1 %v4496_v13  ;;  %v4520_v35 = vld [vmem:[%s4969_s12 + $0xc] ss:$144 sps:$4 sm:$0xff]   ;;  %2791 = vmatprep.mubr.bf16.mxu0 %v4517_v33  ;;  %v4529_v44 = vld [vmem:[%s5849_s1 + $0x150] sm:$0xff]   ;;  %v4537_v52 = vld [vmem:[%s5849_s1 + $0x160] sm:$0xff]  }
  0x13   : > { %2832 = vmatprep.mubr.bf16.mxu1 %v4520_v35  ;;  %v4525_v40 = vld [vmem:[%s5849_s1 + $0x148] sm:$0xff]   ;;  %v4530_v45 = vld [vmem:[%s5849_s1 + $0x1d0] sm:$0xff]   ;;  %v4533_v48 = vld [vmem:[%s5849_s1 + $0x158] sm:$0xff]  }
  0x14   : > { %4000 = vmatpush3.bf16.msra.mxu0 %v4497_v14  ;;  %v4526_v41 = vld [vmem:[%s5849_s1 + $0x1c8] sm:$0xff]   ;;  %v4531_v46 = vld [vmem:[%s5849_s1 + $0x110] sm:$0xff]   ;;  %v4534_v49 = vld [vmem:[%s5849_s1 + $0x1d8] sm:$0xff]  }
  0x15   : > { %4022 = vmatpush3.bf16.msra.mxu1 %v4498_v15  ;;  %4001 = vmatprep.subr.bf16.mxu0 %v4499_v16  ;;  %v4527_v42 = vld [vmem:[%s5849_s1 + $0x108] sm:$0xff]   ;;  %v4532_v47 = vld [vmem:[%s5849_s1 + $0x190] sm:$0xff]   ;;  %v4535_v50 = vld [vmem:[%s5849_s1 + $0x118] sm:$0xff]  }
  0x16   : > { %4023 = vmatprep.subr.bf16.mxu1 %v4500_v17  ;;  %v4528_v43 = vld [vmem:[%s5849_s1 + $0x188] sm:$0xff]   ;;  %v4536_v51 = vld [vmem:[%s5849_s1 + $0x198] sm:$0xff]   ;;  %v4538_v53 = vld [vmem:[%s5849_s1 + $0x1e0] sm:$0xff]  }
  0x17   : > { %v4539_v54 = vld [vmem:[%s5849_s1 + $0x120] sm:$0xff]   ;;  %v4541_v56 = vld [vmem:[%s5849_s1 + $0x168] sm:$0xff]   ;;  %v4545_v60 = vld [vmem:[%s5849_s1 + $0x170] sm:$0xff]  }
  0x18   : > { %4002 = vmatpush3.bf16.msra.mxu0 %v4501_v18  ;;  %v4540_v55 = vld [vmem:[%s5849_s1 + $0x1a0] sm:$0xff]   ;;  %v4542_v57 = vld [vmem:[%s5849_s1 + $0x1e8] sm:$0xff]   ;;  %v4546_v61 = vld [vmem:[%s5849_s1 + $0x1f0] sm:$0xff]  }
  0x19   : > { %4024 = vmatpush3.bf16.msra.mxu1 %v4502_v19  ;;  %4003 = vmatprep.subr.bf16.mxu0 %v4503_v20  ;;  %v4543_v58 = vld [vmem:[%s5849_s1 + $0x128] sm:$0xff]   ;;  %v4547_v62 = vld [vmem:[%s5849_s1 + $0x130] sm:$0xff]   ;;  %v4549_v0 = vld [vmem:[%s5849_s1 + $0x178] sm:$0xff]  }
  0x1a   : > { %4025 = vmatprep.subr.bf16.mxu1 %v4504_v21  ;;  %v4544_v59 = vld [vmem:[%s5849_s1 + $0x1a8] sm:$0xff]   ;;  %v4548_v63 = vld [vmem:[%s5849_s1 + $0x1b0] sm:$0xff]   ;;  %v4550_v1 = vld [vmem:[%s5849_s1 + $0x1f8] sm:$0xff]  }
  0x1b   : > { %v4551_v2 = vld [vmem:[%s5849_s1 + $0x138] sm:$0xff]   ;;  %v4553_v4 = vld [vmem:[%s4969_s12 + $0x10] ss:$144 sps:$4 sm:$0xff]   ;;  %v4555_v5 = vld [vmem:[%s4969_s12 + $0x14] ss:$144 sps:$4 sm:$0xff]  }
  0x1c   : > { %4004 = vmatpush3.bf16.msra.mxu0 %v4505_v22  ;;  %v4552_v3 = vld [vmem:[%s5849_s1 + $0x1b8] sm:$0xff]   ;;  %v4559_v8 = vld [vmem:[%s5849_s1 + $0x240] sm:$0xff]   ;;  %v4563_v12 = vld [vmem:[%s5849_s1 + $0x248] sm:$0xff]  }
  0x1d   : > { %4026 = vmatpush3.bf16.msra.mxu1 %v4506_v23  ;;  %4005 = vmatprep.subr.bf16.mxu0 %v4507_v24  ;;  %v4556_v6 = vld [vmem:[%s4969_s12 + $0x18] ss:$144 sps:$4 sm:$0xff]   ;;  %v4558_v7 = vld [vmem:[%s4969_s12 + $0x1c] ss:$144 sps:$4 sm:$0xff]   ;;  %v4560_v9 = vld [vmem:[%s5849_s1 + $0x2c0] sm:$0xff]  }
  0x1e   : > { %4027 = vmatprep.subr.bf16.mxu1 %v4508_v25  ;;  %v4561_v10 = vld [vmem:[%s5849_s1 + $0x200] sm:$0xff]   ;;  %v4564_v13 = vld [vmem:[%s5849_s1 + $0x2c8] sm:$0xff]   ;;  %v4567_v16 = vld [vmem:[%s5849_s1 + $0x250] sm:$0xff]  }
  0x1f   : > { %v4562_v11 = vld [vmem:[%s5849_s1 + $0x280] sm:$0xff]   ;;  %v4565_v14 = vld [vmem:[%s5849_s1 + $0x208] sm:$0xff]   ;;  %v4568_v17 = vld [vmem:[%s5849_s1 + $0x2d0] sm:$0xff]  }
  0x20   : > { %4006 = vmatpush3.bf16.msra.mxu0 %v4509_v26  ;;  %v4566_v15 = vld [vmem:[%s5849_s1 + $0x288] sm:$0xff]   ;;  %v4569_v18 = vld [vmem:[%s5849_s1 + $0x210] sm:$0xff]   ;;  %v4571_v20 = vld [vmem:[%s5849_s1 + $0x258] sm:$0xff]  }
  0x21   : > { %4028 = vmatpush3.bf16.msra.mxu1 %v4510_v27  ;;  %4007 = vmatprep.subr.bf16.mxu0 %v4511_v28  ;;  %v4570_v19 = vld [vmem:[%s5849_s1 + $0x290] sm:$0xff]   ;;  %v4572_v21 = vld [vmem:[%s5849_s1 + $0x2d8] sm:$0xff]   ;;  %v4575_v24 = vld [vmem:[%s5849_s1 + $0x260] sm:$0xff]  }
  0x22   : > { %4029 = vmatprep.subr.bf16.mxu1 %v4512_v29  ;;  %v4573_v22 = vld [vmem:[%s5849_s1 + $0x218] sm:$0xff]   ;;  %v4576_v25 = vld [vmem:[%s5849_s1 + $0x2e0] sm:$0xff]   ;;  %v4579_v28 = vld [vmem:[%s5849_s1 + $0x268] sm:$0xff]  }
  0x23   : > { %v4574_v23 = vld [vmem:[%s5849_s1 + $0x298] sm:$0xff]   ;;  %v4577_v26 = vld [vmem:[%s5849_s1 + $0x220] sm:$0xff]   ;;  %v4580_v29 = vld [vmem:[%s5849_s1 + $0x2e8] sm:$0xff]  }
  0x24   : > { %4008 = vmatpush3.bf16.msra.mxu0 %v4513_v30  ;;  %v4578_v27 = vld [vmem:[%s5849_s1 + $0x2a0] sm:$0xff]   ;;  %v4581_v30 = vld [vmem:[%s5849_s1 + $0x228] sm:$0xff]   ;;  %v4584_v33 = vld [vmem:[%s5849_s1 + $0x2f0] sm:$0xff]  }
  0x25   : > { %4030 = vmatpush3.bf16.msra.mxu1 %v4514_v31  ;;  %4037 = vmatprep.subr.bf16.mxu0 %v4521_v36  ;;  %v4582_v31 = vld [vmem:[%s5849_s1 + $0x2a8] sm:$0xff]   ;;  %v4586_v35 = vld [vmem:[%s5849_s1 + $0x2b0] sm:$0xff]   ;;  %v4587_v36 = vld [vmem:[%s5849_s1 + $0x278] sm:$0xff]  }
  0x26   : > { %4059 = vmatprep.subr.bf16.mxu1 %v4522_v37  ;;  %v4588_v37 = vld [vmem:[%s5849_s1 + $0x2f8] sm:$0xff]  }
  0x27   : > { %2792 = vmatmul.mubr.bf16.vlgmr.msra.gmra.mrb[0].mxu0 %v4515_v32  ;;  %v4583_v32 = vld [vmem:[%s5849_s1 + $0x270] sm:$0xff]  }
  0x28   : > { %2833 = vmatmul.mubr.bf16.vlgmr.msra.gmra.mrb[0].mxu1 %v4518_v34  ;;  %4038 = vmatpush3.bf16.msra.mxu0 %v4523_v38  ;;  %v4585_v34 = vld [vmem:[%s5849_s1 + $0x230] sm:$0xff]   ;;  %v4589_v38 = vld [vmem:[%s5849_s1 + $0x238] sm:$0xff]  }
  0x29   : > { %4060 = vmatpush3.bf16.msra.mxu1 %v4524_v39  ;;  %4039 = vmatprep.subr.bf16.mxu0 %v4525_v40  ;;  %v4590_v39 = vld [vmem:[%s5849_s1 + $0x2b8] sm:$0xff]   ;;  %v4591_v40 = vld [vmem:[%s4969_s12 + $0x20] ss:$144 sps:$4 sm:$0xff]  }
  0x2a   : > { %4061 = vmatprep.subr.bf16.mxu1 %v4526_v41  ;;  %2873 = vmatprep.mubr.bf16.mxu0 %v4555_v5  ;;  %v4593_v41 = vld [vmem:[%s4969_s12 + $0x24] ss:$144 sps:$4 sm:$0xff]  }
  0x2b   : > { %2914 = vmatprep.mubr.bf16.mxu1 %v4558_v7  ;;  %v4622_v5 = vld [vmem:[%s5849_s1 + $0x3f0] sm:$0xff]  }
  0x2c   : > { %4040 = vmatpush3.bf16.msra.mxu0 %v4527_v42  ;;  %v4594_v42 = vld [vmem:[%s4969_s12 + $0x28] ss:$144 sps:$4 sm:$0xff]   ;;  %v4624_v7 = vld [vmem:[%s5849_s1 + $0x3b0] sm:$0xff]  }
  0x2d   : > { %4062 = vmatpush3.bf16.msra.mxu1 %v4528_v43  ;;  %4041 = vmatprep.subr.bf16.mxu0 %v4529_v44  ;;  %v4596_v43 = vld [vmem:[%s4969_s12 + $0x2c] ss:$144 sps:$4 sm:$0xff]   ;;  %v4597_v44 = vld [vmem:[%s5849_s1 + $0x340] sm:$0xff]  }
  0x2e   : > { %4063 = vmatprep.subr.bf16.mxu1 %v4530_v45  ;;  %v4598_v45 = vld [vmem:[%s5849_s1 + $0x3c0] sm:$0xff]  }
  0x30   : > { %4042 = vmatpush3.bf16.msra.mxu0 %v4531_v46  ;;  %v4599_v46 = vld [vmem:[%s5849_s1 + $0x300] sm:$0xff]  }
  0x31   : > { %4064 = vmatpush3.bf16.msra.mxu1 %v4532_v47  ;;  %4043 = vmatprep.subr.bf16.mxu0 %v4533_v48  ;;  %v4600_v47 = vld [vmem:[%s5849_s1 + $0x380] sm:$0xff]   ;;  %v4601_v48 = vld [vmem:[%s5849_s1 + $0x348] sm:$0xff]  }
  0x32   : > { %4065 = vmatprep.subr.bf16.mxu1 %v4534_v49  ;;  %v4602_v49 = vld [vmem:[%s5849_s1 + $0x3c8] sm:$0xff]  }
  0x34   : > { %4044 = vmatpush3.bf16.msra.mxu0 %v4535_v50  ;;  %v4603_v50 = vld [vmem:[%s5849_s1 + $0x308] sm:$0xff]  }
  0x35   : > { %4066 = vmatpush3.bf16.msra.mxu1 %v4536_v51  ;;  %4045 = vmatprep.subr.bf16.mxu0 %v4537_v52  ;;  %v4604_v51 = vld [vmem:[%s5849_s1 + $0x388] sm:$0xff]   ;;  %v4605_v52 = vld [vmem:[%s5849_s1 + $0x350] sm:$0xff]  }
  0x36   : > { %4067 = vmatprep.subr.bf16.mxu1 %v4538_v53  ;;  %v4606_v53 = vld [vmem:[%s5849_s1 + $0x3d0] sm:$0xff]  }
  0x38   : > { %4046 = vmatpush3.bf16.msra.mxu0 %v4539_v54  ;;  %v4607_v54 = vld [vmem:[%s5849_s1 + $0x310] sm:$0xff]  }
  0x39   : > { %4068 = vmatpush3.bf16.msra.mxu1 %v4540_v55  ;;  %4047 = vmatprep.subr.bf16.mxu0 %v4541_v56  ;;  %v4608_v55 = vld [vmem:[%s5849_s1 + $0x390] sm:$0xff]   ;;  %v4609_v56 = vld [vmem:[%s5849_s1 + $0x358] sm:$0xff]  }
  0x3a   : > { %4069 = vmatprep.subr.bf16.mxu1 %v4542_v57  ;;  %v4610_v57 = vld [vmem:[%s5849_s1 + $0x3d8] sm:$0xff]  }
  0x3c   : > { %4048 = vmatpush3.bf16.msra.mxu0 %v4543_v58  ;;  %v4611_v58 = vld [vmem:[%s5849_s1 + $0x318] sm:$0xff]  }
  0x3d   : > { %4070 = vmatpush3.bf16.msra.mxu1 %v4544_v59  ;;  %4049 = vmatprep.subr.bf16.mxu0 %v4545_v60  ;;  %v4612_v59 = vld [vmem:[%s5849_s1 + $0x398] sm:$0xff]   ;;  %v4613_v60 = vld [vmem:[%s5849_s1 + $0x360] sm:$0xff]  }
  0x3e   : > { %4071 = vmatprep.subr.bf16.mxu1 %v4546_v61  ;;  %v4614_v61 = vld [vmem:[%s5849_s1 + $0x3e0] sm:$0xff]  }
  0x40   : > { %4050 = vmatpush3.bf16.msra.mxu0 %v4547_v62  ;;  %v4615_v62 = vld [vmem:[%s5849_s1 + $0x320] sm:$0xff]  }
  0x41   : > { %4072 = vmatpush3.bf16.msra.mxu1 %v4548_v63  ;;  %4051 = vmatprep.subr.bf16.mxu0 %v4549_v0  ;;  %v4616_v63 = vld [vmem:[%s5849_s1 + $0x3a0] sm:$0xff]   ;;  %v4617_v0 = vld [vmem:[%s5849_s1 + $0x368] sm:$0xff]  }
  0x42   : > { %4073 = vmatprep.subr.bf16.mxu1 %v4550_v1  ;;  %v4618_v1 = vld [vmem:[%s5849_s1 + $0x3e8] sm:$0xff]  }
  0x44   : > { %4052 = vmatpush3.bf16.msra.mxu0 %v4551_v2  ;;  %v4619_v2 = vld [vmem:[%s5849_s1 + $0x328] sm:$0xff]  }
  0x45   : > { %4074 = vmatpush3.bf16.msra.mxu1 %v4552_v3  ;;  %4081 = vmatprep.subr.bf16.mxu0 %v4559_v8  ;;  %v4620_v3 = vld [vmem:[%s5849_s1 + $0x3a8] sm:$0xff]   ;;  %v4625_v8 = vld [vmem:[%s5849_s1 + $0x378] sm:$0xff]  }
  0x46   : > { %4103 = vmatprep.subr.bf16.mxu1 %v4560_v9  ;;  %v4626_v9 = vld [vmem:[%s5849_s1 + $0x3f8] sm:$0xff]  }
  0x47   : > { %2874 = vmatmul.mubr.bf16.vlgmr.msra.gmra.mrb[4].mxu0 %v4553_v4  ;;  %v4621_v4 = vld [vmem:[%s5849_s1 + $0x370] sm:$0xff]  }
  0x48   : > { %2915 = vmatmul.mubr.bf16.vlgmr.msra.gmra.mrb[4].mxu1 %v4556_v6  ;;  %4082 = vmatpush3.bf16.msra.mxu0 %v4561_v10  ;;  %v4623_v6 = vld [vmem:[%s5849_s1 + $0x330] sm:$0xff]   ;;  %v4627_v10 = vld [vmem:[%s5849_s1 + $0x338] sm:$0xff]  }
  0x49   : > { %4104 = vmatpush3.bf16.msra.mxu1 %v4562_v11  ;;  %4083 = vmatprep.subr.bf16.mxu0 %v4563_v12  ;;  %v4628_v11 = vld [vmem:[%s5849_s1 + $0x3b8] sm:$0xff]   ;;  %v4629_v12 = vld [vmem:[%s4969_s12 + $0x30] ss:$144 sps:$4 sm:$0xff]  }
  0x4a   : > { %4105 = vmatprep.subr.bf16.mxu1 %v4564_v13  ;;  %2955 = vmatprep.mubr.bf16.mxu0 %v4593_v41  ;;  %v4631_v13 = vld [vmem:[%s4969_s12 + $0x34] ss:$144 sps:$4 sm:$0xff]  }
  0x4b   : > { %2996 = vmatprep.mubr.bf16.mxu1 %v4596_v43  ;;  %v4660_v41 = vld [vmem:[%s5849_s1 + $0x4f0] sm:$0xff]  }
  0x4c   : > { %4084 = vmatpush3.bf16.msra.mxu0 %v4565_v14  ;;  %v4632_v14 = vld [vmem:[%s4969_s12 + $0x38] ss:$144 sps:$4 sm:$0xff]   ;;  %v4662_v43 = vld [vmem:[%s5849_s1 + $0x4b0] sm:$0xff]  }
  0x4d   : > { %4106 = vmatpush3.bf16.msra.mxu1 %v4566_v15  ;;  %4085 = vmatprep.subr.bf16.mxu0 %v4567_v16  ;;  %v4634_v15 = vld [vmem:[%s4969_s12 + $0x3c] ss:$144 sps:$4 sm:$0xff]   ;;  %v4635_v16 = vld [vmem:[%s5849_s1 + $0x440] sm:$0xff]  }
  0x4e   : > { %4107 = vmatprep.subr.bf16.mxu1 %v4568_v17  ;;  %v4636_v17 = vld [vmem:[%s5849_s1 + $0x4c0] sm:$0xff]  }
  0x50   : > { %4086 = vmatpush3.bf16.msra.mxu0 %v4569_v18  ;;  %v4637_v18 = vld [vmem:[%s5849_s1 + $0x400] sm:$0xff]  }
  0x51   : > { %4108 = vmatpush3.bf16.msra.mxu1 %v4570_v19  ;;  %4087 = vmatprep.subr.bf16.mxu0 %v4571_v20  ;;  %v4638_v19 = vld [vmem:[%s5849_s1 + $0x480] sm:$0xff]   ;;  %v4639_v20 = vld [vmem:[%s5849_s1 + $0x448] sm:$0xff]  }
  0x52   : > { %4109 = vmatprep.subr.bf16.mxu1 %v4572_v21  ;;  %v4640_v21 = vld [vmem:[%s5849_s1 + $0x4c8] sm:$0xff]  }
  0x54   : > { %4088 = vmatpush3.bf16.msra.mxu0 %v4573_v22  ;;  %v4641_v22 = vld [vmem:[%s5849_s1 + $0x408] sm:$0xff]  }
  0x55   : > { %4110 = vmatpush3.bf16.msra.mxu1 %v4574_v23  ;;  %4089 = vmatprep.subr.bf16.mxu0 %v4575_v24  ;;  %v4642_v23 = vld [vmem:[%s5849_s1 + $0x488] sm:$0xff]   ;;  %v4643_v24 = vld [vmem:[%s5849_s1 + $0x450] sm:$0xff]  }
  0x56   : > { %4111 = vmatprep.subr.bf16.mxu1 %v4576_v25  ;;  %v4644_v25 = vld [vmem:[%s5849_s1 + $0x4d0] sm:$0xff]  }
  0x58   : > { %4090 = vmatpush3.bf16.msra.mxu0 %v4577_v26  ;;  %v4645_v26 = vld [vmem:[%s5849_s1 + $0x410] sm:$0xff]  }
  0x59   : > { %4112 = vmatpush3.bf16.msra.mxu1 %v4578_v27  ;;  %4091 = vmatprep.subr.bf16.mxu0 %v4579_v28  ;;  %v4646_v27 = vld [vmem:[%s5849_s1 + $0x490] sm:$0xff]   ;;  %v4647_v28 = vld [vmem:[%s5849_s1 + $0x458] sm:$0xff]  }
  0x5a   : > { %4113 = vmatprep.subr.bf16.mxu1 %v4580_v29  ;;  %v4648_v29 = vld [vmem:[%s5849_s1 + $0x4d8] sm:$0xff]  }
  0x5c   : > { %4092 = vmatpush3.bf16.msra.mxu0 %v4581_v30  ;;  %v4649_v30 = vld [vmem:[%s5849_s1 + $0x418] sm:$0xff]  }
  0x5d   : > { %4114 = vmatpush3.bf16.msra.mxu1 %v4582_v31  ;;  %4093 = vmatprep.subr.bf16.mxu0 %v4583_v32  ;;  %v4650_v31 = vld [vmem:[%s5849_s1 + $0x498] sm:$0xff]   ;;  %v4651_v32 = vld [vmem:[%s5849_s1 + $0x460] sm:$0xff]  }
  0x5e   : > { %4115 = vmatprep.subr.bf16.mxu1 %v4584_v33  ;;  %v4652_v33 = vld [vmem:[%s5849_s1 + $0x4e0] sm:$0xff]  }
  0x60   : > { %4094 = vmatpush3.bf16.msra.mxu0 %v4585_v34  ;;  %v4653_v34 = vld [vmem:[%s5849_s1 + $0x420] sm:$0xff]  }
  0x61   : > { %4116 = vmatpush3.bf16.msra.mxu1 %v4586_v35  ;;  %4095 = vmatprep.subr.bf16.mxu0 %v4587_v36  ;;  %v4654_v35 = vld [vmem:[%s5849_s1 + $0x4a0] sm:$0xff]   ;;  %v4655_v36 = vld [vmem:[%s5849_s1 + $0x468] sm:$0xff]  }
  0x62   : > { %4117 = vmatprep.subr.bf16.mxu1 %v4588_v37  ;;  %v4656_v37 = vld [vmem:[%s5849_s1 + $0x4e8] sm:$0xff]  }
  0x64   : > { %4096 = vmatpush3.bf16.msra.mxu0 %v4589_v38  ;;  %v4657_v38 = vld [vmem:[%s5849_s1 + $0x428] sm:$0xff]  }
  0x65   : > { %4118 = vmatpush3.bf16.msra.mxu1 %v4590_v39  ;;  %4125 = vmatprep.subr.bf16.mxu0 %v4597_v44  ;;  %v4658_v39 = vld [vmem:[%s5849_s1 + $0x4a8] sm:$0xff]   ;;  %v4663_v44 = vld [vmem:[%s5849_s1 + $0x478] sm:$0xff]  }
  0x66   : > { %4147 = vmatprep.subr.bf16.mxu1 %v4598_v45  ;;  %v4664_v45 = vld [vmem:[%s5849_s1 + $0x4f8] sm:$0xff]  }
  0x67   : > { %2956 = vmatmul.mubr.bf16.vlgmr.msra.gmra.mrb[8].mxu0 %v4591_v40  ;;  %v4659_v40 = vld [vmem:[%s5849_s1 + $0x470] sm:$0xff]  }
  0x68   : > { %2997 = vmatmul.mubr.bf16.vlgmr.msra.gmra.mrb[8].mxu1 %v4594_v42  ;;  %4126 = vmatpush3.bf16.msra.mxu0 %v4599_v46  ;;  %v4661_v42 = vld [vmem:[%s5849_s1 + $0x430] sm:$0xff]   ;;  %v4665_v46 = vld [vmem:[%s5849_s1 + $0x438] sm:$0xff]  }
  0x69   : > { %4148 = vmatpush3.bf16.msra.mxu1 %v4600_v47  ;;  %4127 = vmatprep.subr.bf16.mxu0 %v4601_v48  ;;  %v4666_v47 = vld [vmem:[%s5849_s1 + $0x4b8] sm:$0xff]   ;;  %v4667_v48 = vld [vmem:[%s4969_s12 + $0x40] ss:$144 sps:$4 sm:$0xff]  }
  0x6a   : > { %4149 = vmatprep.subr.bf16.mxu1 %v4602_v49  ;;  %3037 = vmatprep.mubr.bf16.mxu0 %v4631_v13  ;;  %v4669_v49 = vld [vmem:[%s4969_s12 + $0x44] ss:$144 sps:$4 sm:$0xff]  }
  0x6b   : > { %3078 = vmatprep.mubr.bf16.mxu1 %v4634_v15  ;;  %v4698_v13 = vld [vmem:[%s5849_s1 + $0x5f0] sm:$0xff]  }
  0x6c   : > { %4128 = vmatpush3.bf16.msra.mxu0 %v4603_v50  ;;  %v4670_v50 = vld [vmem:[%s4969_s12 + $0x48] ss:$144 sps:$4 sm:$0xff]   ;;  %v4700_v15 = vld [vmem:[%s5849_s1 + $0x5b0] sm:$0xff]  }
  0x6d   : > { %4150 = vmatpush3.bf16.msra.mxu1 %v4604_v51  ;;  %4129 = vmatprep.subr.bf16.mxu0 %v4605_v52  ;;  %v4672_v51 = vld [vmem:[%s4969_s12 + $0x4c] ss:$144 sps:$4 sm:$0xff]   ;;  %v4673_v52 = vld [vmem:[%s5849_s1 + $0x540] sm:$0xff]  }
  0x6e   : > { %4151 = vmatprep.subr.bf16.mxu1 %v4606_v53  ;;  %v4674_v53 = vld [vmem:[%s5849_s1 + $0x5c0] sm:$0xff]  }
  0x70   : > { %4130 = vmatpush3.bf16.msra.mxu0 %v4607_v54  ;;  %v4675_v54 = vld [vmem:[%s5849_s1 + $0x500] sm:$0xff]  }
  0x71   : > { %4152 = vmatpush3.bf16.msra.mxu1 %v4608_v55  ;;  %4131 = vmatprep.subr.bf16.mxu0 %v4609_v56  ;;  %v4676_v55 = vld [vmem:[%s5849_s1 + $0x580] sm:$0xff]   ;;  %v4677_v56 = vld [vmem:[%s5849_s1 + $0x548] sm:$0xff]  }
  0x72   : > { %4153 = vmatprep.subr.bf16.mxu1 %v4610_v57  ;;  %v4678_v57 = vld [vmem:[%s5849_s1 + $0x5c8] sm:$0xff]  }
  0x74   : > { %4132 = vmatpush3.bf16.msra.mxu0 %v4611_v58  ;;  %v4679_v58 = vld [vmem:[%s5849_s1 + $0x508] sm:$0xff]  }
  0x75   : > { %4154 = vmatpush3.bf16.msra.mxu1 %v4612_v59  ;;  %4133 = vmatprep.subr.bf16.mxu0 %v4613_v60  ;;  %v4680_v59 = vld [vmem:[%s5849_s1 + $0x588] sm:$0xff]   ;;  %v4681_v60 = vld [vmem:[%s5849_s1 + $0x550] sm:$0xff]  }
  0x76   : > { %4155 = vmatprep.subr.bf16.mxu1 %v4614_v61  ;;  %v4682_v61 = vld [vmem:[%s5849_s1 + $0x5d0] sm:$0xff]  }
  0x78   : > { %4134 = vmatpush3.bf16.msra.mxu0 %v4615_v62  ;;  %v4683_v62 = vld [vmem:[%s5849_s1 + $0x510] sm:$0xff]  }
  0x79   : > { %4156 = vmatpush3.bf16.msra.mxu1 %v4616_v63  ;;  %4135 = vmatprep.subr.bf16.mxu0 %v4617_v0  ;;  %v4684_v63 = vld [vmem:[%s5849_s1 + $0x590] sm:$0xff]   ;;  %v4685_v0 = vld [vmem:[%s5849_s1 + $0x558] sm:$0xff]  }
  0x7a   : > { %4157 = vmatprep.subr.bf16.mxu1 %v4618_v1  ;;  %v4686_v1 = vld [vmem:[%s5849_s1 + $0x5d8] sm:$0xff]  }
  0x7c   : > { %4136 = vmatpush3.bf16.msra.mxu0 %v4619_v2  ;;  %v4687_v2 = vld [vmem:[%s5849_s1 + $0x518] sm:$0xff]  }
  0x7d   : > { %4158 = vmatpush3.bf16.msra.mxu1 %v4620_v3  ;;  %4137 = vmatprep.subr.bf16.mxu0 %v4621_v4  ;;  %v4688_v3 = vld [vmem:[%s5849_s1 + $0x598] sm:$0xff]   ;;  %v4689_v4 = vld [vmem:[%s5849_s1 + $0x560] sm:$0xff]  }
  0x7e   : > { %4159 = vmatprep.subr.bf16.mxu1 %v4622_v5  ;;  %v4690_v5 = vld [vmem:[%s5849_s1 + $0x5e0] sm:$0xff]  }
  0x80   : > { %4138 = vmatpush3.bf16.msra.mxu0 %v4623_v6  ;;  %v4691_v6 = vld [vmem:[%s5849_s1 + $0x520] sm:$0xff]  }
  0x81   : > { %4160 = vmatpush3.bf16.msra.mxu1 %v4624_v7  ;;  %4139 = vmatprep.subr.bf16.mxu0 %v4625_v8  ;;  %v4692_v7 = vld [vmem:[%s5849_s1 + $0x5a0] sm:$0xff]   ;;  %v4693_v8 = vld [vmem:[%s5849_s1 + $0x568] sm:$0xff]  }
  0x82   : > { %4161 = vmatprep.subr.bf16.mxu1 %v4626_v9  ;;  %v4694_v9 = vld [vmem:[%s5849_s1 + $0x5e8] sm:$0xff]  }
  0x84   : > { %4140 = vmatpush3.bf16.msra.mxu0 %v4627_v10  ;;  %v4695_v10 = vld [vmem:[%s5849_s1 + $0x528] sm:$0xff]  }
  0x85   : > { %4162 = vmatpush3.bf16.msra.mxu1 %v4628_v11  ;;  %4169 = vmatprep.subr.bf16.mxu0 %v4635_v16  ;;  %v4696_v11 = vld [vmem:[%s5849_s1 + $0x5a8] sm:$0xff]   ;;  %v4701_v16 = vld [vmem:[%s5849_s1 + $0x578] sm:$0xff]  }
  0x86   : > { %4191 = vmatprep.subr.bf16.mxu1 %v4636_v17  ;;  %v4702_v17 = vld [vmem:[%s5849_s1 + $0x5f8] sm:$0xff]  }
  0x87   : > { %3038 = vmatmul.mubr.bf16.vlgmr.msra.gmra.mrb[12].mxu0 %v4629_v12  ;;  %v4697_v12 = vld [vmem:[%s5849_s1 + $0x570] sm:$0xff]  }
  0x88   : > { %3079 = vmatmul.mubr.bf16.vlgmr.msra.gmra.mrb[12].mxu1 %v4632_v14  ;;  %4170 = vmatpush3.bf16.msra.mxu0 %v4637_v18  ;;  %v4699_v14 = vld [vmem:[%s5849_s1 + $0x530] sm:$0xff]   ;;  %v4703_v18 = vld [vmem:[%s5849_s1 + $0x538] sm:$0xff]  }
  0x89   : > { %4192 = vmatpush3.bf16.msra.mxu1 %v4638_v19  ;;  %4171 = vmatprep.subr.bf16.mxu0 %v4639_v20  ;;  %v4704_v19 = vld [vmem:[%s5849_s1 + $0x5b8] sm:$0xff]   ;;  %v4705_v20 = vld [vmem:[%s4969_s12 + $0x50] ss:$144 sps:$4 sm:$0xff]  }
  0x8a   : > { %4193 = vmatprep.subr.bf16.mxu1 %v4640_v21  ;;  %3119 = vmatprep.mubr.bf16.mxu0 %v4669_v49  ;;  %v4707_v21 = vld [vmem:[%s4969_s12 + $0x54] ss:$144 sps:$4 sm:$0xff]  }
  0x8b   : > { %3160 = vmatprep.mubr.bf16.mxu1 %v4672_v51  ;;  %v4736_v49 = vld [vmem:[%s5849_s1 + $0x6f0] sm:$0xff]  }
  0x8c   : > { %4172 = vmatpush3.bf16.msra.mxu0 %v4641_v22  ;;  %v4708_v22 = vld [vmem:[%s4969_s12 + $0x58] ss:$144 sps:$4 sm:$0xff]   ;;  %v4738_v51 = vld [vmem:[%s5849_s1 + $0x6b0] sm:$0xff]  }
  0x8d   : > { %4194 = vmatpush3.bf16.msra.mxu1 %v4642_v23  ;;  %4173 = vmatprep.subr.bf16.mxu0 %v4643_v24  ;;  %v4710_v23 = vld [vmem:[%s4969_s12 + $0x5c] ss:$144 sps:$4 sm:$0xff]   ;;  %v4711_v24 = vld [vmem:[%s5849_s1 + $0x640] sm:$0xff]  }
  0x8e   : > { %4195 = vmatprep.subr.bf16.mxu1 %v4644_v25  ;;  %v4712_v25 = vld [vmem:[%s5849_s1 + $0x6c0] sm:$0xff]  }
  0x90   : > { %4174 = vmatpush3.bf16.msra.mxu0 %v4645_v26  ;;  %v4713_v26 = vld [vmem:[%s5849_s1 + $0x600] sm:$0xff]  }
  0x91   : > { %4196 = vmatpush3.bf16.msra.mxu1 %v4646_v27  ;;  %4175 = vmatprep.subr.bf16.mxu0 %v4647_v28  ;;  %v4714_v27 = vld [vmem:[%s5849_s1 + $0x680] sm:$0xff]   ;;  %v4715_v28 = vld [vmem:[%s5849_s1 + $0x648] sm:$0xff]  }
  0x92   : > { %4197 = vmatprep.subr.bf16.mxu1 %v4648_v29  ;;  %v4716_v29 = vld [vmem:[%s5849_s1 + $0x6c8] sm:$0xff]  }
  0x94   : > { %4176 = vmatpush3.bf16.msra.mxu0 %v4649_v30  ;;  %v4717_v30 = vld [vmem:[%s5849_s1 + $0x608] sm:$0xff]  }
  0x95   : > { %4198 = vmatpush3.bf16.msra.mxu1 %v4650_v31  ;;  %4177 = vmatprep.subr.bf16.mxu0 %v4651_v32  ;;  %v4718_v31 = vld [vmem:[%s5849_s1 + $0x688] sm:$0xff]   ;;  %v4719_v32 = vld [vmem:[%s5849_s1 + $0x650] sm:$0xff]  }
  0x96   : > { %4199 = vmatprep.subr.bf16.mxu1 %v4652_v33  ;;  %v4720_v33 = vld [vmem:[%s5849_s1 + $0x6d0] sm:$0xff]  }
  0x98   : > { %4178 = vmatpush3.bf16.msra.mxu0 %v4653_v34  ;;  %v4721_v34 = vld [vmem:[%s5849_s1 + $0x610] sm:$0xff]  }
  0x99   : > { %4200 = vmatpush3.bf16.msra.mxu1 %v4654_v35  ;;  %4179 = vmatprep.subr.bf16.mxu0 %v4655_v36  ;;  %v4722_v35 = vld [vmem:[%s5849_s1 + $0x690] sm:$0xff]   ;;  %v4723_v36 = vld [vmem:[%s5849_s1 + $0x658] sm:$0xff]  }
  0x9a   : > { %4201 = vmatprep.subr.bf16.mxu1 %v4656_v37  ;;  %v4724_v37 = vld [vmem:[%s5849_s1 + $0x6d8] sm:$0xff]  }
  0x9c   : > { %4180 = vmatpush3.bf16.msra.mxu0 %v4657_v38  ;;  %v4725_v38 = vld [vmem:[%s5849_s1 + $0x618] sm:$0xff]  }
  0x9d   : > { %4202 = vmatpush3.bf16.msra.mxu1 %v4658_v39  ;;  %4181 = vmatprep.subr.bf16.mxu0 %v4659_v40  ;;  %v4726_v39 = vld [vmem:[%s5849_s1 + $0x698] sm:$0xff]   ;;  %v4727_v40 = vld [vmem:[%s5849_s1 + $0x660] sm:$0xff]  }
  0x9e   : > { %4203 = vmatprep.subr.bf16.mxu1 %v4660_v41  ;;  %v4728_v41 = vld [vmem:[%s5849_s1 + $0x6e0] sm:$0xff]  }
  0xa0   : > { %4182 = vmatpush3.bf16.msra.mxu0 %v4661_v42  ;;  %v4729_v42 = vld [vmem:[%s5849_s1 + $0x620] sm:$0xff]  }
  0xa1   : > { %4204 = vmatpush3.bf16.msra.mxu1 %v4662_v43  ;;  %4183 = vmatprep.subr.bf16.mxu0 %v4663_v44  ;;  %v4730_v43 = vld [vmem:[%s5849_s1 + $0x6a0] sm:$0xff]   ;;  %v4731_v44 = vld [vmem:[%s5849_s1 + $0x668] sm:$0xff]  }
  0xa2   : > { %4205 = vmatprep.subr.bf16.mxu1 %v4664_v45  ;;  %v4732_v45 = vld [vmem:[%s5849_s1 + $0x6e8] sm:$0xff]  }
  0xa4   : > { %4184 = vmatpush3.bf16.msra.mxu0 %v4665_v46  ;;  %v4733_v46 = vld [vmem:[%s5849_s1 + $0x628] sm:$0xff]  }
  0xa5   : > { %4206 = vmatpush3.bf16.msra.mxu1 %v4666_v47  ;;  %4213 = vmatprep.subr.bf16.mxu0 %v4673_v52  ;;  %v4734_v47 = vld [vmem:[%s5849_s1 + $0x6a8] sm:$0xff]   ;;  %v4739_v52 = vld [vmem:[%s5849_s1 + $0x678] sm:$0xff]  }
  0xa6   : > { %4235 = vmatprep.subr.bf16.mxu1 %v4674_v53  ;;  %v4740_v53 = vld [vmem:[%s5849_s1 + $0x6f8] sm:$0xff]  }
  0xa7   : > { %3120 = vmatmul.mubr.bf16.vlgmr.msra.gmra.mrb[16].mxu0 %v4667_v48  ;;  %v4735_v48 = vld [vmem:[%s5849_s1 + $0x670] sm:$0xff]  }
  0xa8   : > { %3161 = vmatmul.mubr.bf16.vlgmr.msra.gmra.mrb[16].mxu1 %v4670_v50  ;;  %4214 = vmatpush3.bf16.msra.mxu0 %v4675_v54  ;;  %v4737_v50 = vld [vmem:[%s5849_s1 + $0x630] sm:$0xff]   ;;  %v4741_v54 = vld [vmem:[%s5849_s1 + $0x638] sm:$0xff]  }
  0xa9   : > { %4236 = vmatpush3.bf16.msra.mxu1 %v4676_v55  ;;  %4215 = vmatprep.subr.bf16.mxu0 %v4677_v56  ;;  %v4742_v55 = vld [vmem:[%s5849_s1 + $0x6b8] sm:$0xff]   ;;  %v4743_v56 = vld [vmem:[%s4969_s12 + $0x60] ss:$144 sps:$4 sm:$0xff]  }
  0xaa   : > { %4237 = vmatprep.subr.bf16.mxu1 %v4678_v57  ;;  %3201 = vmatprep.mubr.bf16.mxu0 %v4707_v21  ;;  %v4745_v57 = vld [vmem:[%s4969_s12 + $0x64] ss:$144 sps:$4 sm:$0xff]   ;;  %v4762_v21 = vld [vmem:[%s5849_s1 + $0x7d8] sm:$0xff]  }
  0xab   : > { %3242 = vmatprep.mubr.bf16.mxu1 %v4710_v23  ;;  %v4764_v23 = vld [vmem:[%s5849_s1 + $0x798] sm:$0xff]  }
  0xac   : > { %4216 = vmatpush3.bf16.msra.mxu0 %v4679_v58  ;;  %v4746_v58 = vld [vmem:[%s4969_s12 + $0x68] ss:$144 sps:$4 sm:$0xff]  }
  0xad   : > { %4238 = vmatpush3.bf16.msra.mxu1 %v4680_v59  ;;  %4217 = vmatprep.subr.bf16.mxu0 %v4681_v60  ;;  %v4748_v59 = vld [vmem:[%s4969_s12 + $0x6c] ss:$144 sps:$4 sm:$0xff]   ;;  %v4749_v60 = vld [vmem:[%s5849_s1 + $0x740] sm:$0xff]  }
  0xae   : > { %4239 = vmatprep.subr.bf16.mxu1 %v4682_v61  ;;  %v4750_v61 = vld [vmem:[%s5849_s1 + $0x7c0] sm:$0xff]  }
  0xb0   : > { %4218 = vmatpush3.bf16.msra.mxu0 %v4683_v62  ;;  %v4751_v62 = vld [vmem:[%s5849_s1 + $0x700] sm:$0xff]  }
  0xb1   : > { %4240 = vmatpush3.bf16.msra.mxu1 %v4684_v63  ;;  %4219 = vmatprep.subr.bf16.mxu0 %v4685_v0  ;;  %v4752_v63 = vld [vmem:[%s5849_s1 + $0x780] sm:$0xff]   ;;  %v4753_v0 = vld [vmem:[%s5849_s1 + $0x748] sm:$0xff]  }
  0xb2   : > { %4241 = vmatprep.subr.bf16.mxu1 %v4686_v1 }
  0xb4   : > { %4220 = vmatpush3.bf16.msra.mxu0 %v4687_v2  ;;  %v4754_v2 = vld [vmem:[%s5849_s1 + $0x7c8] sm:$0xff]  }
  0xb5   : > { %4242 = vmatpush3.bf16.msra.mxu1 %v4688_v3  ;;  %4221 = vmatprep.subr.bf16.mxu0 %v4689_v4  ;;  %v4755_v4 = vld [vmem:[%s5849_s1 + $0x708] sm:$0xff]  }
  0xb6   : > { %4243 = vmatprep.subr.bf16.mxu1 %v4690_v5 }
  0xb8   : > { %4222 = vmatpush3.bf16.msra.mxu0 %v4691_v6  ;;  %v4756_v6 = vld [vmem:[%s5849_s1 + $0x788] sm:$0xff]  }
  0xb9   : > { %4244 = vmatpush3.bf16.msra.mxu1 %v4692_v7  ;;  %4223 = vmatprep.subr.bf16.mxu0 %v4693_v8 }
  0xba   : > { %4245 = vmatprep.subr.bf16.mxu1 %v4694_v9  ;;  %v4757_v9 = vld [vmem:[%s5849_s1 + $0x750] sm:$0xff]  }
  0xbc   : > { %4224 = vmatpush3.bf16.msra.mxu0 %v4695_v10 }
  0xbd   : > { %4246 = vmatpush3.bf16.msra.mxu1 %v4696_v11  ;;  %4225 = vmatprep.subr.bf16.mxu0 %v4697_v12  ;;  %v4758_v12 = vld [vmem:[%s5849_s1 + $0x7d0] sm:$0xff]  }
  0xbe   : > { %4247 = vmatprep.subr.bf16.mxu1 %v4698_v13 }
  0xc0   : > { %4226 = vmatpush3.bf16.msra.mxu0 %v4699_v14  ;;  %v4759_v14 = vld [vmem:[%s5849_s1 + $0x710] sm:$0xff]  }
  0xc1   : > { %4248 = vmatpush3.bf16.msra.mxu1 %v4700_v15  ;;  %4227 = vmatprep.subr.bf16.mxu0 %v4701_v16  ;;  %v4760_v16 = vld [vmem:[%s5849_s1 + $0x790] sm:$0xff]  }
  0xc2   : > { %4249 = vmatprep.subr.bf16.mxu1 %v4702_v17 }
  0xc4   : > { %4228 = vmatpush3.bf16.msra.mxu0 %v4703_v18 }
  0xc5   : > { %4250 = vmatpush3.bf16.msra.mxu1 %v4704_v19  ;;  %4257 = vmatprep.subr.bf16.mxu0 %v4711_v24  ;;  %v4761_v19 = vld [vmem:[%s5849_s1 + $0x758] sm:$0xff]   ;;  %v4765_v24 = vld [vmem:[%s5849_s1 + $0x760] sm:$0xff]  }
  0xc6   : > { %4279 = vmatprep.subr.bf16.mxu1 %v4712_v25  ;;  %v4766_v25 = vld [vmem:[%s5849_s1 + $0x7e0] sm:$0xff]  }
  0xc7   : > { %3202 = vmatmul.mubr.bf16.vlgmr.msra.gmra.mrb[20].mxu0 %v4705_v20 }
  0xc8   : > { %3243 = vmatmul.mubr.bf16.vlgmr.msra.gmra.mrb[20].mxu1 %v4708_v22  ;;  %4258 = vmatpush3.bf16.msra.mxu0 %v4713_v26  ;;  %v4763_v22 = vld [vmem:[%s5849_s1 + $0x718] sm:$0xff]   ;;  %v4767_v26 = vld [vmem:[%s5849_s1 + $0x720] sm:$0xff]  }
  0xc9   : > { %4280 = vmatpush3.bf16.msra.mxu1 %v4714_v27  ;;  %4259 = vmatprep.subr.bf16.mxu0 %v4715_v28  ;;  %v4768_v27 = vld [vmem:[%s5849_s1 + $0x7a0] sm:$0xff]  }
  0xca   : > { %4281 = vmatprep.subr.bf16.mxu1 %v4716_v29  ;;  %3283 = vmatprep.mubr.bf16.mxu0 %v4745_v57  ;;  %v3665_v28 = vld [vmem:[%s5850_s2] ss:$0 sm:$0xff] }
  0xcb   : > { %3324 = vmatprep.mubr.bf16.mxu1 %v4748_v59  ;;  %v4793_v59 = vld [vmem:[%s5849_s1 + $0x808] sm:$0xff]  }
  0xcc   : > { %4260 = vmatpush3.bf16.msra.mxu0 %v4717_v30  ;;  %v4769_v30 = vld [vmem:[%s5849_s1 + $0x768] sm:$0xff]  }
  0xcd   : > { %4282 = vmatpush3.bf16.msra.mxu1 %v4718_v31  ;;  %4261 = vmatprep.subr.bf16.mxu0 %v4719_v32  ;;  %v4770_v32 = vld [vmem:[%s5849_s1 + $0x7e8] sm:$0xff]  }
  0xce   : > { %4283 = vmatprep.subr.bf16.mxu1 %v4720_v33 }
  0xd0   : > { %4262 = vmatpush3.bf16.msra.mxu0 %v4721_v34  ;;  %v4771_v34 = vld [vmem:[%s5849_s1 + $0x728] sm:$0xff]  }
  0xd1   : > { %4284 = vmatpush3.bf16.msra.mxu1 %v4722_v35  ;;  %4263 = vmatprep.subr.bf16.mxu0 %v4723_v36  ;;  %v4772_v36 = vld [vmem:[%s5849_s1 + $0x7a8] sm:$0xff]  }
  0xd2   : > { %4285 = vmatprep.subr.bf16.mxu1 %v4724_v37  ;;  %v4773_v37 = vld [vmem:[%s5849_s1 + $0x770] sm:$0xff]  }
  0xd4   : > { %4264 = vmatpush3.bf16.msra.mxu0 %v4725_v38  ;;  %v4774_v38 = vld [vmem:[%s5849_s1 + $0x7f0] sm:$0xff]  }
  0xd5   : > { %4286 = vmatpush3.bf16.msra.mxu1 %v4726_v39  ;;  %4265 = vmatprep.subr.bf16.mxu0 %v4727_v40  ;;  %v4775_v39 = vld [vmem:[%s5849_s1 + $0x730] sm:$0xff]  }
  0xd6   : > { %4287 = vmatprep.subr.bf16.mxu1 %v4728_v41  ;;  %v4776_v40 = vld [vmem:[%s5849_s1 + $0x7b0] sm:$0xff]   ;;  %v4777_v41 = vld [vmem:[%s5849_s1 + $0x778] sm:$0xff]  }
  0xd8   : > { %4266 = vmatpush3.bf16.msra.mxu0 %v4729_v42  ;;  %v4778_v42 = vld [vmem:[%s5849_s1 + $0x7f8] sm:$0xff]  }
  0xd9   : > { %4288 = vmatpush3.bf16.msra.mxu1 %v4730_v43  ;;  %4267 = vmatprep.subr.bf16.mxu0 %v4731_v44  ;;  %v4779_v43 = vld [vmem:[%s5849_s1 + $0x738] sm:$0xff]  }
  0xda   : > { %4289 = vmatprep.subr.bf16.mxu1 %v4732_v45  ;;  %v4780_v44 = vld [vmem:[%s5849_s1 + $0x7b8] sm:$0xff]   ;;  %v4781_v45 = vld [vmem:[%s4969_s12 + $0x70] ss:$144 sps:$4 sm:$0xff]  }
  0xdc   : > { %4268 = vmatpush3.bf16.msra.mxu0 %v4733_v46  ;;  %v4783_v46 = vld [vmem:[%s4969_s12 + $0x74] ss:$144 sps:$4 sm:$0xff]  }
  0xdd   : > { %4290 = vmatpush3.bf16.msra.mxu1 %v4734_v47  ;;  %4269 = vmatprep.subr.bf16.mxu0 %v4735_v48  ;;  %v4784_v47 = vld [vmem:[%s4969_s12 + $0x78] ss:$144 sps:$4 sm:$0xff]   ;;  %v4786_v48 = vld [vmem:[%s4969_s12 + $0x7c] ss:$144 sps:$4 sm:$0xff]  }
  0xde   : > { %4291 = vmatprep.subr.bf16.mxu1 %v4736_v49  ;;  %v4787_v49 = vld [vmem:[%s5849_s1 + $0x840] sm:$0xff]  }
  0xe0   : > { %4270 = vmatpush3.bf16.msra.mxu0 %v4737_v50  ;;  %v4788_v50 = vld [vmem:[%s5849_s1 + $0x8c0] sm:$0xff]  }
  0xe1   : > { %4292 = vmatpush3.bf16.msra.mxu1 %v4738_v51  ;;  %4271 = vmatprep.subr.bf16.mxu0 %v4739_v52  ;;  %v4789_v51 = vld [vmem:[%s5849_s1 + $0x800] sm:$0xff]  }
  0xe2   : > { %4293 = vmatprep.subr.bf16.mxu1 %v4740_v53  ;;  %v4790_v52 = vld [vmem:[%s5849_s1 + $0x880] sm:$0xff]  }
  0xe4   : > { %4272 = vmatpush3.bf16.msra.mxu0 %v4741_v54  ;;  %v4791_v54 = vld [vmem:[%s5849_s1 + $0x848] sm:$0xff]  }
  0xe5   : > { %4294 = vmatpush3.bf16.msra.mxu1 %v4742_v55  ;;  %4301 = vmatprep.subr.bf16.mxu0 %v4749_v60 }
  0xe6   : > { %4323 = vmatprep.subr.bf16.mxu1 %v4750_v61  ;;  %v4794_v61 = vld [vmem:[%s5849_s1 + $0x888] sm:$0xff]  }
  0xe7   : > { %3284 = vmatmul.mubr.bf16.vlgmr.msra.gmra.mrb[24].mxu0 %v4743_v56  ;;  %v4792_v56 = vld [vmem:[%s5849_s1 + $0x8c8] sm:$0xff]  }
  0xe8   : > { %3325 = vmatmul.mubr.bf16.vlgmr.msra.gmra.mrb[24].mxu1 %v4746_v58  ;;  %4302 = vmatpush3.bf16.msra.mxu0 %v4751_v62 }
  0xe9   : > { %4324 = vmatpush3.bf16.msra.mxu1 %v4752_v63  ;;  %4303 = vmatprep.subr.bf16.mxu0 %v4753_v0 }
  0xea   : > { %4325 = vmatprep.subr.bf16.mxu1 %v4754_v2  ;;  %3365 = vmatprep.mubr.bf16.mxu0 %v4783_v46 }
  0xeb   : > { %3406 = vmatprep.mubr.bf16.mxu1 %v4786_v48 }
  0xec   : > { %4304 = vmatpush3.bf16.msra.mxu0 %v4755_v4 }
  0xed   : > { %4326 = vmatpush3.bf16.msra.mxu1 %v4756_v6  ;;  %4305 = vmatprep.subr.bf16.mxu0 %v4757_v9  ;;  %v4797_v6 = vld [vmem:[%s5849_s1 + $0x810] sm:$0xff]  }
  0xee   : > { %4327 = vmatprep.subr.bf16.mxu1 %v4758_v12  ;;  %v4798_v9 = vld [vmem:[%s5849_s1 + $0x890] sm:$0xff]  }
  0xf0   : > { %4306 = vmatpush3.bf16.msra.mxu0 %v4759_v14  ;;  %v4801_v14 = vld [vmem:[%s5849_s1 + $0x818] sm:$0xff]  }
  0xf1   : > { %4328 = vmatpush3.bf16.msra.mxu1 %v4760_v16  ;;  %4307 = vmatprep.subr.bf16.mxu0 %v4761_v19  ;;  %v4802_v16 = vld [vmem:[%s5849_s1 + $0x898] sm:$0xff]   ;;  %v4805_v19 = vld [vmem:[%s5849_s1 + $0x820] sm:$0xff]  }
  0xf2   : > { %4329 = vmatprep.subr.bf16.mxu1 %v4762_v21  ;;  %v4807_v21 = vld [vmem:[%s5849_s1 + $0x868] sm:$0xff]  }
  0xf4   : > { %4308 = vmatpush3.bf16.msra.mxu0 %v4763_v22  ;;  %v4808_v22 = vld [vmem:[%s5849_s1 + $0x8e8] sm:$0xff]  }
  0xf5   : > { %4330 = vmatpush3.bf16.msra.mxu1 %v4764_v23  ;;  %4309 = vmatprep.subr.bf16.mxu0 %v4765_v24  ;;  %v4809_v23 = vld [vmem:[%s5849_s1 + $0x828] sm:$0xff]  }
  0xf6   : > { %4331 = vmatprep.subr.bf16.mxu1 %v4766_v25  ;;  %v4810_v24 = vld [vmem:[%s5849_s1 + $0x8a8] sm:$0xff]   ;;  %v4811_v25 = vld [vmem:[%s5849_s1 + $0x870] sm:$0xff]  }
  0xf8   : > { %4310 = vmatpush3.bf16.msra.mxu0 %v4767_v26  ;;  %v4812_v26 = vld [vmem:[%s5849_s1 + $0x8f0] sm:$0xff]  }
  0xf9   : > { %4332 = vmatpush3.bf16.msra.mxu1 %v4768_v27  ;;  %4311 = vmatprep.subr.bf16.mxu0 %v4769_v30  ;;  %v4813_v27 = vld [vmem:[%s5849_s1 + $0x830] sm:$0xff]   ;;  %v4816_v30 = vld [vmem:[%s5849_s1 + $0x8f8] sm:$0xff]  }
  0xfa   : > { %v4009_v1 = vpop.f32.mrb[0].mxu0  ;;  %4333 = vmatprep.subr.bf16.mxu1 %v4770_v32  ;;  %v4818_v32 = vld [vmem:[%s5849_s1 + $0x8b8] sm:$0xff]  }
  0xfb   : > { %v4031_v3 = vpop.f32.mrb[0].mxu1  ;;  %v4010_v5 = vpop.f32.mrb[1].mxu0 }
  0xfc   : > { %v4011_v7 = vadd.f32 %v4010_v5, %v4009_v1  ;;  %v4032_v8 = vpop.f32.mrb[1].mxu1  ;;  %v4012_v11 = vpop.f32.mrb[2].mxu0  ;;  %4312 = vmatpush3.bf16.msra.mxu0 %v4771_v34  ;;  %v4795_v1 = vld [vmem:[%s5849_s1 + $0x850] sm:$0xff]  }
  0xfd   : > { %v4033_v10 = vadd.f32 %v4032_v8, %v4031_v3  ;;  %v4034_v13 = vpop.f32.mrb[2].mxu1  ;;  %v4013_v15 = vpop.f32.mrb[3].mxu0  ;;  %4334 = vmatpush3.bf16.msra.mxu1 %v4772_v36  ;;  %4313 = vmatprep.subr.bf16.mxu0 %v4773_v37  ;;  %v4796_v3 = vld [vmem:[%s5849_s1 + $0x8d0] sm:$0xff]   ;;  %v4824_v36 = vld [vmem:[%s4969_s12 + $0x8c] ss:$144 sps:$4 sm:$0xff]  }
  0xfe   : > { %v4014_v17 = vadd.f32 %v4013_v15, %v4012_v11  ;;  %v4035_v18 = vpop.f32.mrb[3].mxu1  ;;  %v2794_v29 = vadd.f32 %v4011_v7, %v3665_v28  ;;  %4335 = vmatprep.subr.bf16.mxu1 %v4774_v38  ;;  %v4799_v11 = vld [vmem:[%s5849_s1 + $0x858] sm:$0xff]   ;;  %v4821_v34 = vld [vmem:[%s4969_s12 + $0x84] ss:$144 sps:$4 sm:$0xff]  }
  0xff   : > { %v4036_v20 = vadd.f32 %v4035_v18, %v4034_v13  ;;  %v4800_v13 = vld [vmem:[%s5849_s1 + $0x8d8] sm:$0xff]   ;;  %v4804_v18 = vld [vmem:[%s5849_s1 + $0x8e0] sm:$0xff]  }
 0x100   : > { %v2797_v31 = vadd.f32 %v4014_v17, %v3665_v28  ;;  %v2835_v33 = vadd.f32 %v4033_v10, %v2794_v29  ;;  %4314 = vmatpush3.bf16.msra.mxu0 %v4775_v39  ;;  %v4803_v17 = vld [vmem:[%s5849_s1 + $0x860] sm:$0xff]   ;;  %v4814_v28 = vld [vmem:[%s5849_s1 + $0x8b0] sm:$0xff]   ;;  %v4815_v29 = vld [vmem:[%s5849_s1 + $0x878] sm:$0xff]  }
 0x101   : > { %4336 = vmatpush3.bf16.msra.mxu1 %v4776_v40  ;;  %4315 = vmatprep.subr.bf16.mxu0 %v4777_v41 }
 0x102   : > { %v5653_v35 = vadd.f32 %v4036_v20, %v2797_v31  ;;  %4337 = vmatprep.subr.bf16.mxu1 %v4778_v42  ;;  %v4806_v20 = vld [vmem:[%s5849_s1 + $0x8a0] sm:$0xff]   ;;  %v4817_v31 = vld [vmem:[%s5849_s1 + $0x838] sm:$0xff]  }
 0x104   : > { %4316 = vmatpush3.bf16.msra.mxu0 %v4779_v43 }
 0x105   : > { %4338 = vmatpush3.bf16.msra.mxu1 %v4780_v44  ;;  %4345 = vmatprep.subr.bf16.mxu0 %v4787_v49 }
 0x106   : > { %4367 = vmatprep.subr.bf16.mxu1 %v4788_v50 }
 0x107   : > { %3366 = vmatmul.mubr.bf16.vlgmr.msra.gmra.mrb[28].mxu0 %v4781_v45 }
 0x108   : > { %3407 = vmatmul.mubr.bf16.vlgmr.msra.gmra.mrb[28].mxu1 %v4784_v47  ;;  %4346 = vmatpush3.bf16.msra.mxu0 %v4789_v51 }
 0x109   : > { %4368 = vmatpush3.bf16.msra.mxu1 %v4790_v52  ;;  %4347 = vmatprep.subr.bf16.mxu0 %v4791_v54 }
 0x10a   : > { %4369 = vmatprep.subr.bf16.mxu1 %v4792_v56  ;;  %3447 = vmatprep.mubr.bf16.mxu0 %v4821_v34 }
 0x10b   : > { %3488 = vmatprep.mubr.bf16.mxu1 %v4824_v36  ;;  %v3509_v36 = vld [vmem:[%s5851_s3 + $0x50] sm:$0xff] }
 0x10c   : > { %4348 = vmatpush3.bf16.msra.mxu0 %v4793_v59 }
 0x10d   : > { %4370 = vmatpush3.bf16.msra.mxu1 %v4794_v61  ;;  %4349 = vmatprep.subr.bf16.mxu0 %v4795_v1 }
 0x10e   : > { %4371 = vmatprep.subr.bf16.mxu1 %v4796_v3 }
 0x110   : > { %4350 = vmatpush3.bf16.msra.mxu0 %v4797_v6  ;;  %v3500_v6 = vld [vmem:[%s5851_s3 + $0x8] sm:$0xff] }
 0x111   : > { %4372 = vmatpush3.bf16.msra.mxu1 %v4798_v9  ;;  %4351 = vmatprep.subr.bf16.mxu0 %v4799_v11  ;;  %v3502_v9 = vld [vmem:[%s5851_s3 + $0x18] sm:$0xff]  ;;  %v3503_v11 = vld [vmem:[%s5851_s3 + $0x20] sm:$0xff] }
 0x112   : > { %4373 = vmatprep.subr.bf16.mxu1 %v4800_v13 }
 0x114   : > { %4352 = vmatpush3.bf16.msra.mxu0 %v4801_v14  ;;  %v3505_v14 = vld [vmem:[%s5851_s3 + $0x30] sm:$0xff] }
 0x115   : > { %4374 = vmatpush3.bf16.msra.mxu1 %v4802_v16  ;;  %4353 = vmatprep.subr.bf16.mxu0 %v4803_v17  ;;  %v3507_v17 = vld [vmem:[%s5851_s3 + $0x40] sm:$0xff] }
 0x116   : > { %4375 = vmatprep.subr.bf16.mxu1 %v4804_v18  ;;  %v3508_v18 = vld [vmem:[%s5851_s3 + $0x48] sm:$0xff] }
 0x118   : > { %4354 = vmatpush3.bf16.msra.mxu0 %v4805_v19  ;;  %v4458_v19 = vpack.c.bf16 %v3508_v18, %v3507_v17 }
 0x119   : > { %4376 = vmatpush3.bf16.msra.mxu1 %v4806_v20  ;;  %4355 = vmatprep.subr.bf16.mxu0 %v4807_v21 }
 0x11a   : > { %v4053_v53 = vpop.f32.mrb[4].mxu0  ;;  %4377 = vmatprep.subr.bf16.mxu1 %v4808_v22 }
 0x11b   : > { %v4054_v55 = vpop.f32.mrb[5].mxu0  ;;  %v4075_v57 = vpop.f32.mrb[4].mxu1 }
 0x11c   : > { %v4055_v58 = vadd.f32 %v4054_v55, %v4053_v53  ;;  %v4076_v60 = vpop.f32.mrb[5].mxu1  ;;  %v4056_v0 = vpop.f32.mrb[6].mxu0  ;;  %4356 = vmatpush3.bf16.msra.mxu0 %v4809_v23 }
 0x11d   : > { %v4077_v63 = vadd.f32 %v4076_v60, %v4075_v57  ;;  %v4078_v2 = vpop.f32.mrb[6].mxu1  ;;  %v4057_v5 = vpop.f32.mrb[7].mxu0  ;;  %4378 = vmatpush3.bf16.msra.mxu1 %v4810_v24  ;;  %4357 = vmatprep.subr.bf16.mxu0 %v4811_v25 }
 0x11e   : > { %v2876_v62 = vadd.f32 %v4055_v58, %v2835_v33  ;;  %v4058_v7 = vadd.f32 %v4057_v5, %v4056_v0  ;;  %v4079_v8 = vpop.f32.mrb[7].mxu1  ;;  %4379 = vmatprep.subr.bf16.mxu1 %v4812_v26  ;;  %v4819_v33 = vld [vmem:[%s4969_s12 + $0x80] ss:$144 sps:$4 sm:$0xff]  }
 0x11f   : > { %v4080_v10 = vadd.f32 %v4079_v8, %v4078_v2  ;;  %v3499_v5 = vld [vmem:[%s5851_s3] sm:$0xff] }
 0x120   : > { %v5716_v4 = vadd.f32 %v4077_v63, %v2876_v62  ;;  %v2879_v12 = vadd.f32 %v4058_v7, %v5653_v35  ;;  %4358 = vmatpush3.bf16.msra.mxu0 %v4813_v27  ;;  %v4822_v35 = vld [vmem:[%s4969_s12 + $0x88] ss:$144 sps:$4 sm:$0xff]   ;;  %v3501_v7 = vld [vmem:[%s5851_s3 + $0x10] sm:$0xff]  ;;  %v4442_v8 = vpack.c.bf16 %v3500_v6, %v3499_v5 }
 0x121   : > { %4380 = vmatpush3.bf16.msra.mxu1 %v4814_v28  ;;  %4359 = vmatprep.subr.bf16.mxu0 %v4815_v29 }
 0x122   : > { %v2920_v15 = vadd.f32 %v4080_v10, %v2879_v12  ;;  %4381 = vmatprep.subr.bf16.mxu1 %v4816_v30  ;;  %v4446_v10 = vpack.c.bf16 %v3502_v9, %v3501_v7  ;;  %v3504_v12 = vld [vmem:[%s5851_s3 + $0x28] sm:$0xff] }
 0x123   : > { %v4450_v13 = vpack.c.bf16 %v3504_v12, %v3503_v11 }
 0x124   : > { %4360 = vmatpush3.bf16.msra.mxu0 %v4817_v31 }
 0x125   : > { %4382 = vmatpush3.bf16.msra.mxu1 %v4818_v32  ;;  %4443 = vmatprep.subr.bf16.mxu0 %v4442_v8 }
 0x127   : > { %3448 = vmatmul.mubr.bf16.vlgmr.msra.gmra.mrb[32].mxu0 %v4819_v33 }
 0x128   : > { %3489 = vmatmul.mubr.bf16.vlgmr.msra.gmra.mrb[32].mxu1 %v4822_v35  ;;  %4445 = vmatpush3.bf16.msra.mxu0 %v4442_v8 }
 0x129   : > { %4447 = vmatprep.subr.bf16.mxu0 %v4446_v10 }
 0x12c   : > { %4449 = vmatpush3.bf16.msra.mxu0 %v4446_v10 }
 0x12d   : > { %4451 = vmatprep.subr.bf16.mxu0 %v4450_v13 }
 0x130   : > { %4453 = vmatpush3.bf16.msra.mxu0 %v4450_v13 }
 0x13a   : > { %v4097_v37 = vpop.f32.mrb[8].mxu0 }
 0x13b   : > { %v4119_v38 = vpop.f32.mrb[8].mxu1  ;;  %v4098_v39 = vpop.f32.mrb[9].mxu0 }
 0x13c   : > { %v4099_v40 = vadd.f32 %v4098_v39, %v4097_v37  ;;  %v4120_v41 = vpop.f32.mrb[9].mxu1  ;;  %v4100_v42 = vpop.f32.mrb[10].mxu0  ;;  %v3510_v37 = vld [vmem:[%s5851_s3 + $0x58] sm:$0xff]  ;;  %v3511_v39 = vld [vmem:[%s5851_s3 + $0x60] sm:$0xff] }
 0x13d   : > { %v4121_v43 = vadd.f32 %v4120_v41, %v4119_v38  ;;  %v4122_v44 = vpop.f32.mrb[10].mxu1  ;;  %v4101_v45 = vpop.f32.mrb[11].mxu0  ;;  %v4462_v38 = vpack.c.bf16 %v3510_v37, %v3509_v36 }
 0x13e   : > { %v2958_v46 = vadd.f32 %v4099_v40, %v5716_v4  ;;  %v4102_v47 = vadd.f32 %v4101_v45, %v4100_v42  ;;  %v4123_v48 = vpop.f32.mrb[11].mxu1  ;;  %v3512_v40 = vld [vmem:[%s5851_s3 + $0x68] sm:$0xff]  ;;  %v3513_v42 = vld [vmem:[%s5851_s3 + $0x70] sm:$0xff] }
 0x13f   : > { %v4124_v49 = vadd.f32 %v4123_v48, %v4122_v44  ;;  %v4466_v41 = vpack.c.bf16 %v3512_v40, %v3511_v39 }
 0x140   : > { %v2999_v50 = vadd.f32 %v4121_v43, %v2958_v46  ;;  %v2961_v51 = vadd.f32 %v4102_v47, %v2920_v15  ;;  %v3506_v15 = vld [vmem:[%s5851_s3 + $0x38] sm:$0xff] }
 0x141   : > { %v4454_v16 = vpack.c.bf16 %v3506_v15, %v3505_v14  ;;  %v3514_v43 = vld [vmem:[%s5851_s3 + $0x78] sm:$0xff] }
 0x142   : > { %v3002_v52 = vadd.f32 %v4124_v49, %v2961_v51  ;;  %v4470_v44 = vpack.c.bf16 %v3514_v43, %v3513_v42 }
 0x143   : > { %4455 = vmatprep.subr.bf16.mxu0 %v4454_v16 }
 0x144   : > { %4457 = vmatpush3.bf16.msra.mxu0 %v4454_v16 }
 0x145   : > { %4459 = vmatprep.subr.bf16.mxu0 %v4458_v19 }
 0x148   : > { %4461 = vmatpush3.bf16.msra.mxu0 %v4458_v19 }
 0x149   : > { %4463 = vmatprep.subr.bf16.mxu0 %v4462_v38 }
 0x14c   : > { %4465 = vmatpush3.bf16.msra.mxu0 %v4462_v38 }
 0x14d   : > { %4467 = vmatprep.subr.bf16.mxu0 %v4466_v41 }
 0x150   : > { %4469 = vmatpush3.bf16.msra.mxu0 %v4466_v41 }
 0x151   : > { %4471 = vmatprep.subr.bf16.mxu0 %v4470_v44 }
 0x154   : > { %4473 = vmatpush3.bf16.msra.mxu0 %v4470_v44 }
 0x15a   : > { %v4141_v53 = vpop.f32.mrb[12].mxu0 }
 0x15b   : > { %v4163_v54 = vpop.f32.mrb[12].mxu1  ;;  %v4142_v55 = vpop.f32.mrb[13].mxu0 }
 0x15c   : > { %v4143_v56 = vadd.f32 %v4142_v55, %v4141_v53  ;;  %v4164_v57 = vpop.f32.mrb[13].mxu1  ;;  %v4144_v58 = vpop.f32.mrb[14].mxu0 }
 0x15d   : > { %v4165_v59 = vadd.f32 %v4164_v57, %v4163_v54  ;;  %v4166_v60 = vpop.f32.mrb[14].mxu1  ;;  %v4145_v61 = vpop.f32.mrb[15].mxu0 }
 0x15e   : > { %v3040_v62 = vadd.f32 %v4143_v56, %v2999_v50  ;;  %v4146_v63 = vadd.f32 %v4145_v61, %v4144_v58  ;;  %v4167_v0 = vpop.f32.mrb[15].mxu1 }
 0x15f   : > { %v4168_v1 = vadd.f32 %v4167_v0, %v4166_v60 }
 0x160   : > { %v3081_v2 = vadd.f32 %v4165_v59, %v3040_v62  ;;  %v3043_v3 = vadd.f32 %v4146_v63, %v3002_v52 }
 0x162   : > { %v3084_v4 = vadd.f32 %v4168_v1, %v3043_v3 }
 0x17a   : > { %v4185_v20 = vpop.f32.mrb[16].mxu0 }
 0x17b   : > { %v4186_v21 = vpop.f32.mrb[17].mxu0  ;;  %v4207_v22 = vpop.f32.mrb[16].mxu1 }
 0x17c   : > { %v4187_v23 = vadd.f32 %v4186_v21, %v4185_v20  ;;  %v4188_v24 = vpop.f32.mrb[18].mxu0  ;;  %v4208_v25 = vpop.f32.mrb[17].mxu1 }
 0x17d   : > { %v4189_v26 = vpop.f32.mrb[19].mxu0  ;;  %v4209_v28 = vadd.f32 %v4208_v25, %v4207_v22  ;;  %v4210_v29 = vpop.f32.mrb[18].mxu1 }
 0x17e   : > { %v3122_v27 = vadd.f32 %v4187_v23, %v3081_v2  ;;  %v4190_v30 = vadd.f32 %v4189_v26, %v4188_v24  ;;  %v4211_v31 = vpop.f32.mrb[19].mxu1 }
 0x17f   : > { %v4212_v34 = vadd.f32 %v4211_v31, %v4210_v29 }
 0x180   : > { %v3163_v32 = vadd.f32 %v4209_v28, %v3122_v27  ;;  %v3125_v33 = vadd.f32 %v4190_v30, %v3084_v4 }
 0x182   : > { %v3166_v35 = vadd.f32 %v4212_v34, %v3125_v33 }
 0x19a   : > { %v4229_v45 = vpop.f32.mrb[20].mxu0 }
 0x19b   : > { %v4251_v46 = vpop.f32.mrb[20].mxu1  ;;  %v4230_v47 = vpop.f32.mrb[21].mxu0 }
 0x19c   : > { %v4231_v48 = vadd.f32 %v4230_v47, %v4229_v45  ;;  %v4252_v49 = vpop.f32.mrb[21].mxu1  ;;  %v4232_v50 = vpop.f32.mrb[22].mxu0  ;;  %v3990_v47 = vld [vmem:[%s5852_s4] ss:$0 sm:$0xff] }
 0x19d   : > { %v4253_v51 = vadd.f32 %v4252_v49, %v4251_v46  ;;  %v4254_v52 = vpop.f32.mrb[22].mxu1  ;;  %v4233_v53 = vpop.f32.mrb[23].mxu0 }
 0x19e   : > { %v3204_v54 = vadd.f32 %v4231_v48, %v3163_v32  ;;  %v4234_v55 = vadd.f32 %v4233_v53, %v4232_v50  ;;  %v4255_v56 = vpop.f32.mrb[23].mxu1 }
 0x19f   : > { %v4256_v57 = vadd.f32 %v4255_v56, %v4254_v52 }
 0x1a0   : > { %v3245_v58 = vadd.f32 %v4253_v51, %v3204_v54  ;;  %v3207_v59 = vadd.f32 %v4234_v55, %v3166_v35 }
 0x1a2   : > { %v3248_v60 = vadd.f32 %v4256_v57, %v3207_v59 }
 0x1ba   : > { %v4273_v61 = vpop.f32.mrb[24].mxu0 }
 0x1bb   : > { %v4295_v62 = vpop.f32.mrb[24].mxu1  ;;  %v4274_v63 = vpop.f32.mrb[25].mxu0 }
 0x1bc   : > { %v4275_v0 = vadd.f32 %v4274_v63, %v4273_v61  ;;  %v4296_v1 = vpop.f32.mrb[25].mxu1  ;;  %v4276_v2 = vpop.f32.mrb[26].mxu0 }
 0x1bd   : > { %v4297_v3 = vadd.f32 %v4296_v1, %v4295_v62  ;;  %v4298_v4 = vpop.f32.mrb[26].mxu1  ;;  %v4277_v5 = vpop.f32.mrb[27].mxu0 }
 0x1be   : > { %v3286_v6 = vadd.f32 %v4275_v0, %v3245_v58  ;;  %v4278_v7 = vadd.f32 %v4277_v5, %v4276_v2  ;;  %v4299_v8 = vpop.f32.mrb[27].mxu1 }
 0x1bf   : > { %v4300_v9 = vadd.f32 %v4299_v8, %v4298_v4 }
 0x1c0   : > { %v3327_v10 = vadd.f32 %v4297_v3, %v3286_v6  ;;  %v3289_v11 = vadd.f32 %v4278_v7, %v3248_v60 }
 0x1c2   : > { %v3330_v12 = vadd.f32 %v4300_v9, %v3289_v11 }
 0x1da   : > { %v4317_v13 = vpop.f32.mrb[28].mxu0 }
 0x1db   : > { %v4339_v14 = vpop.f32.mrb[28].mxu1  ;;  %v4318_v15 = vpop.f32.mrb[29].mxu0 }
 0x1dc   : > { %v4319_v16 = vadd.f32 %v4318_v15, %v4317_v13  ;;  %v4340_v17 = vpop.f32.mrb[29].mxu1  ;;  %v4320_v18 = vpop.f32.mrb[30].mxu0 }
 0x1dd   : > { %v4341_v19 = vadd.f32 %v4340_v17, %v4339_v14  ;;  %v4342_v20 = vpop.f32.mrb[30].mxu1  ;;  %v4321_v21 = vpop.f32.mrb[31].mxu0 }
 0x1de   : > { %v3368_v22 = vadd.f32 %v4319_v16, %v3327_v10  ;;  %v4322_v23 = vadd.f32 %v4321_v21, %v4320_v18  ;;  %v4343_v24 = vpop.f32.mrb[31].mxu1 }
 0x1df   : > { %v4344_v25 = vadd.f32 %v4343_v24, %v4342_v20 }
 0x1e0   : > { %v3409_v26 = vadd.f32 %v4341_v19, %v3368_v22  ;;  %v3371_v27 = vadd.f32 %v4322_v23, %v3330_v12 }
 0x1e2   : > { %v3412_v28 = vadd.f32 %v4344_v25, %v3371_v27 }
 0x1fa   : > { %v4361_v29 = vpop.f32.mrb[32].mxu0 }
 0x1fb   : > { %v4362_v30 = vpop.f32.mrb[33].mxu0  ;;  %v4383_v31 = vpop.f32.mrb[32].mxu1 }
 0x1fc   : > { %v4363_v32 = vadd.f32 %v4362_v30, %v4361_v29  ;;  %v4364_v33 = vpop.f32.mrb[34].mxu0  ;;  %v4384_v34 = vpop.f32.mrb[33].mxu1 }
 0x1fd   : > { %v4365_v35 = vpop.f32.mrb[35].mxu0  ;;  %v4385_v37 = vadd.f32 %v4384_v34, %v4383_v31  ;;  %v4386_v38 = vpop.f32.mrb[34].mxu1 }
 0x1fe   : > { %v3450_v36 = vadd.f32 %v4363_v32, %v3409_v26  ;;  %v4366_v39 = vadd.f32 %v4365_v35, %v4364_v33  ;;  %v4387_v40 = vpop.f32.mrb[35].mxu1 }
 0x1ff   : > { %v4388_v43 = vadd.f32 %v4387_v40, %v4386_v38 }
 0x200   : > { %v3491_v41 = vadd.f32 %v4385_v37, %v3450_v36  ;;  %v3453_v42 = vadd.f32 %v4366_v39, %v3412_v28 }
 0x202   : > { %v3497_v44 = vmax.f32 %v3491_v41, 0.0  ;;  %v3494_v45 = vadd.f32 %v4388_v43, %v3453_v42 }
 0x204   : > { %v3498_v46 = vmax.f32 %v3494_v45, 0.0  ;;  %4439 = vmatprep.mubr.f32.mxu0 %v3497_v44 }
 0x206   : > { %4440 = vmatmul.mubr.f32.vlgmr.msra.gmra.mrb[36].mxu0 %v3498_v46 }
 0x2d9   : > { %v4441_v48 = vpop.f32.mrb[36].mxu0 }
 0x2da   : > { %v3588_v49 = vpop.f32.mrb[37].mxu0  ;;  %v3594_v51 = vadd.f32 %v4441_v48, %v3990_v47 }
 0x2db   : > { %v3589_v50 = vadd.f32 %v3990_v47, %v3588_v49 }
 0x2dc   : > { %3599 = vst.msk [vmem:[%s229_s16 + $0x8] sm:$0xff] %vm3597_vm0, %v3594_v51 }
 0x2dd   : > { %3598 = vst.msk [vmem:[%s229_s16] sm:$0xff] %vm3597_vm0, %v3589_v50 }
 0x2de PF: > { %s15_s18 = sadd.s32 1, %s4831_s18  }
 0x2df   : > { %p12_p4 = scmp.ge.s32.totalorder %s15_s18, 4  }
 0x2e1   :  { %14 = sbr.rel (!%p12_p4) target bundleno = 1 (0x1), region = 70 }

</bundles_post_ra>
